<compile_context>
chip_gen: v5e
topology: v5e:2x2
jax: 0.10.0
libtpu: 0.0.40
codegen_flags: <defaults>
</compile_context>

<pallas_src>
import functools

import jax
import jax.numpy as jnp
from jax.experimental import pallas as pl
from jax.experimental.pallas import tpu as pltpu


# ---------------------------------------------------------------------------
# Kernel
# ---------------------------------------------------------------------------
def _cross_attention_kernel(q_in_ref, kv_in_ref, wq_ref, wk_ref, wv_ref, wp_ref,
                            bp_ref, out_ref, *, num_heads, dim, batch_tile,
                            q_len, kv_len, approx_recip):
    """One grid step == `batch_tile` batch elements.

    q_in_ref : (Bt*N, C)   query tokens (flattened batch tile), compute dtype
    kv_in_ref: (Bt*M, C)   key/value tokens
    wq_ref   : (C, C)      query_linear.weight.T  (1/sqrt(D) pre-folded)
    wk_ref   : (C, C)      kv.weight.T[:, :C]     (K half)
    wv_ref   : (C, C)      kv.weight.T[:, C:]     (V half)
    wp_ref   : (C, C)      proj.weight.T
    bp_ref   : (1, C)      proj.bias, f32
    out_ref  : (Bt*N, C)
    """
    C, H = dim, num_heads
    D = C // H
    Bt, N, M = batch_tile, q_len, kv_len

    xq = q_in_ref[...]        # (Bt*N, C)
    xkv = kv_in_ref[...]      # (Bt*M, C)
    cdt = xq.dtype

    # Input projections over the whole batch tile: MXU-filling (rows, C) @ (C, C)
    # matmuls with f32 accumulation.  The softmax scale is already folded into wq.
    q = jnp.dot(xq, wq_ref[...], preferred_element_type=jnp.float32).astype(cdt)
    k = jnp.dot(xkv, wk_ref[...], preferred_element_type=jnp.float32).astype(cdt)
    v = jnp.dot(xkv, wv_ref[...], preferred_element_type=jnp.float32).astype(cdt)

    # Head-batched attention: merge (batch, head) into one leading batch axis so
    # scores / weighted values are single 3-D batched einsums (no per-head
    # Python loop, no sub-128 lane slicing of q/k/v/wp).
    qh = q.reshape(Bt, N, H, D).transpose(0, 2, 1, 3).reshape(Bt * H, N, D)
    kh = k.reshape(Bt, M, H, D).transpose(0, 2, 1, 3).reshape(Bt * H, M, D)
    vh = v.reshape(Bt, M, H, D).transpose(0, 2, 1, 3).reshape(Bt * H, M, D)

    # Scores, contracting the D axes (no explicit transpose of kh).
    s = jnp.einsum('bnd,bmd->bnm', qh, kh,
                   preferred_element_type=jnp.float32)            # (Bt*H, N, M)
    m = jnp.max(s, axis=-1, keepdims=True)
    p = jnp.exp(s - m)
    denom = jnp.sum(p, axis=-1, keepdims=True)
    p = p * pl.reciprocal(denom, approx=approx_recip)             # softmax (EUP recip)
    # TODO(synk): attn_drop / proj_drop are p=0.0 (identity in eval); no dropout applied.

    o = jnp.einsum('bnm,bmd->bnd', p.astype(cdt), vh,
                   preferred_element_type=jnp.float32)            # (Bt*H, N, D)
    o = o.reshape(Bt, H, N, D).transpose(0, 2, 1, 3).reshape(Bt * N, C).astype(cdt)

    # Output projection + f32 bias added directly to the f32 accumulator.
    y = jnp.dot(o, wp_ref[...], preferred_element_type=jnp.float32) + bp_ref[...]
    out_ref[...] = y.astype(out_ref.dtype)


# ---------------------------------------------------------------------------
# Tiling / VMEM helpers
# ---------------------------------------------------------------------------
def _vmem_limit_bytes():
    """Scoped-VMEM limit for CompilerParams, derived from the chip (with headroom)."""
    cap = None
    try:
        cap = int(getattr(pltpu.get_tpu_info(), "vmem_capacity_bytes"))
    except Exception:
        cap = None
    if not cap:
        cap = 64 << 20                       # conservative (v7x per-core)
    return int(min(max(cap - (8 << 20), 16 << 20), 100 << 20))


def _pick_batch_tile(B, N, M, C, H, itemsize, vmem_budget_bytes, target_rows=512):
    """Largest batch tile that fits the VMEM budget, is (8,128)-aligned when
    tiling, and keeps grid length >= 2 (v7x megacore) when possible."""
    def aligned(bt):
        if bt == B:                           # full-array block, no (8,128) rule
            return True
        return (bt * N) % 8 == 0 and (bt * M) % 8 == 0

    def vmem_bytes(bt):
        rows_q, rows_kv = bt * N, bt * M
        io = 2 * (2 * rows_q + rows_kv) * C * itemsize         # dbl-buffered q-in/out + kv-in
        weights = 4 * C * C * itemsize + 4 * C                 # single-buffered weights + f32 bias
        qkv = (rows_q + 2 * rows_kv) * C * itemsize            # projected q, k, v
        scores = bt * H * N * M * (4 + 4 + itemsize)           # s, p (f32) + p cast
        acc = 2 * rows_q * C * 4                               # f32 attn-out + f32 y
        return io + weights + qkv + scores + acc

    divisors = [d for d in range(1, B + 1) if B % d == 0]
    ok = [d for d in divisors if aligned(d) and vmem_bytes(d) <= vmem_budget_bytes]
    if not ok:
        ok = [d for d in divisors if aligned(d)] or [B]
    small = [d for d in ok if d <= max(1, B // 2)] or ok        # grid length >= 2 if possible
    big_enough = [d for d in small if d * N >= target_rows]
    return min(big_enough) if big_enough else max(small)


def _weight_spec(shape, single_buffer):
    """Constant-index (resident) block; single-buffer it when supported."""
    idx = lambda b: (0, 0)
    if single_buffer:
        try:
            return pl.BlockSpec(shape, idx, pipeline_mode=pl.Buffered(1))
        except TypeError:   # older JAX without pipeline_mode kwarg
            return pl.BlockSpec(shape, idx)
    return pl.BlockSpec(shape, idx)


# ---------------------------------------------------------------------------
# Wrapper
# ---------------------------------------------------------------------------
def cross_attention(query, key_value, wq_t, wkv_t, wp_t, bp, *, num_heads,
                    batch_tile=None, compute_dtype=jnp.bfloat16):
    """query: (B, N, C); key_value: (B, M, C); weights pre-transposed (in, out)."""
    B, N, C = query.shape
    _, M, _ = key_value.shape
    assert C % num_heads == 0

    out_dtype = query.dtype
    cdt = jnp.dtype(compute_dtype)
    itemsize = cdt.itemsize
    approx_recip = cdt == jnp.dtype(jnp.bfloat16)

    vmem_limit = _vmem_limit_bytes()
    if batch_tile is None:
        batch_tile = _pick_batch_tile(B, N, M, C, num_heads, itemsize,
                                      vmem_budget_bytes=(vmem_limit * 3) // 4)
    assert B % batch_tile == 0, "batch_tile must divide B"
    assert batch_tile == B or ((batch_tile * N) % 8 == 0 and
                               (batch_tile * M) % 8 == 0), \
        "batch_tile*N and batch_tile*M must be multiples of 8 when tiling the batch"

    D = C // num_heads
    scale = float(D) ** -0.5

    # Split the fused kv weight so K and V come from separate full-width matmuls
    # (no non-128-aligned kv[:, :C]/kv[:, C:] lane split in-kernel); fold the
    # softmax scale into the query weight once (in f32, before the cast).
    wk_t = wkv_t[:, :C]
    wv_t = wkv_t[:, C:]
    wq_scaled = (wq_t.astype(jnp.float32) * scale).astype(cdt)

    q2 = query.reshape(B * N, C).astype(cdt)
    kv2 = key_value.reshape(B * M, C).astype(cdt)

    kernel = functools.partial(
        _cross_attention_kernel, num_heads=num_heads, dim=C,
        batch_tile=batch_tile, q_len=N, kv_len=M, approx_recip=approx_recip)

    grid = (B // batch_tile,)

    def build(single_buffer_weights):
        return pl.pallas_call(
            kernel,
            out_shape=jax.ShapeDtypeStruct((B * N, C), out_dtype),
            grid=grid,
            in_specs=[
                pl.BlockSpec((batch_tile * N, C), lambda b: (b, 0)),
                pl.BlockSpec((batch_tile * M, C), lambda b: (b, 0)),
                _weight_spec((C, C), single_buffer_weights),
                _weight_spec((C, C), single_buffer_weights),
                _weight_spec((C, C), single_buffer_weights),
                _weight_spec((C, C), single_buffer_weights),
                _weight_spec((1, C), single_buffer_weights),
            ],
            out_specs=pl.BlockSpec((batch_tile * N, C), lambda b: (b, 0)),
            compiler_params=pltpu.CompilerParams(
                dimension_semantics=("parallel",),
                vmem_limit_bytes=vmem_limit),
        )

    args = (q2, kv2, wq_scaled, wk_t.astype(cdt), wv_t.astype(cdt),
            wp_t.astype(cdt), bp.reshape(1, C).astype(jnp.float32))
    try:
        out = build(True)(*args)
    except Exception:
        # Fallback if this JAX build rejects pipeline_mode=pl.Buffered(1).
        out = build(False)(*args)

    return out.reshape(B, N, C)


# ---------------------------------------------------------------------------
# Pure-JAX f32 reference mirroring the PyTorch forward
# ---------------------------------------------------------------------------
def cross_attention_ref(query, key_value, wq_t, wkv_t, wp_t, bp, *, num_heads):
    B, N, C = query.shape
    M = key_value.shape[1]
    D = C // num_heads
    scale = float(D) ** -0.5

    q = query @ wq_t                                   # (B, N, C)
    kv = key_value @ wkv_t                             # (B, M, 2C)
    k, v = kv[..., :C], kv[..., C:]

    q = q.reshape(B, N, num_heads, D).transpose(0, 2, 1, 3)   # (B, H, N, D)
    k = k.reshape(B, M, num_heads, D).transpose(0, 2, 1, 3)   # (B, H, M, D)
    v = v.reshape(B, M, num_heads, D).transpose(0, 2, 1, 3)   # (B, H, M, D)

    attn = jnp.einsum('bhnd,bhmd->bhnm', q, k) * scale
    attn = jax.nn.softmax(attn, axis=-1)
    x = jnp.einsum('bhnm,bhmd->bhnd', attn, v)
    x = x.transpose(0, 2, 1, 3).reshape(B, N, C)
    return x @ wp_t + bp


if __name__ == "__main__":
    B, N, M, C, H = 4, 8, 16, 32, 8   # dim=32, num_heads=8 -> head_dim=4

    key = jax.random.PRNGKey(0)
    kq, kkv, kwq, kwkv, kwp, kbp = jax.random.split(key, 6)

    query = jax.random.normal(kq, (B, N, C), dtype=jnp.float32)
    key_value = jax.random.normal(kkv, (B, M, C), dtype=jnp.float32)

    # Weights stored pre-transposed so the kernel does x @ W.
    # (PyTorch nn.Linear(in,out).weight has shape (out, in); we hold W.T = (in, out).)
    wq_t = jax.random.normal(kwq, (C, C), dtype=jnp.float32) * 0.05
    wkv_t = jax.random.normal(kwkv, (C, 2 * C), dtype=jnp.float32) * 0.05
    wp_t = jax.random.normal(kwp, (C, C), dtype=jnp.float32) * 0.05
    bp = jax.random.normal(kbp, (C,), dtype=jnp.float32) * 0.05

    ref = cross_attention_ref(query, key_value, wq_t, wkv_t, wp_t, bp, num_heads=H)

    # f32 path: tight numerical check (exact reciprocal, f32 MXU).
    out_f32 = cross_attention(query, key_value, wq_t, wkv_t, wp_t, bp,
                              num_heads=H, compute_dtype=jnp.float32)
    out_f32 = jax.block_until_ready(out_f32)
    assert out_f32.shape == (B, N, C)
    assert jnp.allclose(out_f32, ref, atol=1e-4, rtol=1e-4), "f32 mismatch vs reference"

    # bf16 path (default): MXU-native operands, f32 accumulation; looser check.
    out_bf16 = cross_attention(query, key_value, wq_t, wkv_t, wp_t, bp, num_heads=H)
    out_bf16 = jax.block_until_ready(out_bf16)
    assert out_bf16.shape == (B, N, C)
    assert jnp.allclose(out_bf16.astype(jnp.float32), ref, atol=2e-2, rtol=2e-2), \
        "bf16 mismatch vs reference"

    print("KERNEL_OK")
</pallas_src>

<mosaic_0001>
module attributes {stable_mosaic.version = 11 : i64} {
  func.func @_cross_attention_kernel(%arg0: i32, %arg1: memref<16x32xf32, #tpu.memory_space<vmem>>, %arg2: memref<32x32xf32, #tpu.memory_space<vmem>>, %arg3: memref<32x32xf32, #tpu.memory_space<vmem>>, %arg4: memref<32x32xf32, #tpu.memory_space<vmem>>, %arg5: memref<32x32xf32, #tpu.memory_space<vmem>>, %arg6: memref<32x32xf32, #tpu.memory_space<vmem>>, %arg7: memref<1x32xf32, #tpu.memory_space<vmem>>, %arg8: memref<16x32xf32, #tpu.memory_space<vmem>>) attributes {dimension_semantics = [#tpu.dimension_semantics<parallel>], iteration_bounds = array<i64: 2>, scalar_prefetch = 0 : i64, scratch_operands = 0 : i64, tpu.core_type = #tpu.core_type<tc>, window_params = [{transform_indices = @transform_0, window_bounds = array<i64: 16, 32>}, {transform_indices = @transform_1, window_bounds = array<i64: 32, 32>}, {pipeline_mode = #tpu.pipeline_mode<synchronous>, transform_indices = @transform_2, window_bounds = array<i64: 32, 32>}, {pipeline_mode = #tpu.pipeline_mode<synchronous>, transform_indices = @transform_3, window_bounds = array<i64: 32, 32>}, {pipeline_mode = #tpu.pipeline_mode<synchronous>, transform_indices = @transform_4, window_bounds = array<i64: 32, 32>}, {pipeline_mode = #tpu.pipeline_mode<synchronous>, transform_indices = @transform_5, window_bounds = array<i64: 32, 32>}, {pipeline_mode = #tpu.pipeline_mode<synchronous>, transform_indices = @transform_6, window_bounds = array<i64: 1, 32>}, {transform_indices = @transform_7, window_bounds = array<i64: 16, 32>}]} {
    %c0 = arith.constant 0 : index
    %c0_0 = arith.constant 0 : index
    %0 = vector.load %arg1[%c0, %c0_0] : memref<16x32xf32, #tpu.memory_space<vmem>>, vector<16x32xf32>
    %c0_1 = arith.constant 0 : index
    %c0_2 = arith.constant 0 : index
    %1 = vector.load %arg2[%c0_1, %c0_2] : memref<32x32xf32, #tpu.memory_space<vmem>>, vector<32x32xf32>
    %c0_3 = arith.constant 0 : index
    %c0_4 = arith.constant 0 : index
    %2 = vector.load %arg3[%c0_3, %c0_4] : memref<32x32xf32, #tpu.memory_space<vmem>>, vector<32x32xf32>
    %cst = arith.constant dense<0.000000e+00> : vector<16x32xf32>
    %3 = tpu.matmul %0, %2, %cst {dimension_numbers = #tpu.dot_dimension_numbers<[1], [0], [0], [1], [0, 0, 1, 1], [], []>} : vector<16x32xf32>, vector<32x32xf32>, vector<16x32xf32> -> vector<16x32xf32>
    %c0_5 = arith.constant 0 : index
    %c0_6 = arith.constant 0 : index
    %4 = vector.load %arg4[%c0_5, %c0_6] : memref<32x32xf32, #tpu.memory_space<vmem>>, vector<32x32xf32>
    %cst_7 = arith.constant dense<0.000000e+00> : vector<32x32xf32>
    %5 = tpu.matmul %1, %4, %cst_7 {dimension_numbers = #tpu.dot_dimension_numbers<[1], [0], [0], [1], [0, 0, 1, 1], [], []>} : vector<32x32xf32>, vector<32x32xf32>, vector<32x32xf32> -> vector<32x32xf32>
    %c0_8 = arith.constant 0 : index
    %c0_9 = arith.constant 0 : index
    %6 = vector.load %arg5[%c0_8, %c0_9] : memref<32x32xf32, #tpu.memory_space<vmem>>, vector<32x32xf32>
    %cst_10 = arith.constant dense<0.000000e+00> : vector<32x32xf32>
    %7 = tpu.matmul %1, %6, %cst_10 {dimension_numbers = #tpu.dot_dimension_numbers<[1], [0], [0], [1], [0, 0, 1, 1], [], []>} : vector<32x32xf32>, vector<32x32xf32>, vector<32x32xf32> -> vector<32x32xf32>
    %8 = vector.shape_cast %3 : vector<16x32xf32> to vector<2x8x8x4xf32>
    %9 = tpu.transpose %8, [0, 2, 1, 3] : vector<2x8x8x4xf32> -> vector<2x8x8x4xf32>
    %10 = vector.shape_cast %9 : vector<2x8x8x4xf32> to vector<16x8x4xf32>
    %11 = vector.shape_cast %5 : vector<32x32xf32> to vector<2x16x8x4xf32>
    %12 = tpu.transpose %11, [0, 2, 1, 3] : vector<2x16x8x4xf32> -> vector<2x8x16x4xf32>
    %13 = vector.shape_cast %12 : vector<2x8x16x4xf32> to vector<16x16x4xf32>
    %14 = vector.shape_cast %7 : vector<32x32xf32> to vector<2x16x8x4xf32>
    %15 = tpu.transpose %14, [0, 2, 1, 3] : vector<2x16x8x4xf32> -> vector<2x8x16x4xf32>
    %16 = vector.shape_cast %15 : vector<2x8x16x4xf32> to vector<16x16x4xf32>
    "tpu.trace_start"() <{level = 10 : i32, message = "bnd,bmd->bnm"}> : () -> ()
    %cst_11 = arith.constant dense<0.000000e+00> : vector<16x8x16xf32>
    %17 = tpu.matmul %10, %13, %cst_11 {dimension_numbers = #tpu.dot_dimension_numbers<[2], [2], [1], [1], [0, 0, 0, 1, 1, 1], [0], [0]>} : vector<16x8x4xf32>, vector<16x16x4xf32>, vector<16x8x16xf32> -> vector<16x8x16xf32>
    "tpu.trace_stop"() : () -> ()
    %cst_12 = arith.constant dense<0xFF800000> : vector<16x8xf32>
    %18 = vector.multi_reduction <maximumf>, %17, %cst_12 [2] : vector<16x8x16xf32> to vector<16x8xf32>
    %19 = vector.shape_cast %18 : vector<16x8xf32> to vector<16x8x1xf32>
    %20 = vector.broadcast %19 : vector<16x8x1xf32> to vector<16x8x16xf32>
    %21 = arith.subf %17, %20 : vector<16x8x16xf32>
    %22 = math.exp %21 : vector<16x8x16xf32>
    %cst_13 = arith.constant dense<0.000000e+00> : vector<16x8xf32>
    %23 = vector.multi_reduction <add>, %22, %cst_13 [2] : vector<16x8x16xf32> to vector<16x8xf32>
    %24 = vector.shape_cast %23 : vector<16x8xf32> to vector<16x8x1xf32>
    %25 = tpu.reciprocal %24 : vector<16x8x1xf32> -> vector<16x8x1xf32>
    %26 = vector.broadcast %25 : vector<16x8x1xf32> to vector<16x8x16xf32>
    %27 = arith.mulf %22, %26 : vector<16x8x16xf32>
    "tpu.trace_start"() <{level = 10 : i32, message = "bnm,bmd->bnd"}> : () -> ()
    %cst_14 = arith.constant dense<0.000000e+00> : vector<16x8x4xf32>
    %28 = tpu.matmul %27, %16, %cst_14 {dimension_numbers = #tpu.dot_dimension_numbers<[2], [1], [1], [2], [0, 0, 0, 1, 1, 2], [0], [0]>} : vector<16x8x16xf32>, vector<16x16x4xf32>, vector<16x8x4xf32> -> vector<16x8x4xf32>
    "tpu.trace_stop"() : () -> ()
    %29 = vector.shape_cast %28 : vector<16x8x4xf32> to vector<2x8x8x4xf32>
    %30 = tpu.transpose %29, [0, 2, 1, 3] : vector<2x8x8x4xf32> -> vector<2x8x8x4xf32>
    %31 = vector.shape_cast %30 : vector<2x8x8x4xf32> to vector<16x32xf32>
    %c0_15 = arith.constant 0 : index
    %c0_16 = arith.constant 0 : index
    %32 = vector.load %arg6[%c0_15, %c0_16] : memref<32x32xf32, #tpu.memory_space<vmem>>, vector<32x32xf32>
    %cst_17 = arith.constant dense<0.000000e+00> : vector<16x32xf32>
    %33 = tpu.matmul %31, %32, %cst_17 {dimension_numbers = #tpu.dot_dimension_numbers<[1], [0], [0], [1], [0, 0, 1, 1], [], []>} : vector<16x32xf32>, vector<32x32xf32>, vector<16x32xf32> -> vector<16x32xf32>
    %c0_18 = arith.constant 0 : index
    %c0_19 = arith.constant 0 : index
    %34 = vector.load %arg7[%c0_18, %c0_19] : memref<1x32xf32, #tpu.memory_space<vmem>>, vector<1x32xf32>
    %35 = vector.broadcast %34 : vector<1x32xf32> to vector<16x32xf32>
    %36 = arith.addf %33, %35 : vector<16x32xf32>
    %c0_20 = arith.constant 0 : index
    %c0_21 = arith.constant 0 : index
    %37 = vector.load %arg8[%c0_20, %c0_21] : memref<16x32xf32, #tpu.memory_space<vmem>>, vector<16x32xf32>
    tpu.vector_store %arg8[%c0_20, %c0_21], %36 {strides = array<i32>} : memref<16x32xf32, #tpu.memory_space<vmem>>, vector<16x32xf32>,
    return
  }
  func.func @transform_0(%arg0: i32) -> (i32, i32) {
    %c0_i32 = arith.constant 0 : i32
    %c0_i32_0 = arith.constant 0 : i32
    return %arg0, %c0_i32 : i32, i32
  }
  func.func @transform_1(%arg0: i32) -> (i32, i32) {
    %c0_i32 = arith.constant 0 : i32
    %c0_i32_0 = arith.constant 0 : i32
    return %arg0, %c0_i32 : i32, i32
  }
  func.func @transform_2(%arg0: i32) -> (i32, i32) {
    %c0_i32 = arith.constant 0 : i32
    %c0_i32_0 = arith.constant 0 : i32
    %c0_i32_1 = arith.constant 0 : i32
    return %c0_i32, %c0_i32_0 : i32, i32
  }
  func.func @transform_3(%arg0: i32) -> (i32, i32) {
    %c0_i32 = arith.constant 0 : i32
    %c0_i32_0 = arith.constant 0 : i32
    %c0_i32_1 = arith.constant 0 : i32
    return %c0_i32, %c0_i32_0 : i32, i32
  }
  func.func @transform_4(%arg0: i32) -> (i32, i32) {
    %c0_i32 = arith.constant 0 : i32
    %c0_i32_0 = arith.constant 0 : i32
    %c0_i32_1 = arith.constant 0 : i32
    return %c0_i32, %c0_i32_0 : i32, i32
  }
  func.func @transform_5(%arg0: i32) -> (i32, i32) {
    %c0_i32 = arith.constant 0 : i32
    %c0_i32_0 = arith.constant 0 : i32
    %c0_i32_1 = arith.constant 0 : i32
    return %c0_i32, %c0_i32_0 : i32, i32
  }
  func.func @transform_6(%arg0: i32) -> (i32, i32) {
    %c0_i32 = arith.constant 0 : i32
    %c0_i32_0 = arith.constant 0 : i32
    %c0_i32_1 = arith.constant 0 : i32
    return %c0_i32, %c0_i32_0 : i32, i32
  }
  func.func @transform_7(%arg0: i32) -> (i32, i32) {
    %c0_i32 = arith.constant 0 : i32
    %c0_i32_0 = arith.constant 0 : i32
    return %arg0, %c0_i32 : i32, i32
  }
}

module attributes {stable_mosaic.version = 11 : i64} {
  func.func @_cross_attention_kernel(%arg0: i32, %arg1: memref<16x32xf32, #tpu.memory_space<vmem>>, %arg2: memref<32x32xf32, #tpu.memory_space<vmem>>, %arg3: memref<32x32xf32, #tpu.memory_space<vmem>>, %arg4: memref<32x32xf32, #tpu.memory_space<vmem>>, %arg5: memref<32x32xf32, #tpu.memory_space<vmem>>, %arg6: memref<32x32xf32, #tpu.memory_space<vmem>>, %arg7: memref<1x32xf32, #tpu.memory_space<vmem>>, %arg8: memref<16x32xf32, #tpu.memory_space<vmem>>) attributes {dimension_semantics = [#tpu.dimension_semantics<parallel>], iteration_bounds = array<i64: 2>, scalar_prefetch = 0 : i64, scratch_operands = 0 : i64, tpu.core_type = #tpu.core_type<tc>, window_params = [{transform_indices = @transform_0, window_bounds = array<i64: 16, 32>}, {transform_indices = @transform_1, window_bounds = array<i64: 32, 32>}, {pipeline_mode = #tpu.pipeline_mode<synchronous>, transform_indices = @transform_2, window_bounds = array<i64: 32, 32>}, {pipeline_mode = #tpu.pipeline_mode<synchronous>, transform_indices = @transform_3, window_bounds = array<i64: 32, 32>}, {pipeline_mode = #tpu.pipeline_mode<synchronous>, transform_indices = @transform_4, window_bounds = array<i64: 32, 32>}, {pipeline_mode = #tpu.pipeline_mode<synchronous>, transform_indices = @transform_5, window_bounds = array<i64: 32, 32>}, {pipeline_mode = #tpu.pipeline_mode<synchronous>, transform_indices = @transform_6, window_bounds = array<i64: 1, 32>}, {transform_indices = @transform_7, window_bounds = array<i64: 16, 32>}]} {
    %c0 = arith.constant 0 : index
    %c0_0 = arith.constant 0 : index
    %0 = vector.load %arg1[%c0, %c0_0] : memref<16x32xf32, #tpu.memory_space<vmem>>, vector<16x32xf32>
    %c0_1 = arith.constant 0 : index
    %c0_2 = arith.constant 0 : index
    %1 = vector.load %arg2[%c0_1, %c0_2] : memref<32x32xf32, #tpu.memory_space<vmem>>, vector<32x32xf32>
    %c0_3 = arith.constant 0 : index
    %c0_4 = arith.constant 0 : index
    %2 = vector.load %arg3[%c0_3, %c0_4] : memref<32x32xf32, #tpu.memory_space<vmem>>, vector<32x32xf32>
    %cst = arith.constant dense<0.000000e+00> : vector<16x32xf32>
    %3 = tpu.matmul %0, %2, %cst {dimension_numbers = #tpu.dot_dimension_numbers<[1], [0], [0], [1], [0, 0, 1, 1], [], []>} : vector<16x32xf32>, vector<32x32xf32>, vector<16x32xf32> -> vector<16x32xf32>
    %c0_5 = arith.constant 0 : index
    %c0_6 = arith.constant 0 : index
    %4 = vector.load %arg4[%c0_5, %c0_6] : memref<32x32xf32, #tpu.memory_space<vmem>>, vector<32x32xf32>
    %cst_7 = arith.constant dense<0.000000e+00> : vector<32x32xf32>
    %5 = tpu.matmul %1, %4, %cst_7 {dimension_numbers = #tpu.dot_dimension_numbers<[1], [0], [0], [1], [0, 0, 1, 1], [], []>} : vector<32x32xf32>, vector<32x32xf32>, vector<32x32xf32> -> vector<32x32xf32>
    %c0_8 = arith.constant 0 : index
    %c0_9 = arith.constant 0 : index
    %6 = vector.load %arg5[%c0_8, %c0_9] : memref<32x32xf32, #tpu.memory_space<vmem>>, vector<32x32xf32>
    %cst_10 = arith.constant dense<0.000000e+00> : vector<32x32xf32>
    %7 = tpu.matmul %1, %6, %cst_10 {dimension_numbers = #tpu.dot_dimension_numbers<[1], [0], [0], [1], [0, 0, 1, 1], [], []>} : vector<32x32xf32>, vector<32x32xf32>, vector<32x32xf32> -> vector<32x32xf32>
    %8 = vector.shape_cast %3 : vector<16x32xf32> to vector<2x8x8x4xf32>
    %9 = tpu.transpose %8, [0, 2, 1, 3] : vector<2x8x8x4xf32> -> vector<2x8x8x4xf32>
    %10 = vector.shape_cast %9 : vector<2x8x8x4xf32> to vector<16x8x4xf32>
    %11 = vector.shape_cast %5 : vector<32x32xf32> to vector<2x16x8x4xf32>
    %12 = tpu.transpose %11, [0, 2, 1, 3] : vector<2x16x8x4xf32> -> vector<2x8x16x4xf32>
    %13 = vector.shape_cast %12 : vector<2x8x16x4xf32> to vector<16x16x4xf32>
    %14 = vector.shape_cast %7 : vector<32x32xf32> to vector<2x16x8x4xf32>
    %15 = tpu.transpose %14, [0, 2, 1, 3] : vector<2x16x8x4xf32> -> vector<2x8x16x4xf32>
    %16 = vector.shape_cast %15 : vector<2x8x16x4xf32> to vector<16x16x4xf32>
    "tpu.trace_start"() <{level = 10 : i32, message = "bnd,bmd->bnm"}> : () -> ()
    %cst_11 = arith.constant dense<0.000000e+00> : vector<16x8x16xf32>
    %17 = tpu.matmul %10, %13, %cst_11 {dimension_numbers = #tpu.dot_dimension_numbers<[2], [2], [1], [1], [0, 0, 0, 1, 1, 1], [0], [0]>} : vector<16x8x4xf32>, vector<16x16x4xf32>, vector<16x8x16xf32> -> vector<16x8x16xf32>
    "tpu.trace_stop"() : () -> ()
    %cst_12 = arith.constant dense<0xFF800000> : vector<16x8xf32>
    %18 = vector.multi_reduction <maximumf>, %17, %cst_12 [2] : vector<16x8x16xf32> to vector<16x8xf32>
    %19 = vector.shape_cast %18 : vector<16x8xf32> to vector<16x8x1xf32>
    %20 = vector.broadcast %19 : vector<16x8x1xf32> to vector<16x8x16xf32>
    %21 = arith.subf %17, %20 : vector<16x8x16xf32>
    %22 = math.exp %21 : vector<16x8x16xf32>
    %cst_13 = arith.constant dense<0.000000e+00> : vector<16x8xf32>
    %23 = vector.multi_reduction <add>, %22, %cst_13 [2] : vector<16x8x16xf32> to vector<16x8xf32>
    %24 = vector.shape_cast %23 : vector<16x8xf32> to vector<16x8x1xf32>
    %25 = tpu.reciprocal %24 : vector<16x8x1xf32> -> vector<16x8x1xf32>
    %26 = vector.broadcast %25 : vector<16x8x1xf32> to vector<16x8x16xf32>
    %27 = arith.mulf %22, %26 : vector<16x8x16xf32>
    "tpu.trace_start"() <{level = 10 : i32, message = "bnm,bmd->bnd"}> : () -> ()
    %cst_14 = arith.constant dense<0.000000e+00> : vector<16x8x4xf32>
    %28 = tpu.matmul %27, %16, %cst_14 {dimension_numbers = #tpu.dot_dimension_numbers<[2], [1], [1], [2], [0, 0, 0, 1, 1, 2], [0], [0]>} : vector<16x8x16xf32>, vector<16x16x4xf32>, vector<16x8x4xf32> -> vector<16x8x4xf32>
    "tpu.trace_stop"() : () -> ()
    %29 = vector.shape_cast %28 : vector<16x8x4xf32> to vector<2x8x8x4xf32>
    %30 = tpu.transpose %29, [0, 2, 1, 3] : vector<2x8x8x4xf32> -> vector<2x8x8x4xf32>
    %31 = vector.shape_cast %30 : vector<2x8x8x4xf32> to vector<16x32xf32>
    %c0_15 = arith.constant 0 : index
    %c0_16 = arith.constant 0 : index
    %32 = vector.load %arg6[%c0_15, %c0_16] : memref<32x32xf32, #tpu.memory_space<vmem>>, vector<32x32xf32>
    %cst_17 = arith.constant dense<0.000000e+00> : vector<16x32xf32>
    %33 = tpu.matmul %31, %32, %cst_17 {dimension_numbers = #tpu.dot_dimension_numbers<[1], [0], [0], [1], [0, 0, 1, 1], [], []>} : vector<16x32xf32>, vector<32x32xf32>, vector<16x32xf32> -> vector<16x32xf32>
    %c0_18 = arith.constant 0 : index
    %c0_19 = arith.constant 0 : index
    %34 = vector.load %arg7[%c0_18, %c0_19] : memref<1x32xf32, #tpu.memory_space<vmem>>, vector<1x32xf32>
    %35 = vector.broadcast %34 : vector<1x32xf32> to vector<16x32xf32>
    %36 = arith.addf %33, %35 : vector<16x32xf32>
    %c0_20 = arith.constant 0 : index
    %c0_21 = arith.constant 0 : index
    %37 = vector.load %arg8[%c0_20, %c0_21] : memref<16x32xf32, #tpu.memory_space<vmem>>, vector<16x32xf32>
    tpu.vector_store %arg8[%c0_20, %c0_21], %36 {strides = array<i32>} : memref<16x32xf32, #tpu.memory_space<vmem>>, vector<16x32xf32>,
    return
  }
  func.func @transform_0(%arg0: i32) -> (i32, i32) {
    %c0_i32 = arith.constant 0 : i32
    %c0_i32_0 = arith.constant 0 : i32
    return %arg0, %c0_i32 : i32, i32
  }
  func.func @transform_1(%arg0: i32) -> (i32, i32) {
    %c0_i32 = arith.constant 0 : i32
    %c0_i32_0 = arith.constant 0 : i32
    return %arg0, %c0_i32 : i32, i32
  }
  func.func @transform_2(%arg0: i32) -> (i32, i32) {
    %c0_i32 = arith.constant 0 : i32
    %c0_i32_0 = arith.constant 0 : i32
    %c0_i32_1 = arith.constant 0 : i32
    return %c0_i32, %c0_i32_0 : i32, i32
  }
  func.func @transform_3(%arg0: i32) -> (i32, i32) {
    %c0_i32 = arith.constant 0 : i32
    %c0_i32_0 = arith.constant 0 : i32
    %c0_i32_1 = arith.constant 0 : i32
    return %c0_i32, %c0_i32_0 : i32, i32
  }
  func.func @transform_4(%arg0: i32) -> (i32, i32) {
    %c0_i32 = arith.constant 0 : i32
    %c0_i32_0 = arith.constant 0 : i32
    %c0_i32_1 = arith.constant 0 : i32
    return %c0_i32, %c0_i32_0 : i32, i32
  }
  func.func @transform_5(%arg0: i32) -> (i32, i32) {
    %c0_i32 = arith.constant 0 : i32
    %c0_i32_0 = arith.constant 0 : i32
    %c0_i32_1 = arith.constant 0 : i32
    return %c0_i32, %c0_i32_0 : i32, i32
  }
  func.func @transform_6(%arg0: i32) -> (i32, i32) {
    %c0_i32 = arith.constant 0 : i32
    %c0_i32_0 = arith.constant 0 : i32
    %c0_i32_1 = arith.constant 0 : i32
    return %c0_i32, %c0_i32_0 : i32, i32
  }
  func.func @transform_7(%arg0: i32) -> (i32, i32) {
    %c0_i32 = arith.constant 0 : i32
    %c0_i32_0 = arith.constant 0 : i32
    return %arg0, %c0_i32 : i32, i32
  }
}

</mosaic_0001>

<bundles_post_ra>
// kernel: tpu_custom_call.1
= control target key start
LH: loop header
LB: loop body
LE: loop exit
PB: predicated region body
PF: predicated region fallthrough
CT: control target
= control target key end

     0   :  { %12 = vsyncpa [#allocation3], 0  ;;  %s8124_s0 = inlined_call_operand.vmem [shape: f32[32,32], index: 0, kind: input, shape index: {}]   ;;  %s8125_s1 = inlined_call_operand.vmem [shape: f32[64,32], index: 1, kind: input, shape index: {}]   ;;  %s8126_s2 = inlined_call_operand.vmem [shape: f32[32,32], index: 2, kind: input, shape index: {}]   ;;  %s8127_s3 = inlined_call_operand.vmem [shape: f32[32,32], index: 3, kind: input, shape index: {}]   ;;  %s8128_s4 = inlined_call_operand.hbm [shape: f32[32,32], index: 4, kind: input, shape index: {}]   ;;  %s8129_s5 = inlined_call_operand.hbm [shape: f32[32,32], index: 5, kind: input, shape index: {}]   ;;  %s8130_s6 = inlined_call_operand.vmem [shape: f32[1,32], index: 6, kind: input, shape index: {}]   ;;  %s8131_s7 = inlined_call_operand.hbm [shape: f32[32,32], index: 7, kind: output, shape index: {}]  }
   0x1   :  { %13 = vsyncpa [#allocation6], 0 }
   0x2   :  { %14 = vsyncpa [#allocation4], 0 }
   0x3   :  { %16 = vsyncpa [#allocation4 + $0x1], 0  ;;  %s5313_s24 = smov 0   ;;  %s5315_s25 = smov 0  }
   0x4   :  { %s5317_s26 = smov 0   ;;  %s5319_s27 = smov 0  }
   0x5 LB: > { %s5334_s28 = sadd.s32 4294967295, %s5250_s27   ;;  %s4807_s29 = sadd.s32 4294967294, %s5250_s27   ;;  %s5250_s27 = sphi %s5319_s27, %s8245_s27   ;;  %s5246_s26 = sphi %s5317_s26, %s8244_s26   ;;  %s5242_s25 = sphi %s5315_s25, %s8243_s25   ;;  %s5238_s24 = sphi %s5313_s24, %s8242_s24  }
   0x6   : > { %s5338_s30 = sadd.s32 1, %s5250_s27   ;;  %s186_s8 = sadd.s32 1, %s5246_s26 }
   0x7   : > { %s183_s9 = ssub.s32 %s5250_s27, %s5338_s30  ;;  %p196_p0 = scmp.ne.s32.totalorder %s5246_s26, %s5242_s25 }
   0x8   : > { %p184_p1 = scmp.eq.s32.totalorder %s183_s9, 0  ;;  %p197_p2 = scmp.eq.s32.totalorder %s5334_s28, 1 }
   0x9   : > { %p202_p3 = scmp.ne.s32.totalorder %s5242_s25, %s5238_s24  ;;  %p203_p4 = scmp.eq.s32.totalorder %s4807_s29, 1 }
   0xa   : > { %s5349_s10 = scalar_select %p184_p1, %s5246_s26, %s186_s8  }
   0xb   : > { %p5351_p5 = por %p197_p2, %p196_p0  ;;  %p5355_p6 = por %p203_p4, %p202_p3 }
   0xc   : > { %p4808_p7 = scmp.ge.s32.totalorder %s5250_s27, 1  ;;  %p210_p8 = scmp.lt.s32.totalorder %s5250_s27, 3 }
   0xd   : > { %p4927_p9 = scmp.eq.s32.totalorder %s5334_s28, 0  ;;  %s227_s16 = sshll.u32 %s8128_s4, 4  ;;  %s228_s16 = int_to_ptr.hbm [resolvable:$true] %s227_s16 }
   0xe   : > { %p5362_p10 = pnand %p4808_p7, %p210_p8  ;;  %s5252_s17 = smov [#allocation2]  }
   0xf   : > { %s229_s18 = sshll.u32 %s5252_s17, 4  ;;  %s241_s21 = sshll.u32 %s8129_s5, 4  ;;  %s230_s18 = int_to_ptr.vmem [resolvable:$true] %s229_s18  ;;  %s242_s21 = int_to_ptr.hbm [resolvable:$true] %s241_s21 }
  0x10   : > { %p4916_p11 = pneg %p5362_p10  ;;  %s5253_s22 = smov 128  }
  0x11   : > { %s5254_s23 = smov 8   ;;  %s5255_s29 = smov [#allocation5]  }
  0x12   : > { %p4917_p12 = pnand %p4927_p9, %p4916_p11  ;;  %s243_s8 = sshll.u32 %s5255_s29, 4  ;;  %s244_s8 = int_to_ptr.vmem [resolvable:$true] %s243_s8 }
  0x13   : > { %280 = sbr.rel (%p5362_p10) target bundleno = 1334 (0x536), region = 48 }
  0x14   : > { %4919 = dma.hbm_to_vmem [thread:$0]  (!%p4917_p12), %s228_s16, 512, %s230_s18, [#allocation3], %s5253_s22, %s5253_s22, %s5254_s23  }
  0x15   : > { %4922 = dma.hbm_to_vmem [thread:$0]  (!%p4917_p12), %s242_s21, 512, %s244_s8, [#allocation6], %s5253_s22, %s5253_s22, %s5254_s23  }
  0x18   : > { %5225 = dma.done.wait (%p4927_p9), [#allocation3], 512  }
  0x19   : > { %5227 = vsyncadd (%p4927_p9), [#allocation3], 4294966784 }
  0x1a   : > { %5229 = dma.done.wait (%p4927_p9), [#allocation6], 512  }
  0x1b   : > { %5231 = vsyncadd (%p4927_p9), [#allocation6], 4294966784  ;;  %s4818_s9 = sshll.u32 %s5334_s28, 2  ;;  %s4816_s14 = sshll.u32 %s5334_s28, 1  ;;  %v379_v0 = vld [vmem:[%s8127_s3 + $0x18] sm:$0xff]  ;;  %v378_v1 = vld [vmem:[%s8127_s3 + $0x10] sm:$0xff] }
  0x1c   : > { %p330_p13 = scmp.lt.s32.totalorder %s4818_s9, 7  ;;  %p324_p0 = scmp.lt.s32.totalorder %s4816_s14, 3  ;;  %404 = vmatpush.msra.mxu1 %v379_v0  ;;  %v345_v2 = vld [vmem:[%s8126_s2 + $0x18] sm:$0xff]  ;;  %v377_v3 = vld [vmem:[%s8127_s3 + $0x8] sm:$0xff]  ;;  %v344_v4 = vld [vmem:[%s8126_s2 + $0x10] sm:$0xff]  ;;  %vm346_vm0 = vcmask 261120  }
  0x1d   : > { %365 = vmatpush.msra.mxu0 %v345_v2  ;;  %v343_v5 = vld [vmem:[%s8126_s2 + $0x8] sm:$0xff]  ;;  %v376_v6 = vld [vmem:[%s8127_s3] sm:$0xff]  ;;  %v424_v14 = vld [vmem:[#allocation2 + $0x18] sm:$0xff]  ;;  %s5257_s8 = smov 120   ;;  %s5259_s15 = smov 108   ;;  %vm499_vm1 = vcmask 1047556  }
  0x1e   : > { %s8247_s9 = smov (!%p330_p13, %s4818_s9), 7  ;;  %s8249_s14 = smov (!%p324_p0, %s4816_s14), 3  ;;  %405 = vmatpush.msra.mxu1 %v378_v1  ;;  %v342_v8 = vld [vmem:[%s8126_s2] sm:$0xff]  ;;  %437 = vmatpush.msra.mxu2 %v424_v14  ;;  %v423_v15 = vld [vmem:[#allocation2 + $0x10] sm:$0xff]  ;;  %v422_v16 = vld [vmem:[#allocation2 + $0x8] sm:$0xff]  ;;  %vm2915_vm2 = vcmask 31744  }
  0x1f   : > { %s4819_s13 = sshll.u32 %s8247_s9, 3  ;;  %s4817_s19 = sshll.u32 %s8249_s14, 3  ;;  %366 = vmatpush.msra.mxu0 %v344_v4  ;;  %4902 = vmatpush.msra.mxu3 %v424_v14  ;;  %v421_v17 = vld [vmem:[#allocation2] sm:$0xff]  ;;  %v5263_v31 = vmov 1983009808   ;;  %vm3380_vm3 = vcmask 130048  }
  0x20   : > { %s333_s9 = scalar_lea.vmem %s8125_s1, %s4819_s13  ;;  %s327_s21 = scalar_lea.vmem %s8124_s0, %s4817_s19  ;;  %406 = vmatpush.msra.mxu1 %v377_v3  ;;  %438 = vmatpush.msra.mxu2 %v423_v15  ;;  %v504_v32 = vunpack.c.l.s4 %v5263_v31  ;;  %v5264_v46 = vmov 1934713408  }
  0x21   : > { %v338_v7 = vld [vmem:[%s333_s9] sm:$0xff]  ;;  %367 = vmatpush.msra.mxu0 %v343_v5  ;;  %v339_v10 = vld [vmem:[%s333_s9 + $0x8] sm:$0xff]  ;;  %v340_v12 = vld [vmem:[%s333_s9 + $0x10] sm:$0xff]  ;;  %4903 = vmatpush.msra.mxu3 %v423_v15  ;;  %s5256_s19 = smov 112   ;;  %s5260_s16 = smov 116   ;;  %v552_v47 = vunpack.c.l.s4 %v5264_v46 }
  0x22   : > { %v336_v9 = vld [vmem:[%s327_s21] sm:$0xff]  ;;  %407 = vmatpush.msra.mxu1 %v376_v6  ;;  %v337_v11 = vld [vmem:[%s327_s21 + $0x8] sm:$0xff]  ;;  %v341_v13 = vld [vmem:[%s333_s9 + $0x18] sm:$0xff]  ;;  %439 = vmatpush.msra.mxu2 %v422_v16  ;;  %s5258_s9 = smov 124   ;;  %s5261_s14 = smov 104   ;;  %v5534_v37 = vunpack.c.0.s8 %v504_v32 }
  0x23   : > { %4822 = vmatmul.msk.f32.vlgmr.msra.gmra.mxu1 %vm346_vm0, %v338_v7  ;;  %368 = vmatpush.msra.mxu0 %v342_v8  ;;  %s5262_s17 = smov 100   ;;  %v5556_v60 = vunpack.c.0.s8 %v552_v47  ;;  %s5265_s18 = smov 4  }
  0x24   : > { %4820 = vmatmul.msk.f32.vlgmr.msra.gmra.mxu0 %vm346_vm0, %v336_v9  ;;  %4904 = vmatpush.msra.mxu3 %v422_v16  ;;  %s5266_s20 = smov 12   ;;  %s5267_s21 = smov 8  }
  0x25   : > { %440 = vmatpush.msra.mxu2 %v421_v17  ;;  %s5268_s22 = smov 20   ;;  %s5269_s23 = smov 16  }
  0x26   : > { %4905 = vmatpush.msra.mxu3 %v421_v17  ;;  %4826 = vmatmul.msk.f32.vlgmr.msra.gmra.mxu2 %vm346_vm0, %v338_v7  ;;  %s5270_s13 = smov 24   ;;  %s5271_s29 = smov 28  }
  0x27   : > { %4829 = vmatmul.msk.f32.vlgmr.msra.gmra.mxu3 %vm346_vm0, %v341_v13 }
  0x2b   : > { %4823 = vmatmul.msk.f32.gmra.mxu1 %vm346_vm0, %v339_v10 }
  0x2c   : > { %4821 = vmatmul.msk.f32.gmra.mxu0 %vm346_vm0, %v337_v11 }
  0x2e   : > { %4827 = vmatmul.msk.f32.gmra.mxu2 %vm346_vm0, %v339_v10 }
  0x33   : > { %4824 = vmatmul.msk.f32.gmra.mxu1 %vm346_vm0, %v340_v12 }
  0x36   : > { %4828 = vmatmul.msk.f32.gmra.mxu2 %vm346_vm0, %v340_v12 }
  0x3b   : > { %4825 = vmatmul.msk.f32.gmra.mxu1 %vm346_vm0, %v341_v13 }
  0xa0   : > { %v5428_v18 = vpop.f32.mrf.mxu1 }
  0xa1   : > { %987 = vrot.lane.b32.xlu2 %v5428_v18, %s5256_s19  ;;  %963 = vrot.lane.b32.xlu1 %v5428_v18, %s5257_s8  ;;  %v5442_v19 = vpop.f32.mrf.mxu0  ;;  %v1037_v33 = vrot.slane %v5428_v18, 4 }
  0xa2   : > { %951 = vrot.lane.b32.xlu0 %v5428_v18, %s5258_s9  ;;  %v501_v45 = vrot.slane %v5442_v19, 4 }
  0xa8   : > { %v5456_v20 = vpop.f32.mrf.mxu1 }
  0xa9   : > { %999 = vrot.lane.b32.xlu2 %v5428_v18, %s5259_s15  ;;  %975 = vrot.lane.b32.xlu1 %v5428_v18, %s5260_s16  ;;  %v5476_v21 = vpop.f32.mrf.mxu0  ;;  %v5526_v27 = vpop.f32.mrf.mxu2  ;;  %v1149_v63 = vrot.slane %v5456_v20, 4 }
  0xaa   : > { %1011 = vrot.lane.b32.xlu0 %v5428_v18, %s5261_s14  ;;  %8147 = vst [vmem:[#allocation11_spill] sm:$0xff] %v5526_v27  ;;  %v613_v2 = vrot.slane %v5476_v21, 4 }
  0xb0   : > { %v5484_v22 = vpop.f32.mrf.mxu1 }
  0xb1   : > { %462 = vrot.lane.b32.xlu2 %v5442_v19, %s5257_s8  ;;  %456 = vrot.lane.b32.xlu1 %v5442_v19, %s5258_s9  ;;  %v5532_v36 = vpop.f32.mrf.mxu2  ;;  %v1261_v11 = vrot.slane %v5484_v22, 4 }
  0xb2   : > { %474 = vrot.lane.b32.xlu0 %v5442_v19, %s5256_s19  ;;  %8148 = vst [vmem:[#allocation12_spill] sm:$0xff] %v5532_v36  ;;  %v5538_v38 = vpack.i.bf16 %v5526_v27, %v5532_v36 }
  0xb8   : > { %v5498_v23 = vpop.f32.mrf.mxu1 }
  0xb9   : > { %468 = vrot.lane.b32.xlu2 %v5442_v19, %s5260_s16  ;;  %1023 = vrot.lane.b32.xlu1 %v5428_v18, %s5262_s17 }
  0xba   : > { %480 = vrot.lane.b32.xlu0 %v5442_v19, %s5259_s15 }
  0xc1   : > { %492 = vrot.lane.b32.xlu2 %v5442_v19, %s5262_s17  ;;  %486 = vrot.lane.b32.xlu1 %v5442_v19, %s5261_s14 }
  0xc2   : > { %953 = vrot.lane.b32.xlu0 %v5456_v20, %s5258_s9 }
  0xc9   : > { %1001 = vrot.lane.b32.xlu2 %v5456_v20, %s5259_s15  ;;  %989 = vrot.lane.b32.xlu1 %v5456_v20, %s5256_s19 }
  0xca   : > { %965 = vrot.lane.b32.xlu0 %v5456_v20, %s5257_s8 }
  0xd1   : > { %1013 = vrot.lane.b32.xlu2 %v5456_v20, %s5261_s14  ;;  %977 = vrot.lane.b32.xlu1 %v5456_v20, %s5260_s16 }
  0xd2   : > { %1025 = vrot.lane.b32.xlu0 %v5456_v20, %s5262_s17 }
  0xd9   : > { %464 = vrot.lane.b32.xlu2 %v5476_v21, %s5257_s8  ;;  %458 = vrot.lane.b32.xlu1 %v5476_v21, %s5258_s9 }
  0xda   : > { %476 = vrot.lane.b32.xlu0 %v5476_v21, %s5256_s19 }
  0xe1   : > { %991 = vrot.lane.b32.xlu2 %v5484_v22, %s5256_s19  ;;  %967 = vrot.lane.b32.xlu1 %v5484_v22, %s5257_s8 }
  0xe2   : > { %955 = vrot.lane.b32.xlu0 %v5484_v22, %s5258_s9 }
  0xe9   : > { %1003 = vrot.lane.b32.xlu2 %v5484_v22, %s5259_s15  ;;  %979 = vrot.lane.b32.xlu1 %v5484_v22, %s5260_s16 }
  0xea   : > { %1015 = vrot.lane.b32.xlu0 %v5484_v22, %s5261_s14 }
  0xf1   : > { %993 = vrot.lane.b32.xlu2 %v5498_v23, %s5256_s19  ;;  %1027 = vrot.lane.b32.xlu1 %v5484_v22, %s5262_s17 }
  0xf2   : > { %957 = vrot.lane.b32.xlu0 %v5498_v23, %s5258_s9 }
  0xf9   : > { %1017 = vrot.lane.b32.xlu2 %v5498_v23, %s5261_s14  ;;  %969 = vrot.lane.b32.xlu1 %v5498_v23, %s5257_s8 }
  0xfa   : > { %981 = vrot.lane.b32.xlu0 %v5498_v23, %s5260_s16 }
  0xfb   : > { %v988_v24 = vpop.permute.xlu2 %987 }
  0xfc   : > { %v1061_v51 = vrot.slane %v988_v24, 4 }
 0x101   : > { %470 = vrot.lane.b32.xlu2 %v5476_v21, %s5260_s16  ;;  %1005 = vrot.lane.b32.xlu1 %v5498_v23, %s5259_s15 }
 0x102   : > { %1029 = vrot.lane.b32.xlu0 %v5498_v23, %s5262_s17 }
 0x103   : > { %v5518_v25 = vpop.permute.xlu2 %999 }
 0x104   : > { %v1073_v12 = vrot.slane %v5518_v25, 4 }
 0x109   : > { %494 = vrot.lane.b32.xlu2 %v5476_v21, %s5262_s17  ;;  %488 = vrot.lane.b32.xlu1 %v5476_v21, %s5261_s14 }
 0x10a   : > { %482 = vrot.lane.b32.xlu0 %v5476_v21, %s5259_s15 }
 0x10b   : > { %v463_v26 = vpop.permute.xlu2 %462 }
 0x10c   : > { %v498_v40 = vrot.slane %v463_v26, 4  ;;  %v502_v53 = vsel %vm499_vm1, %v463_v26, %v501_v45 }
 0x10d   : > { %v510_v0 = vperm.slane %v502_v53, %v5534_v37 }
 0x10e   : > { %v500_v57 = vsel %vm499_vm1, %v498_v40, %v5442_v19 }
 0x10f   : > { %v506_v3 = vperm.slane %v500_v57, %v5534_v37  ;;  %v561_v17 = vrot.slane %v510_v0, 4 }
 0x111   : > { %4991 = vrot.lane.b32.xlu1 %v5538_v38, %s5257_s8  ;;  %v549_v26 = vrot.slane %v506_v3, 4  ;;  %4996 = vrot.lane.b32.xlu2 %v5538_v38, %s5256_s19 }
 0x112   : > { %4986 = vrot.lane.b32.xlu0 %v5538_v38, %s5258_s9 }
 0x113   : > { %v964_v28 = vpop.permute.xlu1 %963  ;;  %v5528_v29 = vpop.permute.xlu2 %468 }
 0x114   : > { %v952_v30 = vpop.permute.xlu0 %951  ;;  %v1035_v34 = vrot.slane %v964_v28, 4  ;;  %v1038_v35 = vsel %vm499_vm1, %v964_v28, %v1037_v33  ;;  %v511_v7 = vrot.slane %v5528_v29, 4 }
 0x115   : > { %v1049_v39 = vrot.slane %v952_v30, 4  ;;  %v1046_v42 = vperm.slane %v1038_v35, %v5534_v37 }
 0x116   : > { %v1036_v41 = vsel %vm499_vm1, %v1035_v34, %v5428_v18 }
 0x117   : > { %v1042_v54 = vperm.slane %v1036_v41, %v5534_v37  ;;  %v1097_v58 = vrot.slane %v1046_v42, 4 }
 0x119   : > { %v1085_v4 = vrot.slane %v1042_v54, 4  ;;  %5006 = vrot.lane.b32.xlu1 %v5538_v38, %s5259_s15  ;;  %5016 = vrot.lane.b32.xlu2 %v5538_v38, %s5262_s17 }
 0x11a   : > { %5001 = vrot.lane.b32.xlu0 %v5538_v38, %s5260_s16 }
 0x11b   : > { %v976_v43 = vpop.permute.xlu1 %975  ;;  %v5543_v44 = vpop.permute.xlu2 %492 }
 0x11c   : > { %v1047_v48 = vrot.slane %v976_v43, 4  ;;  %v1050_v49 = vsel %vm499_vm1, %v976_v43, %v1049_v39  ;;  %v1012_v50 = vpop.permute.xlu0 %1011 }
 0x11d   : > { %v1058_v52 = vperm.slane %v1050_v49, %v5534_v37  ;;  %v1059_v56 = vrot.slane %v1012_v50, 4  ;;  %v1062_v62 = vsel %vm499_vm1, %v1012_v50, %v1061_v51 }
 0x11e   : > { %v1048_v55 = vsel %vm499_vm1, %v1047_v48, %v952_v30  ;;  %v5567_v8 = vperm.slane %v1062_v62, %v5534_v37  ;;  %v535_v30 = vrot.slane %v5543_v44, 4 }
 0x11f   : > { %v1054_v59 = vperm.slane %v1048_v55, %v5534_v37  ;;  %v1095_v61 = vrot.slane %v1058_v52, 4  ;;  %v1098_v1 = vsel %vm499_vm1, %v1058_v52, %v1097_v58  ;;  %v1060_v6 = vsel %vm499_vm1, %v1059_v56, %v988_v24 }
 0x120   : > { %v5578_v15 = vperm.slane %v1098_v1, %v5556_v60  ;;  %v1066_v18 = vperm.slane %v1060_v6, %v5534_v37  ;;  %v1121_v34 = vrot.slane %v5567_v8, 4 }
 0x121   : > { %v1083_v5 = vrot.slane %v1054_v59, 4  ;;  %v1086_v13 = vsel %vm499_vm1, %v1054_v59, %v1085_v4  ;;  %v1096_v14 = vsel %vm499_vm1, %v1095_v61, %v1046_v42 }
 0x122   : > { %v5590_v32 = vperm.slane %v1086_v13, %v5556_v60  ;;  %v5593_v33 = vperm.slane %v1096_v14, %v5556_v60  ;;  %v1145_v39 = vrot.slane %v5578_v15, 4  ;;  %v1109_v45 = vrot.slane %v1066_v18, 4  ;;  %5011 = vrot.lane.b32.xlu0 %v5538_v38, %s5261_s14 }
 0x123   : > { %v5569_v9 = vpop.permute.xlu2 %1001  ;;  %v457_v10 = vpop.permute.xlu1 %456  ;;  %v1084_v28 = vsel %vm499_vm1, %v1083_v5, %v1042_v54 }
 0x124   : > { %v5580_v16 = vpop.permute.xlu0 %474  ;;  %v512_v19 = vsel %vm499_vm1, %v511_v7, %v457_v10  ;;  %v513_v24 = vrot.slane %v457_v10, 4  ;;  %v5602_v43 = vperm.slane %v1084_v28, %v5556_v60  ;;  %v1141_v50 = vrot.slane %v5593_v33, 4 }
 0x125   : > { %v518_v31 = vperm.slane %v512_v19, %v5534_v37  ;;  %v1185_v51 = vrot.slane %v5569_v9, 4  ;;  %v525_v62 = vrot.slane %v5580_v16, 4 }
 0x126   : > { %v514_v35 = vsel %vm499_vm1, %v5528_v29, %v513_v24  ;;  %v1137_v29 = vrot.slane %v5590_v32, 4  ;;  %v1133_v61 = vrot.slane %v5602_v43, 4 }
 0x127   : > { %v522_v40 = vperm.slane %v514_v35, %v5534_v37  ;;  %v547_v41 = vrot.slane %v518_v31, 4  ;;  %v550_v42 = vsel %vm499_vm1, %v518_v31, %v549_v26 }
 0x128   : > { %v5611_v52 = vperm.slane %v550_v42, %v5556_v60 }
 0x129   : > { %v548_v46 = vsel %vm499_vm1, %v547_v41, %v506_v3  ;;  %v559_v47 = vrot.slane %v522_v40, 4  ;;  %v562_v48 = vsel %vm499_vm1, %v522_v40, %v561_v17 }
 0x12a   : > { %v5618_v55 = vperm.slane %v548_v46, %v5556_v60  ;;  %v5625_v1 = vperm.slane %v562_v48, %v5556_v60  ;;  %v601_v7 = vrot.slane %v5611_v52, 4 }
 0x12b   : > { %v5613_v53 = vpop.permute.xlu2 %1013  ;;  %v1024_v54 = vpop.permute.xlu1 %1023  ;;  %v560_v56 = vsel %vm499_vm1, %v559_v47, %v510_v0 }
 0x12c   : > { %v481_v57 = vpop.permute.xlu0 %480  ;;  %v1071_v58 = vrot.slane %v1024_v54, 4  ;;  %v1074_v59 = vsel %vm499_vm1, %v1024_v54, %v1073_v12  ;;  %v5631_v4 = vperm.slane %v560_v56, %v5556_v60  ;;  %v1171_v12 = vrot.slane %v5613_v53, 4 }
 0x12d   : > { %v536_v3 = vsel %vm499_vm1, %v535_v30, %v481_v57  ;;  %v537_v0 = vrot.slane %v481_v57, 4  ;;  %v1082_v6 = vperm.slane %v1074_v59, %v5534_v37  ;;  %v597_v14 = vrot.slane %v5618_v55, 4 }
 0x12e   : > { %v1072_v5 = vsel %vm499_vm1, %v1071_v58, %v5518_v25  ;;  %v5638_v10 = vperm.slane %v536_v3, %v5534_v37  ;;  %v605_v31 = vrot.slane %v5631_v4, 4  ;;  %v609_v35 = vrot.slane %v5625_v1, 4 }
 0x12f   : > { %v1078_v13 = vperm.slane %v1072_v5, %v5534_v37  ;;  %v538_v17 = vsel %vm499_vm1, %v5543_v44, %v537_v0  ;;  %v1119_v19 = vrot.slane %v1082_v6, 4  ;;  %v1122_v24 = vsel %vm499_vm1, %v1082_v6, %v1121_v34 }
 0x130   : > { %v546_v25 = vperm.slane %v538_v17, %v5534_v37  ;;  %v1130_v30 = vperm.slane %v1122_v24, %v5556_v60  ;;  %v571_v44 = vrot.slane %v5638_v10, 4 }
 0x131   : > { %v1107_v26 = vrot.slane %v1078_v13, 4  ;;  %v1110_v28 = vsel %vm499_vm1, %v1078_v13, %v1109_v45  ;;  %v1120_v41 = vsel %vm499_vm1, %v1119_v19, %v5567_v8 }
 0x132   : > { %v1118_v40 = vperm.slane %v1110_v28, %v5556_v60  ;;  %v1126_v42 = vperm.slane %v1120_v41, %v5556_v60  ;;  %v1143_v46 = vrot.slane %v1130_v30, 4  ;;  %v583_v48 = vrot.slane %v546_v25, 4 }
 0x133   : > { %v1108_v34 = vsel %vm499_vm1, %v1107_v26, %v1066_v18  ;;  %v487_v47 = vpop.permute.xlu1 %486  ;;  %v465_v45 = vpop.permute.xlu2 %464  ;;  %v5662_v57 = vsel %vm499_vm1, %v1130_v30, %v1145_v39 }
 0x134   : > { %v1114_v54 = vperm.slane %v1108_v34, %v5556_v60  ;;  %v5659_v56 = vsel %vm499_vm1, %v1118_v40, %v1137_v29  ;;  %v5664_v58 = vpop.permute.xlu0 %953  ;;  %v1135_v8 = vrot.slane %v1118_v40, 4  ;;  %v1139_v59 = vrot.slane %v1126_v42, 4 }
 0x135   : > { %v5667_v18 = vsel %vm499_vm1, %v1126_v42, %v1141_v50  ;;  %v5671_v3 = vsel %vm499_vm1, %v1143_v46, %v5578_v15  ;;  %v1495_v5 = vrot.slane %v5659_v56, 4  ;;  %v523_v17 = vrot.slane %v487_v47, 4 }
 0x136   : > { %v1131_v0 = vrot.slane %v1114_v54, 4  ;;  %v5678_v39 = vsel %vm499_vm1, %v1139_v59, %v5593_v33  ;;  %v526_v50 = vsel %vm499_vm1, %v487_v47, %v525_v62  ;;  %v1161_v19 = vrot.slane %v5664_v58, 4 }
 0x137   : > { %v534_v15 = vperm.slane %v526_v50, %v5534_v37  ;;  %v611_v24 = vrot.slane %v465_v45, 4  ;;  %v614_v26 = vsel %vm499_vm1, %v465_v45, %v613_v2  ;;  %v524_v28 = vsel %vm499_vm1, %v523_v17, %v5580_v16 }
 0x138   : > { %v5690_v33 = vperm.slane %v614_v26, %v5534_v37  ;;  %v5694_v30 = vsel %vm499_vm1, %v1131_v0, %v5602_v43  ;;  %v5697_v62 = vsel %vm499_vm1, %v1114_v54, %v1133_v61  ;;  %v530_v40 = vperm.slane %v524_v28, %v5534_v37 }
 0x139   : > { %v584_v41 = vsel %vm499_vm1, %v583_v48, %v534_v15  ;;  %v585_v34 = vrot.slane %v534_v15, 4  ;;  %v612_v2 = vsel %vm499_vm1, %v611_v24, %v5476_v21  ;;  %v5712_v61 = vsel %vm499_vm1, %v1135_v8, %v5590_v32 }
 0x13a   : > { %v590_v42 = vperm.slane %v584_v41, %v5556_v60  ;;  %v5706_v46 = vperm.slane %v612_v2, %v5534_v37  ;;  %v572_v45 = vsel %vm499_vm1, %v571_v44, %v530_v40  ;;  %v573_v48 = vrot.slane %v530_v40, 4 }
 0x13b   : > { %v990_v43 = vpop.permute.xlu1 %989  ;;  %v5708_v47 = vpop.permute.xlu2 %991  ;;  %v586_v54 = vsel %vm499_vm1, %v546_v25, %v585_v34  ;;  %v5718_v0 = vperm.slane %v572_v45, %v5556_v60 }
 0x13c   : > { %v966_v59 = vpop.permute.xlu0 %965  ;;  %v594_v17 = vperm.slane %v586_v54, %v5556_v60  ;;  %v603_v50 = vrot.slane %v590_v42, 4  ;;  %v5722_v15 = vsel %vm499_vm1, %v590_v42, %v605_v31  ;;  %v574_v32 = vsel %vm499_vm1, %v5638_v10, %v573_v48 }
 0x13d   : > { %v1147_v8 = vrot.slane %v966_v59, 4  ;;  %v1172_v25 = vsel %vm499_vm1, %v1171_v12, %v990_v43  ;;  %v5731_v24 = vperm.slane %v574_v32, %v5556_v60  ;;  %v5737_v26 = vsel %vm499_vm1, %v5718_v0, %v597_v14 }
 0x13e   : > { %v5741_v31 = vsel %vm499_vm1, %v603_v50, %v5631_v4  ;;  %v607_v40 = vrot.slane %v594_v17, 4  ;;  %v5748_v12 = vsel %vm499_vm1, %v594_v17, %v609_v35  ;;  %v1150_v45 = vsel %vm499_vm1, %v966_v59, %v1149_v63 }
 0x13f   : > { %v5755_v14 = vsel %vm499_vm1, %v5731_v24, %v601_v7  ;;  %v759_v34 = vrot.slane %v5748_v12, 4  ;;  %v1148_v2 = vsel %vm499_vm1, %v1147_v8, %v5456_v20  ;;  %v1158_v17 = vperm.slane %v1150_v45, %v5534_v37 }
 0x140   : > { %v5764_v35 = vsel %vm499_vm1, %v607_v40, %v5625_v1  ;;  %v1154_v7 = vperm.slane %v1148_v2, %v5534_v37  ;;  %v1173_v50 = vrot.slane %v990_v43, 4  ;;  %v1178_v63 = vperm.slane %v1172_v25, %v5534_v37 }
 0x141   : > { %v760_v54 = vsel %vm499_vm1, %v759_v34, %v5722_v15  ;;  %v1209_v45 = vrot.slane %v1158_v17, 4  ;;  %v1483_v1 = vrot.slane %v5712_v61, 4 }
 0x142   : > { %v5778_v40 = vperm.slane %v760_v54, %v5534_v37  ;;  %v1197_v20 = vrot.slane %v1154_v7, 4  ;;  %v1174_v2 = vsel %vm499_vm1, %v5613_v53, %v1173_v50  ;;  %v1221_v41 = vrot.slane %v1178_v63, 4 }
 0x143   : > { %v978_v32 = vpop.permute.xlu1 %977  ;;  %v5774_v8 = vpop.permute.xlu2 %1003  ;;  %v1182_v44 = vperm.slane %v1174_v2, %v5534_v37 }
 0x144   : > { %v1026_v59 = vpop.permute.xlu0 %1025  ;;  %v1159_v4 = vrot.slane %v978_v32, 4  ;;  %v1162_v53 = vsel %vm499_vm1, %v978_v32, %v1161_v19 }
 0x145   : > { %v1183_v49 = vrot.slane %v1026_v59, 4  ;;  %v1186_v43 = vsel %vm499_vm1, %v1026_v59, %v1185_v51  ;;  %v1233_v13 = vrot.slane %v1182_v44, 4 }
 0x146   : > { %v1194_v54 = vperm.slane %v1186_v43, %v5534_v37  ;;  %v1160_v59 = vsel %vm499_vm1, %v1159_v4, %v5664_v58  ;;  %v1170_v43 = vperm.slane %v1162_v53, %v5534_v37 }
 0x147   : > { %v1184_v25 = vsel %vm499_vm1, %v1183_v49, %v5569_v9  ;;  %v1166_v2 = vperm.slane %v1160_v59, %v5534_v37 }
 0x148   : > { %v1190_v16 = vperm.slane %v1184_v25, %v5534_v37  ;;  %v1231_v51 = vrot.slane %v1194_v54, 4  ;;  %v1234_v50 = vsel %vm499_vm1, %v1194_v54, %v1233_v13  ;;  %v1207_v28 = vrot.slane %v1170_v43, 4 }
 0x149   : > { %v1242_v58 = vperm.slane %v1234_v50, %v5556_v60  ;;  %v1195_v4 = vrot.slane %v1166_v2, 4  ;;  %v1198_v9 = vsel %vm499_vm1, %v1166_v2, %v1197_v20 }
 0x14a   : > { %v1219_v49 = vrot.slane %v1190_v16, 4  ;;  %v1222_v19 = vsel %vm499_vm1, %v1190_v16, %v1221_v41  ;;  %v1232_v32 = vsel %vm499_vm1, %v1231_v51, %v1182_v44  ;;  %v1210_v16 = vsel %vm499_vm1, %v1170_v43, %v1209_v45 }
 0x14b   : > { %v1230_v25 = vperm.slane %v1222_v19, %v5556_v60  ;;  %v1238_v48 = vperm.slane %v1232_v32, %v5556_v60  ;;  %v994_v59 = vpop.permute.xlu2 %993  ;;  %v5808_v53 = vpop.permute.xlu1 %458  ;;  %v1255_v51 = vrot.slane %v1242_v58, 4  ;;  %v1196_v50 = vsel %vm499_vm1, %v1195_v4, %v1154_v7 }
 0x14c   : > { %v1220_v42 = vsel %vm499_vm1, %v1219_v49, %v1178_v63  ;;  %v5813_v44 = vpop.permute.xlu0 %476  ;;  %v1206_v19 = vperm.slane %v1198_v9, %v5556_v60  ;;  %v1208_v32 = vsel %vm499_vm1, %v1207_v28, %v1158_v17  ;;  %v1218_v63 = vperm.slane %v1210_v16, %v5556_v60 }
 0x14d   : > { %8149 = vst [vmem:[#allocation13_spill] sm:$0xff] %v5813_v44  ;;  %v1226_v13 = vperm.slane %v1220_v42, %v5556_v60  ;;  %v1247_v41 = vrot.slane %v1230_v25, 4  ;;  %v1251_v54 = vrot.slane %v1238_v48, 4  ;;  %v1202_v20 = vperm.slane %v1196_v50, %v5556_v60 }
 0x14e   : > { %v1214_v45 = vperm.slane %v1208_v32, %v5556_v60  ;;  %v1249_v43 = vrot.slane %v1206_v19, 4  ;;  %v5827_v6 = vsel %vm499_vm1, %v1255_v51, %v1218_v63  ;;  %v1257_v7 = vrot.slane %v1218_v63, 4 }
 0x14f   : > { %v1243_v49 = vrot.slane %v1226_v13, 4  ;;  %v5824_v42 = vsel %vm499_vm1, %v1247_v41, %v1206_v19  ;;  %v1245_v9 = vrot.slane %v1202_v20, 4  ;;  %v1619_v4 = vrot.slane %v5827_v6, 4 }
 0x150   : > { %v5830_v28 = vsel %vm499_vm1, %v1251_v54, %v1214_v45  ;;  %v1253_v17 = vrot.slane %v1214_v45, 4  ;;  %v5834_v16 = vsel %vm499_vm1, %v1230_v25, %v1249_v43  ;;  %v5837_v50 = vsel %vm499_vm1, %v1242_v58, %v1257_v7 }
 0x151   : > { %v1397_v19 = vrot.slane %v994_v59, 4  ;;  %v1631_v32 = vrot.slane %v5837_v50, 4  ;;  %v625_v54 = vrot.slane %v5808_v53, 4  ;;  %v5846_v2 = vsel %vm499_vm1, %v1243_v49, %v1202_v20 }
 0x152   : > { %v5841_v51 = vsel %vm499_vm1, %v1238_v48, %v1253_v17  ;;  %v5862_v49 = vsel %vm499_vm1, %v1226_v13, %v1245_v9  ;;  %v1607_v9 = vrot.slane %v5834_v16, 4 }
 0x153   : > { %v1018_v63 = vpop.permute.xlu2 %1017  ;;  %v968_v45 = vpop.permute.xlu1 %967 }
 0x154   : > { %v5848_v25 = vpop.permute.xlu0 %955  ;;  %v1395_v43 = vrot.slane %v1018_v63, 4  ;;  %v1398_v58 = vsel %vm499_vm1, %v1018_v63, %v1397_v19  ;;  %v1259_v7 = vrot.slane %v968_v45, 4  ;;  %v1262_v48 = vsel %vm499_vm1, %v968_v45, %v1261_v11 }
 0x155   : > { %v1273_v17 = vrot.slane %v5848_v25, 4  ;;  %v5856_v41 = vperm.slane %v1398_v58, %v5534_v37  ;;  %v5859_v29 = vperm.slane %v1262_v48, %v5534_v37  ;;  %v1595_v63 = vrot.slane %v5824_v42, 4 }
 0x156   : > { %v1396_v20 = vsel %vm499_vm1, %v1395_v43, %v994_v59  ;;  %v1260_v19 = vsel %vm499_vm1, %v1259_v7, %v5484_v22  ;;  %v1620_v43 = vsel %vm499_vm1, %v1619_v4, %v5830_v28  ;;  %v1608_v11 = vsel %vm499_vm1, %v1607_v9, %v5862_v49 }
 0x157   : > { %8150 = vst [vmem:[#allocation14_spill] sm:$0xff] %v5856_v41  ;;  %v5870_v45 = vperm.slane %v1396_v20, %v5534_v37  ;;  %v5874_v48 = vperm.slane %v1260_v19, %v5534_v37  ;;  %v1596_v59 = vsel %vm499_vm1, %v1595_v63, %v5846_v2  ;;  %v1626_v58 = vperm.slane %v1620_v43, %v5534_v37 }
 0x158   : > { %v1602_v19 = vperm.slane %v1596_v59, %v5534_v37  ;;  %v1632_v63 = vsel %vm499_vm1, %v1631_v32, %v5841_v51  ;;  %v1484_v4 = vsel %vm499_vm1, %v1483_v1, %v5694_v30  ;;  %v5899_v7 = vsel %vm499_vm1, %v1495_v5, %v5697_v62 }
 0x159   : > { %8151 = vst [vmem:[#allocation15_spill] sm:$0xff] %v5870_v45  ;;  %v1614_v59 = vperm.slane %v1608_v11, %v5534_v37  ;;  %v1638_v43 = vperm.slane %v1632_v63, %v5534_v37  ;;  %v1669_v9 = vrot.slane %v1626_v58, 4  ;;  %v8152_v45 = vrot.slane %v5708_v47, 4 }
 0x15a   : > { %v1645_v22 = vrot.slane %v1602_v19, 4 }
 0x15b   : > { %v471_v20 = vpop.permute.xlu2 %470  ;;  %v980_v13 = vpop.permute.xlu1 %979  ;;  %v1643_v36 = vrot.slane %v1614_v59, 4  ;;  %v1667_v27 = vrot.slane %v1638_v43, 4  ;;  %v1670_v44 = vsel %vm499_vm1, %v1638_v43, %v1669_v9 }
 0x15c   : > { %v1016_v32 = vpop.permute.xlu0 %1015  ;;  %v623_v21 = vrot.slane %v471_v20, 4  ;;  %v626_v10 = vsel %vm499_vm1, %v471_v20, %v625_v54  ;;  %v1271_v34 = vrot.slane %v980_v13, 4  ;;  %v1274_v1 = vsel %vm499_vm1, %v980_v13, %v1273_v17 }
 0x15d   : > { %v1646_v5 = vsel %vm499_vm1, %v1614_v59, %v1645_v22  ;;  %v5911_v63 = vperm.slane %v1670_v44, %v5556_v60  ;;  %v1283_v41 = vrot.slane %v1016_v32, 4  ;;  %v1286_v54 = vsel %vm499_vm1, %v1016_v32, %v8152_v45 }
 0x15e   : > { %v5908_v11 = vperm.slane %v1646_v5, %v5556_v60  ;;  %v1644_v20 = vsel %vm499_vm1, %v1643_v36, %v1602_v19  ;;  %v1668_v17 = vsel %vm499_vm1, %v1667_v27, %v1626_v58  ;;  %v5919_v13 = vperm.slane %v1286_v54, %v5534_v37 }
 0x15f   : > { %v624_v22 = vsel %vm499_vm1, %v623_v21, %v5808_v53  ;;  %v5924_v59 = vperm.slane %v1644_v20, %v5556_v60  ;;  %v5927_v44 = vperm.slane %v1668_v17, %v5556_v60  ;;  %v1695_v43 = vrot.slane %v5911_v63, 4 }
 0x160   : > { %v1284_v36 = vsel %vm499_vm1, %v1283_v41, %v5708_v47  ;;  %v630_v58 = vperm.slane %v624_v22, %v5534_v37  ;;  %v634_v19 = vperm.slane %v626_v10, %v5534_v37  ;;  %v8153_v47 = vrot.slane %v5706_v46, 4 }
 0x161   : > { %v1691_v21 = vrot.slane %v5927_v44, 4  ;;  %v1693_v53 = vrot.slane %v5924_v59, 4  ;;  %v1696_v9 = vsel %vm499_vm1, %v1695_v43, %v5908_v11  ;;  %v5941_v32 = vperm.slane %v1284_v36, %v5534_v37 }
 0x162   : > { %4836 = vmatpush.xpose.msk.msrb.mxu0 %vm2915_vm2, %v1696_v9  ;;  %v659_v5 = vrot.slane %v630_v58, 4  ;;  %v662_v41 = vsel %vm499_vm1, %v630_v58, %v8153_v47  ;;  %v671_v54 = vrot.slane %v634_v19, 4  ;;  %v8154_v10 = vrot.slane %v5690_v33, 4 }
 0x163   : > { %v1692_v17 = vsel %vm499_vm1, %v1691_v21, %v5924_v59  ;;  %v5954_v43 = vperm.slane %v662_v41, %v5556_v60  ;;  %v1282_v21 = vperm.slane %v1274_v1, %v5534_v37  ;;  %v8157_v1 = vrot.slane %v5671_v3, 4 }
 0x164   : > { %v674_v20 = vsel %vm499_vm1, %v634_v19, %v8154_v10  ;;  %4830 = vmatpush.xpose.msk.msrb.mxu3 %vm2915_vm2, %v1692_v17  ;;  %v660_v58 = vsel %vm499_vm1, %v659_v5, %v5706_v46  ;;  %v672_v9 = vsel %vm499_vm1, %v671_v54, %v5690_v33  ;;  %v1272_v19 = vsel %vm499_vm1, %v1271_v34, %v5848_v25 }
 0x165   : > { %v5957_v36 = vperm.slane %v674_v20, %v5556_v60  ;;  %v5968_v47 = vperm.slane %v660_v58, %v5556_v60  ;;  %v5971_v41 = vperm.slane %v672_v9, %v5556_v60  ;;  %v1278_v46 = vperm.slane %v1272_v19, %v5534_v37 }
 0x166   : > { %v1319_v5 = vrot.slane %v1282_v21, 4  ;;  %v8155_v33 = vrot.slane %v5859_v29, 4  ;;  %v1490_v34 = vperm.slane %v1484_v4, %v5534_v37  ;;  %v1497_v58 = vrot.slane %v5697_v62, 4 }
 0x167   : > { %v1307_v9 = vrot.slane %v1278_v46, 4  ;;  %v8156_v20 = vrot.slane %v5874_v48, 4  ;;  %v1502_v4 = vperm.slane %v5899_v7, %v5534_v37  ;;  %v1508_v25 = vsel %vm499_vm1, %v8157_v1, %v5678_v39 }
 0x168   : > { %v1322_v54 = vsel %vm499_vm1, %v1282_v21, %v8155_v33  ;;  %v1320_v10 = vsel %vm499_vm1, %v1319_v5, %v5859_v29  ;;  %v1514_v29 = vperm.slane %v1508_v25, %v5534_v37  ;;  %v8158_v7 = vrot.slane %v5662_v57, 4 }
 0x169   : > { %v5983_v17 = vperm.slane %v1322_v54, %v5556_v60  ;;  %v1310_v19 = vsel %vm499_vm1, %v1278_v46, %v8156_v20  ;;  %v5997_v33 = vperm.slane %v1320_v10, %v5556_v60  ;;  %v1308_v20 = vsel %vm499_vm1, %v1307_v9, %v5874_v48 }
 0x16a   : > { %v5994_v21 = vperm.slane %v1310_v19, %v5556_v60  ;;  %v1520_v46 = vsel %vm499_vm1, %v8158_v7, %v5667_v18  ;;  %v1531_v5 = vrot.slane %v1502_v4, 4  ;;  %v6012_v10 = vperm.slane %v1308_v20, %v5556_v60 }
 0x16b   : > { %v1526_v1 = vperm.slane %v1520_v46, %v5534_v37  ;;  %v1533_v48 = vrot.slane %v1490_v34, 4  ;;  %v1557_v9 = vrot.slane %v1514_v29, 4  ;;  %v8159_v25 = vrot.slane %v5846_v2, 4 }
 0x16c   : > { %v1532_v22 = vsel %vm499_vm1, %v1531_v5, %v1490_v34  ;;  %v1357_v7 = vrot.slane %v6012_v10, 4  ;;  %v8160_v34 = vrot.slane %v5862_v49, 4  ;;  %v8161_v5 = vrot.slane %v5830_v28, 4 }
 0x16d   : > { %v1598_v27 = vsel %vm499_vm1, %v5824_v42, %v8159_v25  ;;  %v6024_v20 = vperm.slane %v1532_v22, %v5556_v60  ;;  %v1555_v45 = vrot.slane %v1526_v1, 4  ;;  %v1534_v54 = vsel %vm499_vm1, %v1502_v4, %v1533_v48 }
 0x16e   : > { %v1606_v19 = vperm.slane %v1598_v27, %v5534_v37  ;;  %v1558_v46 = vsel %vm499_vm1, %v1526_v1, %v1557_v9  ;;  %v1610_v2 = vsel %vm499_vm1, %v5834_v16, %v8160_v34  ;;  %v1622_v42 = vsel %vm499_vm1, %v5827_v6, %v8161_v5 }
 0x16f   : > { %v1556_v22 = vsel %vm499_vm1, %v1555_v45, %v1514_v29  ;;  %v6039_v25 = vperm.slane %v1534_v54, %v5556_v60  ;;  %v6042_v27 = vperm.slane %v1558_v46, %v5556_v60  ;;  %v1618_v4 = vperm.slane %v1610_v2, %v5534_v37 }
 0x170   : > { %v6046_v49 = vperm.slane %v1556_v22, %v5556_v60  ;;  %v1630_v16 = vperm.slane %v1622_v42, %v5534_v37  ;;  %v1633_v28 = vrot.slane %v5841_v51, 4  ;;  %v1657_v1 = vrot.slane %v1606_v19, 4 }
 0x171   : > { %v1583_v6 = vrot.slane %v6042_v27, 4  ;;  %v1694_v45 = vsel %vm499_vm1, %v5927_v44, %v1693_v53  ;;  %v1655_v54 = vrot.slane %v1618_v4, 4  ;;  %v8162_v29 = vrot.slane %v5718_v0, 4 }
 0x172   : > { %v1579_v9 = vrot.slane %v6046_v49, 4  ;;  %v1634_v51 = vsel %vm499_vm1, %v5837_v50, %v1633_v28  ;;  %v1658_v46 = vsel %vm499_vm1, %v1618_v4, %v1657_v1  ;;  %v1681_v34 = vrot.slane %v1630_v16, 4 }
 0x173   : > { %v6059_v48 = vsel %vm499_vm1, %v8162_v29, %v5618_v55  ;;  %v1584_v59 = vsel %vm499_vm1, %v1583_v6, %v6039_v25  ;;  %v1642_v44 = vperm.slane %v1634_v51, %v5534_v37  ;;  %v6069_v53 = vperm.slane %v1658_v46, %v5556_v60 }
 0x174   : > { %v1656_v0 = vsel %vm499_vm1, %v1655_v54, %v1606_v19  ;;  %v1580_v55 = vsel %vm499_vm1, %v1579_v9, %v6024_v20  ;;  %4837 = vmatpush.xpose.msk.msrb.mxu0 %vm2915_vm2, %v1584_v59  ;;  %v8163_v2 = vrot.slane %v5731_v24, 4  ;;  %v725_v42 = vrot.slane %v6059_v48, 4 }
 0x175   : > { %v6076_v50 = vperm.slane %v1656_v0, %v5556_v60  ;;  %4831 = vmatpush.xpose.msk.msrb.mxu3 %vm2915_vm2, %v1580_v55  ;;  %v1679_v22 = vrot.slane %v1642_v44, 4  ;;  %v1682_v19 = vsel %vm499_vm1, %v1642_v44, %v1681_v34  ;;  %v1705_v4 = vrot.slane %v6069_v53, 4 }
 0x176   : > { %v6082_v5 = vsel %vm499_vm1, %v8163_v2, %v5611_v52  ;;  %v6090_v1 = vperm.slane %v1682_v19, %v5556_v60  ;;  %v8164_v52 = vrot.slane %v5755_v14, 4  ;;  %v8165_v6 = vrot.slane %v5764_v35, 4 }
 0x177   : > { %v723_v28 = vrot.slane %v6082_v5, 4  ;;  %v795_v29 = vrot.slane %v5778_v40, 4  ;;  %v1680_v9 = vsel %vm499_vm1, %v1679_v22, %v1630_v16  ;;  %v8166_v22 = vrot.slane %v5694_v30, 4 }
 0x178   : > { %v736_v24 = vsel %vm499_vm1, %v8164_v52, %v5737_v26  ;;  %v748_v54 = vsel %vm499_vm1, %v8165_v6, %v5741_v31  ;;  %v1703_v34 = vrot.slane %v6090_v1, 4  ;;  %v1706_v59 = vsel %vm499_vm1, %v6090_v1, %v1705_v4 }
 0x179   : > { %4833 = vmatpush.xpose.msk.msra.mxu3 %vm2915_vm2, %v1694_v45  ;;  %v724_v51 = vsel %vm499_vm1, %v723_v28, %v6059_v48  ;;  %v742_v46 = vperm.slane %v736_v24, %v5534_v37  ;;  %v754_v45 = vperm.slane %v748_v54, %v5534_v37  ;;  %v6111_v44 = vperm.slane %v1680_v9, %v5556_v60 }
 0x17a   : > { %v730_v0 = vperm.slane %v724_v51, %v5534_v37  ;;  %4851 = vmatpush.xpose.msk.msrb.mxu1 %vm2915_vm2, %v1706_v59  ;;  %v1486_v19 = vsel %vm499_vm1, %v5712_v61, %v8166_v22  ;;  %v1498_v30 = vsel %vm499_vm1, %v5659_v56, %v1497_v58  ;;  %v8167_v61 = vrot.slane %v5678_v39, 4  ;;  %v6152_v58 = vpop.permute.xlu0 %957 }
 0x17b   : > { %v771_v16 = vrot.slane %v742_v46, 4  ;;  %v796_v55 = vsel %vm499_vm1, %v795_v29, %v754_v45  ;;  %v797_v2 = vrot.slane %v754_v45, 4  ;;  %v1699_v28 = vrot.slane %v6111_v44, 4 }
 0x17c   : > { %v6122_v4 = vperm.slane %v796_v55, %v5556_v60  ;;  %v773_v1 = vrot.slane %v730_v0, 4  ;;  %v1494_v52 = vperm.slane %v1486_v19, %v5534_v37  ;;  %v1510_v54 = vsel %vm499_vm1, %v5671_v3, %v8167_v61 }
 0x17d   : > { %v772_v24 = vsel %vm499_vm1, %v771_v16, %v730_v0  ;;  %v798_v6 = vsel %vm499_vm1, %v5778_v40, %v797_v2  ;;  %v1700_v29 = vsel %vm499_vm1, %v1699_v28, %v6076_v50  ;;  %v1506_v3 = vperm.slane %v1498_v30, %v5534_v37  ;;  %v6165_v28 = vpop.permute.xlu2 %494 }
 0x17e   : > { %v6139_v9 = vperm.slane %v772_v24, %v5556_v60  ;;  %v819_v51 = vrot.slane %v6122_v4, 4  ;;  %v774_v40 = vsel %vm499_vm1, %v742_v46, %v773_v1  ;;  %4842 = vmatpush.xpose.msk.msra.mxu0 %vm2915_vm2, %v1700_v29  ;;  %v6148_v56 = vperm.slane %v798_v6, %v5556_v60 }
 0x17f   : > { %v6145_v62 = vperm.slane %v774_v40, %v5556_v60  ;;  %v1518_v39 = vperm.slane %v1510_v54, %v5534_v37  ;;  %v8168_v46 = vrot.slane %v5667_v18, 4  ;;  %v1545_v16 = vrot.slane %v1494_v52, 4 }
 0x180   : > { %v820_v45 = vsel %vm499_vm1, %v819_v51, %v6139_v9  ;;  %v821_v59 = vrot.slane %v6139_v9, 4  ;;  %v823_v55 = vrot.slane %v6148_v56, 4  ;;  %v1581_v24 = vrot.slane %v6024_v20, 4 }
 0x181   : > { %v1522_v0 = vsel %vm499_vm1, %v5662_v57, %v8168_v46  ;;  %4832 = vmatmul.msk.f32.vlgmr.msrb.gmra.mxu3 %vm2915_vm2, %v820_v45  ;;  %v825_v2 = vrot.slane %v6145_v62, 4  ;;  %v1569_v19 = vrot.slane %v1518_v39, 4  ;;  %v1546_v1 = vsel %vm499_vm1, %v1506_v3, %v1545_v16  ;;  %v1028_v57 = vpop.permute.xlu1 %1027 }
 0x182   : > { %v1530_v22 = vperm.slane %v1522_v0, %v5534_v37  ;;  %v1543_v18 = vrot.slane %v1506_v3, 4  ;;  %v1385_v6 = vrot.slane %v6152_v58, 4  ;;  %v824_v30 = vsel %vm499_vm1, %v823_v55, %v6145_v62 }
 0x183   : > { %v6173_v61 = vperm.slane %v1546_v1, %v5556_v60  ;;  %4838 = vmatmul.msk.f32.vlgmr.msrb.gmra.mxu0 %vm2915_vm2, %v824_v30  ;;  %v1582_v20 = vsel %vm499_vm1, %v6046_v49, %v1581_v24  ;;  %v647_v3 = vrot.slane %v6165_v28, 4  ;;  %v1295_v16 = vrot.slane %v1028_v57, 4 }
 0x184   : > { %v1567_v54 = vrot.slane %v1530_v22, 4  ;;  %v1570_v29 = vsel %vm499_vm1, %v1530_v22, %v1569_v19  ;;  %v1544_v40 = vsel %vm499_vm1, %v1543_v18, %v1494_v52  ;;  %4834 = vmatpush.xpose.msk.msra.mxu3 %vm2915_vm2, %v1582_v20  ;;  %v8169_v22 = vrot.slane %v5774_v8, 4  ;;  %v6230_v20 = vpop.permute.xlu0 %981 }
 0x185   : > { %v6178_v51 = vperm.slane %v1570_v29, %v5556_v60  ;;  %v1593_v45 = vrot.slane %v6173_v61, 4  ;;  %v6187_v46 = vperm.slane %v1544_v40, %v5556_v60  ;;  %v8170_v52 = vrot.slane %v5908_v11, 4 }
 0x186   : > { %v1568_v0 = vsel %vm499_vm1, %v1567_v54, %v1518_v39  ;;  %v1298_v49 = vsel %vm499_vm1, %v1028_v57, %v8169_v22  ;;  %v1704_v1 = vsel %vm499_vm1, %v1703_v34, %v6069_v53  ;;  %v1296_v39 = vsel %vm499_vm1, %v1295_v16, %v5774_v8 }
 0x187   : > { %v6191_v55 = vperm.slane %v1568_v0, %v5556_v60  ;;  %v1698_v19 = vsel %vm499_vm1, %v5911_v63, %v8170_v52  ;;  %v1594_v24 = vsel %vm499_vm1, %v6178_v51, %v1593_v45  ;;  %v1306_v18 = vperm.slane %v1298_v49, %v5534_v37 }
 0x188   : > { %4839 = vmatpush.xpose.msk.msrb.mxu3 %vm2915_vm2, %v1698_v19  ;;  %v726_v11 = vsel %vm499_vm1, %v6082_v5, %v725_v42  ;;  %4852 = vmatpush.xpose.msk.msrb.mxu1 %vm2915_vm2, %v1594_v24  ;;  %v1302_v53 = vperm.slane %v1296_v39, %v5534_v37  ;;  %v8171_v8 = vrot.slane %v5737_v26, 4  ;;  %v8172_v48 = vrot.slane %v5919_v13, 4 }
 0x189   : > { %v1587_v63 = vrot.slane %v6191_v55, 4  ;;  %v6216_v34 = vperm.slane %v726_v11, %v5534_v37  ;;  %v1343_v30 = vrot.slane %v1306_v18, 4  ;;  %v8173_v42 = vrot.slane %v5741_v31, 4 }
 0x18a   : > { %v738_v57 = vsel %vm499_vm1, %v5755_v14, %v8171_v8  ;;  %v1346_v54 = vsel %vm499_vm1, %v1306_v18, %v8172_v48  ;;  %v1331_v40 = vrot.slane %v1302_v53, 4  ;;  %v8174_v14 = vrot.slane %v5941_v32, 4 }
 0x18b   : > { %v746_v5 = vperm.slane %v738_v57, %v5534_v37  ;;  %v750_v29 = vsel %vm499_vm1, %v5764_v35, %v8173_v42  ;;  %v1588_v26 = vsel %vm499_vm1, %v1587_v63, %v6187_v46  ;;  %v1354_v0 = vperm.slane %v1346_v54, %v5556_v60 }
 0x18c   : > { %v1334_v45 = vsel %vm499_vm1, %v1302_v53, %v8174_v14  ;;  %4843 = vmatpush.xpose.msk.msra.mxu0 %vm2915_vm2, %v1588_v26  ;;  %v1344_v31 = vsel %vm499_vm1, %v1343_v30, %v5919_v13  ;;  %v758_v35 = vperm.slane %v750_v29, %v5534_v37  ;;  %v8175_v22 = vrot.slane %v5722_v15, 4  ;;  %v970_v13 = vpop.permute.xlu1 %969 }
 0x18d   : > { %v6240_v16 = vperm.slane %v1334_v45, %v5556_v60  ;;  %v1332_v52 = vsel %vm499_vm1, %v1331_v40, %v5941_v32  ;;  %v1350_v19 = vperm.slane %v1344_v31, %v5556_v60  ;;  %v1367_v24 = vrot.slane %v1354_v0, 4 }
 0x18e   : > { %v762_v49 = vsel %vm499_vm1, %v5748_v12, %v8175_v22  ;;  %v8176_v39 = vrot.slane %v5983_v17, 4  ;;  %v6259_v11 = vperm.slane %v1332_v52, %v5556_v60  ;;  %v8177_v12 = vrot.slane %v5994_v21, 4 }
 0x18f   : > { %v1359_v15 = vrot.slane %v6240_v16, 4  ;;  %v1363_v53 = vrot.slane %v1350_v19, 4  ;;  %v8178_v8 = vrot.slane %v5997_v33, 4  ;;  %v770_v29 = vperm.slane %v762_v49, %v5534_v37 }
 0x190   : > { %v6255_v18 = vsel %vm499_vm1, %v1354_v0, %v8176_v39  ;;  %4848 = vmatpush.xpose.msk.msrb.mxu0 %vm2915_vm2, %v1704_v1  ;;  %v6266_v32 = vsel %vm499_vm1, %v6240_v16, %v8177_v12  ;;  %v6276_v1 = vsel %vm499_vm1, %v1367_v24, %v5983_v17  ;;  %v1355_v48 = vrot.slane %v6259_v11, 4  ;;  %v1030_v12 = vpop.permute.xlu0 %1029 }
 0x191   : > { %v1743_v63 = vrot.slane %v6255_v18, 4  ;;  %v6272_v57 = vsel %vm499_vm1, %v1350_v19, %v8178_v8  ;;  %v1719_v30 = vrot.slane %v6266_v32, 4  ;;  %v1731_v54 = vrot.slane %v6276_v1, 4 }
 0x192   : > { %v1745_v42 = vrot.slane %v6272_v57, 4  ;;  %v6285_v26 = vsel %vm499_vm1, %v1363_v53, %v5997_v33  ;;  %v785_v40 = vrot.slane %v6216_v34, 4  ;;  %v809_v14 = vrot.slane %v758_v35, 4 }
 0x193   : > { %v1733_v17 = vrot.slane %v6285_v26, 4  ;;  %v807_v0 = vrot.slane %v770_v29, 4  ;;  %v1585_v31 = vrot.slane %v6039_v25, 4  ;;  %v1591_v33 = vrot.slane %v6178_v51, 4 }
 0x194   : > { %v1746_v45 = vsel %vm499_vm1, %v6255_v18, %v1745_v42  ;;  %v786_v49 = vsel %vm499_vm1, %v746_v5, %v785_v40  ;;  %v810_v52 = vsel %vm499_vm1, %v770_v29, %v809_v14  ;;  %v822_v25 = vsel %vm499_vm1, %v6122_v4, %v821_v59 }
 0x195   : > { %v6293_v22 = vperm.slane %v1746_v45, %v5534_v37  ;;  %v794_v19 = vperm.slane %v786_v49, %v5556_v60  ;;  %v818_v24 = vperm.slane %v810_v52, %v5556_v60  ;;  %v1586_v39 = vsel %vm499_vm1, %v6042_v27, %v1585_v31  ;;  %4835 = vmatmul.msk.f32.vlgmr.msra.gmra.mxu3 %vm2915_vm2, %v822_v25 }
 0x196   : > { %4840 = vmatpush.xpose.msk.msrb.mxu3 %vm2915_vm2, %v1586_v39  ;;  %v1592_v53 = vsel %vm499_vm1, %v1591_v33, %v6173_v61  ;;  %v783_v8 = vrot.slane %v746_v5, 4  ;;  %v808_v51 = vsel %vm499_vm1, %v807_v0, %v758_v35  ;;  %v1701_v42 = vrot.slane %v6076_v50, 4  ;;  %v1006_v5 = vpop.permute.xlu1 %1005 }
 0x197   : > { %v831_v29 = vrot.slane %v818_v24, 4  ;;  %v833_v40 = vrot.slane %v794_v19, 4  ;;  %4849 = vmatpush.xpose.msk.msrb.mxu0 %vm2915_vm2, %v1592_v53  ;;  %v814_v27 = vperm.slane %v808_v51, %v5556_v60  ;;  %v1383_v4 = vrot.slane %v6230_v20, 4 }
 0x198   : > { %v784_v9 = vsel %vm499_vm1, %v783_v8, %v6216_v34  ;;  %v1702_v59 = vsel %vm499_vm1, %v6111_v44, %v1701_v42  ;;  %v1386_v50 = vsel %vm499_vm1, %v6230_v20, %v1385_v6  ;;  %v1371_v61 = vrot.slane %v970_v13, 4 }
 0x199   : > { %v834_v35 = vsel %vm499_vm1, %v818_v24, %v833_v40  ;;  %v790_v14 = vperm.slane %v784_v9, %v5556_v60  ;;  %v827_v45 = vrot.slane %v814_v27, 4  ;;  %v1384_v34 = vsel %vm499_vm1, %v1383_v4, %v6152_v58 }
 0x19a   : > { %4845 = vmatpush.xpose.msk.msra.mxu3 %vm2915_vm2, %v1702_v59  ;;  %4853 = vmatmul.msk.f32.vlgmr.msrb.gmra.mxu1 %vm2915_vm2, %v834_v35  ;;  %v1390_v44 = vperm.slane %v1384_v34, %v5534_v37  ;;  %v1394_v0 = vperm.slane %v1386_v50, %v5534_v37  ;;  %v1372_v6 = vsel %vm499_vm1, %v1371_v61, %v5498_v23  ;;  %v8179_v20 = vrot.slane %v5498_v23, 4 }
 0x19b   : > { %v828_v49 = vsel %vm499_vm1, %v827_v45, %v790_v14  ;;  %v1378_v52 = vperm.slane %v1372_v6, %v5534_v37  ;;  %v1589_v58 = vrot.slane %v6187_v46, 4  ;;  %v826_v25 = vsel %vm499_vm1, %v6148_v56, %v825_v2 }
 0x19c   : > { %v1374_v31 = vsel %vm499_vm1, %v970_v13, %v8179_v20  ;;  %4844 = vmatmul.msk.f32.vlgmr.msra.gmra.mxu0 %vm2915_vm2, %v828_v49  ;;  %v1419_v24 = vrot.slane %v1390_v44, 4  ;;  %v1431_v39 = vrot.slane %v1394_v0, 4  ;;  %v832_v8 = vsel %vm499_vm1, %v831_v29, %v794_v19  ;;  %v483_v19 = vpop.permute.xlu0 %482 }
 0x19d   : > { %v1382_v33 = vperm.slane %v1374_v31, %v5534_v37  ;;  %v1421_v23 = vrot.slane %v1378_v52, 4  ;;  %v1590_v13 = vsel %vm499_vm1, %v6191_v55, %v1589_v58  ;;  %v1407_v62 = vrot.slane %v1030_v12, 4  ;;  %4841 = vmatmul.msk.f32.vlgmr.msrb.gmra.mxu3 %vm2915_vm2, %v826_v25  ;;  %v8180_v31 = vld [vmem:[#allocation15_spill] sm:$0xff] }
 0x19e   : > { %v1420_v51 = vsel %vm499_vm1, %v1419_v24, %v1378_v52  ;;  %4846 = vmatpush.xpose.msk.msra.mxu3 %vm2915_vm2, %v1590_v13  ;;  %v1409_v42 = vrot.slane %v1006_v5, 4  ;;  %v489_v6 = vpop.permute.xlu1 %488  ;;  %v8181_v49 = vrot.slane %v8180_v31, 4  ;;  %v8182_v52 = vld [vmem:[#allocation14_spill] sm:$0xff] }
 0x19f   : > { %v1433_v53 = vrot.slane %v1382_v33, 4  ;;  %v1432_v46 = vsel %vm499_vm1, %v1431_v39, %v1382_v33  ;;  %v1422_v56 = vsel %vm499_vm1, %v1390_v44, %v1421_v23  ;;  %v1426_v2 = vperm.slane %v1420_v51, %v5556_v60 }
 0x1a0   : > { %v1438_v55 = vperm.slane %v1432_v46, %v5556_v60  ;;  %v1430_v29 = vperm.slane %v1422_v56, %v5556_v60  ;;  %v1408_v9 = vsel %vm499_vm1, %v1407_v62, %v1006_v5  ;;  %v1410_v38 = vsel %vm499_vm1, %v1030_v12, %v1409_v42 }
 0x1a1   : > { %v1434_v40 = vsel %vm499_vm1, %v1394_v0, %v1433_v53  ;;  %v1469_v59 = vrot.slane %v1426_v2, 4  ;;  %v1414_v61 = vperm.slane %v1408_v9, %v5534_v37  ;;  %v1418_v35 = vperm.slane %v1410_v38, %v5534_v37 }
 0x1a2   : > { %v1442_v4 = vperm.slane %v1434_v40, %v5556_v60  ;;  %v1477_v50 = vrot.slane %v1438_v55, 4  ;;  %v1473_v45 = vrot.slane %v1430_v29, 4  ;;  %v829_v44 = vrot.slane %v790_v14, 4 }
 0x1a3   : > { %v648_v0 = vsel %vm499_vm1, %v647_v3, %v483_v19  ;;  %v1443_v20 = vrot.slane %v1414_v61, 4  ;;  %v1446_v5 = vsel %vm499_vm1, %v1414_v61, %v8181_v49  ;;  %v1455_v12 = vrot.slane %v1418_v35, 4 }
 0x1a4   : > { %v1481_v34 = vrot.slane %v1442_v4, 4  ;;  %v8183_v33 = vrot.slane %v8182_v52, 4  ;;  %4850 = vmatmul.msk.f32.vlgmr.msrb.gmra.mxu0 %vm2915_vm2, %v832_v8  ;;  %v1454_v24 = vperm.slane %v1446_v5, %v5556_v60  ;;  %v830_v39 = vsel %vm499_vm1, %v814_v27, %v829_v44 }
 0x1a5   : > { %v649_v3 = vrot.slane %v483_v19, 4  ;;  %v1444_v25 = vsel %vm499_vm1, %v1443_v20, %v8180_v31  ;;  %v1456_v23 = vsel %vm499_vm1, %v1455_v12, %v8182_v52  ;;  %v654_v53 = vperm.slane %v648_v0, %v5534_v37  ;;  %4847 = vmatmul.msk.f32.vlgmr.msra.gmra.mxu3 %vm2915_vm2, %v830_v39  ;;  %v8184_v31 = vld [vmem:[#allocation13_spill] sm:$0xff] }
 0x1a6   : > { %v1458_v58 = vsel %vm499_vm1, %v1418_v35, %v8183_v33  ;;  %v635_v13 = vrot.slane %v489_v6, 4  ;;  %v1450_v51 = vperm.slane %v1444_v25, %v5556_v60  ;;  %v1462_v8 = vperm.slane %v1456_v23, %v5556_v60 }
 0x1a7   : > { %v1466_v14 = vperm.slane %v1458_v58, %v5556_v60  ;;  %v1471_v46 = vrot.slane %v1454_v24, 4  ;;  %v1474_v62 = vsel %vm499_vm1, %v1454_v24, %v1473_v45  ;;  %v650_v40 = vsel %vm499_vm1, %v6165_v28, %v649_v3 }
 0x1a8   : > { %v1831_v56 = vrot.slane %v1474_v62, 4  ;;  %v1467_v19 = vrot.slane %v1450_v51, 4  ;;  %v1470_v9 = vsel %vm499_vm1, %v1450_v51, %v1469_v59  ;;  %v1475_v61 = vrot.slane %v1462_v8, 4 }
 0x1a9   : > { %v1479_v42 = vrot.slane %v1466_v14, 4  ;;  %v6388_v27 = vsel %vm499_vm1, %v1466_v14, %v1481_v34  ;;  %v6395_v38 = vsel %vm499_vm1, %v1471_v46, %v1430_v29  ;;  %v1833_v34 = vrot.slane %v1470_v9, 4 }
 0x1aa   : > { %v1819_v45 = vrot.slane %v6395_v38, 4  ;;  %v1855_v44 = vrot.slane %v6388_v27, 4  ;;  %v658_v0 = vperm.slane %v650_v40, %v5534_v37  ;;  %v683_v20 = vrot.slane %v654_v53, 4 }
 0x1ab   : > { %v6398_v35 = vsel %vm499_vm1, %v1479_v42, %v1442_v4  ;;  %v636_v28 = vsel %vm499_vm1, %v635_v13, %v8184_v31  ;;  %v8185_v59 = vrot.slane %v8184_v31, 4  ;;  %v1834_v49 = vsel %vm499_vm1, %v1474_v62, %v1833_v34 }
 0x1ac   : > { %v642_v4 = vperm.slane %v636_v28, %v5534_v37  ;;  %v6412_v12 = vsel %vm499_vm1, %v1467_v19, %v1426_v2  ;;  %v6415_v52 = vperm.slane %v1834_v49, %v5534_v37  ;;  %v695_v33 = vrot.slane %v658_v0, 4 }
 0x1ad   : > { %v638_v29 = vsel %vm499_vm1, %v489_v6, %v8185_v59  ;;  %v6418_v58 = vsel %vm499_vm1, %v1475_v61, %v1438_v55  ;;  %v6421_v24 = vsel %vm499_vm1, %v1462_v8, %v1477_v50  ;;  %v1820_v3 = vsel %vm499_vm1, %v1819_v45, %v6412_v12 }
 0x1ae   : > { %v646_v5 = vperm.slane %v638_v29, %v5534_v37  ;;  %v684_v6 = vsel %vm499_vm1, %v683_v20, %v642_v4  ;;  %v685_v14 = vrot.slane %v642_v4, 4  ;;  %v1821_v23 = vrot.slane %v6412_v12, 4 }
 0x1af   : > { %v6427_v2 = vperm.slane %v684_v6, %v5556_v60  ;;  %v1826_v55 = vperm.slane %v1820_v3, %v5534_v37  ;;  %v1832_v8 = vsel %vm499_vm1, %v1831_v56, %v1470_v9  ;;  %v8186_v40 = vrot.slane %v5968_v47, 4 }
 0x1b0   : > { %v697_v39 = vrot.slane %v646_v5, 4  ;;  %v696_v25 = vsel %vm499_vm1, %v695_v33, %v646_v5  ;;  %v686_v13 = vsel %vm499_vm1, %v654_v53, %v685_v14  ;;  %v8187_v61 = vrot.slane %v5971_v41, 4 }
 0x1b1   : > { %v702_v51 = vperm.slane %v696_v25, %v5556_v60  ;;  %v6437_v46 = vperm.slane %v686_v13, %v5556_v60  ;;  %v707_v42 = vrot.slane %v6427_v2, 4  ;;  %v6445_v19 = vsel %vm499_vm1, %v6427_v2, %v8186_v40 }
 0x1b2   : > { %v698_v50 = vsel %vm499_vm1, %v658_v0, %v697_v39  ;;  %v849_v56 = vrot.slane %v6445_v19, 4  ;;  %v1838_v9 = vperm.slane %v1832_v8, %v5534_v37  ;;  %v8188_v0 = vrot.slane %v5954_v43, 4 }
 0x1b3   : > { %v706_v62 = vperm.slane %v698_v50, %v5556_v60  ;;  %v715_v53 = vrot.slane %v702_v51, 4  ;;  %v718_v45 = vsel %vm499_vm1, %v702_v51, %v8187_v61  ;;  %v711_v34 = vrot.slane %v6437_v46, 4 }
 0x1b4   : > { %v6457_v20 = vsel %vm499_vm1, %v6437_v46, %v8188_v0  ;;  %v8189_v28 = vrot.slane %v5957_v36, 4  ;;  %v873_v5 = vrot.slane %v718_v45, 4  ;;  %v1843_v14 = vrot.slane %v6398_v35, 4 }
 0x1b5   : > { %v719_v31 = vrot.slane %v706_v62, 4  ;;  %v6464_v29 = vsel %vm499_vm1, %v715_v53, %v5971_v41  ;;  %v847_v49 = vrot.slane %v6457_v20, 4  ;;  %v1845_v39 = vrot.slane %v6418_v58, 4 }
 0x1b6   : > { %v722_v59 = vsel %vm499_vm1, %v706_v62, %v8189_v28  ;;  %v861_v6 = vrot.slane %v6464_v29, 4  ;;  %v1856_v13 = vsel %vm499_vm1, %v1855_v44, %v6421_v24  ;;  %v1844_v51 = vsel %vm499_vm1, %v1843_v14, %v6418_v58 }
 0x1b7   : > { %v871_v4 = vrot.slane %v722_v59, 4  ;;  %v6469_v33 = vsel %vm499_vm1, %v719_v31, %v5957_v36  ;;  %v874_v41 = vsel %vm499_vm1, %v722_v59, %v873_v5  ;;  %v1857_v8 = vrot.slane %v6421_v24, 4 }
 0x1b8   : > { %v859_v3 = vrot.slane %v6469_v33, 4  ;;  %v6483_v36 = vperm.slane %v874_v41, %v5534_v37  ;;  %v1850_v62 = vperm.slane %v1844_v51, %v5534_v37  ;;  %v1862_v40 = vperm.slane %v1856_v13, %v5534_v37 }
 0x1b9   : > { %v872_v25 = vsel %vm499_vm1, %v871_v4, %v718_v45  ;;  %v1867_v53 = vrot.slane %v1838_v9, 4  ;;  %v1869_v61 = vrot.slane %v1826_v55, 4  ;;  %v6494_v44 = vsel %vm499_vm1, %v1355_v48, %v6012_v10 }
 0x1ba   : > { %v6480_v50 = vperm.slane %v872_v25, %v5534_v37  ;;  %v6500_v45 = vsel %vm499_vm1, %v6259_v11, %v1357_v7  ;;  %v6506_v58 = vsel %vm499_vm1, %v1359_v15, %v5994_v21  ;;  %v1732_v24 = vsel %vm499_vm1, %v1731_v54, %v6285_v26 }
 0x1bb   : > { %v1868_v48 = vsel %vm499_vm1, %v1867_v53, %v1826_v55  ;;  %v1891_v0 = vrot.slane %v1862_v40, 4  ;;  %v1893_v31 = vrot.slane %v1850_v62, 4  ;;  %v1870_v10 = vsel %vm499_vm1, %v1838_v9, %v1869_v61 }
 0x1bc   : > { %v1874_v7 = vperm.slane %v1868_v48, %v5556_v60  ;;  %v1878_v11 = vperm.slane %v1870_v10, %v5556_v60  ;;  %v1707_v16 = vrot.slane %v6506_v58, 4  ;;  %v1709_v21 = vrot.slane %v6494_v44, 4 }
 0x1bd   : > { %v1892_v15 = vsel %vm499_vm1, %v1891_v0, %v1850_v62  ;;  %v1894_v28 = vsel %vm499_vm1, %v1862_v40, %v1893_v31  ;;  %v1720_v54 = vsel %vm499_vm1, %v1719_v30, %v6500_v45  ;;  %v1721_v55 = vrot.slane %v6500_v45, 4 }
 0x1be   : > { %v1898_v9 = vperm.slane %v1892_v15, %v5556_v60  ;;  %v1917_v59 = vrot.slane %v1874_v7, 4  ;;  %v1902_v4 = vperm.slane %v1894_v28, %v5556_v60  ;;  %v1921_v5 = vrot.slane %v1878_v11, 4 }
 0x1bf   : > { %v1708_v14 = vsel %vm499_vm1, %v1707_v16, %v6494_v44  ;;  %v1726_v25 = vperm.slane %v1720_v54, %v5534_v37  ;;  %v1738_v41 = vperm.slane %v1732_v24, %v5534_v37  ;;  %v1744_v30 = vsel %vm499_vm1, %v1743_v63, %v6272_v57 }
 0x1c0   : > { %v1915_v13 = vrot.slane %v1898_v9, 4  ;;  %v1918_v51 = vsel %vm499_vm1, %v1898_v9, %v1917_v59  ;;  %v1919_v62 = vrot.slane %v1902_v4, 4  ;;  %v1922_v40 = vsel %vm499_vm1, %v1902_v4, %v1921_v5 }
 0x1c1   : > { %4857 = vmatpush.xpose.msk.msrb.mxu3 %vm2915_vm2, %v1918_v51  ;;  %4863 = vmatpush.xpose.msk.msra.mxu1 %vm2915_vm2, %v1922_v40  ;;  %v1714_v53 = vperm.slane %v1708_v14, %v5534_v37  ;;  %v1750_v61 = vperm.slane %v1744_v30, %v5534_v37  ;;  %v1755_v24 = vrot.slane %v1726_v25, 4  ;;  %v1822_v18 = vsel %vm499_vm1, %v6395_v38, %v1821_v23 }
 0x1c2   : > { %v1916_v63 = vsel %vm499_vm1, %v1915_v13, %v1874_v7  ;;  %v1920_v57 = vsel %vm499_vm1, %v1919_v62, %v1878_v11  ;;  %v1830_v48 = vperm.slane %v1822_v18, %v5534_v37  ;;  %v1846_v0 = vsel %vm499_vm1, %v6398_v35, %v1845_v39 }
 0x1c3   : > { %4854 = vmatpush.xpose.msk.msrb.mxu2 %vm2915_vm2, %v1916_v63  ;;  %4860 = vmatpush.xpose.msk.msra.mxu0 %vm2915_vm2, %v1920_v57  ;;  %v1756_v31 = vsel %vm499_vm1, %v1755_v24, %v1714_v53  ;;  %v1779_v10 = vrot.slane %v1750_v61, 4  ;;  %v1854_v12 = vperm.slane %v1846_v0, %v5534_v37  ;;  %v1858_v38 = vsel %vm499_vm1, %v6388_v27, %v1857_v8 }
 0x1c4   : > { %v1762_v23 = vperm.slane %v1756_v31, %v5556_v60  ;;  %v1866_v7 = vperm.slane %v1858_v38, %v5534_v37  ;;  %v1879_v11 = vrot.slane %v6415_v52, 4  ;;  %v1757_v16 = vrot.slane %v1714_v53, 4 }
 0x1c5   : > { %v1780_v35 = vsel %vm499_vm1, %v1779_v10, %v1738_v41  ;;  %v1781_v39 = vrot.slane %v1738_v41, 4  ;;  %v1881_v15 = vrot.slane %v1830_v48, 4  ;;  %v1905_v28 = vrot.slane %v1854_v12, 4 }
 0x1c6   : > { %v1786_v54 = vperm.slane %v1780_v35, %v5556_v60  ;;  %v1805_v9 = vrot.slane %v1762_v23, 4  ;;  %v1880_v59 = vsel %vm499_vm1, %v1879_v11, %v1830_v48  ;;  %v1903_v4 = vrot.slane %v1866_v7, 4 }
 0x1c7   : > { %v1886_v27 = vperm.slane %v1880_v59, %v5556_v60  ;;  %v1758_v8 = vsel %vm499_vm1, %v1726_v25, %v1757_v16  ;;  %v1782_v5 = vsel %vm499_vm1, %v1750_v61, %v1781_v39  ;;  %v1882_v14 = vsel %vm499_vm1, %v6415_v52, %v1881_v15 }
 0x1c8   : > { %v1803_v30 = vrot.slane %v1786_v54, 4  ;;  %v1806_v41 = vsel %vm499_vm1, %v1786_v54, %v1805_v9  ;;  %v1904_v13 = vsel %vm499_vm1, %v1903_v4, %v1854_v12  ;;  %v1766_v51 = vperm.slane %v1758_v8, %v5556_v60 }
 0x1c9   : > { %4858 = vmatpush.xpose.msk.msrb.mxu3 %vm2915_vm2, %v1806_v41  ;;  %v1910_v62 = vperm.slane %v1904_v13, %v5556_v60  ;;  %v1925_v40 = vrot.slane %v1886_v27, 4  ;;  %v1790_v53 = vperm.slane %v1782_v5, %v5556_v60  ;;  %v1890_v25 = vperm.slane %v1882_v14, %v5556_v60  ;;  %v6638_v14 = vpop.permute.xlu0 %4986 }
 0x1ca   : > { %v1804_v61 = vsel %vm499_vm1, %v1803_v30, %v1762_v23  ;;  %v1809_v24 = vrot.slane %v1766_v51, 4  ;;  %v1906_v52 = vsel %vm499_vm1, %v1866_v7, %v1905_v28  ;;  %v6580_v18 = vsel %vm499_vm1, %v707_v42, %v5968_v47 }
 0x1cb   : > { %4855 = vmatpush.xpose.msk.msrb.mxu2 %vm2915_vm2, %v1804_v61  ;;  %v1923_v63 = vrot.slane %v1910_v62, 4  ;;  %v1926_v57 = vsel %vm499_vm1, %v1910_v62, %v1925_v40  ;;  %v1807_v48 = vrot.slane %v1790_v53, 4  ;;  %v1914_v0 = vperm.slane %v1906_v52, %v5556_v60 }
 0x1cc   : > { %v1810_v31 = vsel %vm499_vm1, %v1790_v53, %v1809_v24  ;;  %v1929_v10 = vrot.slane %v1890_v25, 4  ;;  %v712_v2 = vsel %vm499_vm1, %v711_v34, %v5954_v43  ;;  %v837_v47 = vrot.slane %v6580_v18, 4 }
 0x1cd   : > { %4869 = vmatpush.xpose.msk.msra.mxu3 %vm2915_vm2, %v1926_v57  ;;  %v1924_v42 = vsel %vm499_vm1, %v1923_v63, %v1886_v27  ;;  %v1808_v12 = vsel %vm499_vm1, %v1807_v48, %v1766_v51  ;;  %4864 = vmatpush.xpose.msk.msra.mxu1 %vm2915_vm2, %v1810_v31  ;;  %v1927_v38 = vrot.slane %v1914_v0, 4  ;;  %v835_v23 = vrot.slane %v712_v2, 4 }
 0x1ce   : > { %4861 = vmatpush.xpose.msk.msra.mxu0 %vm2915_vm2, %v1808_v12  ;;  %v1930_v7 = vsel %vm499_vm1, %v1914_v0, %v1929_v10  ;;  %v848_v43 = vsel %vm499_vm1, %v847_v49, %v6445_v19  ;;  %v860_v46 = vsel %vm499_vm1, %v859_v3, %v6464_v29  ;;  %v907_v34 = vrot.slane %v6480_v50, 4 }
 0x1cf   : > { %4866 = vmatpush.xpose.msk.msra.mxu2 %vm2915_vm2, %v1924_v42  ;;  %v1928_v11 = vsel %vm499_vm1, %v1927_v38, %v1890_v25  ;;  %v836_v16 = vsel %vm499_vm1, %v835_v23, %v6580_v18  ;;  %v854_v35 = vperm.slane %v848_v43, %v5534_v37  ;;  %v866_v39 = vperm.slane %v860_v46, %v5534_v37 }
 0x1d0   : > { %v842_v49 = vperm.slane %v836_v16, %v5534_v37  ;;  %v1710_v3 = vsel %vm499_vm1, %v6506_v58, %v1709_v21  ;;  %v1722_v15 = vsel %vm499_vm1, %v6266_v32, %v1721_v55  ;;  %v1734_v28 = vsel %vm499_vm1, %v6276_v1, %v1733_v17 }
 0x1d1   : > { %4875 = vmatpush.xpose.msk.msrb.mxu1 %vm2915_vm2, %v1930_v7  ;;  %v883_v54 = vrot.slane %v854_v35, 4  ;;  %v908_v9 = vsel %vm499_vm1, %v907_v34, %v866_v39  ;;  %v909_v59 = vrot.slane %v866_v39, 4  ;;  %v1718_v4 = vperm.slane %v1710_v3, %v5534_v37 }
 0x1d2   : > { %4872 = vmatpush.xpose.msk.msrb.mxu0 %vm2915_vm2, %v1928_v11  ;;  %v885_v44 = vrot.slane %v842_v49, 4  ;;  %v914_v27 = vperm.slane %v908_v9, %v5556_v60  ;;  %v1730_v58 = vperm.slane %v1722_v15, %v5534_v37  ;;  %v1742_v45 = vperm.slane %v1734_v28, %v5534_v37 }
 0x1d3   : > { %v884_v32 = vsel %vm499_vm1, %v883_v54, %v842_v49  ;;  %v1791_v26 = vrot.slane %v6293_v22, 4  ;;  %v910_v1 = vsel %vm499_vm1, %v6480_v50, %v909_v59  ;;  %v1769_v17 = vrot.slane %v1718_v4, 4 }
 0x1d4   : > { %v890_v21 = vperm.slane %v884_v32, %v5556_v60  ;;  %v931_v55 = vrot.slane %v914_v27, 4  ;;  %v1767_v8 = vrot.slane %v1730_v58, 4  ;;  %v886_v5 = vsel %vm499_vm1, %v854_v35, %v885_v44  ;;  %v5002_v35 = vpop.permute.xlu0 %5001 }
 0x1d5   : > { %v1792_v30 = vsel %vm499_vm1, %v1791_v26, %v1742_v45  ;;  %v894_v41 = vperm.slane %v886_v5, %v5556_v60  ;;  %v918_v13 = vperm.slane %v910_v1, %v5556_v60  ;;  %v1770_v51 = vsel %vm499_vm1, %v1730_v58, %v1769_v17 }
 0x1d6   : > { %v932_v62 = vsel %vm499_vm1, %v931_v55, %v890_v21  ;;  %v933_v50 = vrot.slane %v890_v21, 4  ;;  %v1768_v40 = vsel %vm499_vm1, %v1767_v8, %v1718_v4  ;;  %v1798_v53 = vperm.slane %v1792_v30, %v5556_v60  ;;  %v8190_v55 = vld [vmem:[#allocation11_spill] sm:$0xff] }
 0x1d7   : > { %4856 = vmatmul.msk.f32.vlgmr.msrb.gmra.mxu2 %vm2915_vm2, %v932_v62  ;;  %v1774_v25 = vperm.slane %v1768_v40, %v5556_v60  ;;  %v935_v61 = vrot.slane %v918_v13, 4  ;;  %v1778_v24 = vperm.slane %v1770_v51, %v5556_v60  ;;  %v1793_v52 = vrot.slane %v1742_v45, 4 }
 0x1d8   : > { %v1811_v18 = vrot.slane %v1798_v53, 4  ;;  %v934_v63 = vsel %vm499_vm1, %v914_v27, %v933_v50  ;;  %v937_v57 = vrot.slane %v894_v41, 4  ;;  %v838_v48 = vsel %vm499_vm1, %v712_v2, %v837_v47 }
 0x1d9   : > { %v1813_v0 = vrot.slane %v1774_v25, 4  ;;  %4859 = vmatmul.msk.f32.vlgmr.msrb.gmra.mxu3 %vm2915_vm2, %v934_v63  ;;  %v936_v31 = vsel %vm499_vm1, %v935_v61, %v894_v41  ;;  %v1794_v10 = vsel %vm499_vm1, %v6293_v22, %v1793_v52  ;;  %v1817_v42 = vrot.slane %v1778_v24, 4  ;;  %v4992_v41 = vpop.permute.xlu1 %4991 }
 0x1da   : > { %v1812_v12 = vsel %vm499_vm1, %v1811_v18, %v1774_v25  ;;  %4862 = vmatmul.msk.f32.vlgmr.msra.gmra.mxu0 %vm2915_vm2, %v936_v31  ;;  %v1802_v38 = vperm.slane %v1794_v10, %v5556_v60  ;;  %v938_v23 = vsel %vm499_vm1, %v918_v13, %v937_v57  ;;  %v846_v7 = vperm.slane %v838_v48, %v5534_v37 }
 0x1db   : > { %4867 = vmatpush.xpose.msk.msra.mxu2 %vm2915_vm2, %v1812_v12  ;;  %v1814_v2 = vsel %vm499_vm1, %v1798_v53, %v1813_v0  ;;  %4865 = vmatmul.msk.f32.vlgmr.msra.gmra.mxu1 %vm2915_vm2, %v938_v23  ;;  %v850_v22 = vsel %vm499_vm1, %v6457_v20, %v849_v56  ;;  %v862_v47 = vsel %vm499_vm1, %v6469_v33, %v861_v6  ;;  %v919_v43 = vrot.slane %v6483_v36, 4  ;;  %v8191_v53 = vld [vmem:[#allocation12_spill] sm:$0xff] }
 0x1dc   : > { %4870 = vmatpush.xpose.msk.msra.mxu3 %vm2915_vm2, %v1814_v2  ;;  %v1815_v46 = vrot.slane %v1802_v38, 4  ;;  %v1818_v34 = vsel %vm499_vm1, %v1802_v38, %v1817_v42  ;;  %v858_v11 = vperm.slane %v850_v22, %v5534_v37  ;;  %v870_v16 = vperm.slane %v862_v47, %v5534_v37  ;;  %v5012_v10 = vpop.permute.xlu0 %5011 }
 0x1dd   : > { %4876 = vmatpush.xpose.msk.msrb.mxu1 %vm2915_vm2, %v1818_v34  ;;  %v897_v19 = vrot.slane %v846_v7, 4  ;;  %v4989_v56 = vunpack.i.h.bf16 %v6638_v14  ;;  %v5004_v3 = vunpack.i.h.bf16 %v5002_v35  ;;  %v4988_v9 = vunpack.i.l.bf16 %v6638_v14 }
 0x1de   : > { %v1816_v20 = vsel %vm499_vm1, %v1815_v46, %v1778_v24  ;;  %v895_v29 = vrot.slane %v858_v11, 4  ;;  %v920_v33 = vsel %vm499_vm1, %v919_v43, %v870_v16  ;;  %v921_v6 = vrot.slane %v870_v16, 4 }
 0x1df   : > { %4873 = vmatpush.xpose.msk.msrb.mxu0 %vm2915_vm2, %v1816_v20  ;;  %v926_v39 = vperm.slane %v920_v33, %v5556_v60  ;;  %v898_v49 = vsel %vm499_vm1, %v858_v11, %v897_v19  ;;  %v5003_v27 = vunpack.i.l.bf16 %v5002_v35  ;;  %v2033_v45 = vrot.slane %v4989_v56, 4 }
 0x1e0   : > { %v896_v15 = vsel %vm499_vm1, %v895_v29, %v846_v7  ;;  %v906_v28 = vperm.slane %v898_v49, %v5556_v60  ;;  %v922_v54 = vsel %vm499_vm1, %v6483_v36, %v921_v6  ;;  %v2031_v17 = vrot.slane %v5004_v3, 4 }
 0x1e1   : > { %v902_v59 = vperm.slane %v896_v15, %v5556_v60  ;;  %v939_v4 = vrot.slane %v926_v39, 4  ;;  %v930_v44 = vperm.slane %v922_v54, %v5556_v60  ;;  %v2143_v36 = vrot.slane %v5003_v27, 4  ;;  %v5007_v20 = vpop.permute.xlu1 %5006 }
 0x1e2   : > { %v945_v58 = vrot.slane %v906_v28, 4  ;;  %v2021_v8 = vrot.slane %v8190_v55, 4  ;;  %v2145_v30 = vrot.slane %v4988_v9, 4  ;;  %v4994_v13 = vunpack.i.h.bf16 %v4992_v41 }
 0x1e3   : > { %v940_v32 = vsel %vm499_vm1, %v939_v4, %v902_v59  ;;  %v941_v26 = vrot.slane %v902_v59, 4  ;;  %v943_v1 = vrot.slane %v930_v44, 4  ;;  %v2032_v51 = vsel %vm499_vm1, %v2031_v17, %v4989_v56  ;;  %v4997_v56 = vpop.permute.xlu2 %4996 }
 0x1e4   : > { %4868 = vmatmul.msk.f32.vlgmr.msra.gmra.mxu2 %vm2915_vm2, %v940_v32  ;;  %v946_v21 = vsel %vm499_vm1, %v930_v44, %v945_v58  ;;  %v2034_v62 = vsel %vm499_vm1, %v5004_v3, %v2033_v45  ;;  %v4993_v50 = vunpack.i.l.bf16 %v4992_v41  ;;  %v2144_v40 = vsel %vm499_vm1, %v2143_v36, %v4988_v9 }
 0x1e5   : > { %v942_v5 = vsel %vm499_vm1, %v926_v39, %v941_v26  ;;  %v944_v14 = vsel %vm499_vm1, %v943_v1, %v906_v28  ;;  %4877 = vmatmul.msk.f32.vlgmr.msrb.gmra.mxu1 %vm2915_vm2, %v946_v21  ;;  %v2133_v25 = vrot.slane %v8191_v53, 4  ;;  %v2019_v61 = vrot.slane %v4994_v13, 4 }
 0x1e6   : > { %4871 = vmatmul.msk.f32.vlgmr.msra.gmra.mxu3 %vm2915_vm2, %v942_v5  ;;  %4874 = vmatmul.msk.f32.vlgmr.msrb.gmra.mxu0 %vm2915_vm2, %v944_v14  ;;  %v2022_v24 = vsel %vm499_vm1, %v4994_v13, %v2021_v8  ;;  %v2146_v52 = vsel %vm499_vm1, %v5003_v27, %v2145_v30  ;;  %v2131_v18 = vrot.slane %v4993_v50, 4  ;;  %v2038_v63 = vperm.slane %v2032_v51, %v5534_v37 }
 0x1e7   : > { %v2042_v57 = vperm.slane %v2034_v62, %v5534_v37  ;;  %v2020_v48 = vsel %vm499_vm1, %v2019_v61, %v8190_v55  ;;  %v2150_v0 = vperm.slane %v2144_v40, %v5534_v37  ;;  %v2030_v31 = vperm.slane %v2022_v24, %v5534_v37 }
 0x1e8   : > { %v2154_v42 = vperm.slane %v2146_v52, %v5534_v37  ;;  %v2026_v12 = vperm.slane %v2020_v48, %v5534_v37  ;;  %v2134_v38 = vsel %vm499_vm1, %v4993_v50, %v2133_v25  ;;  %v2132_v23 = vsel %vm499_vm1, %v2131_v18, %v8191_v53 }
 0x1e9   : > { %v5014_v7 = vunpack.i.h.bf16 %v5012_v10  ;;  %v2067_v2 = vrot.slane %v2038_v63, 4  ;;  %v2079_v22 = vrot.slane %v2042_v57, 4  ;;  %v5013_v47 = vunpack.i.l.bf16 %v5012_v10 }
 0x1ea   : > { %v2179_v43 = vrot.slane %v2150_v0, 4  ;;  %v2081_v46 = vrot.slane %v2030_v31, 4  ;;  %v2142_v34 = vperm.slane %v2134_v38, %v5534_v37  ;;  %v2191_v11 = vrot.slane %v2154_v42, 4 }
 0x1eb   : > { %v2069_v16 = vrot.slane %v2026_v12, 4  ;;  %v2138_v19 = vperm.slane %v2132_v23, %v5534_v37  ;;  %v4999_v29 = vunpack.i.h.bf16 %v4997_v56  ;;  %v2043_v33 = vrot.slane %v5014_v7, 4  ;;  %v5017_v52 = vpop.permute.xlu2 %5016 }
 0x1ec   : > { %v5009_v6 = vunpack.i.h.bf16 %v5007_v20  ;;  %v2068_v35 = vsel %vm499_vm1, %v2067_v2, %v2026_v12  ;;  %v2080_v39 = vsel %vm499_vm1, %v2079_v22, %v2030_v31  ;;  %v4998_v49 = vunpack.i.l.bf16 %v4997_v56 }
 0x1ed   : > { %v2155_v3 = vrot.slane %v5013_v47, 4  ;;  %v2082_v15 = vsel %vm499_vm1, %v2042_v57, %v2081_v46  ;;  %v2180_v28 = vsel %vm499_vm1, %v2179_v43, %v2138_v19  ;;  %v2193_v54 = vrot.slane %v2142_v34, 4 }
 0x1ee   : > { %v2045_v9 = vrot.slane %v4999_v29, 4  ;;  %v2070_v59 = vsel %vm499_vm1, %v2038_v63, %v2069_v16  ;;  %v2181_v4 = vrot.slane %v2138_v19, 4  ;;  %v2192_v44 = vsel %vm499_vm1, %v2191_v11, %v2142_v34 }
 0x1ef   : > { %v2157_v27 = vrot.slane %v4998_v49, 4  ;;  %v6726_v58 = vperm.slane %v2068_v35, %v5556_v60  ;;  %v6729_v45 = vperm.slane %v2080_v39, %v5556_v60  ;;  %v5008_v26 = vunpack.i.l.bf16 %v5007_v20 }
 0x1f0   : > { %v2046_v32 = vsel %vm499_vm1, %v5014_v7, %v2045_v9  ;;  %v6733_v1 = vperm.slane %v2082_v15, %v5556_v60  ;;  %v6736_v17 = vperm.slane %v2180_v28, %v5556_v60  ;;  %v6740_v36 = vperm.slane %v2070_v59, %v5556_v60 }
 0x1f1   : > { %v2158_v21 = vsel %vm499_vm1, %v5013_v47, %v2157_v27  ;;  %v2194_v55 = vsel %vm499_vm1, %v2154_v42, %v2193_v54  ;;  %v6744_v8 = vperm.slane %v2192_v44, %v5556_v60  ;;  %v2044_v5 = vsel %vm499_vm1, %v2043_v33, %v4999_v29 }
 0x1f2   : > { %v2182_v14 = vsel %vm499_vm1, %v2150_v0, %v2181_v4  ;;  %v2054_v30 = vperm.slane %v2046_v32, %v5534_v37  ;;  %v2156_v41 = vsel %vm499_vm1, %v2155_v3, %v4998_v49  ;;  %v2166_v13 = vperm.slane %v2158_v21, %v5534_v37 }
 0x1f3   : > { %v2117_v51 = vrot.slane %v6726_v58, 4  ;;  %v2125_v62 = vrot.slane %v6729_v45, 4  ;;  %v2057_v50 = vrot.slane %v5009_v6, 4  ;;  %v2169_v40 = vrot.slane %v5008_v26, 4 }
 0x1f4   : > { %v2129_v53 = vrot.slane %v6733_v1, 4  ;;  %v6755_v25 = vperm.slane %v2194_v55, %v5556_v60  ;;  %v2229_v61 = vrot.slane %v6736_v17, 4  ;;  %v2050_v24 = vperm.slane %v2044_v5, %v5534_v37 }
 0x1f5   : > { %v6760_v18 = vperm.slane %v2182_v14, %v5556_v60  ;;  %v2162_v63 = vperm.slane %v2156_v41, %v5534_v37  ;;  %v5019_v57 = vunpack.i.h.bf16 %v5017_v52  ;;  %v5018_v48 = vunpack.i.l.bf16 %v5017_v52 }
 0x1f6   : > { %v2121_v0 = vrot.slane %v6740_v36, 4  ;;  %v2237_v31 = vrot.slane %v6744_v8, 4  ;;  %v2105_v10 = vrot.slane %v2054_v30, 4  ;;  %v2217_v42 = vrot.slane %v2166_v13, 4 }
 0x1f7   : > { %v2055_v12 = vrot.slane %v5019_v57, 4  ;;  %v2058_v38 = vsel %vm499_vm1, %v5019_v57, %v2057_v50  ;;  %v2167_v23 = vrot.slane %v5018_v48, 4  ;;  %v2170_v7 = vsel %vm499_vm1, %v5018_v48, %v2169_v40 }
 0x1f8   : > { %v2241_v2 = vrot.slane %v6755_v25, 4  ;;  %v2093_v22 = vrot.slane %v2050_v24, 4  ;;  %v2066_v47 = vperm.slane %v2058_v38, %v5534_v37  ;;  %v2178_v43 = vperm.slane %v2170_v7, %v5534_v37  ;;  %v6816_v38 = vpop.f32.mrf.mxu3 }
 0x1f9   : > { %v2233_v46 = vrot.slane %v6760_v18, 4  ;;  %v2205_v34 = vrot.slane %v2162_v63, 4  ;;  %v2056_v11 = vsel %vm499_vm1, %v2055_v12, %v5009_v6  ;;  %v2168_v16 = vsel %vm499_vm1, %v2167_v23, %v5008_v26 }
 0x1fa   : > { %v2062_v19 = vperm.slane %v2056_v11, %v5534_v37  ;;  %v2103_v56 = vrot.slane %v2066_v47, 4  ;;  %v2106_v20 = vsel %vm499_vm1, %v2066_v47, %v2105_v10  ;;  %v2174_v29 = vperm.slane %v2168_v16, %v5534_v37 }
 0x1fb   : > { %v2114_v33 = vperm.slane %v2106_v20, %v5556_v60  ;;  %v2215_v35 = vrot.slane %v2178_v43, 4  ;;  %v2218_v39 = vsel %vm499_vm1, %v2178_v43, %v2217_v42 }
 0x1fc   : > { %v2091_v49 = vrot.slane %v2062_v19, 4  ;;  %v2094_v3 = vsel %vm499_vm1, %v2062_v19, %v2093_v22  ;;  %v2104_v6 = vsel %vm499_vm1, %v2103_v56, %v2054_v30  ;;  %v2203_v15 = vrot.slane %v2174_v29, 4 }
 0x1fd   : > { %v2102_v28 = vperm.slane %v2094_v3, %v5556_v60  ;;  %v2110_v54 = vperm.slane %v2104_v6, %v5556_v60  ;;  %v2127_v9 = vrot.slane %v2114_v33, 4  ;;  %v6783_v59 = vsel %vm499_vm1, %v2114_v33, %v2129_v53 }
 0x1fe   : > { %v2092_v4 = vsel %vm499_vm1, %v2091_v49, %v2050_v24  ;;  %v2204_v44 = vsel %vm499_vm1, %v2203_v15, %v2162_v63  ;;  %v2206_v27 = vsel %vm499_vm1, %v2174_v29, %v2205_v34  ;;  %v2216_v32 = vsel %vm499_vm1, %v2215_v35, %v2166_v13 }
 0x1ff   : > { %v2098_v26 = vperm.slane %v2092_v4, %v5556_v60  ;;  %v2119_v21 = vrot.slane %v2102_v28, 4  ;;  %v6791_v55 = vsel %vm499_vm1, %v2102_v28, %v2121_v0  ;;  %v2123_v5 = vrot.slane %v2110_v54, 4 }
 0x200   : > { %v6793_v14 = vpop.f32.mrf.mxu0  ;;  %v6797_v30 = vsel %vm499_vm1, %v2127_v9, %v6733_v1  ;;  %v2210_v41 = vperm.slane %v2204_v44, %v5556_v60  ;;  %v2214_v50 = vperm.slane %v2206_v27, %v5556_v60  ;;  %v2222_v40 = vperm.slane %v2216_v32, %v5556_v60 }
 0x201   : > { %v2115_v13 = vrot.slane %v2098_v26, 4  ;;  %v2226_v53 = vperm.slane %v2218_v39, %v5556_v60  ;;  %v2503_v24 = vrot.slane %v6783_v59, 4  ;;  %v3387_v52 = vsel %vm3380_vm3, %v6793_v14, -inf }
 0x202   : > { %v2227_v63 = vrot.slane %v2210_v41, 4  ;;  %v2231_v57 = vrot.slane %v2214_v50, 4  ;;  %v6807_v48 = vsel %vm499_vm1, %v2214_v50, %v2233_v46  ;;  %v2235_v1 = vrot.slane %v2222_v40, 4  ;;  %3388 = vmax.xlane.f32.xlu2 %v3387_v52 }
 0x203   : > { %v6810_v0 = vsel %vm499_vm1, %v2222_v40, %v2237_v31  ;;  %v2239_v10 = vrot.slane %v2226_v53, 4  ;;  %v6813_v42 = vsel %vm499_vm1, %v2226_v53, %v2241_v2  ;;  %v2591_v12 = vrot.slane %v6807_v48, 4 }
 0x204   : > { %v2615_v23 = vrot.slane %v6813_v42, 4  ;;  %v2617_v7 = vrot.slane %v6810_v0, 4  ;;  %v2228_v22 = vsel %vm499_vm1, %v2227_v63, %v6736_v17  ;;  %v6825_v31 = vsel %vm499_vm1, %v2210_v41, %v2229_v61 }
 0x205   : > { %v6829_v2 = vsel %vm499_vm1, %v2239_v10, %v6755_v25  ;;  %v2232_v47 = vsel %vm499_vm1, %v2231_v57, %v6760_v18  ;;  %v6835_v43 = vsel %vm499_vm1, %v2235_v1, %v6744_v8  ;;  %v2581_v46 = vrot.slane %v2228_v22, 4 }
 0x206   : > { %v2603_v34 = vrot.slane %v6829_v2, 4  ;;  %v2579_v11 = vrot.slane %v2232_v47, 4  ;;  %v2592_v17 = vsel %vm499_vm1, %v2591_v12, %v6825_v31  ;;  %v2593_v61 = vrot.slane %v6825_v31, 4 }
 0x207   : > { %v2598_v16 = vperm.slane %v2592_v17, %v5534_v37  ;;  %v2605_v25 = vrot.slane %v6835_v43, 4  ;;  %v2616_v18 = vsel %vm499_vm1, %v2615_v23, %v6810_v0  ;;  %v6847_v8 = vsel %vm499_vm1, %v2115_v13, %v6726_v58 }
 0x208   : > { %v2580_v19 = vsel %vm499_vm1, %v2579_v11, %v2228_v22  ;;  %v2604_v56 = vsel %vm499_vm1, %v2603_v34, %v6835_v43  ;;  %v2622_v20 = vperm.slane %v2616_v18, %v5534_v37  ;;  %v6856_v29 = vsel %vm499_vm1, %v2098_v26, %v2117_v51 }
 0x209   : > { %v2586_v33 = vperm.slane %v2580_v19, %v5534_v37  ;;  %v2610_v35 = vperm.slane %v2604_v56, %v5534_v37  ;;  %v2627_v39 = vrot.slane %v2598_v16, 4  ;;  %v6862_v49 = vsel %vm499_vm1, %v2119_v21, %v6740_v36  ;;  %v6888_v21 = vpop.f32.mrf.mxu3 }
 0x20a   : > { %v2651_v3 = vrot.slane %v2622_v20, 4  ;;  %v6866_v6 = vsel %vm499_vm1, %v2123_v5, %v6729_v45  ;;  %v6871_v58 = vsel %vm499_vm1, %v2110_v54, %v2125_v62  ;;  %v2467_v51 = vrot.slane %v6862_v49, 4 }
 0x20b   : > { %v2628_v15 = vsel %vm499_vm1, %v2627_v39, %v2586_v33  ;;  %v2469_v28 = vrot.slane %v6847_v8, 4  ;;  %v2479_v9 = vrot.slane %v6791_v55, 4  ;;  %v2481_v36 = vrot.slane %v6856_v29, 4 }
 0x20c   : > { %v2634_v4 = vperm.slane %v2628_v15, %v5556_v60  ;;  %v2652_v44 = vsel %vm499_vm1, %v2651_v3, %v2610_v35  ;;  %v2468_v45 = vsel %vm499_vm1, %v2467_v51, %v6847_v8  ;;  %v2491_v62 = vrot.slane %v6797_v30, 4 }
 0x20d   : > { %v2658_v54 = vperm.slane %v2652_v44, %v5556_v60  ;;  %v2474_v27 = vperm.slane %v2468_v45, %v5534_v37  ;;  %v2480_v32 = vsel %vm499_vm1, %v2479_v9, %v6856_v29  ;;  %v2493_v26 = vrot.slane %v6866_v6, 4 }
 0x20e   : > { %v2486_v5 = vperm.slane %v2480_v32, %v5534_v37  ;;  %v2492_v41 = vsel %vm499_vm1, %v2491_v62, %v6866_v6  ;;  %v2504_v50 = vsel %vm499_vm1, %v2503_v24, %v6871_v58  ;;  %v2505_v40 = vrot.slane %v6871_v58, 4 }
 0x20f   : > { %v2675_v13 = vrot.slane %v2658_v54, 4  ;;  %v2498_v53 = vperm.slane %v2492_v41, %v5534_v37  ;;  %v2510_v52 = vperm.slane %v2504_v50, %v5534_v37  ;;  %v2677_v63 = vrot.slane %v2634_v4, 4 }
 0x210   : > { %v2515_v57 = vrot.slane %v2486_v5, 4  ;;  %v2629_v1 = vrot.slane %v2586_v33, 4  ;;  %v2653_v10 = vrot.slane %v2610_v35, 4  ;;  %v2582_v12 = vsel %vm499_vm1, %v2232_v47, %v2581_v46 }
 0x211   : > { %v2676_v23 = vsel %vm499_vm1, %v2675_v13, %v2634_v4  ;;  %v2539_v22 = vrot.slane %v2510_v52, 4  ;;  %v2678_v31 = vsel %vm499_vm1, %v2658_v54, %v2677_v63  ;;  %v2590_v24 = vperm.slane %v2582_v12, %v5534_v37 }
 0x212   : > { %3782 = vmatpush.msrb.mxu2 %v2676_v23  ;;  %v2516_v43 = vsel %vm499_vm1, %v2515_v57, %v2474_v27  ;;  %3805 = vmatpush.msrb.mxu3 %v2678_v31  ;;  %v2630_v34 = vsel %vm499_vm1, %v2598_v16, %v2629_v1  ;;  %v2654_v11 = vsel %vm499_vm1, %v2622_v20, %v2653_v10  ;;  %v2517_v17 = vrot.slane %v2474_v27, 4 }
 0x213   : > { %v2522_v18 = vperm.slane %v2516_v43, %v5556_v60  ;;  %v2540_v47 = vsel %vm499_vm1, %v2539_v22, %v2498_v53  ;;  %v2638_v46 = vperm.slane %v2630_v34, %v5556_v60  ;;  %v2662_v19 = vperm.slane %v2654_v11, %v5556_v60 }
 0x214   : > { %v2546_v56 = vperm.slane %v2540_v47, %v5556_v60  ;;  %v2594_v33 = vsel %vm499_vm1, %v6807_v48, %v2593_v61  ;;  %v2606_v35 = vsel %vm499_vm1, %v6829_v2, %v2605_v25  ;;  %v2618_v16 = vsel %vm499_vm1, %v6813_v42, %v2617_v7 }
 0x215   : > { %v2679_v20 = vrot.slane %v2662_v19, 4  ;;  %v2602_v39 = vperm.slane %v2594_v33, %v5534_v37  ;;  %v2614_v3 = vperm.slane %v2606_v35, %v5534_v37  ;;  %v2626_v51 = vperm.slane %v2618_v16, %v5534_v37 }
 0x216   : > { %v2563_v15 = vrot.slane %v2546_v56, 4  ;;  %v2565_v9 = vrot.slane %v2522_v18, 4  ;;  %v2518_v4 = vsel %vm499_vm1, %v2486_v5, %v2517_v17  ;;  %v2541_v48 = vrot.slane %v2498_v53, 4 }
 0x217   : > { %v2680_v61 = vsel %vm499_vm1, %v2679_v20, %v2638_v46  ;;  %v2639_v2 = vrot.slane %v2602_v39, 4  ;;  %v2663_v25 = vrot.slane %v2626_v51, 4  ;;  %v2526_v0 = vperm.slane %v2518_v4, %v5556_v60  ;;  %v6948_v12 = vpop.f32.mrf.mxu1 }
 0x218   : > { %v6924_v44 = vpop.f32.mrf.mxu3  ;;  %v2564_v42 = vsel %vm499_vm1, %v2563_v15, %v2522_v18  ;;  %3828 = vmatpush.msra.mxu0 %v2680_v61  ;;  %v2566_v7 = vsel %vm499_vm1, %v2546_v56, %v2565_v9  ;;  %v2542_v45 = vsel %vm499_vm1, %v2510_v52, %v2541_v48  ;;  %v2681_v62 = vrot.slane %v2638_v46, 4 }
 0x219   : > { %3783 = vmatpush.msrb.mxu2 %v2564_v42  ;;  %v2640_v54 = vsel %vm499_vm1, %v2639_v2, %v2590_v24  ;;  %v2664_v27 = vsel %vm499_vm1, %v2663_v25, %v2614_v3  ;;  %3806 = vmatpush.msrb.mxu3 %v2566_v7  ;;  %v2550_v32 = vperm.slane %v2542_v45, %v5556_v60  ;;  %v2641_v5 = vrot.slane %v2590_v24, 4  ;;  %v6964_v24 = vpop.f32.mrf.mxu0 }
 0x21a   : > { %v2646_v41 = vperm.slane %v2640_v54, %v5556_v60  ;;  %v2670_v50 = vperm.slane %v2664_v27, %v5556_v60  ;;  %v2682_v13 = vsel %vm499_vm1, %v2662_v19, %v2681_v62  ;;  %v2470_v53 = vsel %vm499_vm1, %v6862_v49, %v2469_v28 }
 0x21b   : > { %v2567_v52 = vrot.slane %v2550_v32, 4  ;;  %3851 = vmatpush.msra.mxu1 %v2682_v13  ;;  %v2478_v63 = vperm.slane %v2470_v53, %v5534_v37  ;;  %v2482_v57 = vsel %vm499_vm1, %v6791_v55, %v2481_v36  ;;  %v2494_v1 = vsel %vm499_vm1, %v6797_v30, %v2493_v26  ;;  %v6998_v13 = vpop.f32.mrf.mxu2 }
 0x21c   : > { %v2683_v10 = vrot.slane %v2670_v50, 4  ;;  %v2490_v8 = vperm.slane %v2482_v57, %v5534_v37  ;;  %v2502_v49 = vperm.slane %v2494_v1, %v5534_v37  ;;  %v2506_v29 = vsel %vm499_vm1, %v6783_v59, %v2505_v40 }
 0x21d   : > { %v2568_v28 = vsel %vm499_vm1, %v2567_v52, %v2526_v0  ;;  %v2514_v55 = vperm.slane %v2506_v29, %v5534_v37  ;;  %v2685_v6 = vrot.slane %v2646_v41, 4  ;;  %v2642_v36 = vsel %vm499_vm1, %v2602_v39, %v2641_v5 }
 0x21e   : > { %v2684_v30 = vsel %vm499_vm1, %v2683_v10, %v2646_v41  ;;  %3829 = vmatpush.msra.mxu0 %v2568_v28  ;;  %v2527_v26 = vrot.slane %v2490_v8, 4  ;;  %v2650_v23 = vperm.slane %v2642_v36, %v5556_v60  ;;  %v2665_v22 = vrot.slane %v2614_v3, 4 }
 0x21f   : > { %3874 = vmatpush.msra.mxu2 %v2684_v30  ;;  %v2551_v31 = vrot.slane %v2514_v55, 4  ;;  %v2686_v58 = vsel %vm499_vm1, %v2670_v50, %v2685_v6  ;;  %v3402_v59 = vsel %vm3380_vm3, %v6948_v12, -inf  ;;  %v2569_v40 = vrot.slane %v2526_v0, 4 }
 0x220   : > { %v2528_v43 = vsel %vm499_vm1, %v2527_v26, %v2478_v63  ;;  %3897 = vmatpush.msra.mxu3 %v2686_v58  ;;  %v2666_v34 = vsel %vm499_vm1, %v2626_v51, %v2665_v22  ;;  %3403 = vmax.xlane.f32.xlu1 %v3402_v59  ;;  %v2529_v11 = vrot.slane %v2478_v63, 4  ;;  %v2553_v17 = vrot.slane %v2502_v49, 4  ;;  %v6972_v56 = vpop.f32.mrf.mxu3 }
 0x221   : > { %v2534_v18 = vperm.slane %v2528_v43, %v5556_v60  ;;  %v2552_v47 = vsel %vm499_vm1, %v2551_v31, %v2502_v49  ;;  %v2674_v46 = vperm.slane %v2666_v34, %v5556_v60  ;;  %v2570_v19 = vsel %vm499_vm1, %v2550_v32, %v2569_v40  ;;  %v3116_v27 = vpop.f32.mrf.mxu0 }
 0x222   : > { %v2558_v33 = vperm.slane %v2552_v47, %v5556_v60  ;;  %3852 = vmatpush.msra.mxu1 %v2570_v19  ;;  %v2530_v35 = vsel %vm499_vm1, %v2490_v8, %v2529_v11  ;;  %v2554_v16 = vsel %vm499_vm1, %v2514_v55, %v2553_v17  ;;  %v2689_v20 = vrot.slane %v2650_v23, 4 }
 0x223   : > { %v2687_v39 = vrot.slane %v2674_v46, 4  ;;  %v2573_v3 = vrot.slane %v2534_v18, 4  ;;  %v2538_v51 = vperm.slane %v2530_v35, %v5556_v60  ;;  %v2562_v15 = vperm.slane %v2554_v16, %v5556_v60 }
 0x224   : > { %v2571_v9 = vrot.slane %v2558_v33, 4  ;;  %v2690_v4 = vsel %vm499_vm1, %v2674_v46, %v2689_v20  ;;  %v3381_v48 = vsel %vm3380_vm3, %v6888_v21, -inf  ;;  %v3393_v61 = vsel %vm3380_vm3, %v6964_v24, -inf }
 0x225   : > { %v2688_v2 = vsel %vm499_vm1, %v2687_v39, %v2650_v23  ;;  %v2574_v25 = vsel %vm499_vm1, %v2558_v33, %v2573_v3  ;;  %v2575_v0 = vrot.slane %v2562_v15, 4  ;;  %3943 = vmatpush.msrb.mxu1 %v2690_v4  ;;  %3382 = vmax.xlane.f32.xlu0 %v3381_v48  ;;  %v2577_v42 = vrot.slane %v2538_v51, 4 }
 0x226   : > { %v2572_v7 = vsel %vm499_vm1, %v2571_v9, %v2534_v18  ;;  %3920 = vmatpush.msrb.mxu0 %v2688_v2  ;;  %3898 = vmatpush.msra.mxu3 %v2574_v25  ;;  %v3384_v45 = vsel %vm3380_vm3, %v6924_v44, -inf  ;;  %v3390_v32 = vsel %vm3380_vm3, %v6972_v56, -inf  ;;  %v3399_v41 = vsel %vm3380_vm3, %v3116_v27, -inf }
 0x227   : > { %3875 = vmatpush.msra.mxu2 %v2572_v7  ;;  %v2576_v62 = vsel %vm499_vm1, %v2575_v0, %v2538_v51  ;;  %v2578_v54 = vsel %vm499_vm1, %v2562_v15, %v2577_v42  ;;  %3394 = vmax.xlane.f32.xlu2 %v3393_v61  ;;  %v5020_v22 = vpack.i.bf16 %v6998_v13, %v6816_v38 }
 0x228   : > { %3921 = vmatpush.msrb.mxu0 %v2576_v62  ;;  %3944 = vmatpush.msrb.mxu1 %v2578_v54  ;;  %v6993_v5 = vpop.f32.mrf.mxu3 }
 0x229   : > { %3385 = vmax.xlane.f32.xlu1 %v3384_v45  ;;  %v3396_v50 = vsel %vm3380_vm3, %v6993_v5, -inf }
 0x22d   : > { %3391 = vmax.xlane.f32.xlu0 %v3390_v32 }
 0x22f   : > { %3400 = vmax.xlane.f32.xlu2 %v3399_v41 }
 0x231   : > { %3397 = vmax.xlane.f32.xlu1 %v3396_v50 }
 0x257   : > { %v7010_v10 = vpop.f32.mrf.mxu0 }
 0x258   : > { %v7000_v53 = vpop.f32.mrf.mxu1  ;;  %v3411_v29 = vsel %vm3380_vm3, %v7010_v10, -inf }
 0x259   : > { %v3414_v52 = vsel %vm3380_vm3, %v7000_v53, -inf }
 0x25a   : > { %3415 = vmax.xlane.f32.xlu2 %v3414_v52  ;;  %v7004_v63 = vpop.f32.mrf.mxu2 }
 0x25b   : > { %v3405_v57 = vsel %vm3380_vm3, %v7004_v63, -inf }
 0x25c   : > { %3406 = vmax.xlane.f32.xlu0 %v3405_v57  ;;  %v7008_v1 = vpop.f32.mrf.mxu3 }
 0x25d   : > { %v3408_v36 = vsel %vm3380_vm3, %v7008_v1, -inf }
 0x262   : > { %v7012_v8 = vpop.f32.mrf.mxu1 }
 0x263   : > { %v3426_v49 = vsel %vm3380_vm3, %v7012_v8, -inf  ;;  %v7028_v26 = vpop.f32.mrf.mxu0 }
 0x264   : > { %3427 = vmax.xlane.f32.xlu2 %v3426_v49  ;;  %3412 = vmax.xlane.f32.xlu0 %v3411_v29  ;;  %v3423_v23 = vsel %vm3380_vm3, %v7028_v26, -inf }
 0x267   : > { %v7018_v28 = vpop.f32.mrf.mxu2 }
 0x268   : > { %v3417_v55 = vsel %vm3380_vm3, %v7018_v28, -inf }
 0x269   : > { %v7022_v6 = vpop.f32.mrf.mxu3  ;;  %3418 = vmax.xlane.f32.xlu1 %v3417_v55 }
 0x26a   : > { %v3420_v30 = vsel %vm3380_vm3, %v7022_v6, -inf }
 0x26c   : > { %3409 = vmax.xlane.f32.xlu2 %v3408_v36  ;;  %3421 = vmax.xlane.f32.xlu0 %v3420_v30 }
 0x271   : > { %3424 = vmax.xlane.f32.xlu1 %v3423_v23 }
 0x275   : > { %v3389_v31 = vpop.xlane.xlu2 %3388 }
 0x276   : > { %v3431_v59 = vsub.f32 %v6793_v14, %v3389_v31 }
 0x278   : > { %v3449_v40 = vmul.f32 1.442695, %v3431_v59 }
 0x27a   : > { %5056 = vpow2.f32 %v3449_v40 }
 0x280   : > { %5021 = vrot.lane.b32.xlu0 %v5020_v22, %s5258_s9  ;;  %v7043_v33 = vpop.eup %5056 }
 0x284   : > { %5026 = vrot.lane.b32.xlu2 %v5020_v22, %s5257_s8 }
 0x28a   : > { %5031 = vrot.lane.b32.xlu1 %v5020_v22, %s5256_s19  ;;  %s320_s19 = sand.u32 1, %s5242_s25  }
 0x28b   : > { %s4815_s8 = sshll.u32 %s320_s19, 4 }
 0x292   : > { %5036 = vrot.lane.b32.xlu1 %v5020_v22, %s5260_s16  ;;  %s322_s16 = scalar_lea.vmem [#allocation7], %s4815_s8 }
 0x293   : > { %v3404_v58 = vpop.xlane.xlu1 %3403 }
 0x294   : > { %v3436_v17 = vsub.f32 %v6948_v12, %v3404_v58  ;;  %v3483_v12 = vsel %vm3380_vm3, %v7043_v33, 0.0 }
 0x296   : > { %v3459_v46 = vmul.f32 1.442695, %v3436_v17 }
 0x298   : > { %v3383_v34 = vpop.xlane.xlu0 %3382 }
 0x299   : > { %v3429_v7 = vsub.f32 %v6888_v21, %v3383_v34 }
 0x29a   : > { %5041 = vrot.lane.b32.xlu1 %v5020_v22, %s5259_s15  ;;  %v3395_v43 = vpop.xlane.xlu2 %3394  ;;  %s5200_s15 = scalar_lea.hbm %s8131_s7, 32 }
 0x29b   : > { %v3445_v45 = vmul.f32 1.442695, %v3429_v7  ;;  %v3433_v62 = vsub.f32 %v6964_v24, %v3395_v43 }
 0x29c   : > { %v3386_v11 = vpop.xlane.xlu1 %3385 }
 0x29d   : > { %v3430_v18 = vsub.f32 %v6924_v44, %v3386_v11 }
 0x29f   : > { %v3447_v47 = vmul.f32 1.442695, %v3430_v18 }
 0x2a0   : > { %v3392_v14 = vpop.xlane.xlu0 %3391 }
 0x2a1   : > { %5058 = vpow2.f32 %v3447_v47  ;;  %v3432_v44 = vsub.f32 %v6972_v56, %v3392_v14 }
 0x2a2   : > { %5046 = vrot.lane.b32.xlu1 %v5020_v22, %s5261_s14  ;;  %v3401_v19 = vpop.xlane.xlu2 %3400  ;;  %5060 = vpow2.f32 %v3459_v46  ;;  %s4901_s14 = sshll.u32 %s5334_s28, 4 }
 0x2a3   : > { %v3435_v35 = vsub.f32 %v3116_v27, %v3401_v19  ;;  %v3451_v4 = vmul.f32 1.442695, %v3432_v44  ;;  %v3453_v27 = vmul.f32 1.442695, %v3433_v62  ;;  %v2245_v62 = vrot.slane %v6998_v13, 4 }
 0x2a4   : > { %v3398_v16 = vpop.xlane.xlu1 %3397 }
 0x2a5   : > { %v3457_v20 = vmul.f32 1.442695, %v3435_v35  ;;  %v3434_v39 = vsub.f32 %v6993_v5, %v3398_v16 }
 0x2a7   : > { %v7049_v3 = vpop.eup %5058  ;;  %5062 = vpow2.f32 %v3457_v20  ;;  %v3455_v51 = vmul.f32 1.442695, %v3434_v39 }
 0x2a8   : > { %v3480_v15 = vsel %vm3380_vm3, %v7049_v3, 0.0  ;;  %v7054_v9 = vpop.eup %5060 }
 0x2a9   : > { %5064 = vpow2.f32 %v3455_v51  ;;  %v3498_v61 = vsel %vm3380_vm3, %v7054_v9, 0.0 }
 0x2aa   : > { %5051 = vrot.lane.b32.xlu1 %v5020_v22, %s5262_s17  ;;  %3481 = vadd.xlane.f32.xlu0 %v3480_v15  ;;  %5066 = vpow2.f32 %v3451_v4 }
 0x2ab   : > { %5068 = vpow2.f32 %v3445_v45 }
 0x2ac   : > { %5070 = vpow2.f32 %v3453_v27 }
 0x2ad   : > { %3484 = vadd.xlane.f32.xlu2 %v3483_v12  ;;  %v7056_v48 = vpop.eup %5062 }
 0x2ae   : > { %v3495_v2 = vsel %vm3380_vm3, %v7056_v48, 0.0 }
 0x2af   : > { %v7062_v56 = vpop.eup %5064 }
 0x2b0   : > { %v3492_v25 = vsel %vm3380_vm3, %v7062_v56, 0.0  ;;  %v7066_v0 = vpop.eup %5066 }
 0x2b1   : > { %v3486_v42 = vsel %vm3380_vm3, %v7066_v0, 0.0  ;;  %v7072_v5 = vpop.eup %5068 }
 0x2b2   : > { %3496 = vadd.xlane.f32.xlu0 %v3495_v2  ;;  %v3477_v50 = vsel %vm3380_vm3, %v7072_v5, 0.0  ;;  %v7077_v21 = vpop.eup %5070 }
 0x2b3   : > { %v3489_v36 = vsel %vm3380_vm3, %v7077_v21, 0.0 }
 0x2b5   : > { %3499 = vadd.xlane.f32.xlu2 %v3498_v61 }
 0x2ba   : > { %3487 = vadd.xlane.f32.xlu0 %v3486_v42 }
 0x2bd   : > { %3493 = vadd.xlane.f32.xlu2 %v3492_v25 }
 0x2cd   : > { %v3416_v54 = vpop.xlane.xlu2 %3415 }
 0x2ce   : > { %v3440_v55 = vsub.f32 %v7000_v53, %v3416_v54 }
 0x2cf   : > { %v3407_v32 = vpop.xlane.xlu0 %3406 }
 0x2d0   : > { %v3437_v41 = vsub.f32 %v7004_v63, %v3407_v32  ;;  %v3467_v23 = vmul.f32 1.442695, %v3440_v55 }
 0x2d2   : > { %v3461_v52 = vmul.f32 1.442695, %v3437_v41 }
 0x2d4   : > { %3478 = vadd.xlane.f32.xlu1 %v3477_v50  ;;  %5072 = vpow2.f32 %v3461_v52 }
 0x2d7   : > { %v3428_v57 = vpop.xlane.xlu2 %3427  ;;  %v3413_v49 = vpop.xlane.xlu0 %3412 }
 0x2d8   : > { %v3439_v29 = vsub.f32 %v7010_v10, %v3413_v49  ;;  %v2357_v49 = vrot.slane %v6816_v38, 4 }
 0x2da   : > { %v3465_v24 = vmul.f32 1.442695, %v3439_v29  ;;  %v7084_v58 = vpop.eup %5072 }
 0x2db   : > { %v3501_v40 = vsel %vm3380_vm3, %v7084_v58, 0.0 }
 0x2dc   : > { %3490 = vadd.xlane.f32.xlu1 %v3489_v36  ;;  %v3419_v63 = vpop.xlane.xlu1 %3418  ;;  %5074 = vpow2.f32 %v3465_v24 }
 0x2dd   : > { %v3441_v30 = vsub.f32 %v7018_v28, %v3419_v63 }
 0x2df   : > { %v3469_v22 = vmul.f32 1.442695, %v3441_v30  ;;  %v3410_v31 = vpop.xlane.xlu2 %3409  ;;  %v3422_v43 = vpop.xlane.xlu0 %3421 }
 0x2e0   : > { %v3438_v59 = vsub.f32 %v7008_v1, %v3410_v31  ;;  %v3442_v1 = vsub.f32 %v7022_v6, %v3422_v43 }
 0x2e1   : > { %5076 = vpow2.f32 %v3469_v22 }
 0x2e2   : > { %v7087_v10 = vpop.eup %5074  ;;  %5078 = vpow2.f32 %v3467_v23  ;;  %v3463_v53 = vmul.f32 1.442695, %v3438_v59  ;;  %v3471_v19 = vmul.f32 1.442695, %v3442_v1 }
 0x2e3   : > { %v3507_v28 = vsel %vm3380_vm3, %v7087_v10, 0.0 }
 0x2e4   : > { %3502 = vadd.xlane.f32.xlu1 %v3501_v40  ;;  %v3425_v34 = vpop.xlane.xlu1 %3424  ;;  %3508 = vadd.xlane.f32.xlu2 %v3507_v28  ;;  %5080 = vpow2.f32 %v3463_v53 }
 0x2e5   : > { %v3443_v11 = vsub.f32 %v7028_v26, %v3425_v34  ;;  %v3444_v26 = vsub.f32 %v7012_v8, %v3428_v57 }
 0x2e7   : > { %v7094_v17 = vpop.eup %5076  ;;  %v3473_v18 = vmul.f32 1.442695, %v3443_v11  ;;  %v3475_v20 = vmul.f32 1.442695, %v3444_v26  ;;  %v5027_v4 = vpop.permute.xlu2 %5026 }
 0x2e8   : > { %v3513_v47 = vsel %vm3380_vm3, %v7094_v17, 0.0  ;;  %v7099_v46 = vpop.eup %5078  ;;  %v5029_v25 = vunpack.i.h.bf16 %v5027_v4  ;;  %v5028_v7 = vunpack.i.l.bf16 %v5027_v4 }
 0x2e9   : > { %3514 = vadd.xlane.f32.xlu0 %v3513_v47  ;;  %5082 = vpow2.f32 %v3473_v18  ;;  %v3510_v35 = vsel %vm3380_vm3, %v7099_v46, 0.0 }
 0x2ea   : > { %v7103_v14 = vpop.eup %5080  ;;  %5084 = vpow2.f32 %v3471_v19  ;;  %v2243_v27 = vrot.slane %v5029_v25, 4  ;;  %v2246_v32 = vsel %vm499_vm1, %v5029_v25, %v2245_v62  ;;  %v2355_v50 = vrot.slane %v5028_v7, 4 }
 0x2eb   : > { %v3504_v6 = vsel %vm3380_vm3, %v7103_v14, 0.0  ;;  %5086 = vpow2.f32 %v3475_v20  ;;  %v2254_v63 = vperm.slane %v2246_v32, %v5534_v37  ;;  %v2358_v30 = vsel %vm499_vm1, %v5028_v7, %v2357_v49 }
 0x2ec   : > { %3511 = vadd.xlane.f32.xlu2 %v3510_v35  ;;  %v2244_v36 = vsel %vm499_vm1, %v2243_v27, %v6998_v13  ;;  %v2356_v23 = vsel %vm499_vm1, %v2355_v50, %v6816_v38  ;;  %v2366_v34 = vperm.slane %v2358_v30, %v5534_v37 }
 0x2ed   : > { %v2250_v59 = vperm.slane %v2244_v36, %v5534_v37  ;;  %v2305_v43 = vrot.slane %v2254_v63, 4  ;;  %v2362_v13 = vperm.slane %v2356_v23, %v5534_v37 }
 0x2ee   : > { %v2417_v20 = vrot.slane %v2366_v34, 4 }
 0x2ef   : > { %v7108_v16 = vpop.eup %5082  ;;  %v2293_v35 = vrot.slane %v2250_v59, 4 }
 0x2f0   : > { %8192 = vst [vmem:[#allocation15_spill] sm:$0xff] %v7108_v16  ;;  %v3519_v39 = vsel %vm3380_vm3, %v7108_v16, 0.0  ;;  %v7112_v12 = vpop.eup %5084 }
 0x2f1   : > { %3505 = vadd.xlane.f32.xlu0 %v3504_v6  ;;  %v3516_v44 = vsel %vm3380_vm3, %v7112_v12, 0.0  ;;  %v7118_v51 = vpop.eup %5086 }
 0x2f2   : > { %8193 = vst [vmem:[#allocation14_spill] sm:$0xff] %v7118_v51  ;;  %v3522_v15 = vsel %vm3380_vm3, %v7118_v51, 0.0  ;;  %v5022_v61 = vpop.permute.xlu0 %5021 }
 0x2f3   : > { %v5024_v42 = vunpack.i.h.bf16 %v5022_v61  ;;  %v5023_v29 = vunpack.i.l.bf16 %v5022_v61 }
 0x2f4   : > { %3520 = vadd.xlane.f32.xlu2 %v3519_v39 }
 0x2f5   : > { %v2257_v41 = vrot.slane %v5024_v42, 4  ;;  %v2369_v53 = vrot.slane %v5023_v29, 4 }
 0x2f9   : > { %3517 = vadd.xlane.f32.xlu0 %v3516_v44 }
 0x2fc   : > { %v7116_v8 = vpop.permute.xlu1 %5031 }
 0x2fd   : > { %v5034_v28 = vunpack.i.h.bf16 %v7116_v8  ;;  %v5033_v26 = vunpack.i.l.bf16 %v7116_v8 }
 0x2ff   : > { %v2269_v4 = vrot.slane %v5034_v28, 4  ;;  %v2381_v62 = vrot.slane %v5033_v26, 4 }
 0x301   : > { %3523 = vadd.xlane.f32.xlu0 %v3522_v15  ;;  %v2405_v15 = vrot.slane %v2362_v13, 4 }
 0x304   : > { %v5037_v2 = vpop.permute.xlu1 %5036 }
 0x305   : > { %v5039_v45 = vunpack.i.h.bf16 %v5037_v2  ;;  %v5038_v54 = vunpack.i.l.bf16 %v5037_v2 }
 0x307   : > { %v2255_v52 = vrot.slane %v5039_v45, 4  ;;  %v2258_v24 = vsel %vm499_vm1, %v5039_v45, %v2257_v41  ;;  %v2367_v55 = vrot.slane %v5038_v54, 4  ;;  %v2370_v38 = vsel %vm499_vm1, %v5038_v54, %v2369_v53 }
 0x308   : > { %v2266_v31 = vperm.slane %v2258_v24, %v5534_v37  ;;  %v2378_v39 = vperm.slane %v2370_v38, %v5534_v37 }
 0x309   : > { %v2256_v22 = vsel %vm499_vm1, %v2255_v52, %v5024_v42  ;;  %v2368_v40 = vsel %vm499_vm1, %v2367_v55, %v5023_v29 }
 0x30a   : > { %v2262_v11 = vperm.slane %v2256_v22, %v5534_v37  ;;  %v2303_v1 = vrot.slane %v2266_v31, 4  ;;  %v2306_v18 = vsel %vm499_vm1, %v2266_v31, %v2305_v43  ;;  %v2374_v47 = vperm.slane %v2368_v40, %v5534_v37 }
 0x30b   : > { %v7149_v2 = vperm.slane %v2306_v18, %v5556_v60  ;;  %v2415_v41 = vrot.slane %v2378_v39, 4  ;;  %v2418_v50 = vsel %vm499_vm1, %v2378_v39, %v2417_v20 }
 0x30c   : > { %v7124_v57 = vpop.permute.xlu1 %5041  ;;  %v2294_v61 = vsel %vm499_vm1, %v2262_v11, %v2293_v35  ;;  %v2291_v25 = vrot.slane %v2262_v11, 4  ;;  %v2304_v42 = vsel %vm499_vm1, %v2303_v1, %v2254_v63  ;;  %v2403_v7 = vrot.slane %v2374_v47, 4 }
 0x30d   : > { %v5044_v45 = vunpack.i.h.bf16 %v7124_v57  ;;  %v5043_v8 = vunpack.i.l.bf16 %v7124_v57  ;;  %v7156_v32 = vperm.slane %v2294_v61, %v5556_v60  ;;  %v7160_v49 = vperm.slane %v2304_v42, %v5556_v60 }
 0x30e   : > { %v2353_v29 = vrot.slane %v7149_v2, 4  ;;  %v2406_v24 = vsel %vm499_vm1, %v2374_v47, %v2405_v15  ;;  %v2292_v57 = vsel %vm499_vm1, %v2291_v25, %v2250_v59  ;;  %v2404_v36 = vsel %vm499_vm1, %v2403_v7, %v2362_v13 }
 0x30f   : > { %v2281_v63 = vrot.slane %v5044_v45, 4  ;;  %v2393_v22 = vrot.slane %v5043_v8, 4  ;;  %v7170_v43 = vperm.slane %v2406_v24, %v5556_v60  ;;  %v2416_v11 = vsel %vm499_vm1, %v2415_v41, %v2366_v34 }
 0x310   : > { %v2345_v15 = vrot.slane %v7156_v32, 4  ;;  %v7193_v25 = vperm.slane %v2404_v36, %v5556_v60 }
 0x314   : > { %v5047_v19 = vpop.permute.xlu1 %5046 }
 0x315   : > { %v5049_v6 = vunpack.i.h.bf16 %v5047_v19  ;;  %v5048_v44 = vunpack.i.l.bf16 %v5047_v19 }
 0x317   : > { %v2267_v54 = vrot.slane %v5049_v6, 4  ;;  %v2270_v27 = vsel %vm499_vm1, %v5049_v6, %v2269_v4  ;;  %v2379_v52 = vrot.slane %v5048_v44, 4  ;;  %v2382_v55 = vsel %vm499_vm1, %v5048_v44, %v2381_v62 }
 0x318   : > { %v2278_v30 = vperm.slane %v2270_v27, %v5534_v37  ;;  %v2390_v59 = vperm.slane %v2382_v55, %v5534_v37  ;;  %v7187_v44 = vperm.slane %v2292_v57, %v5556_v60 }
 0x319   : > { %v2268_v31 = vsel %vm499_vm1, %v2267_v54, %v5034_v28  ;;  %v2380_v38 = vsel %vm499_vm1, %v2379_v52, %v5033_v26  ;;  %v2426_v52 = vperm.slane %v2418_v50, %v5556_v60 }
 0x31a   : > { %v2274_v19 = vperm.slane %v2268_v31, %v5534_v37  ;;  %v2329_v28 = vrot.slane %v2278_v30, 4  ;;  %v2386_v34 = vperm.slane %v2380_v38, %v5534_v37  ;;  %v2441_v42 = vrot.slane %v2390_v59, 4 }
 0x31b   : > { %v2453_v38 = vrot.slane %v7193_v25, 4 }
 0x31c   : > { %v5052_v23 = vpop.permute.xlu1 %5051  ;;  %v2317_v54 = vrot.slane %v2274_v19, 4  ;;  %v2429_v24 = vrot.slane %v2386_v34, 4 }
 0x31d   : > { %v5054_v53 = vunpack.i.h.bf16 %v5052_v23  ;;  %v5053_v40 = vunpack.i.l.bf16 %v5052_v23  ;;  %v7196_v62 = vpop.xlane.xlu0 %3481 }
 0x31e   : > { %vm3544_vm8 = vweird.f32 %v7196_v62 }
 0x31f   : > { %v2279_v1 = vrot.slane %v5054_v53, 4  ;;  %v2282_v13 = vsel %vm499_vm1, %v5054_v53, %v2281_v63  ;;  %v2391_v18 = vrot.slane %v5053_v40, 4  ;;  %v2394_v47 = vsel %vm499_vm1, %v5053_v40, %v2393_v22 }
 0x320   : > { %v2290_v35 = vperm.slane %v2282_v13, %v5534_v37  ;;  %v2402_v6 = vperm.slane %v2394_v47, %v5534_v37  ;;  %v7180_v20 = vpop.xlane.xlu2 %3484  ;;  %v2457_v63 = vrot.slane %v7170_v43, 4  ;;  %v2465_v47 = vrot.slane %v2426_v52, 4 }
 0x321   : > { %v2280_v26 = vsel %vm499_vm1, %v2279_v1, %v5044_v45  ;;  %v2392_v39 = vsel %vm499_vm1, %v2391_v18, %v5043_v8  ;;  %5088 = vrcp.f32 %v7180_v20  ;;  %v7199_v8 = vperm.slane %v2416_v11, %v5556_v60 }
 0x322   : > { %v2286_v4 = vperm.slane %v2280_v26, %v5534_v37  ;;  %v2398_v61 = vperm.slane %v2392_v39, %v5534_v37  ;;  %v2327_v7 = vrot.slane %v2290_v35, 4  ;;  %v2330_v45 = vsel %vm499_vm1, %v2290_v35, %v2329_v28 }
 0x323   : > { %v2439_v41 = vrot.slane %v2402_v6, 4  ;;  %v2442_v57 = vsel %vm499_vm1, %v2402_v6, %v2441_v42  ;;  %v2338_v22 = vperm.slane %v2330_v45, %v5556_v60  ;;  %v2461_v1 = vrot.slane %v7199_v8, 4 }
 0x324   : > { %v2315_v27 = vrot.slane %v2286_v4, 4  ;;  %v2427_v55 = vrot.slane %v2398_v61, 4  ;;  %v2318_v23 = vsel %vm499_vm1, %v2286_v4, %v2317_v54  ;;  %v2328_v11 = vsel %vm499_vm1, %v2327_v7, %v2278_v30 }
 0x325   : > { %v2430_v50 = vsel %vm499_vm1, %v2398_v61, %v2429_v24  ;;  %v2440_v13 = vsel %vm499_vm1, %v2439_v41, %v2390_v59  ;;  %v2450_v18 = vperm.slane %v2442_v57, %v5556_v60  ;;  %v7216_v28 = vperm.slane %v2318_v23, %v5556_v60  ;;  %v7241_v24 = vpop.xlane.xlu0 %3496 }
 0x326   : > { %v2316_v40 = vsel %vm499_vm1, %v2315_v27, %v2274_v19  ;;  %v2428_v35 = vsel %vm499_vm1, %v2427_v55, %v2386_v34  ;;  %v7224_v6 = vperm.slane %v2328_v11, %v5556_v60  ;;  %v2351_v26 = vrot.slane %v2338_v22, 4 }
 0x327   : > { %v5089_v31 = vpop.eup %5088  ;;  %v7221_v30 = vperm.slane %v2316_v40, %v5556_v60  ;;  %v2438_v39 = vperm.slane %v2430_v50, %v5556_v60  ;;  %v2446_v4 = vperm.slane %v2440_v13, %v5556_v60  ;;  %v2463_v61 = vrot.slane %v2450_v18, 4 }
 0x328   : > { %v3554_v19 = vmul.f32 %v5089_v31, %v7180_v20  ;;  %v7227_v59 = vpop.xlane.xlu2 %3499  ;;  %vm3558_vm4 = vweird.f32 %v7180_v20  ;;  %v7234_v34 = vsel %vm499_vm1, %v2338_v22, %v2353_v29  ;;  %v2434_v7 = vperm.slane %v2428_v35, %v5556_v60 }
 0x329   : > { %v3562_v45 = vand.u32 2147483647, %v7180_v20  ;;  %v3564_v54 = vand.u32 2147483648, %v7180_v20  ;;  %v2343_v27 = vrot.slane %v7216_v28, 4  ;;  %vm3559_vm5 = vweird.f32 %v5089_v31 }
 0x32a   : > { %v3555_v42 = vsub.f32 1.0, %v3554_v19  ;;  %5090 = vrcp.f32 %v7227_v59  ;;  %v2339_v55 = vrot.slane %v7221_v30, 4  ;;  %v7247_v29 = vsel %vm499_vm1, %v2351_v26, %v7149_v2  ;;  %vm3560_vm6 = vmor %vm3558_vm4, %vm3559_vm5 }
 0x32b   : > { %v2455_v23 = vrot.slane %v2438_v39, 4  ;;  %v2459_v22 = vrot.slane %v2446_v4, 4  ;;  %v7250_v40 = vsel %vm499_vm1, %v2463_v61, %v2426_v52  ;;  %5092 = vrcp.f32 %v7196_v62 }
 0x32c   : > { %v3556_v41 = vmul.f32 %v5089_v31, %v3555_v42  ;;  %v2451_v50 = vrot.slane %v2434_v7, 4  ;;  %v7254_v13 = vsel %vm499_vm1, %v2450_v18, %v2465_v47  ;;  %v3565_v35 = vor.u32 1.1754944e-38, %v3564_v54 }
 0x32d   : > { %5094 = vrcp.f32 %v7241_v24  ;;  %vm3563_vm7 = vcmp.eq.f32.partialorder %v3562_v45, 8.507059e+37  ;;  %v7263_v52 = vsel %vm499_vm1, %v2455_v23, %v7170_v43  ;;  %v7266_v61 = vsel %vm499_vm1, %v2438_v39, %v2457_v63 }
 0x32e   : > { %v3557_v11 = vadd.f32 %v5089_v31, %v3556_v41  ;;  %v2827_v18 = vrot.slane %v7250_v40, 4  ;;  %v2839_v42 = vrot.slane %v7254_v13, 4  ;;  %v3634_v54 = vand.u32 2147483648, %v7227_v59 }
 0x32f   : > { %v3632_v63 = vand.u32 2147483647, %v7227_v59  ;;  %v7283_v39 = vsel %vm499_vm1, %v2451_v50, %v7193_v25  ;;  %v7286_v45 = vsel %vm499_vm1, %v2434_v7, %v2453_v38  ;;  %v7302_v38 = vsel %vm499_vm1, %v2446_v4, %v2461_v1 }
 0x330   : > { %v3561_v26 = vsel %vm3560_vm6, %v5089_v31, %v3557_v11  ;;  %v7269_v47 = vpop.eup %5090  ;;  %v7276_v31 = vsel %vm499_vm1, %v2459_v22, %v7199_v8  ;;  %v3550_v11 = vand.u32 2147483648, %v7196_v62  ;;  %v2803_v22 = vrot.slane %v7263_v52, 4 }
 0x331   : > { %v3566_v20 = vsel %vm3563_vm7, %v3565_v35, %v3561_v26  ;;  %v3624_v43 = vmul.f32 %v7269_v47, %v7227_v59  ;;  %v7288_v23 = vpop.eup %5092  ;;  %v2815_v35 = vrot.slane %v7266_v61, 4  ;;  %v2828_v7 = vsel %vm499_vm1, %v2827_v18, %v7276_v31 }
 0x332   : > { %v3751_v41 = vmul.f32 %v7043_v33, %v3566_v20  ;;  %v3548_v33 = vand.u32 2147483647, %v7196_v62  ;;  %v3540_v25 = vmul.f32 %v7288_v23, %v7196_v62  ;;  %v7306_v50 = vor.u32 1.1754944e-38, %v3634_v54 }
 0x333   : > { %v7295_v26 = vpop.eup %5094  ;;  %v3625_v20 = vsub.f32 1.0, %v3624_v43  ;;  %v2804_v43 = vsel %vm499_vm1, %v2803_v22, %v7283_v39  ;;  %v2816_v19 = vsel %vm499_vm1, %v2815_v35, %v7286_v45  ;;  %vm3628_vm9 = vweird.f32 %v7227_v59 }
 0x334   : > { %4880 = vmatmul.msk.f32.vlgmr.msra.gmra.mxu0 %vm3380_vm3, %v3751_v41  ;;  %v3610_v41 = vmul.f32 %v7295_v26, %v7241_v24  ;;  %v3541_v8 = vsub.f32 1.0, %v3540_v25  ;;  %v3618_v1 = vand.u32 2147483647, %v7241_v24  ;;  %v3620_v4 = vand.u32 2147483648, %v7241_v24 }
 0x335   : > { %v7319_v18 = vperm.slane %v2804_v43, %v5534_v37  ;;  %v3551_v54 = vor.u32 1.1754944e-38, %v3550_v11  ;;  %vm3614_vm10 = vweird.f32 %v7241_v24  ;;  %v7323_v53 = vperm.slane %v2828_v7, %v5534_v37 }
 0x336   : > { %v3611_v2 = vsub.f32 1.0, %v3610_v41  ;;  %v2840_v22 = vsel %vm499_vm1, %v2839_v42, %v7302_v38  ;;  %v3626_v35 = vmul.f32 %v7269_v47, %v3625_v20  ;;  %vm3629_vm11 = vweird.f32 %v7269_v47 }
 0x337   : > { %v3542_v25 = vmul.f32 %v7288_v23, %v3541_v8  ;;  %v7331_v36 = vperm.slane %v2816_v19, %v5534_v37  ;;  %v7335_v41 = vperm.slane %v2840_v22, %v5534_v37  ;;  %v2853_v7 = vrot.slane %v7319_v18, 4  ;;  %vm7418_vm6 = vmor %vm3628_vm9, %vm3629_vm11  ;;  %v7450_v19 = vpop.xlane.xlu0 %3487 }
 0x338   : > { %v3612_v11 = vmul.f32 %v7295_v26, %v3611_v2  ;;  %v2877_v43 = vrot.slane %v7323_v53, 4  ;;  %vm3545_vm12 = vweird.f32 %v7288_v23  ;;  %vm7340_vm13 = vcmp.eq.f32.partialorder %v3548_v33, 8.507059e+37 }
 0x339   : > { %vm3615_vm14 = vweird.f32 %v7295_v26  ;;  %v3621_v20 = vor.u32 1.1754944e-38, %v3620_v4  ;;  %vm7346_vm15 = vcmp.eq.f32.partialorder %v3632_v63, 8.507059e+37  ;;  %v3543_v8 = vadd.f32 %v7288_v23, %v3542_v25  ;;  %vm7401_vm5 = vmor %vm3544_vm8, %vm3545_vm12 }
 0x33a   : > { %vm7351_vm4 = vcmp.eq.f32.partialorder %v3618_v1, 8.507059e+37  ;;  %v2854_v33 = vsel %vm499_vm1, %v7331_v36, %v2853_v7  ;;  %v2878_v57 = vsel %vm499_vm1, %v7335_v41, %v2877_v43  ;;  %v7363_v63 = vsel %vm499_vm1, %v2343_v27, %v7156_v32  ;;  %vm7437_vm7 = vmor %vm3614_vm10, %vm3615_vm14 }
 0x33b   : > { %v3627_v4 = vadd.f32 %v7269_v47, %v3626_v35  ;;  %v7367_v25 = vperm.slane %v2854_v33, %v5556_v60  ;;  %v7370_v1 = vperm.slane %v2878_v57, %v5556_v60  ;;  %v7376_v7 = vsel %vm499_vm1, %v7216_v28, %v2345_v15 }
 0x33c   : > { %v3613_v43 = vadd.f32 %v7295_v26, %v3612_v11  ;;  %v7383_v27 = vsel %vm499_vm1, %v2339_v55, %v7187_v44  ;;  %v8200_v35 = vrot.slane %v7224_v6, 4  ;;  %v8201_v32 = vrot.slane %v7160_v49, 4  ;;  %v7431_v55 = vpop.xlane.xlu2 %3493 }
 0x33d   : > { %v2903_v11 = vrot.slane %v7370_v1, 4  ;;  %v8204_v33 = vrot.slane %v7187_v44, 4  ;;  %v3631_v24 = vsel %vm7418_vm6, %v7269_v47, %v3627_v4  ;;  %v2841_v51 = vrot.slane %v7302_v38, 4 }
 0x33e   : > { %v7389_v57 = vsel %vm499_vm1, %v8200_v35, %v7160_v49  ;;  %v7395_v15 = vsel %vm499_vm1, %v7224_v6, %v8201_v32  ;;  %v2691_v6 = vrot.slane %v7363_v63, 4  ;;  %v3547_v35 = vsel %vm7401_vm5, %v7288_v23, %v3543_v8 }
 0x33f   : > { %v7411_v49 = vsel %vm499_vm1, %v7221_v30, %v8204_v33  ;;  %v2703_v32 = vrot.slane %v7376_v7, 4  ;;  %v8207_v30 = vrot.slane %v7247_v29, 4  ;;  %v2904_v23 = vsel %vm499_vm1, %v2903_v11, %v7367_v25 }
 0x340   : > { %v2692_v8 = vsel %vm499_vm1, %v2691_v6, %v7383_v27  ;;  %v3617_v11 = vsel %vm7437_vm7, %v7295_v26, %v3613_v43  ;;  %4012 = vmatpush.msra.mxu0 %v2904_v23  ;;  %5096 = vrcp.f32 %v7431_v55  ;;  %v3552_v47 = vsel %vm7340_vm13, %v3551_v54, %v3547_v35 }
 0x341   : > { %v2716_v33 = vsel %vm499_vm1, %v8207_v30, %v7389_v57  ;;  %v8210_v30 = vrot.slane %v7234_v34, 4  ;;  %v2698_v6 = vperm.slane %v2692_v8, %v5534_v37  ;;  %5098 = vrcp.f32 %v7450_v19 }
 0x342   : > { %v2722_v28 = vperm.slane %v2716_v33, %v5534_v37  ;;  %v2704_v33 = vsel %vm499_vm1, %v2703_v32, %v7411_v49  ;;  %v7471_v26 = vsel %vm7346_vm15, %v7306_v50, %v3631_v24  ;;  %v3622_v43 = vsel %vm7351_vm4, %v3621_v20, %v3617_v11 }
 0x343   : > { %v2728_v44 = vsel %vm499_vm1, %v8210_v30, %v7395_v15  ;;  %v2710_v4 = vperm.slane %v2704_v33, %v5534_v37  ;;  %v2741_v62 = vrot.slane %v2698_v6, 4  ;;  %v2705_v42 = vrot.slane %v7411_v49, 4 }
 0x344   : > { %v2734_v30 = vperm.slane %v2728_v44, %v5534_v37  ;;  %v2765_v16 = vrot.slane %v2722_v28, 4  ;;  %v2693_v44 = vrot.slane %v7383_v27, 4  ;;  %v3604_v20 = vand.u32 2147483647, %v7431_v55 }
 0x345   : > { %v2742_v35 = vsel %vm499_vm1, %v2710_v4, %v2741_v62  ;;  %vm3600_vm8 = vweird.f32 %v7431_v55  ;;  %v2851_v8 = vrot.slane %v7331_v36, 4  ;;  %v2875_v24 = vrot.slane %v7335_v41, 4 }
 0x346   : > { %v2766_v32 = vsel %vm499_vm1, %v2734_v30, %v2765_v16  ;;  %v7487_v2 = vperm.slane %v2742_v35, %v5556_v60  ;;  %v3750_v16 = vmul.f32 %v7049_v3, %v3552_v47  ;;  %v2739_v11 = vrot.slane %v2710_v4, 4  ;;  %v7495_v33 = vpop.eup %5096 }
 0x347   : > { %v7481_v59 = vperm.slane %v2766_v32, %v5556_v60  ;;  %v7483_v23 = vpop.xlane.xlu1 %3478  ;;  %v3606_v62 = vand.u32 2147483648, %v7431_v55  ;;  %v2763_v32 = vrot.slane %v2734_v30, 4  ;;  %v3755_v35 = vmul.f32 %v7056_v48, %v3622_v43  ;;  %v5099_v3 = vpop.eup %5098 }
 0x348   : > { %4879 = vmatmul.msk.f32.vlgmr.msrb.gmra.mxu3 %vm3380_vm3, %v3750_v16  ;;  %5100 = vrcp.f32 %v7483_v23  ;;  %v3596_v36 = vmul.f32 %v7495_v33, %v7431_v55  ;;  %vm3572_vm9 = vweird.f32 %v7450_v19  ;;  %v2852_v41 = vsel %vm499_vm1, %v2851_v8, %v7319_v18 }
 0x349   : > { %v2791_v22 = vrot.slane %v7481_v59, 4  ;;  %v3568_v4 = vmul.f32 %v5099_v3, %v7450_v19  ;;  %v3576_v30 = vand.u32 2147483647, %v7450_v19  ;;  %v7511_v48 = vperm.slane %v2852_v41, %v5556_v60  ;;  %4884 = vmatmul.msk.f32.vlgmr.msrb.gmra.mxu0 %vm3380_vm3, %v3755_v35 }
 0x34a   : > { %v2876_v43 = vsel %vm499_vm1, %v2875_v24, %v7323_v53  ;;  %v3597_v16 = vsub.f32 1.0, %v3596_v36  ;;  %v2740_v50 = vsel %vm499_vm1, %v2739_v11, %v2698_v6  ;;  %v2764_v54 = vsel %vm499_vm1, %v2763_v32, %v2722_v28 }
 0x34b   : > { %v2792_v47 = vsel %vm499_vm1, %v2791_v22, %v7487_v2  ;;  %v3578_v22 = vand.u32 2147483648, %v7450_v19  ;;  %vm7519_vm10 = vcmp.eq.f32.partialorder %v3604_v20, 8.507059e+37  ;;  %v3569_v8 = vsub.f32 1.0, %v3568_v4 }
 0x34c   : > { %4013 = vmatpush.msra.mxu0 %v2792_v47  ;;  %v7524_v47 = vperm.slane %v2876_v43, %v5556_v60  ;;  %v2901_v41 = vrot.slane %v7511_v48, 4  ;;  %v7528_v53 = vperm.slane %v2740_v50, %v5556_v60  ;;  %v3598_v24 = vmul.f32 %v7495_v33, %v3597_v16 }
 0x34d   : > { %vm3601_vm11 = vweird.f32 %v7495_v33  ;;  %vm3573_vm12 = vweird.f32 %v5099_v3  ;;  %v8213_v28 = vrot.slane %v7283_v39, 4  ;;  %v3570_v11 = vmul.f32 %v5099_v3, %v3569_v8 }
 0x34e   : > { %v7536_v20 = vpop.eup %5100  ;;  %v2902_v32 = vsel %vm499_vm1, %v7524_v47, %v2901_v41  ;;  %v7541_v35 = vperm.slane %v2764_v54, %v5556_v60  ;;  %v2789_v50 = vrot.slane %v7528_v53, 4  ;;  %v3599_v36 = vadd.f32 %v7495_v33, %v3598_v24  ;;  %vm7552_vm13 = vmor %vm3600_vm8, %vm3601_vm11 }
 0x34f   : > { %v2806_v6 = vsel %vm499_vm1, %v7263_v52, %v8213_v28  ;;  %v3607_v4 = vor.u32 1.1754944e-38, %v3606_v62  ;;  %3989 = vmatpush.msrb.mxu3 %v2902_v32  ;;  %v3526_v39 = vmul.f32 %v7536_v20, %v7483_v23  ;;  %v3571_v54 = vadd.f32 %v5099_v3, %v3570_v11  ;;  %vm7572_vm15 = vmor %vm3572_vm9, %vm3573_vm12 }
 0x350   : > { %v7548_v52 = vperm.slane %v2806_v6, %v5534_v37  ;;  %vm7556_vm14 = vcmp.eq.f32.partialorder %v3576_v30, 8.507059e+37  ;;  %v2790_v62 = vsel %vm499_vm1, %v7541_v35, %v2789_v50  ;;  %v8218_v8 = vrot.slane %v7286_v45, 4 }
 0x351   : > { %v3603_v55 = vsel %vm7552_vm13, %v7495_v33, %v3599_v36  ;;  %v3579_v24 = vor.u32 1.1754944e-38, %v3578_v22  ;;  %3990 = vmatpush.msrb.mxu3 %v2790_v62  ;;  %v3534_v28 = vand.u32 2147483647, %v7483_v23  ;;  %v8221_v45 = vrot.slane %v7276_v31, 4  ;;  %v7604_v36 = vpop.xlane.xlu1 %3490 }
 0x352   : > { %v2818_v41 = vsel %vm499_vm1, %v7266_v61, %v8218_v8  ;;  %v3575_v6 = vsel %vm7572_vm15, %v5099_v3, %v3571_v54  ;;  %v3527_v33 = vsub.f32 1.0, %v3526_v39  ;;  %v2842_v19 = vsel %vm499_vm1, %v7254_v13, %v2841_v51 }
 0x353   : > { %v2830_v61 = vsel %vm499_vm1, %v7250_v40, %v8221_v45  ;;  %v3536_v22 = vand.u32 2147483648, %v7483_v23  ;;  %v2826_v32 = vperm.slane %v2818_v41, %v5534_v37  ;;  %v2850_v31 = vperm.slane %v2842_v19, %v5534_v37 }
 0x354   : > { %v2838_v11 = vperm.slane %v2830_v61, %v5534_v37  ;;  %v2865_v50 = vrot.slane %v7548_v52, 4  ;;  %v2694_v3 = vsel %vm499_vm1, %v7363_v63, %v2693_v44  ;;  %v2706_v38 = vsel %vm499_vm1, %v7376_v7, %v2705_v42 }
 0x355   : > { %v8222_v51 = vrot.slane %v7389_v57, 4  ;;  %v3608_v39 = vsel %vm7519_vm10, %v3607_v4, %v3603_v55  ;;  %v3580_v27 = vsel %vm7556_vm14, %v3579_v24, %v3575_v6  ;;  %v2702_v49 = vperm.slane %v2694_v3, %v5534_v37 }
 0x356   : > { %v2889_v40 = vrot.slane %v2838_v11, 4  ;;  %v2866_v63 = vsel %vm499_vm1, %v2826_v32, %v2865_v50  ;;  %v3528_v44 = vmul.f32 %v7536_v20, %v3527_v33  ;;  %v2714_v43 = vperm.slane %v2706_v38, %v5534_v37 }
 0x357   : > { %v2718_v13 = vsel %vm499_vm1, %v7247_v29, %v8222_v51  ;;  %v8223_v29 = vrot.slane %v7395_v15, 4  ;;  %v7620_v18 = vperm.slane %v2866_v63, %v5556_v60  ;;  %v2753_v54 = vrot.slane %v2702_v49, 4 }
 0x358   : > { %v2890_v7 = vsel %vm499_vm1, %v2850_v31, %v2889_v40  ;;  %v2726_v57 = vperm.slane %v2718_v13, %v5534_v37  ;;  %v3752_v8 = vmul.f32 %v7066_v0, %v3580_v27  ;;  %v3754_v41 = vmul.f32 %v7062_v56, %v3608_v39  ;;  %v7676_v13 = vpop.xlane.xlu2 %3508 }
 0x359   : > { %v2730_v42 = vsel %vm499_vm1, %v7234_v34, %v8223_v29  ;;  %v7623_v4 = vperm.slane %v2890_v7, %v5556_v60  ;;  %vm3530_vm4 = vweird.f32 %v7483_v23  ;;  %v2754_v15 = vsel %vm499_vm1, %v2714_v43, %v2753_v54  ;;  %v7674_v51 = vpop.xlane.xlu1 %3502 }
 0x35a   : > { %v2738_v16 = vperm.slane %v2730_v42, %v5534_v37  ;;  %v2777_v62 = vrot.slane %v2726_v57, 4  ;;  %5102 = vrcp.f32 %v7604_v36  ;;  %v3529_v55 = vadd.f32 %v7536_v20, %v3528_v44  ;;  %4881 = vmatmul.msk.f32.vlgmr.msra.gmra.mxu1 %vm3380_vm3, %v3752_v8  ;;  %4883 = vmatmul.msk.f32.vlgmr.msra.gmra.mxu3 %vm3380_vm3, %v3754_v41 }
 0x35b   : > { %v2911_v34 = vrot.slane %v7623_v4, 4  ;;  %vm3531_vm5 = vweird.f32 %v7536_v20  ;;  %v7636_v30 = vperm.slane %v2754_v15, %v5556_v60  ;;  %v2905_v61 = vrot.slane %v7367_v25, 4 }
 0x35c   : > { %v2778_v24 = vsel %vm499_vm1, %v2738_v16, %v2777_v62  ;;  %v7641_v56 = vpop.xlane.xlu0 %3514  ;;  %v2863_v6 = vrot.slane %v2826_v32, 4  ;;  %vm7649_vm6 = vcmp.eq.f32.partialorder %v3534_v28, 8.507059e+37  ;;  %v3537_v19 = vor.u32 1.1754944e-38, %v3536_v22  ;;  %vm7658_vm7 = vmor %vm3530_vm4, %vm3531_vm5 }
 0x35d   : > { %v2912_v0 = vsel %vm499_vm1, %v2911_v34, %v7620_v18  ;;  %v7646_v45 = vperm.slane %v2778_v24, %v5556_v60  ;;  %v2887_v50 = vrot.slane %v2850_v31, 4  ;;  %v2793_v40 = vrot.slane %v7487_v2, 4 }
 0x35e   : > { %4104 = vmatpush.msrb.mxu0 %v2912_v0  ;;  %v2906_v28 = vsel %vm499_vm1, %v7370_v1, %v2905_v61  ;;  %v2864_v22 = vsel %vm499_vm1, %v2863_v6, %v7548_v52  ;;  %v2751_v32 = vrot.slane %v2714_v43, 4  ;;  %v3533_v2 = vsel %vm7658_vm7, %v7536_v20, %v3529_v55 }
 0x35f   : > { %v2799_v25 = vrot.slane %v7646_v45, 4  ;;  %4035 = vmatpush.msra.mxu1 %v2906_v28  ;;  %v7671_v23 = vperm.slane %v2864_v22, %v5556_v60  ;;  %v2888_v31 = vsel %vm499_vm1, %v2887_v50, %v2838_v11  ;;  %v2775_v38 = vrot.slane %v2738_v16, 4 }
 0x360   : > { %v5103_v1 = vpop.eup %5102  ;;  %v7681_v39 = vperm.slane %v2888_v31, %v5556_v60  ;;  %v2794_v20 = vsel %vm499_vm1, %v7481_v59, %v2793_v40  ;;  %v2752_v27 = vsel %vm499_vm1, %v2751_v32, %v2702_v49  ;;  %v3756_v7 = vmul.f32 %v7054_v9, %v7471_v26  ;;  %v7728_v6 = vpop.xlane.xlu2 %3511 }
 0x361   : > { %v2800_v52 = vsel %vm499_vm1, %v2799_v25, %v7636_v30  ;;  %v3582_v11 = vmul.f32 %v5103_v1, %v7604_v36  ;;  %v2909_v63 = vrot.slane %v7671_v23, 4  ;;  %4036 = vmatpush.msra.mxu1 %v2794_v20  ;;  %v7689_v44 = vperm.slane %v2752_v27, %v5556_v60 }
 0x362   : > { %4105 = vmatpush.msrb.mxu0 %v2800_v52  ;;  %v3538_v29 = vsel %vm7649_vm6, %v3537_v19, %v3533_v2  ;;  %v3590_v42 = vand.u32 2147483647, %v7604_v36  ;;  %v2776_v59 = vsel %vm499_vm1, %v2775_v38, %v2726_v57  ;;  %5104 = vrcp.f32 %v7674_v51  ;;  %4885 = vmatmul.msk.f32.vlgmr.msrb.gmra.mxu1 %vm3380_vm3, %v3756_v7 }
 0x363   : > { %v3583_v49 = vsub.f32 1.0, %v3582_v11  ;;  %v2910_v43 = vsel %vm499_vm1, %v7681_v39, %v2909_v63  ;;  %v7701_v54 = vperm.slane %v2776_v59, %v5556_v60  ;;  %v2797_v16 = vrot.slane %v7689_v44, 4 }
 0x364   : > { %vm3587_vm8 = vweird.f32 %v5103_v1  ;;  %v3592_v9 = vand.u32 2147483648, %v7604_v36  ;;  %4081 = vmatpush.msra.mxu3 %v2910_v43  ;;  %v2913_v26 = vrot.slane %v7620_v18, 4  ;;  %v2801_v57 = vrot.slane %v7636_v30, 4  ;;  %v7708_v62 = vpop.xlane.xlu0 %3505 }
 0x365   : > { %v3584_v8 = vmul.f32 %v5103_v1, %v3583_v49  ;;  %v2798_v41 = vsel %vm499_vm1, %v7701_v54, %v2797_v16  ;;  %v3749_v34 = vmul.f32 %v7072_v5, %v3538_v29  ;;  %v2899_v15 = vrot.slane %v7524_v47, 4 }
 0x366   : > { %4082 = vmatpush.msra.mxu3 %v2798_v41  ;;  %v3646_v55 = vand.u32 2147483647, %v7674_v51  ;;  %v2914_v24 = vsel %vm499_vm1, %v7623_v4, %v2913_v26  ;;  %5106 = vrcp.f32 %v7676_v13  ;;  %vm3586_vm9 = vweird.f32 %v7604_v36 }
 0x367   : > { %v3585_v18 = vadd.f32 %v5103_v1, %v3584_v8  ;;  %4127 = vmatpush.msrb.mxu1 %v2914_v24  ;;  %4878 = vmatmul.msk.f32.vlgmr.msrb.gmra.mxu2 %vm3380_vm3, %v3749_v34  ;;  %v2900_v30 = vsel %vm499_vm1, %v2899_v15, %v7511_v48  ;;  %vm3588_vm10 = vmor %vm3586_vm9, %vm3587_vm8  ;;  %v3593_v47 = vor.u32 1.1754944e-38, %v3592_v9  ;;  %v3648_v0 = vand.u32 2147483648, %v7674_v51 }
 0x368   : > { %v5105_v5 = vpop.eup %5104  ;;  %v2802_v4 = vsel %vm499_vm1, %v7646_v45, %v2801_v57  ;;  %3966 = vmatpush.msrb.mxu2 %v2900_v30  ;;  %5108 = vrcp.f32 %v7641_v56  ;;  %vm3591_vm11 = vcmp.eq.f32.partialorder %v3590_v42, 8.507059e+37  ;;  %vm3642_vm12 = vweird.f32 %v7674_v51  ;;  %v7784_v34 = vpop.xlane.xlu2 %3520 }
 0x369   : > { %v3589_v61 = vsel %vm3588_vm10, %v5103_v1, %v3585_v18  ;;  %v3638_v36 = vmul.f32 %v5105_v5, %v7674_v51  ;;  %4128 = vmatpush.msrb.mxu1 %v2802_v4  ;;  %vm7731_vm13 = vcmp.eq.f32.partialorder %v3646_v55, 8.507059e+37  ;;  %v2787_v45 = vrot.slane %v7541_v35, 4 }
 0x36a   : > { %v3594_v48 = vsel %vm3591_vm11, %v3593_v47, %v3589_v61  ;;  %v2907_v40 = vrot.slane %v7681_v39, 4  ;;  %v3649_v25 = vor.u32 1.1754944e-38, %v3648_v0  ;;  %v3674_v28 = vand.u32 2147483647, %v7676_v13 }
 0x36b   : > { %v3639_v19 = vsub.f32 1.0, %v3638_v36  ;;  %v3753_v50 = vmul.f32 %v7077_v21, %v3594_v48  ;;  %v3676_v22 = vand.u32 2147483648, %v7676_v13  ;;  %5110 = vrcp.f32 %v7728_v6 }
 0x36c   : > { %v5107_v3 = vpop.eup %5106  ;;  %vm3643_vm14 = vweird.f32 %v5105_v5  ;;  %v2788_v31 = vsel %vm499_vm1, %v2787_v45, %v7528_v53  ;;  %vm3670_vm15 = vweird.f32 %v7676_v13  ;;  %v3702_v21 = vand.u32 2147483647, %v7641_v56  ;;  %v7750_v1 = vpop.xlane.xlu0 %3517 }
 0x36d   : > { %v3640_v32 = vmul.f32 %v5105_v5, %v3639_v19  ;;  %v3666_v2 = vmul.f32 %v5107_v3, %v7676_v13  ;;  %v3704_v38 = vand.u32 2147483648, %v7641_v56  ;;  %3967 = vmatpush.msrb.mxu2 %v2788_v31  ;;  %5112 = vrcp.f32 %v7708_v62  ;;  %vm3644_vm4 = vmor %vm3642_vm12, %vm3643_vm14 }
 0x36e   : > { %v7744_v35 = vpop.eup %5108  ;;  %v2908_v53 = vsel %vm499_vm1, %v2907_v40, %v7671_v23  ;;  %vm3671_vm5 = vweird.f32 %v5107_v3  ;;  %vm7760_vm6 = vcmp.eq.f32.partialorder %v3674_v28, 8.507059e+37  ;;  %v3677_v11 = vor.u32 1.1754944e-38, %v3676_v22 }
 0x36f   : > { %v3641_v52 = vadd.f32 %v5105_v5, %v3640_v32  ;;  %v3667_v39 = vsub.f32 1.0, %v3666_v2  ;;  %v3694_v20 = vmul.f32 %v7744_v35, %v7641_v56  ;;  %4882 = vmatmul.msk.f32.vlgmr.msra.gmra.mxu2 %vm3380_vm3, %v3753_v50  ;;  %vm3698_vm7 = vweird.f32 %v7641_v56  ;;  %vm3672_vm10 = vmor %vm3670_vm15, %vm3671_vm5 }
 0x370   : > { %4058 = vmatpush.msra.mxu2 %v2908_v53  ;;  %v2795_v42 = vrot.slane %v7701_v54, 4  ;;  %vm7768_vm8 = vcmp.eq.f32.partialorder %v3702_v21, 8.507059e+37  ;;  %v3705_v49 = vor.u32 1.1754944e-38, %v3704_v38  ;;  %5114 = vrcp.f32 %v7750_v1 }
 0x371   : > { %v3645_v63 = vsel %vm3644_vm4, %v5105_v5, %v3641_v52  ;;  %v3668_v7 = vmul.f32 %v5107_v3, %v3667_v39  ;;  %v3695_v29 = vsub.f32 1.0, %v3694_v20  ;;  %v5111_v59 = vpop.eup %5110  ;;  %vm3699_vm9 = vweird.f32 %v7744_v35 }
 0x372   : > { %v3650_v23 = vsel %vm7731_vm13, %v3649_v25, %v3645_v63  ;;  %v3680_v9 = vmul.f32 %v5111_v59, %v7728_v6  ;;  %v3688_v54 = vand.u32 2147483647, %v7728_v6  ;;  %v3690_v57 = vand.u32 2147483648, %v7728_v6  ;;  %vm7794_vm11 = vmor %vm3698_vm7, %vm3699_vm9 }
 0x373   : > { %v3669_v43 = vadd.f32 %v5107_v3, %v3668_v7  ;;  %v3696_v16 = vmul.f32 %v7744_v35, %v3695_v29  ;;  %v5113_v26 = vpop.eup %5112  ;;  %v2796_v8 = vsel %vm499_vm1, %v2795_v42, %v7689_v44  ;;  %v3757_v41 = vmul.f32 %v7084_v58, %v3650_v23 }
 0x374   : > { %v3681_v24 = vsub.f32 1.0, %v3680_v9  ;;  %v3652_v18 = vmul.f32 %v5113_v26, %v7708_v62  ;;  %4059 = vmatpush.msra.mxu2 %v2796_v8  ;;  %vm3685_vm12 = vweird.f32 %v5111_v59  ;;  %v3660_v58 = vand.u32 2147483647, %v7708_v62  ;;  %v7811_v36 = vpop.xlane.xlu0 %3523 }
 0x375   : > { %v3673_v15 = vsel %vm3672_vm10, %v5107_v3, %v3669_v43  ;;  %v3697_v55 = vadd.f32 %v7744_v35, %v3696_v16  ;;  %v3662_v30 = vand.u32 2147483648, %v7708_v62  ;;  %5116 = vrcp.f32 %v7784_v34 }
 0x376   : > { %v3678_v13 = vsel %vm7760_vm6, %v3677_v11, %v3673_v15  ;;  %v3682_v47 = vmul.f32 %v5111_v59, %v3681_v24  ;;  %v3653_v0 = vsub.f32 1.0, %v3652_v18  ;;  %v5115_v56 = vpop.eup %5114  ;;  %vm3684_vm13 = vweird.f32 %v7728_v6 }
 0x377   : > { %v3701_v5 = vsel %vm7794_vm11, %v7744_v35, %v3697_v55  ;;  %4886 = vmatmul.msk.f32.vlgmr.msrb.gmra.mxu2 %vm3380_vm3, %v3757_v41  ;;  %vm7806_vm14 = vcmp.eq.f32.partialorder %v3688_v54, 8.507059e+37  ;;  %v3691_v61 = vor.u32 1.1754944e-38, %v3690_v57  ;;  %vm3656_vm15 = vweird.f32 %v7708_v62  ;;  %vm3686_vm5 = vmor %vm3684_vm13, %vm3685_vm12  ;;  %v8240_v54 = vld [vmem:[#allocation15_spill] sm:$0xff] }
 0x378   : > { %v3683_v48 = vadd.f32 %v5111_v59, %v3682_v47  ;;  %v3654_v33 = vmul.f32 %v5113_v26, %v3653_v0  ;;  %vm3657_vm4 = vweird.f32 %v5113_v26  ;;  %v3708_v19 = vmul.f32 %v5115_v56, %v7750_v1 }
 0x379   : > { %v3706_v45 = vsel %vm7768_vm8, %v3705_v49, %v3701_v5  ;;  %vm7817_vm6 = vcmp.eq.f32.partialorder %v3660_v58, 8.507059e+37  ;;  %v3663_v50 = vor.u32 1.1754944e-38, %v3662_v30  ;;  %v3759_v40 = vmul.f32 %v7087_v10, %v3678_v13  ;;  %vm3658_vm7 = vmor %vm3656_vm15, %vm3657_vm4 }
 0x37a   : > { %v3687_v3 = vsel %vm3686_vm5, %v5111_v59, %v3683_v48  ;;  %v3655_v25 = vadd.f32 %v5113_v26, %v3654_v33  ;;  %v3709_v28 = vsub.f32 1.0, %v3708_v19  ;;  %5118 = vrcp.f32 %v7811_v36 }
 0x37b   : > { %v3692_v22 = vsel %vm7806_vm14, %v3691_v61, %v3687_v3  ;;  %vm3713_vm8 = vweird.f32 %v5115_v56  ;;  %v3716_v32 = vand.u32 2147483647, %v7750_v1  ;;  %v3718_v2 = vand.u32 2147483648, %v7750_v1  ;;  %4888 = vmatmul.msk.f32.vlgmr.msra.gmra.mxu0 %vm3380_vm3, %v3759_v40  ;;  %v5117_v31 = vpop.eup %5116 }
 0x37c   : > { %v3659_v10 = vsel %vm3658_vm7, %v5113_v26, %v3655_v25  ;;  %v3710_v35 = vmul.f32 %v5115_v56, %v3709_v28  ;;  %v3761_v21 = vmul.f32 %v7094_v17, %v3706_v45  ;;  %v3760_v38 = vmul.f32 %v7099_v46, %v3692_v22 }
 0x37d   : > { %v3664_v52 = vsel %vm7817_vm6, %v3663_v50, %v3659_v10  ;;  %v3722_v62 = vmul.f32 %v5117_v31, %v7784_v34  ;;  %vm3712_vm9 = vweird.f32 %v7750_v1  ;;  %v3719_v53 = vor.u32 1.1754944e-38, %v3718_v2 }
 0x37e   : > { %v3711_v39 = vadd.f32 %v5115_v56, %v3710_v35  ;;  %v3758_v20 = vmul.f32 %v7103_v14, %v3664_v52  ;;  %4889 = vmatmul.msk.f32.vlgmr.msra.gmra.mxu1 %vm3380_vm3, %v3760_v38  ;;  %vm3714_vm10 = vmor %vm3712_vm9, %vm3713_vm8  ;;  %vm3717_vm11 = vcmp.eq.f32.partialorder %v3716_v32, 8.507059e+37  ;;  %v3730_v11 = vand.u32 2147483647, %v7784_v34 }
 0x37f   : > { %4890 = vmatmul.msk.f32.vlgmr.msra.gmra.mxu2 %vm3380_vm3, %v3761_v21  ;;  %v3723_v17 = vsub.f32 1.0, %v3722_v62  ;;  %v3732_v63 = vand.u32 2147483648, %v7784_v34  ;;  %vm3727_vm12 = vweird.f32 %v5117_v31  ;;  %vm3726_vm13 = vweird.f32 %v7784_v34  ;;  %v8241_v34 = vld [vmem:[#allocation14_spill] sm:$0xff] }
 0x380   : > { %v5119_v27 = vpop.eup %5118  ;;  %v3715_v46 = vsel %vm3714_vm10, %v5115_v56, %v3711_v39  ;;  %4887 = vmatmul.msk.f32.vlgmr.msrb.gmra.mxu3 %vm3380_vm3, %v3758_v20  ;;  %vm3728_vm14 = vmor %vm3726_vm13, %vm3727_vm12  ;;  %vm3731_vm15 = vcmp.eq.f32.partialorder %v3730_v11, 8.507059e+37  ;;  %v3746_v23 = vand.u32 2147483648, %v7811_v36  ;;  %v3744_v16 = vand.u32 2147483647, %v7811_v36 }
 0x381   : > { %v3720_v1 = vsel %vm3717_vm11, %v3719_v53, %v3715_v46  ;;  %v3724_v7 = vmul.f32 %v5117_v31, %v3723_v17  ;;  %v3736_v14 = vmul.f32 %v5119_v27, %v7811_v36  ;;  %v3733_v59 = vor.u32 1.1754944e-38, %v3732_v63 }
 0x382   : > { %v3762_v51 = vmul.f32 %v7112_v12, %v3720_v1  ;;  %vm3741_vm4 = vweird.f32 %v5119_v27  ;;  %vm3740_vm5 = vweird.f32 %v7811_v36  ;;  %v3747_v8 = vor.u32 1.1754944e-38, %v3746_v23 }
 0x383   : > { %v3725_v29 = vadd.f32 %v5117_v31, %v3724_v7  ;;  %v3737_v42 = vsub.f32 1.0, %v3736_v14  ;;  %vm3742_vm6 = vmor %vm3740_vm5, %vm3741_vm4  ;;  %vm3745_vm7 = vcmp.eq.f32.partialorder %v3744_v16, 8.507059e+37  ;;  %vm4639_vm8 = vcmask 64512  }
 0x384   : > { %vm4647_vm9 = vcmask 162816   ;;  %vm4650_vm10 = vcmask 195584   ;;  %vm4653_vm11 = vcmask 228352  }
 0x385   : > { %v3729_v49 = vsel %vm3728_vm14, %v5117_v31, %v3725_v29  ;;  %v3738_v43 = vmul.f32 %v5119_v27, %v3737_v42 }
 0x386   : > { %v3734_v9 = vsel %vm3731_vm15, %v3733_v59, %v3729_v49 }
 0x387   : > { %v3739_v26 = vadd.f32 %v5119_v27, %v3738_v43  ;;  %v3763_v57 = vmul.f32 %v8240_v54, %v3734_v9 }
 0x388   : > { %4891 = vmatmul.msk.f32.vlgmr.msra.gmra.mxu3 %vm3380_vm3, %v3762_v51 }
 0x389   : > { %v3743_v41 = vsel %vm3742_vm6, %v5119_v27, %v3739_v26  ;;  %4892 = vmatmul.msk.f32.vlgmr.msrb.gmra.mxu0 %vm3380_vm3, %v3763_v57 }
 0x38a   : > { %v3748_v12 = vsel %vm3745_vm7, %v3747_v8, %v3743_v41 }
 0x38b   : > { %v3764_v15 = vmul.f32 %v8241_v34, %v3748_v12 }
 0x38d   : > { %4893 = vmatmul.msk.f32.vlgmr.msrb.gmra.mxu1 %vm3380_vm3, %v3764_v15 }
 0x3b1   : > { %v3831_v13 = vpop.f32.mrf.mxu0 }
 0x3b2   : > { %v4133_v30 = vrot.slane %v3831_v13, 4 }
 0x3c6   : > { %v3923_v40 = vpop.f32.mrf.mxu0 }
 0x3c7   : > { %v4157_v2 = vrot.slane %v3923_v40, 4 }
 0x3cb   : > { %v3808_v24 = vpop.f32.mrf.mxu3 }
 0x3cc   : > { %v4147_v58 = vrot.slane %v3808_v24, 4 }
 0x3d7   : > { %v3854_v55 = vpop.f32.mrf.mxu1 }
 0x3d8   : > { %v4145_v18 = vrot.slane %v3854_v55, 4  ;;  %v4148_v56 = vsel %vm499_vm1, %v3854_v55, %v4147_v58 }
 0x3d9   : > { %v4156_v45 = vperm.slane %v4148_v56, %v5534_v37 }
 0x3da   : > { %v4146_v5 = vsel %vm499_vm1, %v4145_v18, %v3808_v24 }
 0x3db   : > { %v4152_v48 = vperm.slane %v4146_v5, %v5534_v37  ;;  %v4193_v31 = vrot.slane %v4156_v45, 4 }
 0x3dd   : > { %v3900_v47 = vpop.f32.mrf.mxu3  ;;  %v4181_v28 = vrot.slane %v4152_v48, 4 }
 0x3de   : > { %v4171_v33 = vrot.slane %v3900_v47, 4 }
 0x3df   : > { %v3946_v44 = vpop.f32.mrf.mxu1 }
 0x3e0   : > { %v4169_v0 = vrot.slane %v3946_v44, 4  ;;  %v4172_v22 = vsel %vm499_vm1, %v3946_v44, %v4171_v33 }
 0x3e1   : > { %v4180_v52 = vperm.slane %v4172_v22, %v5534_v37 }
 0x3e2   : > { %v4170_v6 = vsel %vm499_vm1, %v4169_v0, %v3900_v47 }
 0x3e3   : > { %v4176_v32 = vperm.slane %v4170_v6, %v5534_v37  ;;  %v4217_v29 = vrot.slane %v4180_v52, 4 }
 0x3e5   : > { %v4205_v20 = vrot.slane %v4176_v32, 4 }
 0x3ea   : > { %v3785_v4 = vpop.f32.mrf.mxu2 }
 0x3eb   : > { %v4134_v61 = vsel %vm499_vm1, %v4133_v30, %v3785_v4  ;;  %v4135_v36 = vrot.slane %v3785_v4, 4 }
 0x3ec   : > { %v4140_v19 = vperm.slane %v4134_v61, %v5534_v37 }
 0x3ed   : > { %v4136_v50 = vsel %vm499_vm1, %v3831_v13, %v4135_v36 }
 0x3ee   : > { %v4144_v3 = vperm.slane %v4136_v50, %v5534_v37  ;;  %v4183_v25 = vrot.slane %v4140_v19, 4  ;;  %v4182_v21 = vsel %vm499_vm1, %v4181_v28, %v4140_v19 }
 0x3ef   : > { %v4188_v46 = vperm.slane %v4182_v21, %v5556_v60 }
 0x3f0   : > { %v4184_v10 = vsel %vm499_vm1, %v4152_v48, %v4183_v25  ;;  %v4195_v35 = vrot.slane %v4144_v3, 4  ;;  %v4194_v62 = vsel %vm499_vm1, %v4193_v31, %v4144_v3 }
 0x3f1   : > { %v4192_v53 = vperm.slane %v4184_v10, %v5556_v60  ;;  %v4200_v63 = vperm.slane %v4194_v62, %v5556_v60  ;;  %v4231_v57 = vrot.slane %v4188_v46, 4 }
 0x3f2   : > { %v3877_v38 = vpop.f32.mrf.mxu2  ;;  %v4196_v11 = vsel %vm499_vm1, %v4156_v45, %v4195_v35 }
 0x3f3   : > { %v4158_v39 = vsel %vm499_vm1, %v4157_v2, %v3877_v38  ;;  %v4159_v17 = vrot.slane %v3877_v38, 4  ;;  %v4204_v23 = vperm.slane %v4196_v11, %v5556_v60  ;;  %v4235_v51 = vrot.slane %v4192_v53, 4 }
 0x3f4   : > { %v4164_v27 = vperm.slane %v4158_v39, %v5534_v37  ;;  %v4239_v8 = vrot.slane %v4200_v63, 4 }
 0x3f5   : > { %v4160_v1 = vsel %vm499_vm1, %v3923_v40, %v4159_v17  ;;  %v4243_v5 = vrot.slane %v4204_v23, 4 }
 0x3f6   : > { %v4206_v7 = vsel %vm499_vm1, %v4205_v20, %v4164_v27  ;;  %v4207_v14 = vrot.slane %v4164_v27, 4  ;;  %v4168_v42 = vperm.slane %v4160_v1, %v5534_v37 }
 0x3f7   : > { %v4212_v59 = vperm.slane %v4206_v7, %v5556_v60 }
 0x3f8   : > { %v4208_v49 = vsel %vm499_vm1, %v4176_v32, %v4207_v14  ;;  %v4218_v16 = vsel %vm499_vm1, %v4217_v29, %v4168_v42  ;;  %v4219_v9 = vrot.slane %v4168_v42, 4  ;;  %v4015_v54 = vpop.f32.mrf.mxu0 }
 0x3f9   : > { %v4216_v43 = vperm.slane %v4208_v49, %v5556_v60  ;;  %v4229_v26 = vrot.slane %v4212_v59, 4  ;;  %v4224_v41 = vperm.slane %v4218_v16, %v5556_v60  ;;  %v4245_v12 = vrot.slane %v4015_v54, 4 }
 0x3fa   : > { %v3969_v34 = vpop.f32.mrf.mxu2  ;;  %v4220_v15 = vsel %vm499_vm1, %v4180_v52, %v4219_v9  ;;  %v4232_v44 = vsel %vm499_vm1, %v4212_v59, %v4231_v57 }
 0x3fb   : > { %v4230_v55 = vsel %vm499_vm1, %v4229_v26, %v4188_v46  ;;  %v4233_v24 = vrot.slane %v4216_v43, 4  ;;  %v4236_v18 = vsel %vm499_vm1, %v4216_v43, %v4235_v51  ;;  %v4228_v13 = vperm.slane %v4220_v15, %v5556_v60  ;;  %v4038_v50 = vpop.f32.mrf.mxu1 }
 0x3fc   : > { %v4237_v58 = vrot.slane %v4224_v41, 4  ;;  %v4369_v30 = vrot.slane %v4236_v18, 4  ;;  %v4246_v0 = vsel %vm499_vm1, %v4245_v12, %v3969_v34  ;;  %v4247_v56 = vrot.slane %v3969_v34, 4 }
 0x3fd   : > { %v4234_v47 = vsel %vm499_vm1, %v4233_v24, %v4192_v53  ;;  %v4241_v4 = vrot.slane %v4228_v13, 4  ;;  %v4359_v36 = vrot.slane %v4230_v55, 4  ;;  %v7893_v33 = vsel %vm499_vm1, %v4228_v13, %v4243_v5 }
 0x3fe   : > { %v4357_v61 = vrot.slane %v4234_v47, 4  ;;  %v4370_v48 = vsel %vm499_vm1, %v4369_v30, %v4232_v44  ;;  %v4371_v19 = vrot.slane %v4232_v44, 4  ;;  %v4248_v45 = vsel %vm499_vm1, %v4015_v54, %v4247_v56 }
 0x3ff   : > { %v4252_v6 = vperm.slane %v4246_v0, %v5534_v37  ;;  %v4256_v40 = vperm.slane %v4248_v45, %v5534_v37  ;;  %v7899_v3 = vsel %vm499_vm1, %v4237_v58, %v4200_v63  ;;  %v7902_v25 = vsel %vm499_vm1, %v4241_v4, %v4204_v23 }
 0x400   : > { %v4358_v28 = vsel %vm499_vm1, %v4357_v61, %v4230_v55  ;;  %v7906_v22 = vsel %vm499_vm1, %v4224_v41, %v4239_v8  ;;  %v4376_v2 = vperm.slane %v4370_v48, %v5534_v37  ;;  %v4381_v31 = vrot.slane %v7902_v25, 4 }
 0x401   : > { %v4364_v32 = vperm.slane %v4358_v28, %v5534_v37  ;;  %v4295_v10 = vrot.slane %v4252_v6, 4  ;;  %v4307_v35 = vrot.slane %v4256_v40, 4  ;;  %v4257_v21 = vrot.slane %v4038_v50, 4 }
 0x402   : > { %v4061_v38 = vpop.f32.mrf.mxu2  ;;  %v4393_v52 = vrot.slane %v7893_v33, 4  ;;  %v4382_v62 = vsel %vm499_vm1, %v4381_v31, %v7899_v3  ;;  %v4383_v39 = vrot.slane %v7899_v3, 4  ;;  %v4405_v20 = vrot.slane %v4376_v2, 4 }
 0x403   : > { %v4407_v53 = vrot.slane %v4364_v32, 4  ;;  %v4271_v17 = vrot.slane %v4061_v38, 4  ;;  %v3992_v27 = vpop.f32.mrf.mxu3  ;;  %v4388_v46 = vperm.slane %v4382_v62, %v5534_v37  ;;  %v4395_v63 = vrot.slane %v7906_v22, 4 }
 0x404   : > { %v4394_v11 = vsel %vm499_vm1, %v4393_v52, %v7906_v22  ;;  %v4258_v1 = vsel %vm499_vm1, %v4257_v21, %v3992_v27  ;;  %v4259_v7 = vrot.slane %v3992_v27, 4  ;;  %v4406_v29 = vsel %vm499_vm1, %v4405_v20, %v4364_v32 }
 0x405   : > { %v4400_v14 = vperm.slane %v4394_v11, %v5534_v37  ;;  %v4264_v42 = vperm.slane %v4258_v1, %v5534_v37  ;;  %v7924_v59 = vperm.slane %v4406_v29, %v5556_v60  ;;  %v4408_v23 = vsel %vm499_vm1, %v4376_v2, %v4407_v53 }
 0x406   : > { %v4360_v51 = vsel %vm499_vm1, %v4234_v47, %v4359_v36  ;;  %v4260_v49 = vsel %vm499_vm1, %v4038_v50, %v4259_v7  ;;  %v4107_v16 = vpop.f32.mrf.mxu0  ;;  %v4431_v9 = vrot.slane %v4388_v46, 4  ;;  %v4372_v26 = vsel %vm499_vm1, %v4236_v18, %v4371_v19 }
 0x407   : > { %v4429_v43 = vrot.slane %v4400_v14, 4  ;;  %v4268_v54 = vperm.slane %v4260_v49, %v5534_v37  ;;  %v4293_v57 = vrot.slane %v4264_v42, 4  ;;  %v4296_v8 = vsel %vm499_vm1, %v4264_v42, %v4295_v10 }
 0x408   : > { %v4455_v41 = vrot.slane %v7924_v59, 4  ;;  %v7934_v12 = vperm.slane %v4296_v8, %v5556_v60  ;;  %v4269_v15 = vrot.slane %v4107_v16, 4  ;;  %v4416_v55 = vperm.slane %v4408_v23, %v5556_v60 }
 0x409   : > { %v4430_v34 = vsel %vm499_vm1, %v4429_v43, %v4388_v46  ;;  %v4294_v24 = vsel %vm499_vm1, %v4293_v57, %v4252_v6  ;;  %v4305_v13 = vrot.slane %v4268_v54, 4  ;;  %v4308_v18 = vsel %vm499_vm1, %v4268_v54, %v4307_v35 }
 0x40a   : > { %v7941_v44 = vperm.slane %v4430_v34, %v5556_v60  ;;  %v7944_v58 = vperm.slane %v4294_v24, %v5556_v60  ;;  %v7947_v30 = vperm.slane %v4308_v18, %v5556_v60  ;;  %v4270_v5 = vsel %vm499_vm1, %v4269_v15, %v4061_v38  ;;  %v4130_v50 = vpop.f32.mrf.mxu1 }
 0x40b   : > { %v4272_v47 = vsel %vm499_vm1, %v4107_v16, %v4271_v17  ;;  %v4306_v0 = vsel %vm499_vm1, %v4305_v13, %v4256_v40  ;;  %v4276_v4 = vperm.slane %v4270_v5, %v5534_v37  ;;  %v4084_v61 = vpop.f32.mrf.mxu3  ;;  %v4368_v36 = vperm.slane %v4360_v51, %v5534_v37 }
 0x40c   : > { %v4456_v56 = vsel %vm499_vm1, %v7941_v44, %v4455_v41  ;;  %v7957_v48 = vperm.slane %v4306_v0, %v5556_v60  ;;  %v4343_v19 = vrot.slane %v7944_v58, 4  ;;  %v4347_v45 = vrot.slane %v7934_v12, 4 }
 0x40d   : > { %v4355_v6 = vrot.slane %v7947_v30, 4  ;;  %4583 = vrot.lane.b32.xlu2 %v4456_v56, %s5265_s18  ;;  %v4280_v40 = vperm.slane %v4272_v47, %v5534_v37  ;;  %v4432_v3 = vsel %vm499_vm1, %v4400_v14, %v4431_v9  ;;  %v4459_v28 = vrot.slane %v4416_v55, 4 }
 0x40e   : > { %v4283_v22 = vrot.slane %v4084_v61, 4  ;;  %v4351_v32 = vrot.slane %v7957_v48, 4  ;;  %v4319_v2 = vrot.slane %v4276_v4, 4  ;;  %v4440_v31 = vperm.slane %v4432_v3, %v5556_v60 }
 0x40f   : > { %v4380_v10 = vperm.slane %v4372_v26, %v5534_v37  ;;  %v4384_v35 = vsel %vm499_vm1, %v7902_v25, %v4383_v39  ;;  %v4396_v21 = vsel %vm499_vm1, %v7893_v33, %v4395_v63  ;;  %v4281_v38 = vrot.slane %v4130_v50, 4 }
 0x410   : > { %v4284_v52 = vsel %vm499_vm1, %v4130_v50, %v4283_v22  ;;  %v4460_v62 = vsel %vm499_vm1, %v4440_v31, %v4459_v28  ;;  %v4457_v20 = vrot.slane %v4440_v31, 4  ;;  %v4392_v53 = vperm.slane %v4384_v35, %v5534_v37 }
 0x411   : > { %v4404_v17 = vperm.slane %v4396_v21, %v5534_v37  ;;  %v4331_v27 = vrot.slane %v4280_v40, 4  ;;  %4599 = vrot.lane.b32.xlu1 %v4460_v62, %s5266_s20  ;;  %v4417_v46 = vrot.slane %v4380_v10, 4  ;;  %v4282_v25 = vsel %vm499_vm1, %v4281_v38, %v4084_v61 }
 0x412   : > { %v4292_v39 = vperm.slane %v4284_v52, %v5534_v37  ;;  %v4458_v33 = vsel %vm499_vm1, %v4457_v20, %v4416_v55  ;;  %v4288_v63 = vperm.slane %v4282_v25, %v5534_v37  ;;  %v4419_v1 = vrot.slane %v4368_v36, 4 }
 0x413   : > { %v4441_v11 = vrot.slane %v4404_v17, 4  ;;  %4591 = vrot.lane.b32.xlu0 %v4458_v33, %s5267_s21  ;;  %v4418_v7 = vsel %vm499_vm1, %v4417_v46, %v4368_v36  ;;  %v4443_v42 = vrot.slane %v4392_v53, 4 }
 0x414   : > { %v4329_v14 = vrot.slane %v4292_v39, 4  ;;  %v4332_v29 = vsel %vm499_vm1, %v4292_v39, %v4331_v27  ;;  %v4424_v23 = vperm.slane %v4418_v7, %v5556_v60  ;;  %v4317_v49 = vrot.slane %v4288_v63, 4 }
 0x415   : > { %v4442_v51 = vsel %vm499_vm1, %v4441_v11, %v4392_v53  ;;  %v4320_v43 = vsel %vm499_vm1, %v4288_v63, %v4319_v2  ;;  %v4340_v54 = vperm.slane %v4332_v29, %v5556_v60  ;;  %v4420_v34 = vsel %vm499_vm1, %v4380_v10, %v4419_v1 }
 0x416   : > { %v4448_v16 = vperm.slane %v4442_v51, %v5556_v60  ;;  %v4328_v9 = vperm.slane %v4320_v43, %v5556_v60  ;;  %v4330_v26 = vsel %vm499_vm1, %v4329_v14, %v4280_v40  ;;  %v4463_v57 = vrot.slane %v4424_v23, 4 }
 0x417   : > { %v4318_v8 = vsel %vm499_vm1, %v4317_v49, %v4276_v4  ;;  %v4336_v41 = vperm.slane %v4330_v26, %v5556_v60  ;;  %v4353_v13 = vrot.slane %v4340_v54, 4  ;;  %v4356_v0 = vsel %vm499_vm1, %v4340_v54, %v4355_v6 }
 0x418   : > { %v4324_v15 = vperm.slane %v4318_v8, %v5556_v60  ;;  %v4345_v55 = vrot.slane %v4328_v9, 4  ;;  %v4348_v24 = vsel %vm499_vm1, %v4328_v9, %v4347_v45  ;;  %v4464_v18 = vsel %vm499_vm1, %v4448_v16, %v4463_v57 }
 0x419   : > { %v4349_v5 = vrot.slane %v4336_v41, 4  ;;  %v4352_v47 = vsel %vm499_vm1, %v4336_v41, %v4351_v32  ;;  %4615 = vrot.lane.b32.xlu2 %v4464_v18, %s5268_s22  ;;  %v4354_v61 = vsel %vm499_vm1, %v4353_v13, %v7947_v30  ;;  %v4481_v36 = vrot.slane %v4348_v24, 4 }
 0x41a   : > { %v4341_v56 = vrot.slane %v4324_v15, 4  ;;  %v4346_v4 = vsel %vm499_vm1, %v4345_v55, %v7934_v12  ;;  %v4493_v40 = vrot.slane %v4354_v61, 4  ;;  %v4428_v3 = vperm.slane %v4420_v34, %v5556_v60 }
 0x41b   : > { %v4350_v45 = vsel %vm499_vm1, %v4349_v5, %v7957_v48  ;;  %v4469_v50 = vrot.slane %v4346_v4, 4  ;;  %v4505_v28 = vrot.slane %v4356_v0, 4  ;;  %v4507_v6 = vrot.slane %v4352_v47, 4 }
 0x41c   : > { %v4444_v22 = vsel %vm499_vm1, %v4404_v17, %v4443_v42  ;;  %v4461_v32 = vrot.slane %v4448_v16, 4  ;;  %v4342_v12 = vsel %vm499_vm1, %v4341_v56, %v7944_v58  ;;  %v4344_v30 = vsel %vm499_vm1, %v4324_v15, %v4343_v19 }
 0x41d   : > { %v4452_v2 = vperm.slane %v4444_v22, %v5556_v60  ;;  %v4494_v48 = vsel %vm499_vm1, %v4493_v40, %v4350_v45  ;;  %v4470_v10 = vsel %vm499_vm1, %v4469_v50, %v4342_v12  ;;  %v4471_v35 = vrot.slane %v4342_v12, 4 }
 0x41e   : > { %v4462_v31 = vsel %vm499_vm1, %v4461_v32, %v4424_v23  ;;  %v4482_v21 = vsel %vm499_vm1, %v4481_v36, %v4344_v30  ;;  %v4467_v52 = vrot.slane %v4428_v3, 4  ;;  %v4476_v62 = vperm.slane %v4470_v10, %v5534_v37 }
 0x41f   : > { %v4465_v38 = vrot.slane %v4452_v2, 4  ;;  %4607 = vrot.lane.b32.xlu0 %v4462_v31, %s5269_s23  ;;  %v4483_v20 = vrot.slane %v4344_v30, 4  ;;  %v4488_v58 = vperm.slane %v4482_v21, %v5534_v37  ;;  %v4500_v19 = vperm.slane %v4494_v48, %v5534_v37  ;;  %v4658_v21 = vld [vmem:[#allocation5 + $0x10] sm:$0xff] }
 0x420   : > { %v4506_v53 = vsel %vm499_vm1, %v4505_v28, %v4352_v47  ;;  %v4472_v17 = vsel %vm499_vm1, %v4346_v4, %v4471_v35  ;;  %v4519_v25 = vrot.slane %v4476_v62, 4  ;;  %v4495_v1 = vrot.slane %v4350_v45, 4  ;;  %v4659_v35 = vld [vmem:[#allocation5 + $0x18] sm:$0xff] }
 0x421   : > { %v4466_v27 = vsel %vm499_vm1, %v4465_v38, %v4428_v3  ;;  %v4512_v46 = vperm.slane %v4506_v53, %v5534_v37  ;;  %v4480_v39 = vperm.slane %v4472_v17, %v5534_v37  ;;  %v4543_v33 = vrot.slane %v4500_v19, 4  ;;  %4682 = vmatpush.msrb.mxu2 %v4659_v35  ;;  %v4656_v38 = vld [vmem:[#allocation5] sm:$0xff] }
 0x422   : > { %4623 = vrot.lane.b32.xlu1 %v4466_v27, %s5270_s13  ;;  %v4517_v11 = vrot.slane %v4488_v58, 4  ;;  %v4484_v63 = vsel %vm499_vm1, %v4348_v24, %v4483_v20  ;;  %v4520_v7 = vsel %vm499_vm1, %v4488_v58, %v4519_v25  ;;  %v4508_v42 = vsel %vm499_vm1, %v4356_v0, %v4507_v6 }
 0x423   : > { %v4541_v14 = vrot.slane %v4512_v46, 4  ;;  %v4492_v29 = vperm.slane %v4484_v63, %v5534_v37  ;;  %v4528_v23 = vperm.slane %v4520_v7, %v5556_v60  ;;  %v4544_v51 = vsel %vm499_vm1, %v4512_v46, %v4543_v33  ;;  %4683 = vmatpush.msrb.mxu2 %v4658_v21 }
 0x424   : > { %v4518_v49 = vsel %vm499_vm1, %v4517_v11, %v4476_v62  ;;  %v4496_v43 = vsel %vm499_vm1, %v4354_v61, %v4495_v1  ;;  %v4552_v16 = vperm.slane %v4544_v51, %v5556_v60  ;;  %v4453_v57 = vrot.slane %v7941_v44, 4 }
 0x425   : > { %v4524_v9 = vperm.slane %v4518_v49, %v5556_v60  ;;  %v4542_v26 = vsel %vm499_vm1, %v4541_v14, %v4500_v19  ;;  %v4504_v54 = vperm.slane %v4496_v43, %v5534_v37  ;;  %v4468_v8 = vsel %vm499_vm1, %v4452_v2, %v4467_v52 }
 0x426   : > { %v4516_v41 = vperm.slane %v4508_v42, %v5534_v37  ;;  %v4529_v34 = vrot.slane %v4492_v29, 4  ;;  %v4569_v15 = vrot.slane %v4552_v16, 4  ;;  %v4548_v55 = vperm.slane %v4542_v26, %v5556_v60 }
 0x427   : > { %4631 = vrot.lane.b32.xlu0 %v4468_v8, %s5271_s29  ;;  %v4567_v24 = vrot.slane %v4524_v9, 4  ;;  %v4555_v13 = vrot.slane %v4504_v54, 4  ;;  %v4571_v18 = vrot.slane %v4528_v23, 4  ;;  %v4531_v4 = vrot.slane %v4480_v39, 4  ;;  %v5055_v8 = vld [vmem:[%s8130_s6] ss:$0 sm:$0xff] }
 0x428   : > { %v4530_v5 = vsel %vm499_vm1, %v4529_v34, %v4480_v39  ;;  %v4553_v47 = vrot.slane %v4516_v41, 4  ;;  %v4570_v0 = vsel %vm499_vm1, %v4569_v15, %v4528_v23  ;;  %v4454_v45 = vsel %vm499_vm1, %v4453_v57, %v7924_v59 }
 0x429   : > { %v4568_v44 = vsel %vm499_vm1, %v4548_v55, %v4567_v24  ;;  %v4536_v56 = vperm.slane %v4530_v5, %v5556_v60  ;;  %v4556_v36 = vsel %vm499_vm1, %v4516_v41, %v4555_v13  ;;  %v4572_v50 = vsel %vm499_vm1, %v4552_v16, %v4571_v18 }
 0x42a   : > { %4593 = vrot.lane.b32.xlu1 %v4570_v0, %s5267_s21  ;;  %4585 = vrot.lane.b32.xlu2 %v4568_v44, %s5265_s18  ;;  %v4554_v37 = vsel %vm499_vm1, %v4553_v47, %v4504_v54  ;;  %v4532_v28 = vsel %vm499_vm1, %v4492_v29, %v4531_v4  ;;  %v4564_v6 = vperm.slane %v4556_v36, %v5556_v60  ;;  %v4565_v12 = vrot.slane %v4548_v55, 4 }
 0x42b   : > { %v4560_v61 = vperm.slane %v4554_v37, %v5556_v60  ;;  %v4575_v40 = vrot.slane %v4536_v56, 4  ;;  %v4540_v2 = vperm.slane %v4532_v28, %v5556_v60  ;;  %v4657_v60 = vld [vmem:[#allocation5 + $0x8] sm:$0xff] }
 0x42c   : > { %v4577_v59 = vrot.slane %v4564_v6, 4  ;;  %v4566_v10 = vsel %vm499_vm1, %v4565_v12, %v4524_v9  ;;  %4684 = vmatpush.msrb.mxu2 %v4657_v60 }
 0x42d   : > { %v4573_v3 = vrot.slane %v4560_v61, 4  ;;  %v4576_v22 = vsel %vm499_vm1, %v4560_v61, %v4575_v40  ;;  %v4579_v30 = vrot.slane %v4540_v2, 4 }
 0x42e   : > { %v4578_v48 = vsel %vm499_vm1, %v4577_v59, %v4540_v2  ;;  %4685 = vmatpush.msrb.mxu2 %v4656_v38 }
 0x42f   : > { %4601 = vrot.lane.b32.xlu0 %v4572_v50, %s5266_s20  ;;  %v4574_v32 = vsel %vm499_vm1, %v4573_v3, %v4536_v56  ;;  %v4580_v31 = vsel %vm499_vm1, %v4564_v6, %v4579_v30  ;;  %vm4642_vm1 = vcmask 97280   ;;  %s4707_s20 = scalar_lea.hbm %s8131_s7, %s4901_s14 }
 0x432   : > { %4617 = vrot.lane.b32.xlu1 %v4576_v22, %s5268_s22  ;;  %4609 = vrot.lane.b32.xlu2 %v4574_v32, %s5269_s23  ;;  %s4708_s22 = sshll.u32 %s322_s16, 4  ;;  %s4710_s23 = sshll.u32 %s4707_s20, 4  ;;  %s4709_s22 = int_to_ptr.vmem [resolvable:$true] %s4708_s22  ;;  %s4711_s23 = int_to_ptr.hbm [resolvable:$true] %s4710_s23 }
 0x437   : > { %4625 = vrot.lane.b32.xlu0 %v4578_v48, %s5270_s13  ;;  %s4696_s13 = scalar_lea.sflag [#allocation4], %s320_s19 }
 0x43a   : > { %4633 = vrot.lane.b32.xlu2 %v4580_v31, %s5271_s29  ;;  %s5194_s29 = sshra.s32 %s4711_s23, 4  ;;  %s5195_s29 = int_to_ptr.hbm [resolvable:$true] %s5194_s29 }
 0x43b   : > { %s5196_s8 = scalar_lea.hbm %s5195_s29, 16  ;;  %p5201_p4 = scmp.lt.s32.totalorder %s5195_s29, %s8131_s7 }
 0x43c   : > { %p5197_p1 = scmp.ne.s32.totalorder %s5195_s29, %s5196_s8  ;;  %p5202_p7 = scmp.lt.s32.totalorder %s5200_s15, %s5196_s8 }
 0x43e   : > { %p5198_p2 = pnand %p5197_p1, %p5351_p5  ;;  %p5203_p8 = por %p5202_p7, %p5201_p4 }
 0x440   : > { %p5199_p3 = pneg %p5198_p2 }
 0x442   : > { %p5204_p9 = pnand %p5203_p8, %p5199_p3 }
 0x467   : > { %v4584_v52 = vpop.permute.xlu2 %4583 }
 0x468   : > { %v4637_v58 = vsel %vm2915_vm2, %v4454_v45, %v4584_v52 }
 0x473   : > { %v4616_v19 = vpop.permute.xlu2 %4615 }
 0x483   : > { %v4600_v20 = vpop.permute.xlu1 %4599 }
 0x484   : > { %v4586_v39 = vpop.permute.xlu2 %4585 }
 0x485   : > { %v4592_v62 = vpop.permute.xlu0 %4591  ;;  %v4638_v14 = vsel %vm2915_vm2, %v4566_v10, %v4586_v39 }
 0x486   : > { %v4640_v53 = vsel %vm4639_vm8, %v4637_v58, %v4592_v62 }
 0x487   : > { %v4643_v27 = vsel %vm4642_vm1, %v4640_v53, %v4600_v20 }
 0x48c   : > { %v4610_v29 = vpop.permute.xlu2 %4609 }
 0x491   : > { %v4608_v17 = vpop.permute.xlu0 %4607 }
 0x492   : > { %v4645_v46 = vsel %vm3380_vm3, %v4643_v27, %v4608_v17 }
 0x493   : > { %v4648_v33 = vsel %vm4647_vm9, %v4645_v46, %v4616_v19 }
 0x494   : > { %v4624_v25 = vpop.permute.xlu1 %4623  ;;  %v4634_v26 = vpop.permute.xlu2 %4633 }
 0x495   : > { %v4651_v63 = vsel %vm4650_vm10, %v4648_v33, %v4624_v25 }
 0x499   : > { %v4632_v11 = vpop.permute.xlu0 %4631 }
 0x49a   : > { %v4654_v1 = vsel %vm4653_vm11, %v4651_v63, %v4632_v11 }
 0x49b   : > { %4894 = vmatmul.msk.f32.vlgmr.msrb.gmra.mxu2 %vm346_vm0, %v4654_v1 }
 0x49c   : > { %v4594_v7 = vpop.permute.xlu1 %4593 }
 0x49d   : > { %v4641_v42 = vsel %vm4639_vm8, %v4638_v14, %v4594_v7 }
 0x4a1   : > { %v4602_v23 = vpop.permute.xlu0 %4601 }
 0x4a2   : > { %v4644_v51 = vsel %vm4642_vm1, %v4641_v42, %v4602_v23 }
 0x4a3   : > { %v4646_v43 = vsel %vm3380_vm3, %v4644_v51, %v4610_v29 }
 0x4a4   : > { %v4618_v49 = vpop.permute.xlu1 %4617 }
 0x4a5   : > { %v4649_v16 = vsel %vm4647_vm9, %v4646_v43, %v4618_v49 }
 0x4a9   : > { %v4626_v9 = vpop.permute.xlu0 %4625 }
 0x4aa   : > { %v4652_v54 = vsel %vm4650_vm10, %v4649_v16, %v4626_v9 }
 0x4ab   : > { %v4655_v57 = vsel %vm4653_vm11, %v4652_v54, %v4634_v26 }
 0x4ac   : > { %4895 = vmatmul.msk.f32.gmra.mxu2 %vm346_vm0, %v4655_v57 }
 0x51e   : > { %v4687_v41 = vpop.f32.mrf.mxu2 }
 0x51f   : > { %v4688_v34 = vadd.f32 %v5055_v8, %v4687_v41 }
 0x521   : > { %4693 = vst.msk [vmem:[%s322_s16] sm:$0xff] %vm346_vm0, %v4688_v34 }
 0x52f   : > { %v4690_v15 = vpop.f32.mrf.mxu2 }
 0x530   : > { %v4691_v55 = vadd.f32 %v5055_v8, %v4690_v15 }
 0x532   : > { %4694 = vst.msk [vmem:[%s322_s16 + $0x8] sm:$0xff] %vm346_vm0, %v4691_v55 }
 0x533   : > { %5207 = shalt.err (!%p5204_p9)
}
 0x534   : > { %s5272_s19 = smov 128  }
 0x535   : > { %4914 = dma.vmem_to_hbm [thread:$0]  (%p5351_p5), %s4709_s22, 256, %s4711_s23, %s4696_s13, %s5272_s19, %s5272_s19, %s5267_s21  }
 0x536 PF: > { %p4931_p10 = scmp.ge.s32.totalorder %s5250_s27, 2  ;;  %s4725_s16 = sand.u32 1, %s5238_s24  }
 0x537   : > { %s4726_s18 = scalar_lea.sflag [#allocation4], %s4725_s16 }
 0x538   : > { %p4924_p11 = pnand %p4931_p10, %p5355_p6 }
 0x53a   : > { %p4925_p12 = pneg %p4924_p11 }
 0x53c   : > { %5233 = dma.done.wait (%p4925_p12), %s4726_s18, 256  }
 0x53d   : > { %5235 = vsyncadd (%p4925_p12), %s4726_s18, 4294967040  ;;  %p19_p13 = scmp.ge.s32.totalorder %s5338_s30, 4   ;;  %s8242_s24 = smov %s5242_s25 }
 0x53e   : > { %s8243_s25 = smov %s5246_s26  ;;  %s8244_s26 = smov %s5349_s10 }
 0x53f   : > { %s8245_s27 = smov %s5338_s30  ;;  %21 = sbr.rel (!%p19_p13) target bundleno = 5 (0x5), region = 95 }
 0x544   :  { %4732 = vsyncpa [#allocation3], 1 }
 0x545   :  { %4734 = vsyncpa [#allocation3 + $0x1], 1 }
 0x546   :  { %4735 = vsyncpa [#allocation6], 1 }
 0x547   :  { %4736 = vsyncpa [#allocation4], 1 }
 0x548   :  { %4738 = vsyncpa [#allocation4 + $0x1], 1 }

// kernel: tpu_custom_call.1
= control target key start
LH: loop header
LB: loop body
LE: loop exit
PB: predicated region body
PF: predicated region fallthrough
CT: control target
= control target key end

     0   :  { %12 = vsyncpa [#allocation3], 0  ;;  %s8124_s0 = inlined_call_operand.vmem [shape: f32[32,32], index: 0, kind: input, shape index: {}]   ;;  %s8125_s1 = inlined_call_operand.vmem [shape: f32[64,32], index: 1, kind: input, shape index: {}]   ;;  %s8126_s2 = inlined_call_operand.vmem [shape: f32[32,32], index: 2, kind: input, shape index: {}]   ;;  %s8127_s3 = inlined_call_operand.vmem [shape: f32[32,32], index: 3, kind: input, shape index: {}]   ;;  %s8128_s4 = inlined_call_operand.hbm [shape: f32[32,32], index: 4, kind: input, shape index: {}]   ;;  %s8129_s5 = inlined_call_operand.hbm [shape: f32[32,32], index: 5, kind: input, shape index: {}]   ;;  %s8130_s6 = inlined_call_operand.vmem [shape: f32[1,32], index: 6, kind: input, shape index: {}]   ;;  %s8131_s7 = inlined_call_operand.hbm [shape: f32[32,32], index: 7, kind: output, shape index: {}]  }
   0x1   :  { %13 = vsyncpa [#allocation6], 0 }
   0x2   :  { %14 = vsyncpa [#allocation4], 0 }
   0x3   :  { %16 = vsyncpa [#allocation4 + $0x1], 0  ;;  %s5313_s24 = smov 0   ;;  %s5315_s25 = smov 0  }
   0x4   :  { %s5317_s26 = smov 0   ;;  %s5319_s27 = smov 0  }
   0x5 LB: > { %s5334_s28 = sadd.s32 4294967295, %s5250_s27   ;;  %s4807_s29 = sadd.s32 4294967294, %s5250_s27   ;;  %s5250_s27 = sphi %s5319_s27, %s8245_s27   ;;  %s5246_s26 = sphi %s5317_s26, %s8244_s26   ;;  %s5242_s25 = sphi %s5315_s25, %s8243_s25   ;;  %s5238_s24 = sphi %s5313_s24, %s8242_s24  }
   0x6   : > { %s5338_s30 = sadd.s32 1, %s5250_s27   ;;  %s186_s8 = sadd.s32 1, %s5246_s26 }
   0x7   : > { %s183_s9 = ssub.s32 %s5250_s27, %s5338_s30  ;;  %p196_p0 = scmp.ne.s32.totalorder %s5246_s26, %s5242_s25 }
   0x8   : > { %p184_p1 = scmp.eq.s32.totalorder %s183_s9, 0  ;;  %p197_p2 = scmp.eq.s32.totalorder %s5334_s28, 1 }
   0x9   : > { %p202_p3 = scmp.ne.s32.totalorder %s5242_s25, %s5238_s24  ;;  %p203_p4 = scmp.eq.s32.totalorder %s4807_s29, 1 }
   0xa   : > { %s5349_s10 = scalar_select %p184_p1, %s5246_s26, %s186_s8  }
   0xb   : > { %p5351_p5 = por %p197_p2, %p196_p0  ;;  %p5355_p6 = por %p203_p4, %p202_p3 }
   0xc   : > { %p4808_p7 = scmp.ge.s32.totalorder %s5250_s27, 1  ;;  %p210_p8 = scmp.lt.s32.totalorder %s5250_s27, 3 }
   0xd   : > { %p4927_p9 = scmp.eq.s32.totalorder %s5334_s28, 0  ;;  %s227_s16 = sshll.u32 %s8128_s4, 4  ;;  %s228_s16 = int_to_ptr.hbm [resolvable:$true] %s227_s16 }
   0xe   : > { %p5362_p10 = pnand %p4808_p7, %p210_p8  ;;  %s5252_s17 = smov [#allocation2]  }
   0xf   : > { %s229_s18 = sshll.u32 %s5252_s17, 4  ;;  %s241_s21 = sshll.u32 %s8129_s5, 4  ;;  %s230_s18 = int_to_ptr.vmem [resolvable:$true] %s229_s18  ;;  %s242_s21 = int_to_ptr.hbm [resolvable:$true] %s241_s21 }
  0x10   : > { %p4916_p11 = pneg %p5362_p10  ;;  %s5253_s22 = smov 128  }
  0x11   : > { %s5254_s23 = smov 8   ;;  %s5255_s29 = smov [#allocation5]  }
  0x12   : > { %p4917_p12 = pnand %p4927_p9, %p4916_p11  ;;  %s243_s8 = sshll.u32 %s5255_s29, 4  ;;  %s244_s8 = int_to_ptr.vmem [resolvable:$true] %s243_s8 }
  0x13   : > { %280 = sbr.rel (%p5362_p10) target bundleno = 1334 (0x536), region = 48 }
  0x14   : > { %4919 = dma.hbm_to_vmem [thread:$0]  (!%p4917_p12), %s228_s16, 512, %s230_s18, [#allocation3], %s5253_s22, %s5253_s22, %s5254_s23  }
  0x15   : > { %4922 = dma.hbm_to_vmem [thread:$0]  (!%p4917_p12), %s242_s21, 512, %s244_s8, [#allocation6], %s5253_s22, %s5253_s22, %s5254_s23  }
  0x18   : > { %5225 = dma.done.wait (%p4927_p9), [#allocation3], 512  }
  0x19   : > { %5227 = vsyncadd (%p4927_p9), [#allocation3], 4294966784 }
  0x1a   : > { %5229 = dma.done.wait (%p4927_p9), [#allocation6], 512  }
  0x1b   : > { %5231 = vsyncadd (%p4927_p9), [#allocation6], 4294966784  ;;  %s4818_s9 = sshll.u32 %s5334_s28, 2  ;;  %s4816_s14 = sshll.u32 %s5334_s28, 1  ;;  %v379_v0 = vld [vmem:[%s8127_s3 + $0x18] sm:$0xff]  ;;  %v378_v1 = vld [vmem:[%s8127_s3 + $0x10] sm:$0xff] }
  0x1c   : > { %p330_p13 = scmp.lt.s32.totalorder %s4818_s9, 7  ;;  %p324_p0 = scmp.lt.s32.totalorder %s4816_s14, 3  ;;  %404 = vmatpush.msra.mxu1 %v379_v0  ;;  %v345_v2 = vld [vmem:[%s8126_s2 + $0x18] sm:$0xff]  ;;  %v377_v3 = vld [vmem:[%s8127_s3 + $0x8] sm:$0xff]  ;;  %v344_v4 = vld [vmem:[%s8126_s2 + $0x10] sm:$0xff]  ;;  %vm346_vm0 = vcmask 261120  }
  0x1d   : > { %365 = vmatpush.msra.mxu0 %v345_v2  ;;  %v343_v5 = vld [vmem:[%s8126_s2 + $0x8] sm:$0xff]  ;;  %v376_v6 = vld [vmem:[%s8127_s3] sm:$0xff]  ;;  %v424_v14 = vld [vmem:[#allocation2 + $0x18] sm:$0xff]  ;;  %s5257_s8 = smov 120   ;;  %s5259_s15 = smov 108   ;;  %vm499_vm1 = vcmask 1047556  }
  0x1e   : > { %s8247_s9 = smov (!%p330_p13, %s4818_s9), 7  ;;  %s8249_s14 = smov (!%p324_p0, %s4816_s14), 3  ;;  %405 = vmatpush.msra.mxu1 %v378_v1  ;;  %v342_v8 = vld [vmem:[%s8126_s2] sm:$0xff]  ;;  %437 = vmatpush.msra.mxu2 %v424_v14  ;;  %v423_v15 = vld [vmem:[#allocation2 + $0x10] sm:$0xff]  ;;  %v422_v16 = vld [vmem:[#allocation2 + $0x8] sm:$0xff]  ;;  %vm2915_vm2 = vcmask 31744  }
  0x1f   : > { %s4819_s13 = sshll.u32 %s8247_s9, 3  ;;  %s4817_s19 = sshll.u32 %s8249_s14, 3  ;;  %366 = vmatpush.msra.mxu0 %v344_v4  ;;  %4902 = vmatpush.msra.mxu3 %v424_v14  ;;  %v421_v17 = vld [vmem:[#allocation2] sm:$0xff]  ;;  %v5263_v31 = vmov 1983009808   ;;  %vm3380_vm3 = vcmask 130048  }
  0x20   : > { %s333_s9 = scalar_lea.vmem %s8125_s1, %s4819_s13  ;;  %s327_s21 = scalar_lea.vmem %s8124_s0, %s4817_s19  ;;  %406 = vmatpush.msra.mxu1 %v377_v3  ;;  %438 = vmatpush.msra.mxu2 %v423_v15  ;;  %v504_v32 = vunpack.c.l.s4 %v5263_v31  ;;  %v5264_v46 = vmov 1934713408  }
  0x21   : > { %v338_v7 = vld [vmem:[%s333_s9] sm:$0xff]  ;;  %367 = vmatpush.msra.mxu0 %v343_v5  ;;  %v339_v10 = vld [vmem:[%s333_s9 + $0x8] sm:$0xff]  ;;  %v340_v12 = vld [vmem:[%s333_s9 + $0x10] sm:$0xff]  ;;  %4903 = vmatpush.msra.mxu3 %v423_v15  ;;  %s5256_s19 = smov 112   ;;  %s5260_s16 = smov 116   ;;  %v552_v47 = vunpack.c.l.s4 %v5264_v46 }
  0x22   : > { %v336_v9 = vld [vmem:[%s327_s21] sm:$0xff]  ;;  %407 = vmatpush.msra.mxu1 %v376_v6  ;;  %v337_v11 = vld [vmem:[%s327_s21 + $0x8] sm:$0xff]  ;;  %v341_v13 = vld [vmem:[%s333_s9 + $0x18] sm:$0xff]  ;;  %439 = vmatpush.msra.mxu2 %v422_v16  ;;  %s5258_s9 = smov 124   ;;  %s5261_s14 = smov 104   ;;  %v5534_v37 = vunpack.c.0.s8 %v504_v32 }
  0x23   : > { %4822 = vmatmul.msk.f32.vlgmr.msra.gmra.mxu1 %vm346_vm0, %v338_v7  ;;  %368 = vmatpush.msra.mxu0 %v342_v8  ;;  %s5262_s17 = smov 100   ;;  %v5556_v60 = vunpack.c.0.s8 %v552_v47  ;;  %s5265_s18 = smov 4  }
  0x24   : > { %4820 = vmatmul.msk.f32.vlgmr.msra.gmra.mxu0 %vm346_vm0, %v336_v9  ;;  %4904 = vmatpush.msra.mxu3 %v422_v16  ;;  %s5266_s20 = smov 12   ;;  %s5267_s21 = smov 8  }
  0x25   : > { %440 = vmatpush.msra.mxu2 %v421_v17  ;;  %s5268_s22 = smov 20   ;;  %s5269_s23 = smov 16  }
  0x26   : > { %4905 = vmatpush.msra.mxu3 %v421_v17  ;;  %4826 = vmatmul.msk.f32.vlgmr.msra.gmra.mxu2 %vm346_vm0, %v338_v7  ;;  %s5270_s13 = smov 24   ;;  %s5271_s29 = smov 28  }
  0x27   : > { %4829 = vmatmul.msk.f32.vlgmr.msra.gmra.mxu3 %vm346_vm0, %v341_v13 }
  0x2b   : > { %4823 = vmatmul.msk.f32.gmra.mxu1 %vm346_vm0, %v339_v10 }
  0x2c   : > { %4821 = vmatmul.msk.f32.gmra.mxu0 %vm346_vm0, %v337_v11 }
  0x2e   : > { %4827 = vmatmul.msk.f32.gmra.mxu2 %vm346_vm0, %v339_v10 }
  0x33   : > { %4824 = vmatmul.msk.f32.gmra.mxu1 %vm346_vm0, %v340_v12 }
  0x36   : > { %4828 = vmatmul.msk.f32.gmra.mxu2 %vm346_vm0, %v340_v12 }
  0x3b   : > { %4825 = vmatmul.msk.f32.gmra.mxu1 %vm346_vm0, %v341_v13 }
  0xa0   : > { %v5428_v18 = vpop.f32.mrf.mxu1 }
  0xa1   : > { %987 = vrot.lane.b32.xlu2 %v5428_v18, %s5256_s19  ;;  %963 = vrot.lane.b32.xlu1 %v5428_v18, %s5257_s8  ;;  %v5442_v19 = vpop.f32.mrf.mxu0  ;;  %v1037_v33 = vrot.slane %v5428_v18, 4 }
  0xa2   : > { %951 = vrot.lane.b32.xlu0 %v5428_v18, %s5258_s9  ;;  %v501_v45 = vrot.slane %v5442_v19, 4 }
  0xa8   : > { %v5456_v20 = vpop.f32.mrf.mxu1 }
  0xa9   : > { %999 = vrot.lane.b32.xlu2 %v5428_v18, %s5259_s15  ;;  %975 = vrot.lane.b32.xlu1 %v5428_v18, %s5260_s16  ;;  %v5476_v21 = vpop.f32.mrf.mxu0  ;;  %v5526_v27 = vpop.f32.mrf.mxu2  ;;  %v1149_v63 = vrot.slane %v5456_v20, 4 }
  0xaa   : > { %1011 = vrot.lane.b32.xlu0 %v5428_v18, %s5261_s14  ;;  %8147 = vst [vmem:[#allocation11_spill] sm:$0xff] %v5526_v27  ;;  %v613_v2 = vrot.slane %v5476_v21, 4 }
  0xb0   : > { %v5484_v22 = vpop.f32.mrf.mxu1 }
  0xb1   : > { %462 = vrot.lane.b32.xlu2 %v5442_v19, %s5257_s8  ;;  %456 = vrot.lane.b32.xlu1 %v5442_v19, %s5258_s9  ;;  %v5532_v36 = vpop.f32.mrf.mxu2  ;;  %v1261_v11 = vrot.slane %v5484_v22, 4 }
  0xb2   : > { %474 = vrot.lane.b32.xlu0 %v5442_v19, %s5256_s19  ;;  %8148 = vst [vmem:[#allocation12_spill] sm:$0xff] %v5532_v36  ;;  %v5538_v38 = vpack.i.bf16 %v5526_v27, %v5532_v36 }
  0xb8   : > { %v5498_v23 = vpop.f32.mrf.mxu1 }
  0xb9   : > { %468 = vrot.lane.b32.xlu2 %v5442_v19, %s5260_s16  ;;  %1023 = vrot.lane.b32.xlu1 %v5428_v18, %s5262_s17 }
  0xba   : > { %480 = vrot.lane.b32.xlu0 %v5442_v19, %s5259_s15 }
  0xc1   : > { %492 = vrot.lane.b32.xlu2 %v5442_v19, %s5262_s17  ;;  %486 = vrot.lane.b32.xlu1 %v5442_v19, %s5261_s14 }
  0xc2   : > { %953 = vrot.lane.b32.xlu0 %v5456_v20, %s5258_s9 }
  0xc9   : > { %1001 = vrot.lane.b32.xlu2 %v5456_v20, %s5259_s15  ;;  %989 = vrot.lane.b32.xlu1 %v5456_v20, %s5256_s19 }
  0xca   : > { %965 = vrot.lane.b32.xlu0 %v5456_v20, %s5257_s8 }
  0xd1   : > { %1013 = vrot.lane.b32.xlu2 %v5456_v20, %s5261_s14  ;;  %977 = vrot.lane.b32.xlu1 %v5456_v20, %s5260_s16 }
  0xd2   : > { %1025 = vrot.lane.b32.xlu0 %v5456_v20, %s5262_s17 }
  0xd9   : > { %464 = vrot.lane.b32.xlu2 %v5476_v21, %s5257_s8  ;;  %458 = vrot.lane.b32.xlu1 %v5476_v21, %s5258_s9 }
  0xda   : > { %476 = vrot.lane.b32.xlu0 %v5476_v21, %s5256_s19 }
  0xe1   : > { %991 = vrot.lane.b32.xlu2 %v5484_v22, %s5256_s19  ;;  %967 = vrot.lane.b32.xlu1 %v5484_v22, %s5257_s8 }
  0xe2   : > { %955 = vrot.lane.b32.xlu0 %v5484_v22, %s5258_s9 }
  0xe9   : > { %1003 = vrot.lane.b32.xlu2 %v5484_v22, %s5259_s15  ;;  %979 = vrot.lane.b32.xlu1 %v5484_v22, %s5260_s16 }
  0xea   : > { %1015 = vrot.lane.b32.xlu0 %v5484_v22, %s5261_s14 }
  0xf1   : > { %993 = vrot.lane.b32.xlu2 %v5498_v23, %s5256_s19  ;;  %1027 = vrot.lane.b32.xlu1 %v5484_v22, %s5262_s17 }
  0xf2   : > { %957 = vrot.lane.b32.xlu0 %v5498_v23, %s5258_s9 }
  0xf9   : > { %1017 = vrot.lane.b32.xlu2 %v5498_v23, %s5261_s14  ;;  %969 = vrot.lane.b32.xlu1 %v5498_v23, %s5257_s8 }
  0xfa   : > { %981 = vrot.lane.b32.xlu0 %v5498_v23, %s5260_s16 }
  0xfb   : > { %v988_v24 = vpop.permute.xlu2 %987 }
  0xfc   : > { %v1061_v51 = vrot.slane %v988_v24, 4 }
 0x101   : > { %470 = vrot.lane.b32.xlu2 %v5476_v21, %s5260_s16  ;;  %1005 = vrot.lane.b32.xlu1 %v5498_v23, %s5259_s15 }
 0x102   : > { %1029 = vrot.lane.b32.xlu0 %v5498_v23, %s5262_s17 }
 0x103   : > { %v5518_v25 = vpop.permute.xlu2 %999 }
 0x104   : > { %v1073_v12 = vrot.slane %v5518_v25, 4 }
 0x109   : > { %494 = vrot.lane.b32.xlu2 %v5476_v21, %s5262_s17  ;;  %488 = vrot.lane.b32.xlu1 %v5476_v21, %s5261_s14 }
 0x10a   : > { %482 = vrot.lane.b32.xlu0 %v5476_v21, %s5259_s15 }
 0x10b   : > { %v463_v26 = vpop.permute.xlu2 %462 }
 0x10c   : > { %v498_v40 = vrot.slane %v463_v26, 4  ;;  %v502_v53 = vsel %vm499_vm1, %v463_v26, %v501_v45 }
 0x10d   : > { %v510_v0 = vperm.slane %v502_v53, %v5534_v37 }
 0x10e   : > { %v500_v57 = vsel %vm499_vm1, %v498_v40, %v5442_v19 }
 0x10f   : > { %v506_v3 = vperm.slane %v500_v57, %v5534_v37  ;;  %v561_v17 = vrot.slane %v510_v0, 4 }
 0x111   : > { %4991 = vrot.lane.b32.xlu1 %v5538_v38, %s5257_s8  ;;  %v549_v26 = vrot.slane %v506_v3, 4  ;;  %4996 = vrot.lane.b32.xlu2 %v5538_v38, %s5256_s19 }
 0x112   : > { %4986 = vrot.lane.b32.xlu0 %v5538_v38, %s5258_s9 }
 0x113   : > { %v964_v28 = vpop.permute.xlu1 %963  ;;  %v5528_v29 = vpop.permute.xlu2 %468 }
 0x114   : > { %v952_v30 = vpop.permute.xlu0 %951  ;;  %v1035_v34 = vrot.slane %v964_v28, 4  ;;  %v1038_v35 = vsel %vm499_vm1, %v964_v28, %v1037_v33  ;;  %v511_v7 = vrot.slane %v5528_v29, 4 }
 0x115   : > { %v1049_v39 = vrot.slane %v952_v30, 4  ;;  %v1046_v42 = vperm.slane %v1038_v35, %v5534_v37 }
 0x116   : > { %v1036_v41 = vsel %vm499_vm1, %v1035_v34, %v5428_v18 }
 0x117   : > { %v1042_v54 = vperm.slane %v1036_v41, %v5534_v37  ;;  %v1097_v58 = vrot.slane %v1046_v42, 4 }
 0x119   : > { %v1085_v4 = vrot.slane %v1042_v54, 4  ;;  %5006 = vrot.lane.b32.xlu1 %v5538_v38, %s5259_s15  ;;  %5016 = vrot.lane.b32.xlu2 %v5538_v38, %s5262_s17 }
 0x11a   : > { %5001 = vrot.lane.b32.xlu0 %v5538_v38, %s5260_s16 }
 0x11b   : > { %v976_v43 = vpop.permute.xlu1 %975  ;;  %v5543_v44 = vpop.permute.xlu2 %492 }
 0x11c   : > { %v1047_v48 = vrot.slane %v976_v43, 4  ;;  %v1050_v49 = vsel %vm499_vm1, %v976_v43, %v1049_v39  ;;  %v1012_v50 = vpop.permute.xlu0 %1011 }
 0x11d   : > { %v1058_v52 = vperm.slane %v1050_v49, %v5534_v37  ;;  %v1059_v56 = vrot.slane %v1012_v50, 4  ;;  %v1062_v62 = vsel %vm499_vm1, %v1012_v50, %v1061_v51 }
 0x11e   : > { %v1048_v55 = vsel %vm499_vm1, %v1047_v48, %v952_v30  ;;  %v5567_v8 = vperm.slane %v1062_v62, %v5534_v37  ;;  %v535_v30 = vrot.slane %v5543_v44, 4 }
 0x11f   : > { %v1054_v59 = vperm.slane %v1048_v55, %v5534_v37  ;;  %v1095_v61 = vrot.slane %v1058_v52, 4  ;;  %v1098_v1 = vsel %vm499_vm1, %v1058_v52, %v1097_v58  ;;  %v1060_v6 = vsel %vm499_vm1, %v1059_v56, %v988_v24 }
 0x120   : > { %v5578_v15 = vperm.slane %v1098_v1, %v5556_v60  ;;  %v1066_v18 = vperm.slane %v1060_v6, %v5534_v37  ;;  %v1121_v34 = vrot.slane %v5567_v8, 4 }
 0x121   : > { %v1083_v5 = vrot.slane %v1054_v59, 4  ;;  %v1086_v13 = vsel %vm499_vm1, %v1054_v59, %v1085_v4  ;;  %v1096_v14 = vsel %vm499_vm1, %v1095_v61, %v1046_v42 }
 0x122   : > { %v5590_v32 = vperm.slane %v1086_v13, %v5556_v60  ;;  %v5593_v33 = vperm.slane %v1096_v14, %v5556_v60  ;;  %v1145_v39 = vrot.slane %v5578_v15, 4  ;;  %v1109_v45 = vrot.slane %v1066_v18, 4  ;;  %5011 = vrot.lane.b32.xlu0 %v5538_v38, %s5261_s14 }
 0x123   : > { %v5569_v9 = vpop.permute.xlu2 %1001  ;;  %v457_v10 = vpop.permute.xlu1 %456  ;;  %v1084_v28 = vsel %vm499_vm1, %v1083_v5, %v1042_v54 }
 0x124   : > { %v5580_v16 = vpop.permute.xlu0 %474  ;;  %v512_v19 = vsel %vm499_vm1, %v511_v7, %v457_v10  ;;  %v513_v24 = vrot.slane %v457_v10, 4  ;;  %v5602_v43 = vperm.slane %v1084_v28, %v5556_v60  ;;  %v1141_v50 = vrot.slane %v5593_v33, 4 }
 0x125   : > { %v518_v31 = vperm.slane %v512_v19, %v5534_v37  ;;  %v1185_v51 = vrot.slane %v5569_v9, 4  ;;  %v525_v62 = vrot.slane %v5580_v16, 4 }
 0x126   : > { %v514_v35 = vsel %vm499_vm1, %v5528_v29, %v513_v24  ;;  %v1137_v29 = vrot.slane %v5590_v32, 4  ;;  %v1133_v61 = vrot.slane %v5602_v43, 4 }
 0x127   : > { %v522_v40 = vperm.slane %v514_v35, %v5534_v37  ;;  %v547_v41 = vrot.slane %v518_v31, 4  ;;  %v550_v42 = vsel %vm499_vm1, %v518_v31, %v549_v26 }
 0x128   : > { %v5611_v52 = vperm.slane %v550_v42, %v5556_v60 }
 0x129   : > { %v548_v46 = vsel %vm499_vm1, %v547_v41, %v506_v3  ;;  %v559_v47 = vrot.slane %v522_v40, 4  ;;  %v562_v48 = vsel %vm499_vm1, %v522_v40, %v561_v17 }
 0x12a   : > { %v5618_v55 = vperm.slane %v548_v46, %v5556_v60  ;;  %v5625_v1 = vperm.slane %v562_v48, %v5556_v60  ;;  %v601_v7 = vrot.slane %v5611_v52, 4 }
 0x12b   : > { %v5613_v53 = vpop.permute.xlu2 %1013  ;;  %v1024_v54 = vpop.permute.xlu1 %1023  ;;  %v560_v56 = vsel %vm499_vm1, %v559_v47, %v510_v0 }
 0x12c   : > { %v481_v57 = vpop.permute.xlu0 %480  ;;  %v1071_v58 = vrot.slane %v1024_v54, 4  ;;  %v1074_v59 = vsel %vm499_vm1, %v1024_v54, %v1073_v12  ;;  %v5631_v4 = vperm.slane %v560_v56, %v5556_v60  ;;  %v1171_v12 = vrot.slane %v5613_v53, 4 }
 0x12d   : > { %v536_v3 = vsel %vm499_vm1, %v535_v30, %v481_v57  ;;  %v537_v0 = vrot.slane %v481_v57, 4  ;;  %v1082_v6 = vperm.slane %v1074_v59, %v5534_v37  ;;  %v597_v14 = vrot.slane %v5618_v55, 4 }
 0x12e   : > { %v1072_v5 = vsel %vm499_vm1, %v1071_v58, %v5518_v25  ;;  %v5638_v10 = vperm.slane %v536_v3, %v5534_v37  ;;  %v605_v31 = vrot.slane %v5631_v4, 4  ;;  %v609_v35 = vrot.slane %v5625_v1, 4 }
 0x12f   : > { %v1078_v13 = vperm.slane %v1072_v5, %v5534_v37  ;;  %v538_v17 = vsel %vm499_vm1, %v5543_v44, %v537_v0  ;;  %v1119_v19 = vrot.slane %v1082_v6, 4  ;;  %v1122_v24 = vsel %vm499_vm1, %v1082_v6, %v1121_v34 }
 0x130   : > { %v546_v25 = vperm.slane %v538_v17, %v5534_v37  ;;  %v1130_v30 = vperm.slane %v1122_v24, %v5556_v60  ;;  %v571_v44 = vrot.slane %v5638_v10, 4 }
 0x131   : > { %v1107_v26 = vrot.slane %v1078_v13, 4  ;;  %v1110_v28 = vsel %vm499_vm1, %v1078_v13, %v1109_v45  ;;  %v1120_v41 = vsel %vm499_vm1, %v1119_v19, %v5567_v8 }
 0x132   : > { %v1118_v40 = vperm.slane %v1110_v28, %v5556_v60  ;;  %v1126_v42 = vperm.slane %v1120_v41, %v5556_v60  ;;  %v1143_v46 = vrot.slane %v1130_v30, 4  ;;  %v583_v48 = vrot.slane %v546_v25, 4 }
 0x133   : > { %v1108_v34 = vsel %vm499_vm1, %v1107_v26, %v1066_v18  ;;  %v487_v47 = vpop.permute.xlu1 %486  ;;  %v465_v45 = vpop.permute.xlu2 %464  ;;  %v5662_v57 = vsel %vm499_vm1, %v1130_v30, %v1145_v39 }
 0x134   : > { %v1114_v54 = vperm.slane %v1108_v34, %v5556_v60  ;;  %v5659_v56 = vsel %vm499_vm1, %v1118_v40, %v1137_v29  ;;  %v5664_v58 = vpop.permute.xlu0 %953  ;;  %v1135_v8 = vrot.slane %v1118_v40, 4  ;;  %v1139_v59 = vrot.slane %v1126_v42, 4 }
 0x135   : > { %v5667_v18 = vsel %vm499_vm1, %v1126_v42, %v1141_v50  ;;  %v5671_v3 = vsel %vm499_vm1, %v1143_v46, %v5578_v15  ;;  %v1495_v5 = vrot.slane %v5659_v56, 4  ;;  %v523_v17 = vrot.slane %v487_v47, 4 }
 0x136   : > { %v1131_v0 = vrot.slane %v1114_v54, 4  ;;  %v5678_v39 = vsel %vm499_vm1, %v1139_v59, %v5593_v33  ;;  %v526_v50 = vsel %vm499_vm1, %v487_v47, %v525_v62  ;;  %v1161_v19 = vrot.slane %v5664_v58, 4 }
 0x137   : > { %v534_v15 = vperm.slane %v526_v50, %v5534_v37  ;;  %v611_v24 = vrot.slane %v465_v45, 4  ;;  %v614_v26 = vsel %vm499_vm1, %v465_v45, %v613_v2  ;;  %v524_v28 = vsel %vm499_vm1, %v523_v17, %v5580_v16 }
 0x138   : > { %v5690_v33 = vperm.slane %v614_v26, %v5534_v37  ;;  %v5694_v30 = vsel %vm499_vm1, %v1131_v0, %v5602_v43  ;;  %v5697_v62 = vsel %vm499_vm1, %v1114_v54, %v1133_v61  ;;  %v530_v40 = vperm.slane %v524_v28, %v5534_v37 }
 0x139   : > { %v584_v41 = vsel %vm499_vm1, %v583_v48, %v534_v15  ;;  %v585_v34 = vrot.slane %v534_v15, 4  ;;  %v612_v2 = vsel %vm499_vm1, %v611_v24, %v5476_v21  ;;  %v5712_v61 = vsel %vm499_vm1, %v1135_v8, %v5590_v32 }
 0x13a   : > { %v590_v42 = vperm.slane %v584_v41, %v5556_v60  ;;  %v5706_v46 = vperm.slane %v612_v2, %v5534_v37  ;;  %v572_v45 = vsel %vm499_vm1, %v571_v44, %v530_v40  ;;  %v573_v48 = vrot.slane %v530_v40, 4 }
 0x13b   : > { %v990_v43 = vpop.permute.xlu1 %989  ;;  %v5708_v47 = vpop.permute.xlu2 %991  ;;  %v586_v54 = vsel %vm499_vm1, %v546_v25, %v585_v34  ;;  %v5718_v0 = vperm.slane %v572_v45, %v5556_v60 }
 0x13c   : > { %v966_v59 = vpop.permute.xlu0 %965  ;;  %v594_v17 = vperm.slane %v586_v54, %v5556_v60  ;;  %v603_v50 = vrot.slane %v590_v42, 4  ;;  %v5722_v15 = vsel %vm499_vm1, %v590_v42, %v605_v31  ;;  %v574_v32 = vsel %vm499_vm1, %v5638_v10, %v573_v48 }
 0x13d   : > { %v1147_v8 = vrot.slane %v966_v59, 4  ;;  %v1172_v25 = vsel %vm499_vm1, %v1171_v12, %v990_v43  ;;  %v5731_v24 = vperm.slane %v574_v32, %v5556_v60  ;;  %v5737_v26 = vsel %vm499_vm1, %v5718_v0, %v597_v14 }
 0x13e   : > { %v5741_v31 = vsel %vm499_vm1, %v603_v50, %v5631_v4  ;;  %v607_v40 = vrot.slane %v594_v17, 4  ;;  %v5748_v12 = vsel %vm499_vm1, %v594_v17, %v609_v35  ;;  %v1150_v45 = vsel %vm499_vm1, %v966_v59, %v1149_v63 }
 0x13f   : > { %v5755_v14 = vsel %vm499_vm1, %v5731_v24, %v601_v7  ;;  %v759_v34 = vrot.slane %v5748_v12, 4  ;;  %v1148_v2 = vsel %vm499_vm1, %v1147_v8, %v5456_v20  ;;  %v1158_v17 = vperm.slane %v1150_v45, %v5534_v37 }
 0x140   : > { %v5764_v35 = vsel %vm499_vm1, %v607_v40, %v5625_v1  ;;  %v1154_v7 = vperm.slane %v1148_v2, %v5534_v37  ;;  %v1173_v50 = vrot.slane %v990_v43, 4  ;;  %v1178_v63 = vperm.slane %v1172_v25, %v5534_v37 }
 0x141   : > { %v760_v54 = vsel %vm499_vm1, %v759_v34, %v5722_v15  ;;  %v1209_v45 = vrot.slane %v1158_v17, 4  ;;  %v1483_v1 = vrot.slane %v5712_v61, 4 }
 0x142   : > { %v5778_v40 = vperm.slane %v760_v54, %v5534_v37  ;;  %v1197_v20 = vrot.slane %v1154_v7, 4  ;;  %v1174_v2 = vsel %vm499_vm1, %v5613_v53, %v1173_v50  ;;  %v1221_v41 = vrot.slane %v1178_v63, 4 }
 0x143   : > { %v978_v32 = vpop.permute.xlu1 %977  ;;  %v5774_v8 = vpop.permute.xlu2 %1003  ;;  %v1182_v44 = vperm.slane %v1174_v2, %v5534_v37 }
 0x144   : > { %v1026_v59 = vpop.permute.xlu0 %1025  ;;  %v1159_v4 = vrot.slane %v978_v32, 4  ;;  %v1162_v53 = vsel %vm499_vm1, %v978_v32, %v1161_v19 }
 0x145   : > { %v1183_v49 = vrot.slane %v1026_v59, 4  ;;  %v1186_v43 = vsel %vm499_vm1, %v1026_v59, %v1185_v51  ;;  %v1233_v13 = vrot.slane %v1182_v44, 4 }
 0x146   : > { %v1194_v54 = vperm.slane %v1186_v43, %v5534_v37  ;;  %v1160_v59 = vsel %vm499_vm1, %v1159_v4, %v5664_v58  ;;  %v1170_v43 = vperm.slane %v1162_v53, %v5534_v37 }
 0x147   : > { %v1184_v25 = vsel %vm499_vm1, %v1183_v49, %v5569_v9  ;;  %v1166_v2 = vperm.slane %v1160_v59, %v5534_v37 }
 0x148   : > { %v1190_v16 = vperm.slane %v1184_v25, %v5534_v37  ;;  %v1231_v51 = vrot.slane %v1194_v54, 4  ;;  %v1234_v50 = vsel %vm499_vm1, %v1194_v54, %v1233_v13  ;;  %v1207_v28 = vrot.slane %v1170_v43, 4 }
 0x149   : > { %v1242_v58 = vperm.slane %v1234_v50, %v5556_v60  ;;  %v1195_v4 = vrot.slane %v1166_v2, 4  ;;  %v1198_v9 = vsel %vm499_vm1, %v1166_v2, %v1197_v20 }
 0x14a   : > { %v1219_v49 = vrot.slane %v1190_v16, 4  ;;  %v1222_v19 = vsel %vm499_vm1, %v1190_v16, %v1221_v41  ;;  %v1232_v32 = vsel %vm499_vm1, %v1231_v51, %v1182_v44  ;;  %v1210_v16 = vsel %vm499_vm1, %v1170_v43, %v1209_v45 }
 0x14b   : > { %v1230_v25 = vperm.slane %v1222_v19, %v5556_v60  ;;  %v1238_v48 = vperm.slane %v1232_v32, %v5556_v60  ;;  %v994_v59 = vpop.permute.xlu2 %993  ;;  %v5808_v53 = vpop.permute.xlu1 %458  ;;  %v1255_v51 = vrot.slane %v1242_v58, 4  ;;  %v1196_v50 = vsel %vm499_vm1, %v1195_v4, %v1154_v7 }
 0x14c   : > { %v1220_v42 = vsel %vm499_vm1, %v1219_v49, %v1178_v63  ;;  %v5813_v44 = vpop.permute.xlu0 %476  ;;  %v1206_v19 = vperm.slane %v1198_v9, %v5556_v60  ;;  %v1208_v32 = vsel %vm499_vm1, %v1207_v28, %v1158_v17  ;;  %v1218_v63 = vperm.slane %v1210_v16, %v5556_v60 }
 0x14d   : > { %8149 = vst [vmem:[#allocation13_spill] sm:$0xff] %v5813_v44  ;;  %v1226_v13 = vperm.slane %v1220_v42, %v5556_v60  ;;  %v1247_v41 = vrot.slane %v1230_v25, 4  ;;  %v1251_v54 = vrot.slane %v1238_v48, 4  ;;  %v1202_v20 = vperm.slane %v1196_v50, %v5556_v60 }
 0x14e   : > { %v1214_v45 = vperm.slane %v1208_v32, %v5556_v60  ;;  %v1249_v43 = vrot.slane %v1206_v19, 4  ;;  %v5827_v6 = vsel %vm499_vm1, %v1255_v51, %v1218_v63  ;;  %v1257_v7 = vrot.slane %v1218_v63, 4 }
 0x14f   : > { %v1243_v49 = vrot.slane %v1226_v13, 4  ;;  %v5824_v42 = vsel %vm499_vm1, %v1247_v41, %v1206_v19  ;;  %v1245_v9 = vrot.slane %v1202_v20, 4  ;;  %v1619_v4 = vrot.slane %v5827_v6, 4 }
 0x150   : > { %v5830_v28 = vsel %vm499_vm1, %v1251_v54, %v1214_v45  ;;  %v1253_v17 = vrot.slane %v1214_v45, 4  ;;  %v5834_v16 = vsel %vm499_vm1, %v1230_v25, %v1249_v43  ;;  %v5837_v50 = vsel %vm499_vm1, %v1242_v58, %v1257_v7 }
 0x151   : > { %v1397_v19 = vrot.slane %v994_v59, 4  ;;  %v1631_v32 = vrot.slane %v5837_v50, 4  ;;  %v625_v54 = vrot.slane %v5808_v53, 4  ;;  %v5846_v2 = vsel %vm499_vm1, %v1243_v49, %v1202_v20 }
 0x152   : > { %v5841_v51 = vsel %vm499_vm1, %v1238_v48, %v1253_v17  ;;  %v5862_v49 = vsel %vm499_vm1, %v1226_v13, %v1245_v9  ;;  %v1607_v9 = vrot.slane %v5834_v16, 4 }
 0x153   : > { %v1018_v63 = vpop.permute.xlu2 %1017  ;;  %v968_v45 = vpop.permute.xlu1 %967 }
 0x154   : > { %v5848_v25 = vpop.permute.xlu0 %955  ;;  %v1395_v43 = vrot.slane %v1018_v63, 4  ;;  %v1398_v58 = vsel %vm499_vm1, %v1018_v63, %v1397_v19  ;;  %v1259_v7 = vrot.slane %v968_v45, 4  ;;  %v1262_v48 = vsel %vm499_vm1, %v968_v45, %v1261_v11 }
 0x155   : > { %v1273_v17 = vrot.slane %v5848_v25, 4  ;;  %v5856_v41 = vperm.slane %v1398_v58, %v5534_v37  ;;  %v5859_v29 = vperm.slane %v1262_v48, %v5534_v37  ;;  %v1595_v63 = vrot.slane %v5824_v42, 4 }
 0x156   : > { %v1396_v20 = vsel %vm499_vm1, %v1395_v43, %v994_v59  ;;  %v1260_v19 = vsel %vm499_vm1, %v1259_v7, %v5484_v22  ;;  %v1620_v43 = vsel %vm499_vm1, %v1619_v4, %v5830_v28  ;;  %v1608_v11 = vsel %vm499_vm1, %v1607_v9, %v5862_v49 }
 0x157   : > { %8150 = vst [vmem:[#allocation14_spill] sm:$0xff] %v5856_v41  ;;  %v5870_v45 = vperm.slane %v1396_v20, %v5534_v37  ;;  %v5874_v48 = vperm.slane %v1260_v19, %v5534_v37  ;;  %v1596_v59 = vsel %vm499_vm1, %v1595_v63, %v5846_v2  ;;  %v1626_v58 = vperm.slane %v1620_v43, %v5534_v37 }
 0x158   : > { %v1602_v19 = vperm.slane %v1596_v59, %v5534_v37  ;;  %v1632_v63 = vsel %vm499_vm1, %v1631_v32, %v5841_v51  ;;  %v1484_v4 = vsel %vm499_vm1, %v1483_v1, %v5694_v30  ;;  %v5899_v7 = vsel %vm499_vm1, %v1495_v5, %v5697_v62 }
 0x159   : > { %8151 = vst [vmem:[#allocation15_spill] sm:$0xff] %v5870_v45  ;;  %v1614_v59 = vperm.slane %v1608_v11, %v5534_v37  ;;  %v1638_v43 = vperm.slane %v1632_v63, %v5534_v37  ;;  %v1669_v9 = vrot.slane %v1626_v58, 4  ;;  %v8152_v45 = vrot.slane %v5708_v47, 4 }
 0x15a   : > { %v1645_v22 = vrot.slane %v1602_v19, 4 }
 0x15b   : > { %v471_v20 = vpop.permute.xlu2 %470  ;;  %v980_v13 = vpop.permute.xlu1 %979  ;;  %v1643_v36 = vrot.slane %v1614_v59, 4  ;;  %v1667_v27 = vrot.slane %v1638_v43, 4  ;;  %v1670_v44 = vsel %vm499_vm1, %v1638_v43, %v1669_v9 }
 0x15c   : > { %v1016_v32 = vpop.permute.xlu0 %1015  ;;  %v623_v21 = vrot.slane %v471_v20, 4  ;;  %v626_v10 = vsel %vm499_vm1, %v471_v20, %v625_v54  ;;  %v1271_v34 = vrot.slane %v980_v13, 4  ;;  %v1274_v1 = vsel %vm499_vm1, %v980_v13, %v1273_v17 }
 0x15d   : > { %v1646_v5 = vsel %vm499_vm1, %v1614_v59, %v1645_v22  ;;  %v5911_v63 = vperm.slane %v1670_v44, %v5556_v60  ;;  %v1283_v41 = vrot.slane %v1016_v32, 4  ;;  %v1286_v54 = vsel %vm499_vm1, %v1016_v32, %v8152_v45 }
 0x15e   : > { %v5908_v11 = vperm.slane %v1646_v5, %v5556_v60  ;;  %v1644_v20 = vsel %vm499_vm1, %v1643_v36, %v1602_v19  ;;  %v1668_v17 = vsel %vm499_vm1, %v1667_v27, %v1626_v58  ;;  %v5919_v13 = vperm.slane %v1286_v54, %v5534_v37 }
 0x15f   : > { %v624_v22 = vsel %vm499_vm1, %v623_v21, %v5808_v53  ;;  %v5924_v59 = vperm.slane %v1644_v20, %v5556_v60  ;;  %v5927_v44 = vperm.slane %v1668_v17, %v5556_v60  ;;  %v1695_v43 = vrot.slane %v5911_v63, 4 }
 0x160   : > { %v1284_v36 = vsel %vm499_vm1, %v1283_v41, %v5708_v47  ;;  %v630_v58 = vperm.slane %v624_v22, %v5534_v37  ;;  %v634_v19 = vperm.slane %v626_v10, %v5534_v37  ;;  %v8153_v47 = vrot.slane %v5706_v46, 4 }
 0x161   : > { %v1691_v21 = vrot.slane %v5927_v44, 4  ;;  %v1693_v53 = vrot.slane %v5924_v59, 4  ;;  %v1696_v9 = vsel %vm499_vm1, %v1695_v43, %v5908_v11  ;;  %v5941_v32 = vperm.slane %v1284_v36, %v5534_v37 }
 0x162   : > { %4836 = vmatpush.xpose.msk.msrb.mxu0 %vm2915_vm2, %v1696_v9  ;;  %v659_v5 = vrot.slane %v630_v58, 4  ;;  %v662_v41 = vsel %vm499_vm1, %v630_v58, %v8153_v47  ;;  %v671_v54 = vrot.slane %v634_v19, 4  ;;  %v8154_v10 = vrot.slane %v5690_v33, 4 }
 0x163   : > { %v1692_v17 = vsel %vm499_vm1, %v1691_v21, %v5924_v59  ;;  %v5954_v43 = vperm.slane %v662_v41, %v5556_v60  ;;  %v1282_v21 = vperm.slane %v1274_v1, %v5534_v37  ;;  %v8157_v1 = vrot.slane %v5671_v3, 4 }
 0x164   : > { %v674_v20 = vsel %vm499_vm1, %v634_v19, %v8154_v10  ;;  %4830 = vmatpush.xpose.msk.msrb.mxu3 %vm2915_vm2, %v1692_v17  ;;  %v660_v58 = vsel %vm499_vm1, %v659_v5, %v5706_v46  ;;  %v672_v9 = vsel %vm499_vm1, %v671_v54, %v5690_v33  ;;  %v1272_v19 = vsel %vm499_vm1, %v1271_v34, %v5848_v25 }
 0x165   : > { %v5957_v36 = vperm.slane %v674_v20, %v5556_v60  ;;  %v5968_v47 = vperm.slane %v660_v58, %v5556_v60  ;;  %v5971_v41 = vperm.slane %v672_v9, %v5556_v60  ;;  %v1278_v46 = vperm.slane %v1272_v19, %v5534_v37 }
 0x166   : > { %v1319_v5 = vrot.slane %v1282_v21, 4  ;;  %v8155_v33 = vrot.slane %v5859_v29, 4  ;;  %v1490_v34 = vperm.slane %v1484_v4, %v5534_v37  ;;  %v1497_v58 = vrot.slane %v5697_v62, 4 }
 0x167   : > { %v1307_v9 = vrot.slane %v1278_v46, 4  ;;  %v8156_v20 = vrot.slane %v5874_v48, 4  ;;  %v1502_v4 = vperm.slane %v5899_v7, %v5534_v37  ;;  %v1508_v25 = vsel %vm499_vm1, %v8157_v1, %v5678_v39 }
 0x168   : > { %v1322_v54 = vsel %vm499_vm1, %v1282_v21, %v8155_v33  ;;  %v1320_v10 = vsel %vm499_vm1, %v1319_v5, %v5859_v29  ;;  %v1514_v29 = vperm.slane %v1508_v25, %v5534_v37  ;;  %v8158_v7 = vrot.slane %v5662_v57, 4 }
 0x169   : > { %v5983_v17 = vperm.slane %v1322_v54, %v5556_v60  ;;  %v1310_v19 = vsel %vm499_vm1, %v1278_v46, %v8156_v20  ;;  %v5997_v33 = vperm.slane %v1320_v10, %v5556_v60  ;;  %v1308_v20 = vsel %vm499_vm1, %v1307_v9, %v5874_v48 }
 0x16a   : > { %v5994_v21 = vperm.slane %v1310_v19, %v5556_v60  ;;  %v1520_v46 = vsel %vm499_vm1, %v8158_v7, %v5667_v18  ;;  %v1531_v5 = vrot.slane %v1502_v4, 4  ;;  %v6012_v10 = vperm.slane %v1308_v20, %v5556_v60 }
 0x16b   : > { %v1526_v1 = vperm.slane %v1520_v46, %v5534_v37  ;;  %v1533_v48 = vrot.slane %v1490_v34, 4  ;;  %v1557_v9 = vrot.slane %v1514_v29, 4  ;;  %v8159_v25 = vrot.slane %v5846_v2, 4 }
 0x16c   : > { %v1532_v22 = vsel %vm499_vm1, %v1531_v5, %v1490_v34  ;;  %v1357_v7 = vrot.slane %v6012_v10, 4  ;;  %v8160_v34 = vrot.slane %v5862_v49, 4  ;;  %v8161_v5 = vrot.slane %v5830_v28, 4 }
 0x16d   : > { %v1598_v27 = vsel %vm499_vm1, %v5824_v42, %v8159_v25  ;;  %v6024_v20 = vperm.slane %v1532_v22, %v5556_v60  ;;  %v1555_v45 = vrot.slane %v1526_v1, 4  ;;  %v1534_v54 = vsel %vm499_vm1, %v1502_v4, %v1533_v48 }
 0x16e   : > { %v1606_v19 = vperm.slane %v1598_v27, %v5534_v37  ;;  %v1558_v46 = vsel %vm499_vm1, %v1526_v1, %v1557_v9  ;;  %v1610_v2 = vsel %vm499_vm1, %v5834_v16, %v8160_v34  ;;  %v1622_v42 = vsel %vm499_vm1, %v5827_v6, %v8161_v5 }
 0x16f   : > { %v1556_v22 = vsel %vm499_vm1, %v1555_v45, %v1514_v29  ;;  %v6039_v25 = vperm.slane %v1534_v54, %v5556_v60  ;;  %v6042_v27 = vperm.slane %v1558_v46, %v5556_v60  ;;  %v1618_v4 = vperm.slane %v1610_v2, %v5534_v37 }
 0x170   : > { %v6046_v49 = vperm.slane %v1556_v22, %v5556_v60  ;;  %v1630_v16 = vperm.slane %v1622_v42, %v5534_v37  ;;  %v1633_v28 = vrot.slane %v5841_v51, 4  ;;  %v1657_v1 = vrot.slane %v1606_v19, 4 }
 0x171   : > { %v1583_v6 = vrot.slane %v6042_v27, 4  ;;  %v1694_v45 = vsel %vm499_vm1, %v5927_v44, %v1693_v53  ;;  %v1655_v54 = vrot.slane %v1618_v4, 4  ;;  %v8162_v29 = vrot.slane %v5718_v0, 4 }
 0x172   : > { %v1579_v9 = vrot.slane %v6046_v49, 4  ;;  %v1634_v51 = vsel %vm499_vm1, %v5837_v50, %v1633_v28  ;;  %v1658_v46 = vsel %vm499_vm1, %v1618_v4, %v1657_v1  ;;  %v1681_v34 = vrot.slane %v1630_v16, 4 }
 0x173   : > { %v6059_v48 = vsel %vm499_vm1, %v8162_v29, %v5618_v55  ;;  %v1584_v59 = vsel %vm499_vm1, %v1583_v6, %v6039_v25  ;;  %v1642_v44 = vperm.slane %v1634_v51, %v5534_v37  ;;  %v6069_v53 = vperm.slane %v1658_v46, %v5556_v60 }
 0x174   : > { %v1656_v0 = vsel %vm499_vm1, %v1655_v54, %v1606_v19  ;;  %v1580_v55 = vsel %vm499_vm1, %v1579_v9, %v6024_v20  ;;  %4837 = vmatpush.xpose.msk.msrb.mxu0 %vm2915_vm2, %v1584_v59  ;;  %v8163_v2 = vrot.slane %v5731_v24, 4  ;;  %v725_v42 = vrot.slane %v6059_v48, 4 }
 0x175   : > { %v6076_v50 = vperm.slane %v1656_v0, %v5556_v60  ;;  %4831 = vmatpush.xpose.msk.msrb.mxu3 %vm2915_vm2, %v1580_v55  ;;  %v1679_v22 = vrot.slane %v1642_v44, 4  ;;  %v1682_v19 = vsel %vm499_vm1, %v1642_v44, %v1681_v34  ;;  %v1705_v4 = vrot.slane %v6069_v53, 4 }
 0x176   : > { %v6082_v5 = vsel %vm499_vm1, %v8163_v2, %v5611_v52  ;;  %v6090_v1 = vperm.slane %v1682_v19, %v5556_v60  ;;  %v8164_v52 = vrot.slane %v5755_v14, 4  ;;  %v8165_v6 = vrot.slane %v5764_v35, 4 }
 0x177   : > { %v723_v28 = vrot.slane %v6082_v5, 4  ;;  %v795_v29 = vrot.slane %v5778_v40, 4  ;;  %v1680_v9 = vsel %vm499_vm1, %v1679_v22, %v1630_v16  ;;  %v8166_v22 = vrot.slane %v5694_v30, 4 }
 0x178   : > { %v736_v24 = vsel %vm499_vm1, %v8164_v52, %v5737_v26  ;;  %v748_v54 = vsel %vm499_vm1, %v8165_v6, %v5741_v31  ;;  %v1703_v34 = vrot.slane %v6090_v1, 4  ;;  %v1706_v59 = vsel %vm499_vm1, %v6090_v1, %v1705_v4 }
 0x179   : > { %4833 = vmatpush.xpose.msk.msra.mxu3 %vm2915_vm2, %v1694_v45  ;;  %v724_v51 = vsel %vm499_vm1, %v723_v28, %v6059_v48  ;;  %v742_v46 = vperm.slane %v736_v24, %v5534_v37  ;;  %v754_v45 = vperm.slane %v748_v54, %v5534_v37  ;;  %v6111_v44 = vperm.slane %v1680_v9, %v5556_v60 }
 0x17a   : > { %v730_v0 = vperm.slane %v724_v51, %v5534_v37  ;;  %4851 = vmatpush.xpose.msk.msrb.mxu1 %vm2915_vm2, %v1706_v59  ;;  %v1486_v19 = vsel %vm499_vm1, %v5712_v61, %v8166_v22  ;;  %v1498_v30 = vsel %vm499_vm1, %v5659_v56, %v1497_v58  ;;  %v8167_v61 = vrot.slane %v5678_v39, 4  ;;  %v6152_v58 = vpop.permute.xlu0 %957 }
 0x17b   : > { %v771_v16 = vrot.slane %v742_v46, 4  ;;  %v796_v55 = vsel %vm499_vm1, %v795_v29, %v754_v45  ;;  %v797_v2 = vrot.slane %v754_v45, 4  ;;  %v1699_v28 = vrot.slane %v6111_v44, 4 }
 0x17c   : > { %v6122_v4 = vperm.slane %v796_v55, %v5556_v60  ;;  %v773_v1 = vrot.slane %v730_v0, 4  ;;  %v1494_v52 = vperm.slane %v1486_v19, %v5534_v37  ;;  %v1510_v54 = vsel %vm499_vm1, %v5671_v3, %v8167_v61 }
 0x17d   : > { %v772_v24 = vsel %vm499_vm1, %v771_v16, %v730_v0  ;;  %v798_v6 = vsel %vm499_vm1, %v5778_v40, %v797_v2  ;;  %v1700_v29 = vsel %vm499_vm1, %v1699_v28, %v6076_v50  ;;  %v1506_v3 = vperm.slane %v1498_v30, %v5534_v37  ;;  %v6165_v28 = vpop.permute.xlu2 %494 }
 0x17e   : > { %v6139_v9 = vperm.slane %v772_v24, %v5556_v60  ;;  %v819_v51 = vrot.slane %v6122_v4, 4  ;;  %v774_v40 = vsel %vm499_vm1, %v742_v46, %v773_v1  ;;  %4842 = vmatpush.xpose.msk.msra.mxu0 %vm2915_vm2, %v1700_v29  ;;  %v6148_v56 = vperm.slane %v798_v6, %v5556_v60 }
 0x17f   : > { %v6145_v62 = vperm.slane %v774_v40, %v5556_v60  ;;  %v1518_v39 = vperm.slane %v1510_v54, %v5534_v37  ;;  %v8168_v46 = vrot.slane %v5667_v18, 4  ;;  %v1545_v16 = vrot.slane %v1494_v52, 4 }
 0x180   : > { %v820_v45 = vsel %vm499_vm1, %v819_v51, %v6139_v9  ;;  %v821_v59 = vrot.slane %v6139_v9, 4  ;;  %v823_v55 = vrot.slane %v6148_v56, 4  ;;  %v1581_v24 = vrot.slane %v6024_v20, 4 }
 0x181   : > { %v1522_v0 = vsel %vm499_vm1, %v5662_v57, %v8168_v46  ;;  %4832 = vmatmul.msk.f32.vlgmr.msrb.gmra.mxu3 %vm2915_vm2, %v820_v45  ;;  %v825_v2 = vrot.slane %v6145_v62, 4  ;;  %v1569_v19 = vrot.slane %v1518_v39, 4  ;;  %v1546_v1 = vsel %vm499_vm1, %v1506_v3, %v1545_v16  ;;  %v1028_v57 = vpop.permute.xlu1 %1027 }
 0x182   : > { %v1530_v22 = vperm.slane %v1522_v0, %v5534_v37  ;;  %v1543_v18 = vrot.slane %v1506_v3, 4  ;;  %v1385_v6 = vrot.slane %v6152_v58, 4  ;;  %v824_v30 = vsel %vm499_vm1, %v823_v55, %v6145_v62 }
 0x183   : > { %v6173_v61 = vperm.slane %v1546_v1, %v5556_v60  ;;  %4838 = vmatmul.msk.f32.vlgmr.msrb.gmra.mxu0 %vm2915_vm2, %v824_v30  ;;  %v1582_v20 = vsel %vm499_vm1, %v6046_v49, %v1581_v24  ;;  %v647_v3 = vrot.slane %v6165_v28, 4  ;;  %v1295_v16 = vrot.slane %v1028_v57, 4 }
 0x184   : > { %v1567_v54 = vrot.slane %v1530_v22, 4  ;;  %v1570_v29 = vsel %vm499_vm1, %v1530_v22, %v1569_v19  ;;  %v1544_v40 = vsel %vm499_vm1, %v1543_v18, %v1494_v52  ;;  %4834 = vmatpush.xpose.msk.msra.mxu3 %vm2915_vm2, %v1582_v20  ;;  %v8169_v22 = vrot.slane %v5774_v8, 4  ;;  %v6230_v20 = vpop.permute.xlu0 %981 }
 0x185   : > { %v6178_v51 = vperm.slane %v1570_v29, %v5556_v60  ;;  %v1593_v45 = vrot.slane %v6173_v61, 4  ;;  %v6187_v46 = vperm.slane %v1544_v40, %v5556_v60  ;;  %v8170_v52 = vrot.slane %v5908_v11, 4 }
 0x186   : > { %v1568_v0 = vsel %vm499_vm1, %v1567_v54, %v1518_v39  ;;  %v1298_v49 = vsel %vm499_vm1, %v1028_v57, %v8169_v22  ;;  %v1704_v1 = vsel %vm499_vm1, %v1703_v34, %v6069_v53  ;;  %v1296_v39 = vsel %vm499_vm1, %v1295_v16, %v5774_v8 }
 0x187   : > { %v6191_v55 = vperm.slane %v1568_v0, %v5556_v60  ;;  %v1698_v19 = vsel %vm499_vm1, %v5911_v63, %v8170_v52  ;;  %v1594_v24 = vsel %vm499_vm1, %v6178_v51, %v1593_v45  ;;  %v1306_v18 = vperm.slane %v1298_v49, %v5534_v37 }
 0x188   : > { %4839 = vmatpush.xpose.msk.msrb.mxu3 %vm2915_vm2, %v1698_v19  ;;  %v726_v11 = vsel %vm499_vm1, %v6082_v5, %v725_v42  ;;  %4852 = vmatpush.xpose.msk.msrb.mxu1 %vm2915_vm2, %v1594_v24  ;;  %v1302_v53 = vperm.slane %v1296_v39, %v5534_v37  ;;  %v8171_v8 = vrot.slane %v5737_v26, 4  ;;  %v8172_v48 = vrot.slane %v5919_v13, 4 }
 0x189   : > { %v1587_v63 = vrot.slane %v6191_v55, 4  ;;  %v6216_v34 = vperm.slane %v726_v11, %v5534_v37  ;;  %v1343_v30 = vrot.slane %v1306_v18, 4  ;;  %v8173_v42 = vrot.slane %v5741_v31, 4 }
 0x18a   : > { %v738_v57 = vsel %vm499_vm1, %v5755_v14, %v8171_v8  ;;  %v1346_v54 = vsel %vm499_vm1, %v1306_v18, %v8172_v48  ;;  %v1331_v40 = vrot.slane %v1302_v53, 4  ;;  %v8174_v14 = vrot.slane %v5941_v32, 4 }
 0x18b   : > { %v746_v5 = vperm.slane %v738_v57, %v5534_v37  ;;  %v750_v29 = vsel %vm499_vm1, %v5764_v35, %v8173_v42  ;;  %v1588_v26 = vsel %vm499_vm1, %v1587_v63, %v6187_v46  ;;  %v1354_v0 = vperm.slane %v1346_v54, %v5556_v60 }
 0x18c   : > { %v1334_v45 = vsel %vm499_vm1, %v1302_v53, %v8174_v14  ;;  %4843 = vmatpush.xpose.msk.msra.mxu0 %vm2915_vm2, %v1588_v26  ;;  %v1344_v31 = vsel %vm499_vm1, %v1343_v30, %v5919_v13  ;;  %v758_v35 = vperm.slane %v750_v29, %v5534_v37  ;;  %v8175_v22 = vrot.slane %v5722_v15, 4  ;;  %v970_v13 = vpop.permute.xlu1 %969 }
 0x18d   : > { %v6240_v16 = vperm.slane %v1334_v45, %v5556_v60  ;;  %v1332_v52 = vsel %vm499_vm1, %v1331_v40, %v5941_v32  ;;  %v1350_v19 = vperm.slane %v1344_v31, %v5556_v60  ;;  %v1367_v24 = vrot.slane %v1354_v0, 4 }
 0x18e   : > { %v762_v49 = vsel %vm499_vm1, %v5748_v12, %v8175_v22  ;;  %v8176_v39 = vrot.slane %v5983_v17, 4  ;;  %v6259_v11 = vperm.slane %v1332_v52, %v5556_v60  ;;  %v8177_v12 = vrot.slane %v5994_v21, 4 }
 0x18f   : > { %v1359_v15 = vrot.slane %v6240_v16, 4  ;;  %v1363_v53 = vrot.slane %v1350_v19, 4  ;;  %v8178_v8 = vrot.slane %v5997_v33, 4  ;;  %v770_v29 = vperm.slane %v762_v49, %v5534_v37 }
 0x190   : > { %v6255_v18 = vsel %vm499_vm1, %v1354_v0, %v8176_v39  ;;  %4848 = vmatpush.xpose.msk.msrb.mxu0 %vm2915_vm2, %v1704_v1  ;;  %v6266_v32 = vsel %vm499_vm1, %v6240_v16, %v8177_v12  ;;  %v6276_v1 = vsel %vm499_vm1, %v1367_v24, %v5983_v17  ;;  %v1355_v48 = vrot.slane %v6259_v11, 4  ;;  %v1030_v12 = vpop.permute.xlu0 %1029 }
 0x191   : > { %v1743_v63 = vrot.slane %v6255_v18, 4  ;;  %v6272_v57 = vsel %vm499_vm1, %v1350_v19, %v8178_v8  ;;  %v1719_v30 = vrot.slane %v6266_v32, 4  ;;  %v1731_v54 = vrot.slane %v6276_v1, 4 }
 0x192   : > { %v1745_v42 = vrot.slane %v6272_v57, 4  ;;  %v6285_v26 = vsel %vm499_vm1, %v1363_v53, %v5997_v33  ;;  %v785_v40 = vrot.slane %v6216_v34, 4  ;;  %v809_v14 = vrot.slane %v758_v35, 4 }
 0x193   : > { %v1733_v17 = vrot.slane %v6285_v26, 4  ;;  %v807_v0 = vrot.slane %v770_v29, 4  ;;  %v1585_v31 = vrot.slane %v6039_v25, 4  ;;  %v1591_v33 = vrot.slane %v6178_v51, 4 }
 0x194   : > { %v1746_v45 = vsel %vm499_vm1, %v6255_v18, %v1745_v42  ;;  %v786_v49 = vsel %vm499_vm1, %v746_v5, %v785_v40  ;;  %v810_v52 = vsel %vm499_vm1, %v770_v29, %v809_v14  ;;  %v822_v25 = vsel %vm499_vm1, %v6122_v4, %v821_v59 }
 0x195   : > { %v6293_v22 = vperm.slane %v1746_v45, %v5534_v37  ;;  %v794_v19 = vperm.slane %v786_v49, %v5556_v60  ;;  %v818_v24 = vperm.slane %v810_v52, %v5556_v60  ;;  %v1586_v39 = vsel %vm499_vm1, %v6042_v27, %v1585_v31  ;;  %4835 = vmatmul.msk.f32.vlgmr.msra.gmra.mxu3 %vm2915_vm2, %v822_v25 }
 0x196   : > { %4840 = vmatpush.xpose.msk.msrb.mxu3 %vm2915_vm2, %v1586_v39  ;;  %v1592_v53 = vsel %vm499_vm1, %v1591_v33, %v6173_v61  ;;  %v783_v8 = vrot.slane %v746_v5, 4  ;;  %v808_v51 = vsel %vm499_vm1, %v807_v0, %v758_v35  ;;  %v1701_v42 = vrot.slane %v6076_v50, 4  ;;  %v1006_v5 = vpop.permute.xlu1 %1005 }
 0x197   : > { %v831_v29 = vrot.slane %v818_v24, 4  ;;  %v833_v40 = vrot.slane %v794_v19, 4  ;;  %4849 = vmatpush.xpose.msk.msrb.mxu0 %vm2915_vm2, %v1592_v53  ;;  %v814_v27 = vperm.slane %v808_v51, %v5556_v60  ;;  %v1383_v4 = vrot.slane %v6230_v20, 4 }
 0x198   : > { %v784_v9 = vsel %vm499_vm1, %v783_v8, %v6216_v34  ;;  %v1702_v59 = vsel %vm499_vm1, %v6111_v44, %v1701_v42  ;;  %v1386_v50 = vsel %vm499_vm1, %v6230_v20, %v1385_v6  ;;  %v1371_v61 = vrot.slane %v970_v13, 4 }
 0x199   : > { %v834_v35 = vsel %vm499_vm1, %v818_v24, %v833_v40  ;;  %v790_v14 = vperm.slane %v784_v9, %v5556_v60  ;;  %v827_v45 = vrot.slane %v814_v27, 4  ;;  %v1384_v34 = vsel %vm499_vm1, %v1383_v4, %v6152_v58 }
 0x19a   : > { %4845 = vmatpush.xpose.msk.msra.mxu3 %vm2915_vm2, %v1702_v59  ;;  %4853 = vmatmul.msk.f32.vlgmr.msrb.gmra.mxu1 %vm2915_vm2, %v834_v35  ;;  %v1390_v44 = vperm.slane %v1384_v34, %v5534_v37  ;;  %v1394_v0 = vperm.slane %v1386_v50, %v5534_v37  ;;  %v1372_v6 = vsel %vm499_vm1, %v1371_v61, %v5498_v23  ;;  %v8179_v20 = vrot.slane %v5498_v23, 4 }
 0x19b   : > { %v828_v49 = vsel %vm499_vm1, %v827_v45, %v790_v14  ;;  %v1378_v52 = vperm.slane %v1372_v6, %v5534_v37  ;;  %v1589_v58 = vrot.slane %v6187_v46, 4  ;;  %v826_v25 = vsel %vm499_vm1, %v6148_v56, %v825_v2 }
 0x19c   : > { %v1374_v31 = vsel %vm499_vm1, %v970_v13, %v8179_v20  ;;  %4844 = vmatmul.msk.f32.vlgmr.msra.gmra.mxu0 %vm2915_vm2, %v828_v49  ;;  %v1419_v24 = vrot.slane %v1390_v44, 4  ;;  %v1431_v39 = vrot.slane %v1394_v0, 4  ;;  %v832_v8 = vsel %vm499_vm1, %v831_v29, %v794_v19  ;;  %v483_v19 = vpop.permute.xlu0 %482 }
 0x19d   : > { %v1382_v33 = vperm.slane %v1374_v31, %v5534_v37  ;;  %v1421_v23 = vrot.slane %v1378_v52, 4  ;;  %v1590_v13 = vsel %vm499_vm1, %v6191_v55, %v1589_v58  ;;  %v1407_v62 = vrot.slane %v1030_v12, 4  ;;  %4841 = vmatmul.msk.f32.vlgmr.msrb.gmra.mxu3 %vm2915_vm2, %v826_v25  ;;  %v8180_v31 = vld [vmem:[#allocation15_spill] sm:$0xff] }
 0x19e   : > { %v1420_v51 = vsel %vm499_vm1, %v1419_v24, %v1378_v52  ;;  %4846 = vmatpush.xpose.msk.msra.mxu3 %vm2915_vm2, %v1590_v13  ;;  %v1409_v42 = vrot.slane %v1006_v5, 4  ;;  %v489_v6 = vpop.permute.xlu1 %488  ;;  %v8181_v49 = vrot.slane %v8180_v31, 4  ;;  %v8182_v52 = vld [vmem:[#allocation14_spill] sm:$0xff] }
 0x19f   : > { %v1433_v53 = vrot.slane %v1382_v33, 4  ;;  %v1432_v46 = vsel %vm499_vm1, %v1431_v39, %v1382_v33  ;;  %v1422_v56 = vsel %vm499_vm1, %v1390_v44, %v1421_v23  ;;  %v1426_v2 = vperm.slane %v1420_v51, %v5556_v60 }
 0x1a0   : > { %v1438_v55 = vperm.slane %v1432_v46, %v5556_v60  ;;  %v1430_v29 = vperm.slane %v1422_v56, %v5556_v60  ;;  %v1408_v9 = vsel %vm499_vm1, %v1407_v62, %v1006_v5  ;;  %v1410_v38 = vsel %vm499_vm1, %v1030_v12, %v1409_v42 }
 0x1a1   : > { %v1434_v40 = vsel %vm499_vm1, %v1394_v0, %v1433_v53  ;;  %v1469_v59 = vrot.slane %v1426_v2, 4  ;;  %v1414_v61 = vperm.slane %v1408_v9, %v5534_v37  ;;  %v1418_v35 = vperm.slane %v1410_v38, %v5534_v37 }
 0x1a2   : > { %v1442_v4 = vperm.slane %v1434_v40, %v5556_v60  ;;  %v1477_v50 = vrot.slane %v1438_v55, 4  ;;  %v1473_v45 = vrot.slane %v1430_v29, 4  ;;  %v829_v44 = vrot.slane %v790_v14, 4 }
 0x1a3   : > { %v648_v0 = vsel %vm499_vm1, %v647_v3, %v483_v19  ;;  %v1443_v20 = vrot.slane %v1414_v61, 4  ;;  %v1446_v5 = vsel %vm499_vm1, %v1414_v61, %v8181_v49  ;;  %v1455_v12 = vrot.slane %v1418_v35, 4 }
 0x1a4   : > { %v1481_v34 = vrot.slane %v1442_v4, 4  ;;  %v8183_v33 = vrot.slane %v8182_v52, 4  ;;  %4850 = vmatmul.msk.f32.vlgmr.msrb.gmra.mxu0 %vm2915_vm2, %v832_v8  ;;  %v1454_v24 = vperm.slane %v1446_v5, %v5556_v60  ;;  %v830_v39 = vsel %vm499_vm1, %v814_v27, %v829_v44 }
 0x1a5   : > { %v649_v3 = vrot.slane %v483_v19, 4  ;;  %v1444_v25 = vsel %vm499_vm1, %v1443_v20, %v8180_v31  ;;  %v1456_v23 = vsel %vm499_vm1, %v1455_v12, %v8182_v52  ;;  %v654_v53 = vperm.slane %v648_v0, %v5534_v37  ;;  %4847 = vmatmul.msk.f32.vlgmr.msra.gmra.mxu3 %vm2915_vm2, %v830_v39  ;;  %v8184_v31 = vld [vmem:[#allocation13_spill] sm:$0xff] }
 0x1a6   : > { %v1458_v58 = vsel %vm499_vm1, %v1418_v35, %v8183_v33  ;;  %v635_v13 = vrot.slane %v489_v6, 4  ;;  %v1450_v51 = vperm.slane %v1444_v25, %v5556_v60  ;;  %v1462_v8 = vperm.slane %v1456_v23, %v5556_v60 }
 0x1a7   : > { %v1466_v14 = vperm.slane %v1458_v58, %v5556_v60  ;;  %v1471_v46 = vrot.slane %v1454_v24, 4  ;;  %v1474_v62 = vsel %vm499_vm1, %v1454_v24, %v1473_v45  ;;  %v650_v40 = vsel %vm499_vm1, %v6165_v28, %v649_v3 }
 0x1a8   : > { %v1831_v56 = vrot.slane %v1474_v62, 4  ;;  %v1467_v19 = vrot.slane %v1450_v51, 4  ;;  %v1470_v9 = vsel %vm499_vm1, %v1450_v51, %v1469_v59  ;;  %v1475_v61 = vrot.slane %v1462_v8, 4 }
 0x1a9   : > { %v1479_v42 = vrot.slane %v1466_v14, 4  ;;  %v6388_v27 = vsel %vm499_vm1, %v1466_v14, %v1481_v34  ;;  %v6395_v38 = vsel %vm499_vm1, %v1471_v46, %v1430_v29  ;;  %v1833_v34 = vrot.slane %v1470_v9, 4 }
 0x1aa   : > { %v1819_v45 = vrot.slane %v6395_v38, 4  ;;  %v1855_v44 = vrot.slane %v6388_v27, 4  ;;  %v658_v0 = vperm.slane %v650_v40, %v5534_v37  ;;  %v683_v20 = vrot.slane %v654_v53, 4 }
 0x1ab   : > { %v6398_v35 = vsel %vm499_vm1, %v1479_v42, %v1442_v4  ;;  %v636_v28 = vsel %vm499_vm1, %v635_v13, %v8184_v31  ;;  %v8185_v59 = vrot.slane %v8184_v31, 4  ;;  %v1834_v49 = vsel %vm499_vm1, %v1474_v62, %v1833_v34 }
 0x1ac   : > { %v642_v4 = vperm.slane %v636_v28, %v5534_v37  ;;  %v6412_v12 = vsel %vm499_vm1, %v1467_v19, %v1426_v2  ;;  %v6415_v52 = vperm.slane %v1834_v49, %v5534_v37  ;;  %v695_v33 = vrot.slane %v658_v0, 4 }
 0x1ad   : > { %v638_v29 = vsel %vm499_vm1, %v489_v6, %v8185_v59  ;;  %v6418_v58 = vsel %vm499_vm1, %v1475_v61, %v1438_v55  ;;  %v6421_v24 = vsel %vm499_vm1, %v1462_v8, %v1477_v50  ;;  %v1820_v3 = vsel %vm499_vm1, %v1819_v45, %v6412_v12 }
 0x1ae   : > { %v646_v5 = vperm.slane %v638_v29, %v5534_v37  ;;  %v684_v6 = vsel %vm499_vm1, %v683_v20, %v642_v4  ;;  %v685_v14 = vrot.slane %v642_v4, 4  ;;  %v1821_v23 = vrot.slane %v6412_v12, 4 }
 0x1af   : > { %v6427_v2 = vperm.slane %v684_v6, %v5556_v60  ;;  %v1826_v55 = vperm.slane %v1820_v3, %v5534_v37  ;;  %v1832_v8 = vsel %vm499_vm1, %v1831_v56, %v1470_v9  ;;  %v8186_v40 = vrot.slane %v5968_v47, 4 }
 0x1b0   : > { %v697_v39 = vrot.slane %v646_v5, 4  ;;  %v696_v25 = vsel %vm499_vm1, %v695_v33, %v646_v5  ;;  %v686_v13 = vsel %vm499_vm1, %v654_v53, %v685_v14  ;;  %v8187_v61 = vrot.slane %v5971_v41, 4 }
 0x1b1   : > { %v702_v51 = vperm.slane %v696_v25, %v5556_v60  ;;  %v6437_v46 = vperm.slane %v686_v13, %v5556_v60  ;;  %v707_v42 = vrot.slane %v6427_v2, 4  ;;  %v6445_v19 = vsel %vm499_vm1, %v6427_v2, %v8186_v40 }
 0x1b2   : > { %v698_v50 = vsel %vm499_vm1, %v658_v0, %v697_v39  ;;  %v849_v56 = vrot.slane %v6445_v19, 4  ;;  %v1838_v9 = vperm.slane %v1832_v8, %v5534_v37  ;;  %v8188_v0 = vrot.slane %v5954_v43, 4 }
 0x1b3   : > { %v706_v62 = vperm.slane %v698_v50, %v5556_v60  ;;  %v715_v53 = vrot.slane %v702_v51, 4  ;;  %v718_v45 = vsel %vm499_vm1, %v702_v51, %v8187_v61  ;;  %v711_v34 = vrot.slane %v6437_v46, 4 }
 0x1b4   : > { %v6457_v20 = vsel %vm499_vm1, %v6437_v46, %v8188_v0  ;;  %v8189_v28 = vrot.slane %v5957_v36, 4  ;;  %v873_v5 = vrot.slane %v718_v45, 4  ;;  %v1843_v14 = vrot.slane %v6398_v35, 4 }
 0x1b5   : > { %v719_v31 = vrot.slane %v706_v62, 4  ;;  %v6464_v29 = vsel %vm499_vm1, %v715_v53, %v5971_v41  ;;  %v847_v49 = vrot.slane %v6457_v20, 4  ;;  %v1845_v39 = vrot.slane %v6418_v58, 4 }
 0x1b6   : > { %v722_v59 = vsel %vm499_vm1, %v706_v62, %v8189_v28  ;;  %v861_v6 = vrot.slane %v6464_v29, 4  ;;  %v1856_v13 = vsel %vm499_vm1, %v1855_v44, %v6421_v24  ;;  %v1844_v51 = vsel %vm499_vm1, %v1843_v14, %v6418_v58 }
 0x1b7   : > { %v871_v4 = vrot.slane %v722_v59, 4  ;;  %v6469_v33 = vsel %vm499_vm1, %v719_v31, %v5957_v36  ;;  %v874_v41 = vsel %vm499_vm1, %v722_v59, %v873_v5  ;;  %v1857_v8 = vrot.slane %v6421_v24, 4 }
 0x1b8   : > { %v859_v3 = vrot.slane %v6469_v33, 4  ;;  %v6483_v36 = vperm.slane %v874_v41, %v5534_v37  ;;  %v1850_v62 = vperm.slane %v1844_v51, %v5534_v37  ;;  %v1862_v40 = vperm.slane %v1856_v13, %v5534_v37 }
 0x1b9   : > { %v872_v25 = vsel %vm499_vm1, %v871_v4, %v718_v45  ;;  %v1867_v53 = vrot.slane %v1838_v9, 4  ;;  %v1869_v61 = vrot.slane %v1826_v55, 4  ;;  %v6494_v44 = vsel %vm499_vm1, %v1355_v48, %v6012_v10 }
 0x1ba   : > { %v6480_v50 = vperm.slane %v872_v25, %v5534_v37  ;;  %v6500_v45 = vsel %vm499_vm1, %v6259_v11, %v1357_v7  ;;  %v6506_v58 = vsel %vm499_vm1, %v1359_v15, %v5994_v21  ;;  %v1732_v24 = vsel %vm499_vm1, %v1731_v54, %v6285_v26 }
 0x1bb   : > { %v1868_v48 = vsel %vm499_vm1, %v1867_v53, %v1826_v55  ;;  %v1891_v0 = vrot.slane %v1862_v40, 4  ;;  %v1893_v31 = vrot.slane %v1850_v62, 4  ;;  %v1870_v10 = vsel %vm499_vm1, %v1838_v9, %v1869_v61 }
 0x1bc   : > { %v1874_v7 = vperm.slane %v1868_v48, %v5556_v60  ;;  %v1878_v11 = vperm.slane %v1870_v10, %v5556_v60  ;;  %v1707_v16 = vrot.slane %v6506_v58, 4  ;;  %v1709_v21 = vrot.slane %v6494_v44, 4 }
 0x1bd   : > { %v1892_v15 = vsel %vm499_vm1, %v1891_v0, %v1850_v62  ;;  %v1894_v28 = vsel %vm499_vm1, %v1862_v40, %v1893_v31  ;;  %v1720_v54 = vsel %vm499_vm1, %v1719_v30, %v6500_v45  ;;  %v1721_v55 = vrot.slane %v6500_v45, 4 }
 0x1be   : > { %v1898_v9 = vperm.slane %v1892_v15, %v5556_v60  ;;  %v1917_v59 = vrot.slane %v1874_v7, 4  ;;  %v1902_v4 = vperm.slane %v1894_v28, %v5556_v60  ;;  %v1921_v5 = vrot.slane %v1878_v11, 4 }
 0x1bf   : > { %v1708_v14 = vsel %vm499_vm1, %v1707_v16, %v6494_v44  ;;  %v1726_v25 = vperm.slane %v1720_v54, %v5534_v37  ;;  %v1738_v41 = vperm.slane %v1732_v24, %v5534_v37  ;;  %v1744_v30 = vsel %vm499_vm1, %v1743_v63, %v6272_v57 }
 0x1c0   : > { %v1915_v13 = vrot.slane %v1898_v9, 4  ;;  %v1918_v51 = vsel %vm499_vm1, %v1898_v9, %v1917_v59  ;;  %v1919_v62 = vrot.slane %v1902_v4, 4  ;;  %v1922_v40 = vsel %vm499_vm1, %v1902_v4, %v1921_v5 }
 0x1c1   : > { %4857 = vmatpush.xpose.msk.msrb.mxu3 %vm2915_vm2, %v1918_v51  ;;  %4863 = vmatpush.xpose.msk.msra.mxu1 %vm2915_vm2, %v1922_v40  ;;  %v1714_v53 = vperm.slane %v1708_v14, %v5534_v37  ;;  %v1750_v61 = vperm.slane %v1744_v30, %v5534_v37  ;;  %v1755_v24 = vrot.slane %v1726_v25, 4  ;;  %v1822_v18 = vsel %vm499_vm1, %v6395_v38, %v1821_v23 }
 0x1c2   : > { %v1916_v63 = vsel %vm499_vm1, %v1915_v13, %v1874_v7  ;;  %v1920_v57 = vsel %vm499_vm1, %v1919_v62, %v1878_v11  ;;  %v1830_v48 = vperm.slane %v1822_v18, %v5534_v37  ;;  %v1846_v0 = vsel %vm499_vm1, %v6398_v35, %v1845_v39 }
 0x1c3   : > { %4854 = vmatpush.xpose.msk.msrb.mxu2 %vm2915_vm2, %v1916_v63  ;;  %4860 = vmatpush.xpose.msk.msra.mxu0 %vm2915_vm2, %v1920_v57  ;;  %v1756_v31 = vsel %vm499_vm1, %v1755_v24, %v1714_v53  ;;  %v1779_v10 = vrot.slane %v1750_v61, 4  ;;  %v1854_v12 = vperm.slane %v1846_v0, %v5534_v37  ;;  %v1858_v38 = vsel %vm499_vm1, %v6388_v27, %v1857_v8 }
 0x1c4   : > { %v1762_v23 = vperm.slane %v1756_v31, %v5556_v60  ;;  %v1866_v7 = vperm.slane %v1858_v38, %v5534_v37  ;;  %v1879_v11 = vrot.slane %v6415_v52, 4  ;;  %v1757_v16 = vrot.slane %v1714_v53, 4 }
 0x1c5   : > { %v1780_v35 = vsel %vm499_vm1, %v1779_v10, %v1738_v41  ;;  %v1781_v39 = vrot.slane %v1738_v41, 4  ;;  %v1881_v15 = vrot.slane %v1830_v48, 4  ;;  %v1905_v28 = vrot.slane %v1854_v12, 4 }
 0x1c6   : > { %v1786_v54 = vperm.slane %v1780_v35, %v5556_v60  ;;  %v1805_v9 = vrot.slane %v1762_v23, 4  ;;  %v1880_v59 = vsel %vm499_vm1, %v1879_v11, %v1830_v48  ;;  %v1903_v4 = vrot.slane %v1866_v7, 4 }
 0x1c7   : > { %v1886_v27 = vperm.slane %v1880_v59, %v5556_v60  ;;  %v1758_v8 = vsel %vm499_vm1, %v1726_v25, %v1757_v16  ;;  %v1782_v5 = vsel %vm499_vm1, %v1750_v61, %v1781_v39  ;;  %v1882_v14 = vsel %vm499_vm1, %v6415_v52, %v1881_v15 }
 0x1c8   : > { %v1803_v30 = vrot.slane %v1786_v54, 4  ;;  %v1806_v41 = vsel %vm499_vm1, %v1786_v54, %v1805_v9  ;;  %v1904_v13 = vsel %vm499_vm1, %v1903_v4, %v1854_v12  ;;  %v1766_v51 = vperm.slane %v1758_v8, %v5556_v60 }
 0x1c9   : > { %4858 = vmatpush.xpose.msk.msrb.mxu3 %vm2915_vm2, %v1806_v41  ;;  %v1910_v62 = vperm.slane %v1904_v13, %v5556_v60  ;;  %v1925_v40 = vrot.slane %v1886_v27, 4  ;;  %v1790_v53 = vperm.slane %v1782_v5, %v5556_v60  ;;  %v1890_v25 = vperm.slane %v1882_v14, %v5556_v60  ;;  %v6638_v14 = vpop.permute.xlu0 %4986 }
 0x1ca   : > { %v1804_v61 = vsel %vm499_vm1, %v1803_v30, %v1762_v23  ;;  %v1809_v24 = vrot.slane %v1766_v51, 4  ;;  %v1906_v52 = vsel %vm499_vm1, %v1866_v7, %v1905_v28  ;;  %v6580_v18 = vsel %vm499_vm1, %v707_v42, %v5968_v47 }
 0x1cb   : > { %4855 = vmatpush.xpose.msk.msrb.mxu2 %vm2915_vm2, %v1804_v61  ;;  %v1923_v63 = vrot.slane %v1910_v62, 4  ;;  %v1926_v57 = vsel %vm499_vm1, %v1910_v62, %v1925_v40  ;;  %v1807_v48 = vrot.slane %v1790_v53, 4  ;;  %v1914_v0 = vperm.slane %v1906_v52, %v5556_v60 }
 0x1cc   : > { %v1810_v31 = vsel %vm499_vm1, %v1790_v53, %v1809_v24  ;;  %v1929_v10 = vrot.slane %v1890_v25, 4  ;;  %v712_v2 = vsel %vm499_vm1, %v711_v34, %v5954_v43  ;;  %v837_v47 = vrot.slane %v6580_v18, 4 }
 0x1cd   : > { %4869 = vmatpush.xpose.msk.msra.mxu3 %vm2915_vm2, %v1926_v57  ;;  %v1924_v42 = vsel %vm499_vm1, %v1923_v63, %v1886_v27  ;;  %v1808_v12 = vsel %vm499_vm1, %v1807_v48, %v1766_v51  ;;  %4864 = vmatpush.xpose.msk.msra.mxu1 %vm2915_vm2, %v1810_v31  ;;  %v1927_v38 = vrot.slane %v1914_v0, 4  ;;  %v835_v23 = vrot.slane %v712_v2, 4 }
 0x1ce   : > { %4861 = vmatpush.xpose.msk.msra.mxu0 %vm2915_vm2, %v1808_v12  ;;  %v1930_v7 = vsel %vm499_vm1, %v1914_v0, %v1929_v10  ;;  %v848_v43 = vsel %vm499_vm1, %v847_v49, %v6445_v19  ;;  %v860_v46 = vsel %vm499_vm1, %v859_v3, %v6464_v29  ;;  %v907_v34 = vrot.slane %v6480_v50, 4 }
 0x1cf   : > { %4866 = vmatpush.xpose.msk.msra.mxu2 %vm2915_vm2, %v1924_v42  ;;  %v1928_v11 = vsel %vm499_vm1, %v1927_v38, %v1890_v25  ;;  %v836_v16 = vsel %vm499_vm1, %v835_v23, %v6580_v18  ;;  %v854_v35 = vperm.slane %v848_v43, %v5534_v37  ;;  %v866_v39 = vperm.slane %v860_v46, %v5534_v37 }
 0x1d0   : > { %v842_v49 = vperm.slane %v836_v16, %v5534_v37  ;;  %v1710_v3 = vsel %vm499_vm1, %v6506_v58, %v1709_v21  ;;  %v1722_v15 = vsel %vm499_vm1, %v6266_v32, %v1721_v55  ;;  %v1734_v28 = vsel %vm499_vm1, %v6276_v1, %v1733_v17 }
 0x1d1   : > { %4875 = vmatpush.xpose.msk.msrb.mxu1 %vm2915_vm2, %v1930_v7  ;;  %v883_v54 = vrot.slane %v854_v35, 4  ;;  %v908_v9 = vsel %vm499_vm1, %v907_v34, %v866_v39  ;;  %v909_v59 = vrot.slane %v866_v39, 4  ;;  %v1718_v4 = vperm.slane %v1710_v3, %v5534_v37 }
 0x1d2   : > { %4872 = vmatpush.xpose.msk.msrb.mxu0 %vm2915_vm2, %v1928_v11  ;;  %v885_v44 = vrot.slane %v842_v49, 4  ;;  %v914_v27 = vperm.slane %v908_v9, %v5556_v60  ;;  %v1730_v58 = vperm.slane %v1722_v15, %v5534_v37  ;;  %v1742_v45 = vperm.slane %v1734_v28, %v5534_v37 }
 0x1d3   : > { %v884_v32 = vsel %vm499_vm1, %v883_v54, %v842_v49  ;;  %v1791_v26 = vrot.slane %v6293_v22, 4  ;;  %v910_v1 = vsel %vm499_vm1, %v6480_v50, %v909_v59  ;;  %v1769_v17 = vrot.slane %v1718_v4, 4 }
 0x1d4   : > { %v890_v21 = vperm.slane %v884_v32, %v5556_v60  ;;  %v931_v55 = vrot.slane %v914_v27, 4  ;;  %v1767_v8 = vrot.slane %v1730_v58, 4  ;;  %v886_v5 = vsel %vm499_vm1, %v854_v35, %v885_v44  ;;  %v5002_v35 = vpop.permute.xlu0 %5001 }
 0x1d5   : > { %v1792_v30 = vsel %vm499_vm1, %v1791_v26, %v1742_v45  ;;  %v894_v41 = vperm.slane %v886_v5, %v5556_v60  ;;  %v918_v13 = vperm.slane %v910_v1, %v5556_v60  ;;  %v1770_v51 = vsel %vm499_vm1, %v1730_v58, %v1769_v17 }
 0x1d6   : > { %v932_v62 = vsel %vm499_vm1, %v931_v55, %v890_v21  ;;  %v933_v50 = vrot.slane %v890_v21, 4  ;;  %v1768_v40 = vsel %vm499_vm1, %v1767_v8, %v1718_v4  ;;  %v1798_v53 = vperm.slane %v1792_v30, %v5556_v60  ;;  %v8190_v55 = vld [vmem:[#allocation11_spill] sm:$0xff] }
 0x1d7   : > { %4856 = vmatmul.msk.f32.vlgmr.msrb.gmra.mxu2 %vm2915_vm2, %v932_v62  ;;  %v1774_v25 = vperm.slane %v1768_v40, %v5556_v60  ;;  %v935_v61 = vrot.slane %v918_v13, 4  ;;  %v1778_v24 = vperm.slane %v1770_v51, %v5556_v60  ;;  %v1793_v52 = vrot.slane %v1742_v45, 4 }
 0x1d8   : > { %v1811_v18 = vrot.slane %v1798_v53, 4  ;;  %v934_v63 = vsel %vm499_vm1, %v914_v27, %v933_v50  ;;  %v937_v57 = vrot.slane %v894_v41, 4  ;;  %v838_v48 = vsel %vm499_vm1, %v712_v2, %v837_v47 }
 0x1d9   : > { %v1813_v0 = vrot.slane %v1774_v25, 4  ;;  %4859 = vmatmul.msk.f32.vlgmr.msrb.gmra.mxu3 %vm2915_vm2, %v934_v63  ;;  %v936_v31 = vsel %vm499_vm1, %v935_v61, %v894_v41  ;;  %v1794_v10 = vsel %vm499_vm1, %v6293_v22, %v1793_v52  ;;  %v1817_v42 = vrot.slane %v1778_v24, 4  ;;  %v4992_v41 = vpop.permute.xlu1 %4991 }
 0x1da   : > { %v1812_v12 = vsel %vm499_vm1, %v1811_v18, %v1774_v25  ;;  %4862 = vmatmul.msk.f32.vlgmr.msra.gmra.mxu0 %vm2915_vm2, %v936_v31  ;;  %v1802_v38 = vperm.slane %v1794_v10, %v5556_v60  ;;  %v938_v23 = vsel %vm499_vm1, %v918_v13, %v937_v57  ;;  %v846_v7 = vperm.slane %v838_v48, %v5534_v37 }
 0x1db   : > { %4867 = vmatpush.xpose.msk.msra.mxu2 %vm2915_vm2, %v1812_v12  ;;  %v1814_v2 = vsel %vm499_vm1, %v1798_v53, %v1813_v0  ;;  %4865 = vmatmul.msk.f32.vlgmr.msra.gmra.mxu1 %vm2915_vm2, %v938_v23  ;;  %v850_v22 = vsel %vm499_vm1, %v6457_v20, %v849_v56  ;;  %v862_v47 = vsel %vm499_vm1, %v6469_v33, %v861_v6  ;;  %v919_v43 = vrot.slane %v6483_v36, 4  ;;  %v8191_v53 = vld [vmem:[#allocation12_spill] sm:$0xff] }
 0x1dc   : > { %4870 = vmatpush.xpose.msk.msra.mxu3 %vm2915_vm2, %v1814_v2  ;;  %v1815_v46 = vrot.slane %v1802_v38, 4  ;;  %v1818_v34 = vsel %vm499_vm1, %v1802_v38, %v1817_v42  ;;  %v858_v11 = vperm.slane %v850_v22, %v5534_v37  ;;  %v870_v16 = vperm.slane %v862_v47, %v5534_v37  ;;  %v5012_v10 = vpop.permute.xlu0 %5011 }
 0x1dd   : > { %4876 = vmatpush.xpose.msk.msrb.mxu1 %vm2915_vm2, %v1818_v34  ;;  %v897_v19 = vrot.slane %v846_v7, 4  ;;  %v4989_v56 = vunpack.i.h.bf16 %v6638_v14  ;;  %v5004_v3 = vunpack.i.h.bf16 %v5002_v35  ;;  %v4988_v9 = vunpack.i.l.bf16 %v6638_v14 }
 0x1de   : > { %v1816_v20 = vsel %vm499_vm1, %v1815_v46, %v1778_v24  ;;  %v895_v29 = vrot.slane %v858_v11, 4  ;;  %v920_v33 = vsel %vm499_vm1, %v919_v43, %v870_v16  ;;  %v921_v6 = vrot.slane %v870_v16, 4 }
 0x1df   : > { %4873 = vmatpush.xpose.msk.msrb.mxu0 %vm2915_vm2, %v1816_v20  ;;  %v926_v39 = vperm.slane %v920_v33, %v5556_v60  ;;  %v898_v49 = vsel %vm499_vm1, %v858_v11, %v897_v19  ;;  %v5003_v27 = vunpack.i.l.bf16 %v5002_v35  ;;  %v2033_v45 = vrot.slane %v4989_v56, 4 }
 0x1e0   : > { %v896_v15 = vsel %vm499_vm1, %v895_v29, %v846_v7  ;;  %v906_v28 = vperm.slane %v898_v49, %v5556_v60  ;;  %v922_v54 = vsel %vm499_vm1, %v6483_v36, %v921_v6  ;;  %v2031_v17 = vrot.slane %v5004_v3, 4 }
 0x1e1   : > { %v902_v59 = vperm.slane %v896_v15, %v5556_v60  ;;  %v939_v4 = vrot.slane %v926_v39, 4  ;;  %v930_v44 = vperm.slane %v922_v54, %v5556_v60  ;;  %v2143_v36 = vrot.slane %v5003_v27, 4  ;;  %v5007_v20 = vpop.permute.xlu1 %5006 }
 0x1e2   : > { %v945_v58 = vrot.slane %v906_v28, 4  ;;  %v2021_v8 = vrot.slane %v8190_v55, 4  ;;  %v2145_v30 = vrot.slane %v4988_v9, 4  ;;  %v4994_v13 = vunpack.i.h.bf16 %v4992_v41 }
 0x1e3   : > { %v940_v32 = vsel %vm499_vm1, %v939_v4, %v902_v59  ;;  %v941_v26 = vrot.slane %v902_v59, 4  ;;  %v943_v1 = vrot.slane %v930_v44, 4  ;;  %v2032_v51 = vsel %vm499_vm1, %v2031_v17, %v4989_v56  ;;  %v4997_v56 = vpop.permute.xlu2 %4996 }
 0x1e4   : > { %4868 = vmatmul.msk.f32.vlgmr.msra.gmra.mxu2 %vm2915_vm2, %v940_v32  ;;  %v946_v21 = vsel %vm499_vm1, %v930_v44, %v945_v58  ;;  %v2034_v62 = vsel %vm499_vm1, %v5004_v3, %v2033_v45  ;;  %v4993_v50 = vunpack.i.l.bf16 %v4992_v41  ;;  %v2144_v40 = vsel %vm499_vm1, %v2143_v36, %v4988_v9 }
 0x1e5   : > { %v942_v5 = vsel %vm499_vm1, %v926_v39, %v941_v26  ;;  %v944_v14 = vsel %vm499_vm1, %v943_v1, %v906_v28  ;;  %4877 = vmatmul.msk.f32.vlgmr.msrb.gmra.mxu1 %vm2915_vm2, %v946_v21  ;;  %v2133_v25 = vrot.slane %v8191_v53, 4  ;;  %v2019_v61 = vrot.slane %v4994_v13, 4 }
 0x1e6   : > { %4871 = vmatmul.msk.f32.vlgmr.msra.gmra.mxu3 %vm2915_vm2, %v942_v5  ;;  %4874 = vmatmul.msk.f32.vlgmr.msrb.gmra.mxu0 %vm2915_vm2, %v944_v14  ;;  %v2022_v24 = vsel %vm499_vm1, %v4994_v13, %v2021_v8  ;;  %v2146_v52 = vsel %vm499_vm1, %v5003_v27, %v2145_v30  ;;  %v2131_v18 = vrot.slane %v4993_v50, 4  ;;  %v2038_v63 = vperm.slane %v2032_v51, %v5534_v37 }
 0x1e7   : > { %v2042_v57 = vperm.slane %v2034_v62, %v5534_v37  ;;  %v2020_v48 = vsel %vm499_vm1, %v2019_v61, %v8190_v55  ;;  %v2150_v0 = vperm.slane %v2144_v40, %v5534_v37  ;;  %v2030_v31 = vperm.slane %v2022_v24, %v5534_v37 }
 0x1e8   : > { %v2154_v42 = vperm.slane %v2146_v52, %v5534_v37  ;;  %v2026_v12 = vperm.slane %v2020_v48, %v5534_v37  ;;  %v2134_v38 = vsel %vm499_vm1, %v4993_v50, %v2133_v25  ;;  %v2132_v23 = vsel %vm499_vm1, %v2131_v18, %v8191_v53 }
 0x1e9   : > { %v5014_v7 = vunpack.i.h.bf16 %v5012_v10  ;;  %v2067_v2 = vrot.slane %v2038_v63, 4  ;;  %v2079_v22 = vrot.slane %v2042_v57, 4  ;;  %v5013_v47 = vunpack.i.l.bf16 %v5012_v10 }
 0x1ea   : > { %v2179_v43 = vrot.slane %v2150_v0, 4  ;;  %v2081_v46 = vrot.slane %v2030_v31, 4  ;;  %v2142_v34 = vperm.slane %v2134_v38, %v5534_v37  ;;  %v2191_v11 = vrot.slane %v2154_v42, 4 }
 0x1eb   : > { %v2069_v16 = vrot.slane %v2026_v12, 4  ;;  %v2138_v19 = vperm.slane %v2132_v23, %v5534_v37  ;;  %v4999_v29 = vunpack.i.h.bf16 %v4997_v56  ;;  %v2043_v33 = vrot.slane %v5014_v7, 4  ;;  %v5017_v52 = vpop.permute.xlu2 %5016 }
 0x1ec   : > { %v5009_v6 = vunpack.i.h.bf16 %v5007_v20  ;;  %v2068_v35 = vsel %vm499_vm1, %v2067_v2, %v2026_v12  ;;  %v2080_v39 = vsel %vm499_vm1, %v2079_v22, %v2030_v31  ;;  %v4998_v49 = vunpack.i.l.bf16 %v4997_v56 }
 0x1ed   : > { %v2155_v3 = vrot.slane %v5013_v47, 4  ;;  %v2082_v15 = vsel %vm499_vm1, %v2042_v57, %v2081_v46  ;;  %v2180_v28 = vsel %vm499_vm1, %v2179_v43, %v2138_v19  ;;  %v2193_v54 = vrot.slane %v2142_v34, 4 }
 0x1ee   : > { %v2045_v9 = vrot.slane %v4999_v29, 4  ;;  %v2070_v59 = vsel %vm499_vm1, %v2038_v63, %v2069_v16  ;;  %v2181_v4 = vrot.slane %v2138_v19, 4  ;;  %v2192_v44 = vsel %vm499_vm1, %v2191_v11, %v2142_v34 }
 0x1ef   : > { %v2157_v27 = vrot.slane %v4998_v49, 4  ;;  %v6726_v58 = vperm.slane %v2068_v35, %v5556_v60  ;;  %v6729_v45 = vperm.slane %v2080_v39, %v5556_v60  ;;  %v5008_v26 = vunpack.i.l.bf16 %v5007_v20 }
 0x1f0   : > { %v2046_v32 = vsel %vm499_vm1, %v5014_v7, %v2045_v9  ;;  %v6733_v1 = vperm.slane %v2082_v15, %v5556_v60  ;;  %v6736_v17 = vperm.slane %v2180_v28, %v5556_v60  ;;  %v6740_v36 = vperm.slane %v2070_v59, %v5556_v60 }
 0x1f1   : > { %v2158_v21 = vsel %vm499_vm1, %v5013_v47, %v2157_v27  ;;  %v2194_v55 = vsel %vm499_vm1, %v2154_v42, %v2193_v54  ;;  %v6744_v8 = vperm.slane %v2192_v44, %v5556_v60  ;;  %v2044_v5 = vsel %vm499_vm1, %v2043_v33, %v4999_v29 }
 0x1f2   : > { %v2182_v14 = vsel %vm499_vm1, %v2150_v0, %v2181_v4  ;;  %v2054_v30 = vperm.slane %v2046_v32, %v5534_v37  ;;  %v2156_v41 = vsel %vm499_vm1, %v2155_v3, %v4998_v49  ;;  %v2166_v13 = vperm.slane %v2158_v21, %v5534_v37 }
 0x1f3   : > { %v2117_v51 = vrot.slane %v6726_v58, 4  ;;  %v2125_v62 = vrot.slane %v6729_v45, 4  ;;  %v2057_v50 = vrot.slane %v5009_v6, 4  ;;  %v2169_v40 = vrot.slane %v5008_v26, 4 }
 0x1f4   : > { %v2129_v53 = vrot.slane %v6733_v1, 4  ;;  %v6755_v25 = vperm.slane %v2194_v55, %v5556_v60  ;;  %v2229_v61 = vrot.slane %v6736_v17, 4  ;;  %v2050_v24 = vperm.slane %v2044_v5, %v5534_v37 }
 0x1f5   : > { %v6760_v18 = vperm.slane %v2182_v14, %v5556_v60  ;;  %v2162_v63 = vperm.slane %v2156_v41, %v5534_v37  ;;  %v5019_v57 = vunpack.i.h.bf16 %v5017_v52  ;;  %v5018_v48 = vunpack.i.l.bf16 %v5017_v52 }
 0x1f6   : > { %v2121_v0 = vrot.slane %v6740_v36, 4  ;;  %v2237_v31 = vrot.slane %v6744_v8, 4  ;;  %v2105_v10 = vrot.slane %v2054_v30, 4  ;;  %v2217_v42 = vrot.slane %v2166_v13, 4 }
 0x1f7   : > { %v2055_v12 = vrot.slane %v5019_v57, 4  ;;  %v2058_v38 = vsel %vm499_vm1, %v5019_v57, %v2057_v50  ;;  %v2167_v23 = vrot.slane %v5018_v48, 4  ;;  %v2170_v7 = vsel %vm499_vm1, %v5018_v48, %v2169_v40 }
 0x1f8   : > { %v2241_v2 = vrot.slane %v6755_v25, 4  ;;  %v2093_v22 = vrot.slane %v2050_v24, 4  ;;  %v2066_v47 = vperm.slane %v2058_v38, %v5534_v37  ;;  %v2178_v43 = vperm.slane %v2170_v7, %v5534_v37  ;;  %v6816_v38 = vpop.f32.mrf.mxu3 }
 0x1f9   : > { %v2233_v46 = vrot.slane %v6760_v18, 4  ;;  %v2205_v34 = vrot.slane %v2162_v63, 4  ;;  %v2056_v11 = vsel %vm499_vm1, %v2055_v12, %v5009_v6  ;;  %v2168_v16 = vsel %vm499_vm1, %v2167_v23, %v5008_v26 }
 0x1fa   : > { %v2062_v19 = vperm.slane %v2056_v11, %v5534_v37  ;;  %v2103_v56 = vrot.slane %v2066_v47, 4  ;;  %v2106_v20 = vsel %vm499_vm1, %v2066_v47, %v2105_v10  ;;  %v2174_v29 = vperm.slane %v2168_v16, %v5534_v37 }
 0x1fb   : > { %v2114_v33 = vperm.slane %v2106_v20, %v5556_v60  ;;  %v2215_v35 = vrot.slane %v2178_v43, 4  ;;  %v2218_v39 = vsel %vm499_vm1, %v2178_v43, %v2217_v42 }
 0x1fc   : > { %v2091_v49 = vrot.slane %v2062_v19, 4  ;;  %v2094_v3 = vsel %vm499_vm1, %v2062_v19, %v2093_v22  ;;  %v2104_v6 = vsel %vm499_vm1, %v2103_v56, %v2054_v30  ;;  %v2203_v15 = vrot.slane %v2174_v29, 4 }
 0x1fd   : > { %v2102_v28 = vperm.slane %v2094_v3, %v5556_v60  ;;  %v2110_v54 = vperm.slane %v2104_v6, %v5556_v60  ;;  %v2127_v9 = vrot.slane %v2114_v33, 4  ;;  %v6783_v59 = vsel %vm499_vm1, %v2114_v33, %v2129_v53 }
 0x1fe   : > { %v2092_v4 = vsel %vm499_vm1, %v2091_v49, %v2050_v24  ;;  %v2204_v44 = vsel %vm499_vm1, %v2203_v15, %v2162_v63  ;;  %v2206_v27 = vsel %vm499_vm1, %v2174_v29, %v2205_v34  ;;  %v2216_v32 = vsel %vm499_vm1, %v2215_v35, %v2166_v13 }
 0x1ff   : > { %v2098_v26 = vperm.slane %v2092_v4, %v5556_v60  ;;  %v2119_v21 = vrot.slane %v2102_v28, 4  ;;  %v6791_v55 = vsel %vm499_vm1, %v2102_v28, %v2121_v0  ;;  %v2123_v5 = vrot.slane %v2110_v54, 4 }
 0x200   : > { %v6793_v14 = vpop.f32.mrf.mxu0  ;;  %v6797_v30 = vsel %vm499_vm1, %v2127_v9, %v6733_v1  ;;  %v2210_v41 = vperm.slane %v2204_v44, %v5556_v60  ;;  %v2214_v50 = vperm.slane %v2206_v27, %v5556_v60  ;;  %v2222_v40 = vperm.slane %v2216_v32, %v5556_v60 }
 0x201   : > { %v2115_v13 = vrot.slane %v2098_v26, 4  ;;  %v2226_v53 = vperm.slane %v2218_v39, %v5556_v60  ;;  %v2503_v24 = vrot.slane %v6783_v59, 4  ;;  %v3387_v52 = vsel %vm3380_vm3, %v6793_v14, -inf }
 0x202   : > { %v2227_v63 = vrot.slane %v2210_v41, 4  ;;  %v2231_v57 = vrot.slane %v2214_v50, 4  ;;  %v6807_v48 = vsel %vm499_vm1, %v2214_v50, %v2233_v46  ;;  %v2235_v1 = vrot.slane %v2222_v40, 4  ;;  %3388 = vmax.xlane.f32.xlu2 %v3387_v52 }
 0x203   : > { %v6810_v0 = vsel %vm499_vm1, %v2222_v40, %v2237_v31  ;;  %v2239_v10 = vrot.slane %v2226_v53, 4  ;;  %v6813_v42 = vsel %vm499_vm1, %v2226_v53, %v2241_v2  ;;  %v2591_v12 = vrot.slane %v6807_v48, 4 }
 0x204   : > { %v2615_v23 = vrot.slane %v6813_v42, 4  ;;  %v2617_v7 = vrot.slane %v6810_v0, 4  ;;  %v2228_v22 = vsel %vm499_vm1, %v2227_v63, %v6736_v17  ;;  %v6825_v31 = vsel %vm499_vm1, %v2210_v41, %v2229_v61 }
 0x205   : > { %v6829_v2 = vsel %vm499_vm1, %v2239_v10, %v6755_v25  ;;  %v2232_v47 = vsel %vm499_vm1, %v2231_v57, %v6760_v18  ;;  %v6835_v43 = vsel %vm499_vm1, %v2235_v1, %v6744_v8  ;;  %v2581_v46 = vrot.slane %v2228_v22, 4 }
 0x206   : > { %v2603_v34 = vrot.slane %v6829_v2, 4  ;;  %v2579_v11 = vrot.slane %v2232_v47, 4  ;;  %v2592_v17 = vsel %vm499_vm1, %v2591_v12, %v6825_v31  ;;  %v2593_v61 = vrot.slane %v6825_v31, 4 }
 0x207   : > { %v2598_v16 = vperm.slane %v2592_v17, %v5534_v37  ;;  %v2605_v25 = vrot.slane %v6835_v43, 4  ;;  %v2616_v18 = vsel %vm499_vm1, %v2615_v23, %v6810_v0  ;;  %v6847_v8 = vsel %vm499_vm1, %v2115_v13, %v6726_v58 }
 0x208   : > { %v2580_v19 = vsel %vm499_vm1, %v2579_v11, %v2228_v22  ;;  %v2604_v56 = vsel %vm499_vm1, %v2603_v34, %v6835_v43  ;;  %v2622_v20 = vperm.slane %v2616_v18, %v5534_v37  ;;  %v6856_v29 = vsel %vm499_vm1, %v2098_v26, %v2117_v51 }
 0x209   : > { %v2586_v33 = vperm.slane %v2580_v19, %v5534_v37  ;;  %v2610_v35 = vperm.slane %v2604_v56, %v5534_v37  ;;  %v2627_v39 = vrot.slane %v2598_v16, 4  ;;  %v6862_v49 = vsel %vm499_vm1, %v2119_v21, %v6740_v36  ;;  %v6888_v21 = vpop.f32.mrf.mxu3 }
 0x20a   : > { %v2651_v3 = vrot.slane %v2622_v20, 4  ;;  %v6866_v6 = vsel %vm499_vm1, %v2123_v5, %v6729_v45  ;;  %v6871_v58 = vsel %vm499_vm1, %v2110_v54, %v2125_v62  ;;  %v2467_v51 = vrot.slane %v6862_v49, 4 }
 0x20b   : > { %v2628_v15 = vsel %vm499_vm1, %v2627_v39, %v2586_v33  ;;  %v2469_v28 = vrot.slane %v6847_v8, 4  ;;  %v2479_v9 = vrot.slane %v6791_v55, 4  ;;  %v2481_v36 = vrot.slane %v6856_v29, 4 }
 0x20c   : > { %v2634_v4 = vperm.slane %v2628_v15, %v5556_v60  ;;  %v2652_v44 = vsel %vm499_vm1, %v2651_v3, %v2610_v35  ;;  %v2468_v45 = vsel %vm499_vm1, %v2467_v51, %v6847_v8  ;;  %v2491_v62 = vrot.slane %v6797_v30, 4 }
 0x20d   : > { %v2658_v54 = vperm.slane %v2652_v44, %v5556_v60  ;;  %v2474_v27 = vperm.slane %v2468_v45, %v5534_v37  ;;  %v2480_v32 = vsel %vm499_vm1, %v2479_v9, %v6856_v29  ;;  %v2493_v26 = vrot.slane %v6866_v6, 4 }
 0x20e   : > { %v2486_v5 = vperm.slane %v2480_v32, %v5534_v37  ;;  %v2492_v41 = vsel %vm499_vm1, %v2491_v62, %v6866_v6  ;;  %v2504_v50 = vsel %vm499_vm1, %v2503_v24, %v6871_v58  ;;  %v2505_v40 = vrot.slane %v6871_v58, 4 }
 0x20f   : > { %v2675_v13 = vrot.slane %v2658_v54, 4  ;;  %v2498_v53 = vperm.slane %v2492_v41, %v5534_v37  ;;  %v2510_v52 = vperm.slane %v2504_v50, %v5534_v37  ;;  %v2677_v63 = vrot.slane %v2634_v4, 4 }
 0x210   : > { %v2515_v57 = vrot.slane %v2486_v5, 4  ;;  %v2629_v1 = vrot.slane %v2586_v33, 4  ;;  %v2653_v10 = vrot.slane %v2610_v35, 4  ;;  %v2582_v12 = vsel %vm499_vm1, %v2232_v47, %v2581_v46 }
 0x211   : > { %v2676_v23 = vsel %vm499_vm1, %v2675_v13, %v2634_v4  ;;  %v2539_v22 = vrot.slane %v2510_v52, 4  ;;  %v2678_v31 = vsel %vm499_vm1, %v2658_v54, %v2677_v63  ;;  %v2590_v24 = vperm.slane %v2582_v12, %v5534_v37 }
 0x212   : > { %3782 = vmatpush.msrb.mxu2 %v2676_v23  ;;  %v2516_v43 = vsel %vm499_vm1, %v2515_v57, %v2474_v27  ;;  %3805 = vmatpush.msrb.mxu3 %v2678_v31  ;;  %v2630_v34 = vsel %vm499_vm1, %v2598_v16, %v2629_v1  ;;  %v2654_v11 = vsel %vm499_vm1, %v2622_v20, %v2653_v10  ;;  %v2517_v17 = vrot.slane %v2474_v27, 4 }
 0x213   : > { %v2522_v18 = vperm.slane %v2516_v43, %v5556_v60  ;;  %v2540_v47 = vsel %vm499_vm1, %v2539_v22, %v2498_v53  ;;  %v2638_v46 = vperm.slane %v2630_v34, %v5556_v60  ;;  %v2662_v19 = vperm.slane %v2654_v11, %v5556_v60 }
 0x214   : > { %v2546_v56 = vperm.slane %v2540_v47, %v5556_v60  ;;  %v2594_v33 = vsel %vm499_vm1, %v6807_v48, %v2593_v61  ;;  %v2606_v35 = vsel %vm499_vm1, %v6829_v2, %v2605_v25  ;;  %v2618_v16 = vsel %vm499_vm1, %v6813_v42, %v2617_v7 }
 0x215   : > { %v2679_v20 = vrot.slane %v2662_v19, 4  ;;  %v2602_v39 = vperm.slane %v2594_v33, %v5534_v37  ;;  %v2614_v3 = vperm.slane %v2606_v35, %v5534_v37  ;;  %v2626_v51 = vperm.slane %v2618_v16, %v5534_v37 }
 0x216   : > { %v2563_v15 = vrot.slane %v2546_v56, 4  ;;  %v2565_v9 = vrot.slane %v2522_v18, 4  ;;  %v2518_v4 = vsel %vm499_vm1, %v2486_v5, %v2517_v17  ;;  %v2541_v48 = vrot.slane %v2498_v53, 4 }
 0x217   : > { %v2680_v61 = vsel %vm499_vm1, %v2679_v20, %v2638_v46  ;;  %v2639_v2 = vrot.slane %v2602_v39, 4  ;;  %v2663_v25 = vrot.slane %v2626_v51, 4  ;;  %v2526_v0 = vperm.slane %v2518_v4, %v5556_v60  ;;  %v6948_v12 = vpop.f32.mrf.mxu1 }
 0x218   : > { %v6924_v44 = vpop.f32.mrf.mxu3  ;;  %v2564_v42 = vsel %vm499_vm1, %v2563_v15, %v2522_v18  ;;  %3828 = vmatpush.msra.mxu0 %v2680_v61  ;;  %v2566_v7 = vsel %vm499_vm1, %v2546_v56, %v2565_v9  ;;  %v2542_v45 = vsel %vm499_vm1, %v2510_v52, %v2541_v48  ;;  %v2681_v62 = vrot.slane %v2638_v46, 4 }
 0x219   : > { %3783 = vmatpush.msrb.mxu2 %v2564_v42  ;;  %v2640_v54 = vsel %vm499_vm1, %v2639_v2, %v2590_v24  ;;  %v2664_v27 = vsel %vm499_vm1, %v2663_v25, %v2614_v3  ;;  %3806 = vmatpush.msrb.mxu3 %v2566_v7  ;;  %v2550_v32 = vperm.slane %v2542_v45, %v5556_v60  ;;  %v2641_v5 = vrot.slane %v2590_v24, 4  ;;  %v6964_v24 = vpop.f32.mrf.mxu0 }
 0x21a   : > { %v2646_v41 = vperm.slane %v2640_v54, %v5556_v60  ;;  %v2670_v50 = vperm.slane %v2664_v27, %v5556_v60  ;;  %v2682_v13 = vsel %vm499_vm1, %v2662_v19, %v2681_v62  ;;  %v2470_v53 = vsel %vm499_vm1, %v6862_v49, %v2469_v28 }
 0x21b   : > { %v2567_v52 = vrot.slane %v2550_v32, 4  ;;  %3851 = vmatpush.msra.mxu1 %v2682_v13  ;;  %v2478_v63 = vperm.slane %v2470_v53, %v5534_v37  ;;  %v2482_v57 = vsel %vm499_vm1, %v6791_v55, %v2481_v36  ;;  %v2494_v1 = vsel %vm499_vm1, %v6797_v30, %v2493_v26  ;;  %v6998_v13 = vpop.f32.mrf.mxu2 }
 0x21c   : > { %v2683_v10 = vrot.slane %v2670_v50, 4  ;;  %v2490_v8 = vperm.slane %v2482_v57, %v5534_v37  ;;  %v2502_v49 = vperm.slane %v2494_v1, %v5534_v37  ;;  %v2506_v29 = vsel %vm499_vm1, %v6783_v59, %v2505_v40 }
 0x21d   : > { %v2568_v28 = vsel %vm499_vm1, %v2567_v52, %v2526_v0  ;;  %v2514_v55 = vperm.slane %v2506_v29, %v5534_v37  ;;  %v2685_v6 = vrot.slane %v2646_v41, 4  ;;  %v2642_v36 = vsel %vm499_vm1, %v2602_v39, %v2641_v5 }
 0x21e   : > { %v2684_v30 = vsel %vm499_vm1, %v2683_v10, %v2646_v41  ;;  %3829 = vmatpush.msra.mxu0 %v2568_v28  ;;  %v2527_v26 = vrot.slane %v2490_v8, 4  ;;  %v2650_v23 = vperm.slane %v2642_v36, %v5556_v60  ;;  %v2665_v22 = vrot.slane %v2614_v3, 4 }
 0x21f   : > { %3874 = vmatpush.msra.mxu2 %v2684_v30  ;;  %v2551_v31 = vrot.slane %v2514_v55, 4  ;;  %v2686_v58 = vsel %vm499_vm1, %v2670_v50, %v2685_v6  ;;  %v3402_v59 = vsel %vm3380_vm3, %v6948_v12, -inf  ;;  %v2569_v40 = vrot.slane %v2526_v0, 4 }
 0x220   : > { %v2528_v43 = vsel %vm499_vm1, %v2527_v26, %v2478_v63  ;;  %3897 = vmatpush.msra.mxu3 %v2686_v58  ;;  %v2666_v34 = vsel %vm499_vm1, %v2626_v51, %v2665_v22  ;;  %3403 = vmax.xlane.f32.xlu1 %v3402_v59  ;;  %v2529_v11 = vrot.slane %v2478_v63, 4  ;;  %v2553_v17 = vrot.slane %v2502_v49, 4  ;;  %v6972_v56 = vpop.f32.mrf.mxu3 }
 0x221   : > { %v2534_v18 = vperm.slane %v2528_v43, %v5556_v60  ;;  %v2552_v47 = vsel %vm499_vm1, %v2551_v31, %v2502_v49  ;;  %v2674_v46 = vperm.slane %v2666_v34, %v5556_v60  ;;  %v2570_v19 = vsel %vm499_vm1, %v2550_v32, %v2569_v40  ;;  %v3116_v27 = vpop.f32.mrf.mxu0 }
 0x222   : > { %v2558_v33 = vperm.slane %v2552_v47, %v5556_v60  ;;  %3852 = vmatpush.msra.mxu1 %v2570_v19  ;;  %v2530_v35 = vsel %vm499_vm1, %v2490_v8, %v2529_v11  ;;  %v2554_v16 = vsel %vm499_vm1, %v2514_v55, %v2553_v17  ;;  %v2689_v20 = vrot.slane %v2650_v23, 4 }
 0x223   : > { %v2687_v39 = vrot.slane %v2674_v46, 4  ;;  %v2573_v3 = vrot.slane %v2534_v18, 4  ;;  %v2538_v51 = vperm.slane %v2530_v35, %v5556_v60  ;;  %v2562_v15 = vperm.slane %v2554_v16, %v5556_v60 }
 0x224   : > { %v2571_v9 = vrot.slane %v2558_v33, 4  ;;  %v2690_v4 = vsel %vm499_vm1, %v2674_v46, %v2689_v20  ;;  %v3381_v48 = vsel %vm3380_vm3, %v6888_v21, -inf  ;;  %v3393_v61 = vsel %vm3380_vm3, %v6964_v24, -inf }
 0x225   : > { %v2688_v2 = vsel %vm499_vm1, %v2687_v39, %v2650_v23  ;;  %v2574_v25 = vsel %vm499_vm1, %v2558_v33, %v2573_v3  ;;  %v2575_v0 = vrot.slane %v2562_v15, 4  ;;  %3943 = vmatpush.msrb.mxu1 %v2690_v4  ;;  %3382 = vmax.xlane.f32.xlu0 %v3381_v48  ;;  %v2577_v42 = vrot.slane %v2538_v51, 4 }
 0x226   : > { %v2572_v7 = vsel %vm499_vm1, %v2571_v9, %v2534_v18  ;;  %3920 = vmatpush.msrb.mxu0 %v2688_v2  ;;  %3898 = vmatpush.msra.mxu3 %v2574_v25  ;;  %v3384_v45 = vsel %vm3380_vm3, %v6924_v44, -inf  ;;  %v3390_v32 = vsel %vm3380_vm3, %v6972_v56, -inf  ;;  %v3399_v41 = vsel %vm3380_vm3, %v3116_v27, -inf }
 0x227   : > { %3875 = vmatpush.msra.mxu2 %v2572_v7  ;;  %v2576_v62 = vsel %vm499_vm1, %v2575_v0, %v2538_v51  ;;  %v2578_v54 = vsel %vm499_vm1, %v2562_v15, %v2577_v42  ;;  %3394 = vmax.xlane.f32.xlu2 %v3393_v61  ;;  %v5020_v22 = vpack.i.bf16 %v6998_v13, %v6816_v38 }
 0x228   : > { %3921 = vmatpush.msrb.mxu0 %v2576_v62  ;;  %3944 = vmatpush.msrb.mxu1 %v2578_v54  ;;  %v6993_v5 = vpop.f32.mrf.mxu3 }
 0x229   : > { %3385 = vmax.xlane.f32.xlu1 %v3384_v45  ;;  %v3396_v50 = vsel %vm3380_vm3, %v6993_v5, -inf }
 0x22d   : > { %3391 = vmax.xlane.f32.xlu0 %v3390_v32 }
 0x22f   : > { %3400 = vmax.xlane.f32.xlu2 %v3399_v41 }
 0x231   : > { %3397 = vmax.xlane.f32.xlu1 %v3396_v50 }
 0x257   : > { %v7010_v10 = vpop.f32.mrf.mxu0 }
 0x258   : > { %v7000_v53 = vpop.f32.mrf.mxu1  ;;  %v3411_v29 = vsel %vm3380_vm3, %v7010_v10, -inf }
 0x259   : > { %v3414_v52 = vsel %vm3380_vm3, %v7000_v53, -inf }
 0x25a   : > { %3415 = vmax.xlane.f32.xlu2 %v3414_v52  ;;  %v7004_v63 = vpop.f32.mrf.mxu2 }
 0x25b   : > { %v3405_v57 = vsel %vm3380_vm3, %v7004_v63, -inf }
 0x25c   : > { %3406 = vmax.xlane.f32.xlu0 %v3405_v57  ;;  %v7008_v1 = vpop.f32.mrf.mxu3 }
 0x25d   : > { %v3408_v36 = vsel %vm3380_vm3, %v7008_v1, -inf }
 0x262   : > { %v7012_v8 = vpop.f32.mrf.mxu1 }
 0x263   : > { %v3426_v49 = vsel %vm3380_vm3, %v7012_v8, -inf  ;;  %v7028_v26 = vpop.f32.mrf.mxu0 }
 0x264   : > { %3427 = vmax.xlane.f32.xlu2 %v3426_v49  ;;  %3412 = vmax.xlane.f32.xlu0 %v3411_v29  ;;  %v3423_v23 = vsel %vm3380_vm3, %v7028_v26, -inf }
 0x267   : > { %v7018_v28 = vpop.f32.mrf.mxu2 }
 0x268   : > { %v3417_v55 = vsel %vm3380_vm3, %v7018_v28, -inf }
 0x269   : > { %v7022_v6 = vpop.f32.mrf.mxu3  ;;  %3418 = vmax.xlane.f32.xlu1 %v3417_v55 }
 0x26a   : > { %v3420_v30 = vsel %vm3380_vm3, %v7022_v6, -inf }
 0x26c   : > { %3409 = vmax.xlane.f32.xlu2 %v3408_v36  ;;  %3421 = vmax.xlane.f32.xlu0 %v3420_v30 }
 0x271   : > { %3424 = vmax.xlane.f32.xlu1 %v3423_v23 }
 0x275   : > { %v3389_v31 = vpop.xlane.xlu2 %3388 }
 0x276   : > { %v3431_v59 = vsub.f32 %v6793_v14, %v3389_v31 }
 0x278   : > { %v3449_v40 = vmul.f32 1.442695, %v3431_v59 }
 0x27a   : > { %5056 = vpow2.f32 %v3449_v40 }
 0x280   : > { %5021 = vrot.lane.b32.xlu0 %v5020_v22, %s5258_s9  ;;  %v7043_v33 = vpop.eup %5056 }
 0x284   : > { %5026 = vrot.lane.b32.xlu2 %v5020_v22, %s5257_s8 }
 0x28a   : > { %5031 = vrot.lane.b32.xlu1 %v5020_v22, %s5256_s19  ;;  %s320_s19 = sand.u32 1, %s5242_s25  }
 0x28b   : > { %s4815_s8 = sshll.u32 %s320_s19, 4 }
 0x292   : > { %5036 = vrot.lane.b32.xlu1 %v5020_v22, %s5260_s16  ;;  %s322_s16 = scalar_lea.vmem [#allocation7], %s4815_s8 }
 0x293   : > { %v3404_v58 = vpop.xlane.xlu1 %3403 }
 0x294   : > { %v3436_v17 = vsub.f32 %v6948_v12, %v3404_v58  ;;  %v3483_v12 = vsel %vm3380_vm3, %v7043_v33, 0.0 }
 0x296   : > { %v3459_v46 = vmul.f32 1.442695, %v3436_v17 }
 0x298   : > { %v3383_v34 = vpop.xlane.xlu0 %3382 }
 0x299   : > { %v3429_v7 = vsub.f32 %v6888_v21, %v3383_v34 }
 0x29a   : > { %5041 = vrot.lane.b32.xlu1 %v5020_v22, %s5259_s15  ;;  %v3395_v43 = vpop.xlane.xlu2 %3394  ;;  %s5200_s15 = scalar_lea.hbm %s8131_s7, 32 }
 0x29b   : > { %v3445_v45 = vmul.f32 1.442695, %v3429_v7  ;;  %v3433_v62 = vsub.f32 %v6964_v24, %v3395_v43 }
 0x29c   : > { %v3386_v11 = vpop.xlane.xlu1 %3385 }
 0x29d   : > { %v3430_v18 = vsub.f32 %v6924_v44, %v3386_v11 }
 0x29f   : > { %v3447_v47 = vmul.f32 1.442695, %v3430_v18 }
 0x2a0   : > { %v3392_v14 = vpop.xlane.xlu0 %3391 }
 0x2a1   : > { %5058 = vpow2.f32 %v3447_v47  ;;  %v3432_v44 = vsub.f32 %v6972_v56, %v3392_v14 }
 0x2a2   : > { %5046 = vrot.lane.b32.xlu1 %v5020_v22, %s5261_s14  ;;  %v3401_v19 = vpop.xlane.xlu2 %3400  ;;  %5060 = vpow2.f32 %v3459_v46  ;;  %s4901_s14 = sshll.u32 %s5334_s28, 4 }
 0x2a3   : > { %v3435_v35 = vsub.f32 %v3116_v27, %v3401_v19  ;;  %v3451_v4 = vmul.f32 1.442695, %v3432_v44  ;;  %v3453_v27 = vmul.f32 1.442695, %v3433_v62  ;;  %v2245_v62 = vrot.slane %v6998_v13, 4 }
 0x2a4   : > { %v3398_v16 = vpop.xlane.xlu1 %3397 }
 0x2a5   : > { %v3457_v20 = vmul.f32 1.442695, %v3435_v35  ;;  %v3434_v39 = vsub.f32 %v6993_v5, %v3398_v16 }
 0x2a7   : > { %v7049_v3 = vpop.eup %5058  ;;  %5062 = vpow2.f32 %v3457_v20  ;;  %v3455_v51 = vmul.f32 1.442695, %v3434_v39 }
 0x2a8   : > { %v3480_v15 = vsel %vm3380_vm3, %v7049_v3, 0.0  ;;  %v7054_v9 = vpop.eup %5060 }
 0x2a9   : > { %5064 = vpow2.f32 %v3455_v51  ;;  %v3498_v61 = vsel %vm3380_vm3, %v7054_v9, 0.0 }
 0x2aa   : > { %5051 = vrot.lane.b32.xlu1 %v5020_v22, %s5262_s17  ;;  %3481 = vadd.xlane.f32.xlu0 %v3480_v15  ;;  %5066 = vpow2.f32 %v3451_v4 }
 0x2ab   : > { %5068 = vpow2.f32 %v3445_v45 }
 0x2ac   : > { %5070 = vpow2.f32 %v3453_v27 }
 0x2ad   : > { %3484 = vadd.xlane.f32.xlu2 %v3483_v12  ;;  %v7056_v48 = vpop.eup %5062 }
 0x2ae   : > { %v3495_v2 = vsel %vm3380_vm3, %v7056_v48, 0.0 }
 0x2af   : > { %v7062_v56 = vpop.eup %5064 }
 0x2b0   : > { %v3492_v25 = vsel %vm3380_vm3, %v7062_v56, 0.0  ;;  %v7066_v0 = vpop.eup %5066 }
 0x2b1   : > { %v3486_v42 = vsel %vm3380_vm3, %v7066_v0, 0.0  ;;  %v7072_v5 = vpop.eup %5068 }
 0x2b2   : > { %3496 = vadd.xlane.f32.xlu0 %v3495_v2  ;;  %v3477_v50 = vsel %vm3380_vm3, %v7072_v5, 0.0  ;;  %v7077_v21 = vpop.eup %5070 }
 0x2b3   : > { %v3489_v36 = vsel %vm3380_vm3, %v7077_v21, 0.0 }
 0x2b5   : > { %3499 = vadd.xlane.f32.xlu2 %v3498_v61 }
 0x2ba   : > { %3487 = vadd.xlane.f32.xlu0 %v3486_v42 }
 0x2bd   : > { %3493 = vadd.xlane.f32.xlu2 %v3492_v25 }
 0x2cd   : > { %v3416_v54 = vpop.xlane.xlu2 %3415 }
 0x2ce   : > { %v3440_v55 = vsub.f32 %v7000_v53, %v3416_v54 }
 0x2cf   : > { %v3407_v32 = vpop.xlane.xlu0 %3406 }
 0x2d0   : > { %v3437_v41 = vsub.f32 %v7004_v63, %v3407_v32  ;;  %v3467_v23 = vmul.f32 1.442695, %v3440_v55 }
 0x2d2   : > { %v3461_v52 = vmul.f32 1.442695, %v3437_v41 }
 0x2d4   : > { %3478 = vadd.xlane.f32.xlu1 %v3477_v50  ;;  %5072 = vpow2.f32 %v3461_v52 }
 0x2d7   : > { %v3428_v57 = vpop.xlane.xlu2 %3427  ;;  %v3413_v49 = vpop.xlane.xlu0 %3412 }
 0x2d8   : > { %v3439_v29 = vsub.f32 %v7010_v10, %v3413_v49  ;;  %v2357_v49 = vrot.slane %v6816_v38, 4 }
 0x2da   : > { %v3465_v24 = vmul.f32 1.442695, %v3439_v29  ;;  %v7084_v58 = vpop.eup %5072 }
 0x2db   : > { %v3501_v40 = vsel %vm3380_vm3, %v7084_v58, 0.0 }
 0x2dc   : > { %3490 = vadd.xlane.f32.xlu1 %v3489_v36  ;;  %v3419_v63 = vpop.xlane.xlu1 %3418  ;;  %5074 = vpow2.f32 %v3465_v24 }
 0x2dd   : > { %v3441_v30 = vsub.f32 %v7018_v28, %v3419_v63 }
 0x2df   : > { %v3469_v22 = vmul.f32 1.442695, %v3441_v30  ;;  %v3410_v31 = vpop.xlane.xlu2 %3409  ;;  %v3422_v43 = vpop.xlane.xlu0 %3421 }
 0x2e0   : > { %v3438_v59 = vsub.f32 %v7008_v1, %v3410_v31  ;;  %v3442_v1 = vsub.f32 %v7022_v6, %v3422_v43 }
 0x2e1   : > { %5076 = vpow2.f32 %v3469_v22 }
 0x2e2   : > { %v7087_v10 = vpop.eup %5074  ;;  %5078 = vpow2.f32 %v3467_v23  ;;  %v3463_v53 = vmul.f32 1.442695, %v3438_v59  ;;  %v3471_v19 = vmul.f32 1.442695, %v3442_v1 }
 0x2e3   : > { %v3507_v28 = vsel %vm3380_vm3, %v7087_v10, 0.0 }
 0x2e4   : > { %3502 = vadd.xlane.f32.xlu1 %v3501_v40  ;;  %v3425_v34 = vpop.xlane.xlu1 %3424  ;;  %3508 = vadd.xlane.f32.xlu2 %v3507_v28  ;;  %5080 = vpow2.f32 %v3463_v53 }
 0x2e5   : > { %v3443_v11 = vsub.f32 %v7028_v26, %v3425_v34  ;;  %v3444_v26 = vsub.f32 %v7012_v8, %v3428_v57 }
 0x2e7   : > { %v7094_v17 = vpop.eup %5076  ;;  %v3473_v18 = vmul.f32 1.442695, %v3443_v11  ;;  %v3475_v20 = vmul.f32 1.442695, %v3444_v26  ;;  %v5027_v4 = vpop.permute.xlu2 %5026 }
 0x2e8   : > { %v3513_v47 = vsel %vm3380_vm3, %v7094_v17, 0.0  ;;  %v7099_v46 = vpop.eup %5078  ;;  %v5029_v25 = vunpack.i.h.bf16 %v5027_v4  ;;  %v5028_v7 = vunpack.i.l.bf16 %v5027_v4 }
 0x2e9   : > { %3514 = vadd.xlane.f32.xlu0 %v3513_v47  ;;  %5082 = vpow2.f32 %v3473_v18  ;;  %v3510_v35 = vsel %vm3380_vm3, %v7099_v46, 0.0 }
 0x2ea   : > { %v7103_v14 = vpop.eup %5080  ;;  %5084 = vpow2.f32 %v3471_v19  ;;  %v2243_v27 = vrot.slane %v5029_v25, 4  ;;  %v2246_v32 = vsel %vm499_vm1, %v5029_v25, %v2245_v62  ;;  %v2355_v50 = vrot.slane %v5028_v7, 4 }
 0x2eb   : > { %v3504_v6 = vsel %vm3380_vm3, %v7103_v14, 0.0  ;;  %5086 = vpow2.f32 %v3475_v20  ;;  %v2254_v63 = vperm.slane %v2246_v32, %v5534_v37  ;;  %v2358_v30 = vsel %vm499_vm1, %v5028_v7, %v2357_v49 }
 0x2ec   : > { %3511 = vadd.xlane.f32.xlu2 %v3510_v35  ;;  %v2244_v36 = vsel %vm499_vm1, %v2243_v27, %v6998_v13  ;;  %v2356_v23 = vsel %vm499_vm1, %v2355_v50, %v6816_v38  ;;  %v2366_v34 = vperm.slane %v2358_v30, %v5534_v37 }
 0x2ed   : > { %v2250_v59 = vperm.slane %v2244_v36, %v5534_v37  ;;  %v2305_v43 = vrot.slane %v2254_v63, 4  ;;  %v2362_v13 = vperm.slane %v2356_v23, %v5534_v37 }
 0x2ee   : > { %v2417_v20 = vrot.slane %v2366_v34, 4 }
 0x2ef   : > { %v7108_v16 = vpop.eup %5082  ;;  %v2293_v35 = vrot.slane %v2250_v59, 4 }
 0x2f0   : > { %8192 = vst [vmem:[#allocation15_spill] sm:$0xff] %v7108_v16  ;;  %v3519_v39 = vsel %vm3380_vm3, %v7108_v16, 0.0  ;;  %v7112_v12 = vpop.eup %5084 }
 0x2f1   : > { %3505 = vadd.xlane.f32.xlu0 %v3504_v6  ;;  %v3516_v44 = vsel %vm3380_vm3, %v7112_v12, 0.0  ;;  %v7118_v51 = vpop.eup %5086 }
 0x2f2   : > { %8193 = vst [vmem:[#allocation14_spill] sm:$0xff] %v7118_v51  ;;  %v3522_v15 = vsel %vm3380_vm3, %v7118_v51, 0.0  ;;  %v5022_v61 = vpop.permute.xlu0 %5021 }
 0x2f3   : > { %v5024_v42 = vunpack.i.h.bf16 %v5022_v61  ;;  %v5023_v29 = vunpack.i.l.bf16 %v5022_v61 }
 0x2f4   : > { %3520 = vadd.xlane.f32.xlu2 %v3519_v39 }
 0x2f5   : > { %v2257_v41 = vrot.slane %v5024_v42, 4  ;;  %v2369_v53 = vrot.slane %v5023_v29, 4 }
 0x2f9   : > { %3517 = vadd.xlane.f32.xlu0 %v3516_v44 }
 0x2fc   : > { %v7116_v8 = vpop.permute.xlu1 %5031 }
 0x2fd   : > { %v5034_v28 = vunpack.i.h.bf16 %v7116_v8  ;;  %v5033_v26 = vunpack.i.l.bf16 %v7116_v8 }
 0x2ff   : > { %v2269_v4 = vrot.slane %v5034_v28, 4  ;;  %v2381_v62 = vrot.slane %v5033_v26, 4 }
 0x301   : > { %3523 = vadd.xlane.f32.xlu0 %v3522_v15  ;;  %v2405_v15 = vrot.slane %v2362_v13, 4 }
 0x304   : > { %v5037_v2 = vpop.permute.xlu1 %5036 }
 0x305   : > { %v5039_v45 = vunpack.i.h.bf16 %v5037_v2  ;;  %v5038_v54 = vunpack.i.l.bf16 %v5037_v2 }
 0x307   : > { %v2255_v52 = vrot.slane %v5039_v45, 4  ;;  %v2258_v24 = vsel %vm499_vm1, %v5039_v45, %v2257_v41  ;;  %v2367_v55 = vrot.slane %v5038_v54, 4  ;;  %v2370_v38 = vsel %vm499_vm1, %v5038_v54, %v2369_v53 }
 0x308   : > { %v2266_v31 = vperm.slane %v2258_v24, %v5534_v37  ;;  %v2378_v39 = vperm.slane %v2370_v38, %v5534_v37 }
 0x309   : > { %v2256_v22 = vsel %vm499_vm1, %v2255_v52, %v5024_v42  ;;  %v2368_v40 = vsel %vm499_vm1, %v2367_v55, %v5023_v29 }
 0x30a   : > { %v2262_v11 = vperm.slane %v2256_v22, %v5534_v37  ;;  %v2303_v1 = vrot.slane %v2266_v31, 4  ;;  %v2306_v18 = vsel %vm499_vm1, %v2266_v31, %v2305_v43  ;;  %v2374_v47 = vperm.slane %v2368_v40, %v5534_v37 }
 0x30b   : > { %v7149_v2 = vperm.slane %v2306_v18, %v5556_v60  ;;  %v2415_v41 = vrot.slane %v2378_v39, 4  ;;  %v2418_v50 = vsel %vm499_vm1, %v2378_v39, %v2417_v20 }
 0x30c   : > { %v7124_v57 = vpop.permute.xlu1 %5041  ;;  %v2294_v61 = vsel %vm499_vm1, %v2262_v11, %v2293_v35  ;;  %v2291_v25 = vrot.slane %v2262_v11, 4  ;;  %v2304_v42 = vsel %vm499_vm1, %v2303_v1, %v2254_v63  ;;  %v2403_v7 = vrot.slane %v2374_v47, 4 }
 0x30d   : > { %v5044_v45 = vunpack.i.h.bf16 %v7124_v57  ;;  %v5043_v8 = vunpack.i.l.bf16 %v7124_v57  ;;  %v7156_v32 = vperm.slane %v2294_v61, %v5556_v60  ;;  %v7160_v49 = vperm.slane %v2304_v42, %v5556_v60 }
 0x30e   : > { %v2353_v29 = vrot.slane %v7149_v2, 4  ;;  %v2406_v24 = vsel %vm499_vm1, %v2374_v47, %v2405_v15  ;;  %v2292_v57 = vsel %vm499_vm1, %v2291_v25, %v2250_v59  ;;  %v2404_v36 = vsel %vm499_vm1, %v2403_v7, %v2362_v13 }
 0x30f   : > { %v2281_v63 = vrot.slane %v5044_v45, 4  ;;  %v2393_v22 = vrot.slane %v5043_v8, 4  ;;  %v7170_v43 = vperm.slane %v2406_v24, %v5556_v60  ;;  %v2416_v11 = vsel %vm499_vm1, %v2415_v41, %v2366_v34 }
 0x310   : > { %v2345_v15 = vrot.slane %v7156_v32, 4  ;;  %v7193_v25 = vperm.slane %v2404_v36, %v5556_v60 }
 0x314   : > { %v5047_v19 = vpop.permute.xlu1 %5046 }
 0x315   : > { %v5049_v6 = vunpack.i.h.bf16 %v5047_v19  ;;  %v5048_v44 = vunpack.i.l.bf16 %v5047_v19 }
 0x317   : > { %v2267_v54 = vrot.slane %v5049_v6, 4  ;;  %v2270_v27 = vsel %vm499_vm1, %v5049_v6, %v2269_v4  ;;  %v2379_v52 = vrot.slane %v5048_v44, 4  ;;  %v2382_v55 = vsel %vm499_vm1, %v5048_v44, %v2381_v62 }
 0x318   : > { %v2278_v30 = vperm.slane %v2270_v27, %v5534_v37  ;;  %v2390_v59 = vperm.slane %v2382_v55, %v5534_v37  ;;  %v7187_v44 = vperm.slane %v2292_v57, %v5556_v60 }
 0x319   : > { %v2268_v31 = vsel %vm499_vm1, %v2267_v54, %v5034_v28  ;;  %v2380_v38 = vsel %vm499_vm1, %v2379_v52, %v5033_v26  ;;  %v2426_v52 = vperm.slane %v2418_v50, %v5556_v60 }
 0x31a   : > { %v2274_v19 = vperm.slane %v2268_v31, %v5534_v37  ;;  %v2329_v28 = vrot.slane %v2278_v30, 4  ;;  %v2386_v34 = vperm.slane %v2380_v38, %v5534_v37  ;;  %v2441_v42 = vrot.slane %v2390_v59, 4 }
 0x31b   : > { %v2453_v38 = vrot.slane %v7193_v25, 4 }
 0x31c   : > { %v5052_v23 = vpop.permute.xlu1 %5051  ;;  %v2317_v54 = vrot.slane %v2274_v19, 4  ;;  %v2429_v24 = vrot.slane %v2386_v34, 4 }
 0x31d   : > { %v5054_v53 = vunpack.i.h.bf16 %v5052_v23  ;;  %v5053_v40 = vunpack.i.l.bf16 %v5052_v23  ;;  %v7196_v62 = vpop.xlane.xlu0 %3481 }
 0x31e   : > { %vm3544_vm8 = vweird.f32 %v7196_v62 }
 0x31f   : > { %v2279_v1 = vrot.slane %v5054_v53, 4  ;;  %v2282_v13 = vsel %vm499_vm1, %v5054_v53, %v2281_v63  ;;  %v2391_v18 = vrot.slane %v5053_v40, 4  ;;  %v2394_v47 = vsel %vm499_vm1, %v5053_v40, %v2393_v22 }
 0x320   : > { %v2290_v35 = vperm.slane %v2282_v13, %v5534_v37  ;;  %v2402_v6 = vperm.slane %v2394_v47, %v5534_v37  ;;  %v7180_v20 = vpop.xlane.xlu2 %3484  ;;  %v2457_v63 = vrot.slane %v7170_v43, 4  ;;  %v2465_v47 = vrot.slane %v2426_v52, 4 }
 0x321   : > { %v2280_v26 = vsel %vm499_vm1, %v2279_v1, %v5044_v45  ;;  %v2392_v39 = vsel %vm499_vm1, %v2391_v18, %v5043_v8  ;;  %5088 = vrcp.f32 %v7180_v20  ;;  %v7199_v8 = vperm.slane %v2416_v11, %v5556_v60 }
 0x322   : > { %v2286_v4 = vperm.slane %v2280_v26, %v5534_v37  ;;  %v2398_v61 = vperm.slane %v2392_v39, %v5534_v37  ;;  %v2327_v7 = vrot.slane %v2290_v35, 4  ;;  %v2330_v45 = vsel %vm499_vm1, %v2290_v35, %v2329_v28 }
 0x323   : > { %v2439_v41 = vrot.slane %v2402_v6, 4  ;;  %v2442_v57 = vsel %vm499_vm1, %v2402_v6, %v2441_v42  ;;  %v2338_v22 = vperm.slane %v2330_v45, %v5556_v60  ;;  %v2461_v1 = vrot.slane %v7199_v8, 4 }
 0x324   : > { %v2315_v27 = vrot.slane %v2286_v4, 4  ;;  %v2427_v55 = vrot.slane %v2398_v61, 4  ;;  %v2318_v23 = vsel %vm499_vm1, %v2286_v4, %v2317_v54  ;;  %v2328_v11 = vsel %vm499_vm1, %v2327_v7, %v2278_v30 }
 0x325   : > { %v2430_v50 = vsel %vm499_vm1, %v2398_v61, %v2429_v24  ;;  %v2440_v13 = vsel %vm499_vm1, %v2439_v41, %v2390_v59  ;;  %v2450_v18 = vperm.slane %v2442_v57, %v5556_v60  ;;  %v7216_v28 = vperm.slane %v2318_v23, %v5556_v60  ;;  %v7241_v24 = vpop.xlane.xlu0 %3496 }
 0x326   : > { %v2316_v40 = vsel %vm499_vm1, %v2315_v27, %v2274_v19  ;;  %v2428_v35 = vsel %vm499_vm1, %v2427_v55, %v2386_v34  ;;  %v7224_v6 = vperm.slane %v2328_v11, %v5556_v60  ;;  %v2351_v26 = vrot.slane %v2338_v22, 4 }
 0x327   : > { %v5089_v31 = vpop.eup %5088  ;;  %v7221_v30 = vperm.slane %v2316_v40, %v5556_v60  ;;  %v2438_v39 = vperm.slane %v2430_v50, %v5556_v60  ;;  %v2446_v4 = vperm.slane %v2440_v13, %v5556_v60  ;;  %v2463_v61 = vrot.slane %v2450_v18, 4 }
 0x328   : > { %v3554_v19 = vmul.f32 %v5089_v31, %v7180_v20  ;;  %v7227_v59 = vpop.xlane.xlu2 %3499  ;;  %vm3558_vm4 = vweird.f32 %v7180_v20  ;;  %v7234_v34 = vsel %vm499_vm1, %v2338_v22, %v2353_v29  ;;  %v2434_v7 = vperm.slane %v2428_v35, %v5556_v60 }
 0x329   : > { %v3562_v45 = vand.u32 2147483647, %v7180_v20  ;;  %v3564_v54 = vand.u32 2147483648, %v7180_v20  ;;  %v2343_v27 = vrot.slane %v7216_v28, 4  ;;  %vm3559_vm5 = vweird.f32 %v5089_v31 }
 0x32a   : > { %v3555_v42 = vsub.f32 1.0, %v3554_v19  ;;  %5090 = vrcp.f32 %v7227_v59  ;;  %v2339_v55 = vrot.slane %v7221_v30, 4  ;;  %v7247_v29 = vsel %vm499_vm1, %v2351_v26, %v7149_v2  ;;  %vm3560_vm6 = vmor %vm3558_vm4, %vm3559_vm5 }
 0x32b   : > { %v2455_v23 = vrot.slane %v2438_v39, 4  ;;  %v2459_v22 = vrot.slane %v2446_v4, 4  ;;  %v7250_v40 = vsel %vm499_vm1, %v2463_v61, %v2426_v52  ;;  %5092 = vrcp.f32 %v7196_v62 }
 0x32c   : > { %v3556_v41 = vmul.f32 %v5089_v31, %v3555_v42  ;;  %v2451_v50 = vrot.slane %v2434_v7, 4  ;;  %v7254_v13 = vsel %vm499_vm1, %v2450_v18, %v2465_v47  ;;  %v3565_v35 = vor.u32 1.1754944e-38, %v3564_v54 }
 0x32d   : > { %5094 = vrcp.f32 %v7241_v24  ;;  %vm3563_vm7 = vcmp.eq.f32.partialorder %v3562_v45, 8.507059e+37  ;;  %v7263_v52 = vsel %vm499_vm1, %v2455_v23, %v7170_v43  ;;  %v7266_v61 = vsel %vm499_vm1, %v2438_v39, %v2457_v63 }
 0x32e   : > { %v3557_v11 = vadd.f32 %v5089_v31, %v3556_v41  ;;  %v2827_v18 = vrot.slane %v7250_v40, 4  ;;  %v2839_v42 = vrot.slane %v7254_v13, 4  ;;  %v3634_v54 = vand.u32 2147483648, %v7227_v59 }
 0x32f   : > { %v3632_v63 = vand.u32 2147483647, %v7227_v59  ;;  %v7283_v39 = vsel %vm499_vm1, %v2451_v50, %v7193_v25  ;;  %v7286_v45 = vsel %vm499_vm1, %v2434_v7, %v2453_v38  ;;  %v7302_v38 = vsel %vm499_vm1, %v2446_v4, %v2461_v1 }
 0x330   : > { %v3561_v26 = vsel %vm3560_vm6, %v5089_v31, %v3557_v11  ;;  %v7269_v47 = vpop.eup %5090  ;;  %v7276_v31 = vsel %vm499_vm1, %v2459_v22, %v7199_v8  ;;  %v3550_v11 = vand.u32 2147483648, %v7196_v62  ;;  %v2803_v22 = vrot.slane %v7263_v52, 4 }
 0x331   : > { %v3566_v20 = vsel %vm3563_vm7, %v3565_v35, %v3561_v26  ;;  %v3624_v43 = vmul.f32 %v7269_v47, %v7227_v59  ;;  %v7288_v23 = vpop.eup %5092  ;;  %v2815_v35 = vrot.slane %v7266_v61, 4  ;;  %v2828_v7 = vsel %vm499_vm1, %v2827_v18, %v7276_v31 }
 0x332   : > { %v3751_v41 = vmul.f32 %v7043_v33, %v3566_v20  ;;  %v3548_v33 = vand.u32 2147483647, %v7196_v62  ;;  %v3540_v25 = vmul.f32 %v7288_v23, %v7196_v62  ;;  %v7306_v50 = vor.u32 1.1754944e-38, %v3634_v54 }
 0x333   : > { %v7295_v26 = vpop.eup %5094  ;;  %v3625_v20 = vsub.f32 1.0, %v3624_v43  ;;  %v2804_v43 = vsel %vm499_vm1, %v2803_v22, %v7283_v39  ;;  %v2816_v19 = vsel %vm499_vm1, %v2815_v35, %v7286_v45  ;;  %vm3628_vm9 = vweird.f32 %v7227_v59 }
 0x334   : > { %4880 = vmatmul.msk.f32.vlgmr.msra.gmra.mxu0 %vm3380_vm3, %v3751_v41  ;;  %v3610_v41 = vmul.f32 %v7295_v26, %v7241_v24  ;;  %v3541_v8 = vsub.f32 1.0, %v3540_v25  ;;  %v3618_v1 = vand.u32 2147483647, %v7241_v24  ;;  %v3620_v4 = vand.u32 2147483648, %v7241_v24 }
 0x335   : > { %v7319_v18 = vperm.slane %v2804_v43, %v5534_v37  ;;  %v3551_v54 = vor.u32 1.1754944e-38, %v3550_v11  ;;  %vm3614_vm10 = vweird.f32 %v7241_v24  ;;  %v7323_v53 = vperm.slane %v2828_v7, %v5534_v37 }
 0x336   : > { %v3611_v2 = vsub.f32 1.0, %v3610_v41  ;;  %v2840_v22 = vsel %vm499_vm1, %v2839_v42, %v7302_v38  ;;  %v3626_v35 = vmul.f32 %v7269_v47, %v3625_v20  ;;  %vm3629_vm11 = vweird.f32 %v7269_v47 }
 0x337   : > { %v3542_v25 = vmul.f32 %v7288_v23, %v3541_v8  ;;  %v7331_v36 = vperm.slane %v2816_v19, %v5534_v37  ;;  %v7335_v41 = vperm.slane %v2840_v22, %v5534_v37  ;;  %v2853_v7 = vrot.slane %v7319_v18, 4  ;;  %vm7418_vm6 = vmor %vm3628_vm9, %vm3629_vm11  ;;  %v7450_v19 = vpop.xlane.xlu0 %3487 }
 0x338   : > { %v3612_v11 = vmul.f32 %v7295_v26, %v3611_v2  ;;  %v2877_v43 = vrot.slane %v7323_v53, 4  ;;  %vm3545_vm12 = vweird.f32 %v7288_v23  ;;  %vm7340_vm13 = vcmp.eq.f32.partialorder %v3548_v33, 8.507059e+37 }
 0x339   : > { %vm3615_vm14 = vweird.f32 %v7295_v26  ;;  %v3621_v20 = vor.u32 1.1754944e-38, %v3620_v4  ;;  %vm7346_vm15 = vcmp.eq.f32.partialorder %v3632_v63, 8.507059e+37  ;;  %v3543_v8 = vadd.f32 %v7288_v23, %v3542_v25  ;;  %vm7401_vm5 = vmor %vm3544_vm8, %vm3545_vm12 }
 0x33a   : > { %vm7351_vm4 = vcmp.eq.f32.partialorder %v3618_v1, 8.507059e+37  ;;  %v2854_v33 = vsel %vm499_vm1, %v7331_v36, %v2853_v7  ;;  %v2878_v57 = vsel %vm499_vm1, %v7335_v41, %v2877_v43  ;;  %v7363_v63 = vsel %vm499_vm1, %v2343_v27, %v7156_v32  ;;  %vm7437_vm7 = vmor %vm3614_vm10, %vm3615_vm14 }
 0x33b   : > { %v3627_v4 = vadd.f32 %v7269_v47, %v3626_v35  ;;  %v7367_v25 = vperm.slane %v2854_v33, %v5556_v60  ;;  %v7370_v1 = vperm.slane %v2878_v57, %v5556_v60  ;;  %v7376_v7 = vsel %vm499_vm1, %v7216_v28, %v2345_v15 }
 0x33c   : > { %v3613_v43 = vadd.f32 %v7295_v26, %v3612_v11  ;;  %v7383_v27 = vsel %vm499_vm1, %v2339_v55, %v7187_v44  ;;  %v8200_v35 = vrot.slane %v7224_v6, 4  ;;  %v8201_v32 = vrot.slane %v7160_v49, 4  ;;  %v7431_v55 = vpop.xlane.xlu2 %3493 }
 0x33d   : > { %v2903_v11 = vrot.slane %v7370_v1, 4  ;;  %v8204_v33 = vrot.slane %v7187_v44, 4  ;;  %v3631_v24 = vsel %vm7418_vm6, %v7269_v47, %v3627_v4  ;;  %v2841_v51 = vrot.slane %v7302_v38, 4 }
 0x33e   : > { %v7389_v57 = vsel %vm499_vm1, %v8200_v35, %v7160_v49  ;;  %v7395_v15 = vsel %vm499_vm1, %v7224_v6, %v8201_v32  ;;  %v2691_v6 = vrot.slane %v7363_v63, 4  ;;  %v3547_v35 = vsel %vm7401_vm5, %v7288_v23, %v3543_v8 }
 0x33f   : > { %v7411_v49 = vsel %vm499_vm1, %v7221_v30, %v8204_v33  ;;  %v2703_v32 = vrot.slane %v7376_v7, 4  ;;  %v8207_v30 = vrot.slane %v7247_v29, 4  ;;  %v2904_v23 = vsel %vm499_vm1, %v2903_v11, %v7367_v25 }
 0x340   : > { %v2692_v8 = vsel %vm499_vm1, %v2691_v6, %v7383_v27  ;;  %v3617_v11 = vsel %vm7437_vm7, %v7295_v26, %v3613_v43  ;;  %4012 = vmatpush.msra.mxu0 %v2904_v23  ;;  %5096 = vrcp.f32 %v7431_v55  ;;  %v3552_v47 = vsel %vm7340_vm13, %v3551_v54, %v3547_v35 }
 0x341   : > { %v2716_v33 = vsel %vm499_vm1, %v8207_v30, %v7389_v57  ;;  %v8210_v30 = vrot.slane %v7234_v34, 4  ;;  %v2698_v6 = vperm.slane %v2692_v8, %v5534_v37  ;;  %5098 = vrcp.f32 %v7450_v19 }
 0x342   : > { %v2722_v28 = vperm.slane %v2716_v33, %v5534_v37  ;;  %v2704_v33 = vsel %vm499_vm1, %v2703_v32, %v7411_v49  ;;  %v7471_v26 = vsel %vm7346_vm15, %v7306_v50, %v3631_v24  ;;  %v3622_v43 = vsel %vm7351_vm4, %v3621_v20, %v3617_v11 }
 0x343   : > { %v2728_v44 = vsel %vm499_vm1, %v8210_v30, %v7395_v15  ;;  %v2710_v4 = vperm.slane %v2704_v33, %v5534_v37  ;;  %v2741_v62 = vrot.slane %v2698_v6, 4  ;;  %v2705_v42 = vrot.slane %v7411_v49, 4 }
 0x344   : > { %v2734_v30 = vperm.slane %v2728_v44, %v5534_v37  ;;  %v2765_v16 = vrot.slane %v2722_v28, 4  ;;  %v2693_v44 = vrot.slane %v7383_v27, 4  ;;  %v3604_v20 = vand.u32 2147483647, %v7431_v55 }
 0x345   : > { %v2742_v35 = vsel %vm499_vm1, %v2710_v4, %v2741_v62  ;;  %vm3600_vm8 = vweird.f32 %v7431_v55  ;;  %v2851_v8 = vrot.slane %v7331_v36, 4  ;;  %v2875_v24 = vrot.slane %v7335_v41, 4 }
 0x346   : > { %v2766_v32 = vsel %vm499_vm1, %v2734_v30, %v2765_v16  ;;  %v7487_v2 = vperm.slane %v2742_v35, %v5556_v60  ;;  %v3750_v16 = vmul.f32 %v7049_v3, %v3552_v47  ;;  %v2739_v11 = vrot.slane %v2710_v4, 4  ;;  %v7495_v33 = vpop.eup %5096 }
 0x347   : > { %v7481_v59 = vperm.slane %v2766_v32, %v5556_v60  ;;  %v7483_v23 = vpop.xlane.xlu1 %3478  ;;  %v3606_v62 = vand.u32 2147483648, %v7431_v55  ;;  %v2763_v32 = vrot.slane %v2734_v30, 4  ;;  %v3755_v35 = vmul.f32 %v7056_v48, %v3622_v43  ;;  %v5099_v3 = vpop.eup %5098 }
 0x348   : > { %4879 = vmatmul.msk.f32.vlgmr.msrb.gmra.mxu3 %vm3380_vm3, %v3750_v16  ;;  %5100 = vrcp.f32 %v7483_v23  ;;  %v3596_v36 = vmul.f32 %v7495_v33, %v7431_v55  ;;  %vm3572_vm9 = vweird.f32 %v7450_v19  ;;  %v2852_v41 = vsel %vm499_vm1, %v2851_v8, %v7319_v18 }
 0x349   : > { %v2791_v22 = vrot.slane %v7481_v59, 4  ;;  %v3568_v4 = vmul.f32 %v5099_v3, %v7450_v19  ;;  %v3576_v30 = vand.u32 2147483647, %v7450_v19  ;;  %v7511_v48 = vperm.slane %v2852_v41, %v5556_v60  ;;  %4884 = vmatmul.msk.f32.vlgmr.msrb.gmra.mxu0 %vm3380_vm3, %v3755_v35 }
 0x34a   : > { %v2876_v43 = vsel %vm499_vm1, %v2875_v24, %v7323_v53  ;;  %v3597_v16 = vsub.f32 1.0, %v3596_v36  ;;  %v2740_v50 = vsel %vm499_vm1, %v2739_v11, %v2698_v6  ;;  %v2764_v54 = vsel %vm499_vm1, %v2763_v32, %v2722_v28 }
 0x34b   : > { %v2792_v47 = vsel %vm499_vm1, %v2791_v22, %v7487_v2  ;;  %v3578_v22 = vand.u32 2147483648, %v7450_v19  ;;  %vm7519_vm10 = vcmp.eq.f32.partialorder %v3604_v20, 8.507059e+37  ;;  %v3569_v8 = vsub.f32 1.0, %v3568_v4 }
 0x34c   : > { %4013 = vmatpush.msra.mxu0 %v2792_v47  ;;  %v7524_v47 = vperm.slane %v2876_v43, %v5556_v60  ;;  %v2901_v41 = vrot.slane %v7511_v48, 4  ;;  %v7528_v53 = vperm.slane %v2740_v50, %v5556_v60  ;;  %v3598_v24 = vmul.f32 %v7495_v33, %v3597_v16 }
 0x34d   : > { %vm3601_vm11 = vweird.f32 %v7495_v33  ;;  %vm3573_vm12 = vweird.f32 %v5099_v3  ;;  %v8213_v28 = vrot.slane %v7283_v39, 4  ;;  %v3570_v11 = vmul.f32 %v5099_v3, %v3569_v8 }
 0x34e   : > { %v7536_v20 = vpop.eup %5100  ;;  %v2902_v32 = vsel %vm499_vm1, %v7524_v47, %v2901_v41  ;;  %v7541_v35 = vperm.slane %v2764_v54, %v5556_v60  ;;  %v2789_v50 = vrot.slane %v7528_v53, 4  ;;  %v3599_v36 = vadd.f32 %v7495_v33, %v3598_v24  ;;  %vm7552_vm13 = vmor %vm3600_vm8, %vm3601_vm11 }
 0x34f   : > { %v2806_v6 = vsel %vm499_vm1, %v7263_v52, %v8213_v28  ;;  %v3607_v4 = vor.u32 1.1754944e-38, %v3606_v62  ;;  %3989 = vmatpush.msrb.mxu3 %v2902_v32  ;;  %v3526_v39 = vmul.f32 %v7536_v20, %v7483_v23  ;;  %v3571_v54 = vadd.f32 %v5099_v3, %v3570_v11  ;;  %vm7572_vm15 = vmor %vm3572_vm9, %vm3573_vm12 }
 0x350   : > { %v7548_v52 = vperm.slane %v2806_v6, %v5534_v37  ;;  %vm7556_vm14 = vcmp.eq.f32.partialorder %v3576_v30, 8.507059e+37  ;;  %v2790_v62 = vsel %vm499_vm1, %v7541_v35, %v2789_v50  ;;  %v8218_v8 = vrot.slane %v7286_v45, 4 }
 0x351   : > { %v3603_v55 = vsel %vm7552_vm13, %v7495_v33, %v3599_v36  ;;  %v3579_v24 = vor.u32 1.1754944e-38, %v3578_v22  ;;  %3990 = vmatpush.msrb.mxu3 %v2790_v62  ;;  %v3534_v28 = vand.u32 2147483647, %v7483_v23  ;;  %v8221_v45 = vrot.slane %v7276_v31, 4  ;;  %v7604_v36 = vpop.xlane.xlu1 %3490 }
 0x352   : > { %v2818_v41 = vsel %vm499_vm1, %v7266_v61, %v8218_v8  ;;  %v3575_v6 = vsel %vm7572_vm15, %v5099_v3, %v3571_v54  ;;  %v3527_v33 = vsub.f32 1.0, %v3526_v39  ;;  %v2842_v19 = vsel %vm499_vm1, %v7254_v13, %v2841_v51 }
 0x353   : > { %v2830_v61 = vsel %vm499_vm1, %v7250_v40, %v8221_v45  ;;  %v3536_v22 = vand.u32 2147483648, %v7483_v23  ;;  %v2826_v32 = vperm.slane %v2818_v41, %v5534_v37  ;;  %v2850_v31 = vperm.slane %v2842_v19, %v5534_v37 }
 0x354   : > { %v2838_v11 = vperm.slane %v2830_v61, %v5534_v37  ;;  %v2865_v50 = vrot.slane %v7548_v52, 4  ;;  %v2694_v3 = vsel %vm499_vm1, %v7363_v63, %v2693_v44  ;;  %v2706_v38 = vsel %vm499_vm1, %v7376_v7, %v2705_v42 }
 0x355   : > { %v8222_v51 = vrot.slane %v7389_v57, 4  ;;  %v3608_v39 = vsel %vm7519_vm10, %v3607_v4, %v3603_v55  ;;  %v3580_v27 = vsel %vm7556_vm14, %v3579_v24, %v3575_v6  ;;  %v2702_v49 = vperm.slane %v2694_v3, %v5534_v37 }
 0x356   : > { %v2889_v40 = vrot.slane %v2838_v11, 4  ;;  %v2866_v63 = vsel %vm499_vm1, %v2826_v32, %v2865_v50  ;;  %v3528_v44 = vmul.f32 %v7536_v20, %v3527_v33  ;;  %v2714_v43 = vperm.slane %v2706_v38, %v5534_v37 }
 0x357   : > { %v2718_v13 = vsel %vm499_vm1, %v7247_v29, %v8222_v51  ;;  %v8223_v29 = vrot.slane %v7395_v15, 4  ;;  %v7620_v18 = vperm.slane %v2866_v63, %v5556_v60  ;;  %v2753_v54 = vrot.slane %v2702_v49, 4 }
 0x358   : > { %v2890_v7 = vsel %vm499_vm1, %v2850_v31, %v2889_v40  ;;  %v2726_v57 = vperm.slane %v2718_v13, %v5534_v37  ;;  %v3752_v8 = vmul.f32 %v7066_v0, %v3580_v27  ;;  %v3754_v41 = vmul.f32 %v7062_v56, %v3608_v39  ;;  %v7676_v13 = vpop.xlane.xlu2 %3508 }
 0x359   : > { %v2730_v42 = vsel %vm499_vm1, %v7234_v34, %v8223_v29  ;;  %v7623_v4 = vperm.slane %v2890_v7, %v5556_v60  ;;  %vm3530_vm4 = vweird.f32 %v7483_v23  ;;  %v2754_v15 = vsel %vm499_vm1, %v2714_v43, %v2753_v54  ;;  %v7674_v51 = vpop.xlane.xlu1 %3502 }
 0x35a   : > { %v2738_v16 = vperm.slane %v2730_v42, %v5534_v37  ;;  %v2777_v62 = vrot.slane %v2726_v57, 4  ;;  %5102 = vrcp.f32 %v7604_v36  ;;  %v3529_v55 = vadd.f32 %v7536_v20, %v3528_v44  ;;  %4881 = vmatmul.msk.f32.vlgmr.msra.gmra.mxu1 %vm3380_vm3, %v3752_v8  ;;  %4883 = vmatmul.msk.f32.vlgmr.msra.gmra.mxu3 %vm3380_vm3, %v3754_v41 }
 0x35b   : > { %v2911_v34 = vrot.slane %v7623_v4, 4  ;;  %vm3531_vm5 = vweird.f32 %v7536_v20  ;;  %v7636_v30 = vperm.slane %v2754_v15, %v5556_v60  ;;  %v2905_v61 = vrot.slane %v7367_v25, 4 }
 0x35c   : > { %v2778_v24 = vsel %vm499_vm1, %v2738_v16, %v2777_v62  ;;  %v7641_v56 = vpop.xlane.xlu0 %3514  ;;  %v2863_v6 = vrot.slane %v2826_v32, 4  ;;  %vm7649_vm6 = vcmp.eq.f32.partialorder %v3534_v28, 8.507059e+37  ;;  %v3537_v19 = vor.u32 1.1754944e-38, %v3536_v22  ;;  %vm7658_vm7 = vmor %vm3530_vm4, %vm3531_vm5 }
 0x35d   : > { %v2912_v0 = vsel %vm499_vm1, %v2911_v34, %v7620_v18  ;;  %v7646_v45 = vperm.slane %v2778_v24, %v5556_v60  ;;  %v2887_v50 = vrot.slane %v2850_v31, 4  ;;  %v2793_v40 = vrot.slane %v7487_v2, 4 }
 0x35e   : > { %4104 = vmatpush.msrb.mxu0 %v2912_v0  ;;  %v2906_v28 = vsel %vm499_vm1, %v7370_v1, %v2905_v61  ;;  %v2864_v22 = vsel %vm499_vm1, %v2863_v6, %v7548_v52  ;;  %v2751_v32 = vrot.slane %v2714_v43, 4  ;;  %v3533_v2 = vsel %vm7658_vm7, %v7536_v20, %v3529_v55 }
 0x35f   : > { %v2799_v25 = vrot.slane %v7646_v45, 4  ;;  %4035 = vmatpush.msra.mxu1 %v2906_v28  ;;  %v7671_v23 = vperm.slane %v2864_v22, %v5556_v60  ;;  %v2888_v31 = vsel %vm499_vm1, %v2887_v50, %v2838_v11  ;;  %v2775_v38 = vrot.slane %v2738_v16, 4 }
 0x360   : > { %v5103_v1 = vpop.eup %5102  ;;  %v7681_v39 = vperm.slane %v2888_v31, %v5556_v60  ;;  %v2794_v20 = vsel %vm499_vm1, %v7481_v59, %v2793_v40  ;;  %v2752_v27 = vsel %vm499_vm1, %v2751_v32, %v2702_v49  ;;  %v3756_v7 = vmul.f32 %v7054_v9, %v7471_v26  ;;  %v7728_v6 = vpop.xlane.xlu2 %3511 }
 0x361   : > { %v2800_v52 = vsel %vm499_vm1, %v2799_v25, %v7636_v30  ;;  %v3582_v11 = vmul.f32 %v5103_v1, %v7604_v36  ;;  %v2909_v63 = vrot.slane %v7671_v23, 4  ;;  %4036 = vmatpush.msra.mxu1 %v2794_v20  ;;  %v7689_v44 = vperm.slane %v2752_v27, %v5556_v60 }
 0x362   : > { %4105 = vmatpush.msrb.mxu0 %v2800_v52  ;;  %v3538_v29 = vsel %vm7649_vm6, %v3537_v19, %v3533_v2  ;;  %v3590_v42 = vand.u32 2147483647, %v7604_v36  ;;  %v2776_v59 = vsel %vm499_vm1, %v2775_v38, %v2726_v57  ;;  %5104 = vrcp.f32 %v7674_v51  ;;  %4885 = vmatmul.msk.f32.vlgmr.msrb.gmra.mxu1 %vm3380_vm3, %v3756_v7 }
 0x363   : > { %v3583_v49 = vsub.f32 1.0, %v3582_v11  ;;  %v2910_v43 = vsel %vm499_vm1, %v7681_v39, %v2909_v63  ;;  %v7701_v54 = vperm.slane %v2776_v59, %v5556_v60  ;;  %v2797_v16 = vrot.slane %v7689_v44, 4 }
 0x364   : > { %vm3587_vm8 = vweird.f32 %v5103_v1  ;;  %v3592_v9 = vand.u32 2147483648, %v7604_v36  ;;  %4081 = vmatpush.msra.mxu3 %v2910_v43  ;;  %v2913_v26 = vrot.slane %v7620_v18, 4  ;;  %v2801_v57 = vrot.slane %v7636_v30, 4  ;;  %v7708_v62 = vpop.xlane.xlu0 %3505 }
 0x365   : > { %v3584_v8 = vmul.f32 %v5103_v1, %v3583_v49  ;;  %v2798_v41 = vsel %vm499_vm1, %v7701_v54, %v2797_v16  ;;  %v3749_v34 = vmul.f32 %v7072_v5, %v3538_v29  ;;  %v2899_v15 = vrot.slane %v7524_v47, 4 }
 0x366   : > { %4082 = vmatpush.msra.mxu3 %v2798_v41  ;;  %v3646_v55 = vand.u32 2147483647, %v7674_v51  ;;  %v2914_v24 = vsel %vm499_vm1, %v7623_v4, %v2913_v26  ;;  %5106 = vrcp.f32 %v7676_v13  ;;  %vm3586_vm9 = vweird.f32 %v7604_v36 }
 0x367   : > { %v3585_v18 = vadd.f32 %v5103_v1, %v3584_v8  ;;  %4127 = vmatpush.msrb.mxu1 %v2914_v24  ;;  %4878 = vmatmul.msk.f32.vlgmr.msrb.gmra.mxu2 %vm3380_vm3, %v3749_v34  ;;  %v2900_v30 = vsel %vm499_vm1, %v2899_v15, %v7511_v48  ;;  %vm3588_vm10 = vmor %vm3586_vm9, %vm3587_vm8  ;;  %v3593_v47 = vor.u32 1.1754944e-38, %v3592_v9  ;;  %v3648_v0 = vand.u32 2147483648, %v7674_v51 }
 0x368   : > { %v5105_v5 = vpop.eup %5104  ;;  %v2802_v4 = vsel %vm499_vm1, %v7646_v45, %v2801_v57  ;;  %3966 = vmatpush.msrb.mxu2 %v2900_v30  ;;  %5108 = vrcp.f32 %v7641_v56  ;;  %vm3591_vm11 = vcmp.eq.f32.partialorder %v3590_v42, 8.507059e+37  ;;  %vm3642_vm12 = vweird.f32 %v7674_v51  ;;  %v7784_v34 = vpop.xlane.xlu2 %3520 }
 0x369   : > { %v3589_v61 = vsel %vm3588_vm10, %v5103_v1, %v3585_v18  ;;  %v3638_v36 = vmul.f32 %v5105_v5, %v7674_v51  ;;  %4128 = vmatpush.msrb.mxu1 %v2802_v4  ;;  %vm7731_vm13 = vcmp.eq.f32.partialorder %v3646_v55, 8.507059e+37  ;;  %v2787_v45 = vrot.slane %v7541_v35, 4 }
 0x36a   : > { %v3594_v48 = vsel %vm3591_vm11, %v3593_v47, %v3589_v61  ;;  %v2907_v40 = vrot.slane %v7681_v39, 4  ;;  %v3649_v25 = vor.u32 1.1754944e-38, %v3648_v0  ;;  %v3674_v28 = vand.u32 2147483647, %v7676_v13 }
 0x36b   : > { %v3639_v19 = vsub.f32 1.0, %v3638_v36  ;;  %v3753_v50 = vmul.f32 %v7077_v21, %v3594_v48  ;;  %v3676_v22 = vand.u32 2147483648, %v7676_v13  ;;  %5110 = vrcp.f32 %v7728_v6 }
 0x36c   : > { %v5107_v3 = vpop.eup %5106  ;;  %vm3643_vm14 = vweird.f32 %v5105_v5  ;;  %v2788_v31 = vsel %vm499_vm1, %v2787_v45, %v7528_v53  ;;  %vm3670_vm15 = vweird.f32 %v7676_v13  ;;  %v3702_v21 = vand.u32 2147483647, %v7641_v56  ;;  %v7750_v1 = vpop.xlane.xlu0 %3517 }
 0x36d   : > { %v3640_v32 = vmul.f32 %v5105_v5, %v3639_v19  ;;  %v3666_v2 = vmul.f32 %v5107_v3, %v7676_v13  ;;  %v3704_v38 = vand.u32 2147483648, %v7641_v56  ;;  %3967 = vmatpush.msrb.mxu2 %v2788_v31  ;;  %5112 = vrcp.f32 %v7708_v62  ;;  %vm3644_vm4 = vmor %vm3642_vm12, %vm3643_vm14 }
 0x36e   : > { %v7744_v35 = vpop.eup %5108  ;;  %v2908_v53 = vsel %vm499_vm1, %v2907_v40, %v7671_v23  ;;  %vm3671_vm5 = vweird.f32 %v5107_v3  ;;  %vm7760_vm6 = vcmp.eq.f32.partialorder %v3674_v28, 8.507059e+37  ;;  %v3677_v11 = vor.u32 1.1754944e-38, %v3676_v22 }
 0x36f   : > { %v3641_v52 = vadd.f32 %v5105_v5, %v3640_v32  ;;  %v3667_v39 = vsub.f32 1.0, %v3666_v2  ;;  %v3694_v20 = vmul.f32 %v7744_v35, %v7641_v56  ;;  %4882 = vmatmul.msk.f32.vlgmr.msra.gmra.mxu2 %vm3380_vm3, %v3753_v50  ;;  %vm3698_vm7 = vweird.f32 %v7641_v56  ;;  %vm3672_vm10 = vmor %vm3670_vm15, %vm3671_vm5 }
 0x370   : > { %4058 = vmatpush.msra.mxu2 %v2908_v53  ;;  %v2795_v42 = vrot.slane %v7701_v54, 4  ;;  %vm7768_vm8 = vcmp.eq.f32.partialorder %v3702_v21, 8.507059e+37  ;;  %v3705_v49 = vor.u32 1.1754944e-38, %v3704_v38  ;;  %5114 = vrcp.f32 %v7750_v1 }
 0x371   : > { %v3645_v63 = vsel %vm3644_vm4, %v5105_v5, %v3641_v52  ;;  %v3668_v7 = vmul.f32 %v5107_v3, %v3667_v39  ;;  %v3695_v29 = vsub.f32 1.0, %v3694_v20  ;;  %v5111_v59 = vpop.eup %5110  ;;  %vm3699_vm9 = vweird.f32 %v7744_v35 }
 0x372   : > { %v3650_v23 = vsel %vm7731_vm13, %v3649_v25, %v3645_v63  ;;  %v3680_v9 = vmul.f32 %v5111_v59, %v7728_v6  ;;  %v3688_v54 = vand.u32 2147483647, %v7728_v6  ;;  %v3690_v57 = vand.u32 2147483648, %v7728_v6  ;;  %vm7794_vm11 = vmor %vm3698_vm7, %vm3699_vm9 }
 0x373   : > { %v3669_v43 = vadd.f32 %v5107_v3, %v3668_v7  ;;  %v3696_v16 = vmul.f32 %v7744_v35, %v3695_v29  ;;  %v5113_v26 = vpop.eup %5112  ;;  %v2796_v8 = vsel %vm499_vm1, %v2795_v42, %v7689_v44  ;;  %v3757_v41 = vmul.f32 %v7084_v58, %v3650_v23 }
 0x374   : > { %v3681_v24 = vsub.f32 1.0, %v3680_v9  ;;  %v3652_v18 = vmul.f32 %v5113_v26, %v7708_v62  ;;  %4059 = vmatpush.msra.mxu2 %v2796_v8  ;;  %vm3685_vm12 = vweird.f32 %v5111_v59  ;;  %v3660_v58 = vand.u32 2147483647, %v7708_v62  ;;  %v7811_v36 = vpop.xlane.xlu0 %3523 }
 0x375   : > { %v3673_v15 = vsel %vm3672_vm10, %v5107_v3, %v3669_v43  ;;  %v3697_v55 = vadd.f32 %v7744_v35, %v3696_v16  ;;  %v3662_v30 = vand.u32 2147483648, %v7708_v62  ;;  %5116 = vrcp.f32 %v7784_v34 }
 0x376   : > { %v3678_v13 = vsel %vm7760_vm6, %v3677_v11, %v3673_v15  ;;  %v3682_v47 = vmul.f32 %v5111_v59, %v3681_v24  ;;  %v3653_v0 = vsub.f32 1.0, %v3652_v18  ;;  %v5115_v56 = vpop.eup %5114  ;;  %vm3684_vm13 = vweird.f32 %v7728_v6 }
 0x377   : > { %v3701_v5 = vsel %vm7794_vm11, %v7744_v35, %v3697_v55  ;;  %4886 = vmatmul.msk.f32.vlgmr.msrb.gmra.mxu2 %vm3380_vm3, %v3757_v41  ;;  %vm7806_vm14 = vcmp.eq.f32.partialorder %v3688_v54, 8.507059e+37  ;;  %v3691_v61 = vor.u32 1.1754944e-38, %v3690_v57  ;;  %vm3656_vm15 = vweird.f32 %v7708_v62  ;;  %vm3686_vm5 = vmor %vm3684_vm13, %vm3685_vm12  ;;  %v8240_v54 = vld [vmem:[#allocation15_spill] sm:$0xff] }
 0x378   : > { %v3683_v48 = vadd.f32 %v5111_v59, %v3682_v47  ;;  %v3654_v33 = vmul.f32 %v5113_v26, %v3653_v0  ;;  %vm3657_vm4 = vweird.f32 %v5113_v26  ;;  %v3708_v19 = vmul.f32 %v5115_v56, %v7750_v1 }
 0x379   : > { %v3706_v45 = vsel %vm7768_vm8, %v3705_v49, %v3701_v5  ;;  %vm7817_vm6 = vcmp.eq.f32.partialorder %v3660_v58, 8.507059e+37  ;;  %v3663_v50 = vor.u32 1.1754944e-38, %v3662_v30  ;;  %v3759_v40 = vmul.f32 %v7087_v10, %v3678_v13  ;;  %vm3658_vm7 = vmor %vm3656_vm15, %vm3657_vm4 }
 0x37a   : > { %v3687_v3 = vsel %vm3686_vm5, %v5111_v59, %v3683_v48  ;;  %v3655_v25 = vadd.f32 %v5113_v26, %v3654_v33  ;;  %v3709_v28 = vsub.f32 1.0, %v3708_v19  ;;  %5118 = vrcp.f32 %v7811_v36 }
 0x37b   : > { %v3692_v22 = vsel %vm7806_vm14, %v3691_v61, %v3687_v3  ;;  %vm3713_vm8 = vweird.f32 %v5115_v56  ;;  %v3716_v32 = vand.u32 2147483647, %v7750_v1  ;;  %v3718_v2 = vand.u32 2147483648, %v7750_v1  ;;  %4888 = vmatmul.msk.f32.vlgmr.msra.gmra.mxu0 %vm3380_vm3, %v3759_v40  ;;  %v5117_v31 = vpop.eup %5116 }
 0x37c   : > { %v3659_v10 = vsel %vm3658_vm7, %v5113_v26, %v3655_v25  ;;  %v3710_v35 = vmul.f32 %v5115_v56, %v3709_v28  ;;  %v3761_v21 = vmul.f32 %v7094_v17, %v3706_v45  ;;  %v3760_v38 = vmul.f32 %v7099_v46, %v3692_v22 }
 0x37d   : > { %v3664_v52 = vsel %vm7817_vm6, %v3663_v50, %v3659_v10  ;;  %v3722_v62 = vmul.f32 %v5117_v31, %v7784_v34  ;;  %vm3712_vm9 = vweird.f32 %v7750_v1  ;;  %v3719_v53 = vor.u32 1.1754944e-38, %v3718_v2 }
 0x37e   : > { %v3711_v39 = vadd.f32 %v5115_v56, %v3710_v35  ;;  %v3758_v20 = vmul.f32 %v7103_v14, %v3664_v52  ;;  %4889 = vmatmul.msk.f32.vlgmr.msra.gmra.mxu1 %vm3380_vm3, %v3760_v38  ;;  %vm3714_vm10 = vmor %vm3712_vm9, %vm3713_vm8  ;;  %vm3717_vm11 = vcmp.eq.f32.partialorder %v3716_v32, 8.507059e+37  ;;  %v3730_v11 = vand.u32 2147483647, %v7784_v34 }
 0x37f   : > { %4890 = vmatmul.msk.f32.vlgmr.msra.gmra.mxu2 %vm3380_vm3, %v3761_v21  ;;  %v3723_v17 = vsub.f32 1.0, %v3722_v62  ;;  %v3732_v63 = vand.u32 2147483648, %v7784_v34  ;;  %vm3727_vm12 = vweird.f32 %v5117_v31  ;;  %vm3726_vm13 = vweird.f32 %v7784_v34  ;;  %v8241_v34 = vld [vmem:[#allocation14_spill] sm:$0xff] }
 0x380   : > { %v5119_v27 = vpop.eup %5118  ;;  %v3715_v46 = vsel %vm3714_vm10, %v5115_v56, %v3711_v39  ;;  %4887 = vmatmul.msk.f32.vlgmr.msrb.gmra.mxu3 %vm3380_vm3, %v3758_v20  ;;  %vm3728_vm14 = vmor %vm3726_vm13, %vm3727_vm12  ;;  %vm3731_vm15 = vcmp.eq.f32.partialorder %v3730_v11, 8.507059e+37  ;;  %v3746_v23 = vand.u32 2147483648, %v7811_v36  ;;  %v3744_v16 = vand.u32 2147483647, %v7811_v36 }
 0x381   : > { %v3720_v1 = vsel %vm3717_vm11, %v3719_v53, %v3715_v46  ;;  %v3724_v7 = vmul.f32 %v5117_v31, %v3723_v17  ;;  %v3736_v14 = vmul.f32 %v5119_v27, %v7811_v36  ;;  %v3733_v59 = vor.u32 1.1754944e-38, %v3732_v63 }
 0x382   : > { %v3762_v51 = vmul.f32 %v7112_v12, %v3720_v1  ;;  %vm3741_vm4 = vweird.f32 %v5119_v27  ;;  %vm3740_vm5 = vweird.f32 %v7811_v36  ;;  %v3747_v8 = vor.u32 1.1754944e-38, %v3746_v23 }
 0x383   : > { %v3725_v29 = vadd.f32 %v5117_v31, %v3724_v7  ;;  %v3737_v42 = vsub.f32 1.0, %v3736_v14  ;;  %vm3742_vm6 = vmor %vm3740_vm5, %vm3741_vm4  ;;  %vm3745_vm7 = vcmp.eq.f32.partialorder %v3744_v16, 8.507059e+37  ;;  %vm4639_vm8 = vcmask 64512  }
 0x384   : > { %vm4647_vm9 = vcmask 162816   ;;  %vm4650_vm10 = vcmask 195584   ;;  %vm4653_vm11 = vcmask 228352  }
 0x385   : > { %v3729_v49 = vsel %vm3728_vm14, %v5117_v31, %v3725_v29  ;;  %v3738_v43 = vmul.f32 %v5119_v27, %v3737_v42 }
 0x386   : > { %v3734_v9 = vsel %vm3731_vm15, %v3733_v59, %v3729_v49 }
 0x387   : > { %v3739_v26 = vadd.f32 %v5119_v27, %v3738_v43  ;;  %v3763_v57 = vmul.f32 %v8240_v54, %v3734_v9 }
 0x388   : > { %4891 = vmatmul.msk.f32.vlgmr.msra.gmra.mxu3 %vm3380_vm3, %v3762_v51 }
 0x389   : > { %v3743_v41 = vsel %vm3742_vm6, %v5119_v27, %v3739_v26  ;;  %4892 = vmatmul.msk.f32.vlgmr.msrb.gmra.mxu0 %vm3380_vm3, %v3763_v57 }
 0x38a   : > { %v3748_v12 = vsel %vm3745_vm7, %v3747_v8, %v3743_v41 }
 0x38b   : > { %v3764_v15 = vmul.f32 %v8241_v34, %v3748_v12 }
 0x38d   : > { %4893 = vmatmul.msk.f32.vlgmr.msrb.gmra.mxu1 %vm3380_vm3, %v3764_v15 }
 0x3b1   : > { %v3831_v13 = vpop.f32.mrf.mxu0 }
 0x3b2   : > { %v4133_v30 = vrot.slane %v3831_v13, 4 }
 0x3c6   : > { %v3923_v40 = vpop.f32.mrf.mxu0 }
 0x3c7   : > { %v4157_v2 = vrot.slane %v3923_v40, 4 }
 0x3cb   : > { %v3808_v24 = vpop.f32.mrf.mxu3 }
 0x3cc   : > { %v4147_v58 = vrot.slane %v3808_v24, 4 }
 0x3d7   : > { %v3854_v55 = vpop.f32.mrf.mxu1 }
 0x3d8   : > { %v4145_v18 = vrot.slane %v3854_v55, 4  ;;  %v4148_v56 = vsel %vm499_vm1, %v3854_v55, %v4147_v58 }
 0x3d9   : > { %v4156_v45 = vperm.slane %v4148_v56, %v5534_v37 }
 0x3da   : > { %v4146_v5 = vsel %vm499_vm1, %v4145_v18, %v3808_v24 }
 0x3db   : > { %v4152_v48 = vperm.slane %v4146_v5, %v5534_v37  ;;  %v4193_v31 = vrot.slane %v4156_v45, 4 }
 0x3dd   : > { %v3900_v47 = vpop.f32.mrf.mxu3  ;;  %v4181_v28 = vrot.slane %v4152_v48, 4 }
 0x3de   : > { %v4171_v33 = vrot.slane %v3900_v47, 4 }
 0x3df   : > { %v3946_v44 = vpop.f32.mrf.mxu1 }
 0x3e0   : > { %v4169_v0 = vrot.slane %v3946_v44, 4  ;;  %v4172_v22 = vsel %vm499_vm1, %v3946_v44, %v4171_v33 }
 0x3e1   : > { %v4180_v52 = vperm.slane %v4172_v22, %v5534_v37 }
 0x3e2   : > { %v4170_v6 = vsel %vm499_vm1, %v4169_v0, %v3900_v47 }
 0x3e3   : > { %v4176_v32 = vperm.slane %v4170_v6, %v5534_v37  ;;  %v4217_v29 = vrot.slane %v4180_v52, 4 }
 0x3e5   : > { %v4205_v20 = vrot.slane %v4176_v32, 4 }
 0x3ea   : > { %v3785_v4 = vpop.f32.mrf.mxu2 }
 0x3eb   : > { %v4134_v61 = vsel %vm499_vm1, %v4133_v30, %v3785_v4  ;;  %v4135_v36 = vrot.slane %v3785_v4, 4 }
 0x3ec   : > { %v4140_v19 = vperm.slane %v4134_v61, %v5534_v37 }
 0x3ed   : > { %v4136_v50 = vsel %vm499_vm1, %v3831_v13, %v4135_v36 }
 0x3ee   : > { %v4144_v3 = vperm.slane %v4136_v50, %v5534_v37  ;;  %v4183_v25 = vrot.slane %v4140_v19, 4  ;;  %v4182_v21 = vsel %vm499_vm1, %v4181_v28, %v4140_v19 }
 0x3ef   : > { %v4188_v46 = vperm.slane %v4182_v21, %v5556_v60 }
 0x3f0   : > { %v4184_v10 = vsel %vm499_vm1, %v4152_v48, %v4183_v25  ;;  %v4195_v35 = vrot.slane %v4144_v3, 4  ;;  %v4194_v62 = vsel %vm499_vm1, %v4193_v31, %v4144_v3 }
 0x3f1   : > { %v4192_v53 = vperm.slane %v4184_v10, %v5556_v60  ;;  %v4200_v63 = vperm.slane %v4194_v62, %v5556_v60  ;;  %v4231_v57 = vrot.slane %v4188_v46, 4 }
 0x3f2   : > { %v3877_v38 = vpop.f32.mrf.mxu2  ;;  %v4196_v11 = vsel %vm499_vm1, %v4156_v45, %v4195_v35 }
 0x3f3   : > { %v4158_v39 = vsel %vm499_vm1, %v4157_v2, %v3877_v38  ;;  %v4159_v17 = vrot.slane %v3877_v38, 4  ;;  %v4204_v23 = vperm.slane %v4196_v11, %v5556_v60  ;;  %v4235_v51 = vrot.slane %v4192_v53, 4 }
 0x3f4   : > { %v4164_v27 = vperm.slane %v4158_v39, %v5534_v37  ;;  %v4239_v8 = vrot.slane %v4200_v63, 4 }
 0x3f5   : > { %v4160_v1 = vsel %vm499_vm1, %v3923_v40, %v4159_v17  ;;  %v4243_v5 = vrot.slane %v4204_v23, 4 }
 0x3f6   : > { %v4206_v7 = vsel %vm499_vm1, %v4205_v20, %v4164_v27  ;;  %v4207_v14 = vrot.slane %v4164_v27, 4  ;;  %v4168_v42 = vperm.slane %v4160_v1, %v5534_v37 }
 0x3f7   : > { %v4212_v59 = vperm.slane %v4206_v7, %v5556_v60 }
 0x3f8   : > { %v4208_v49 = vsel %vm499_vm1, %v4176_v32, %v4207_v14  ;;  %v4218_v16 = vsel %vm499_vm1, %v4217_v29, %v4168_v42  ;;  %v4219_v9 = vrot.slane %v4168_v42, 4  ;;  %v4015_v54 = vpop.f32.mrf.mxu0 }
 0x3f9   : > { %v4216_v43 = vperm.slane %v4208_v49, %v5556_v60  ;;  %v4229_v26 = vrot.slane %v4212_v59, 4  ;;  %v4224_v41 = vperm.slane %v4218_v16, %v5556_v60  ;;  %v4245_v12 = vrot.slane %v4015_v54, 4 }
 0x3fa   : > { %v3969_v34 = vpop.f32.mrf.mxu2  ;;  %v4220_v15 = vsel %vm499_vm1, %v4180_v52, %v4219_v9  ;;  %v4232_v44 = vsel %vm499_vm1, %v4212_v59, %v4231_v57 }
 0x3fb   : > { %v4230_v55 = vsel %vm499_vm1, %v4229_v26, %v4188_v46  ;;  %v4233_v24 = vrot.slane %v4216_v43, 4  ;;  %v4236_v18 = vsel %vm499_vm1, %v4216_v43, %v4235_v51  ;;  %v4228_v13 = vperm.slane %v4220_v15, %v5556_v60  ;;  %v4038_v50 = vpop.f32.mrf.mxu1 }
 0x3fc   : > { %v4237_v58 = vrot.slane %v4224_v41, 4  ;;  %v4369_v30 = vrot.slane %v4236_v18, 4  ;;  %v4246_v0 = vsel %vm499_vm1, %v4245_v12, %v3969_v34  ;;  %v4247_v56 = vrot.slane %v3969_v34, 4 }
 0x3fd   : > { %v4234_v47 = vsel %vm499_vm1, %v4233_v24, %v4192_v53  ;;  %v4241_v4 = vrot.slane %v4228_v13, 4  ;;  %v4359_v36 = vrot.slane %v4230_v55, 4  ;;  %v7893_v33 = vsel %vm499_vm1, %v4228_v13, %v4243_v5 }
 0x3fe   : > { %v4357_v61 = vrot.slane %v4234_v47, 4  ;;  %v4370_v48 = vsel %vm499_vm1, %v4369_v30, %v4232_v44  ;;  %v4371_v19 = vrot.slane %v4232_v44, 4  ;;  %v4248_v45 = vsel %vm499_vm1, %v4015_v54, %v4247_v56 }
 0x3ff   : > { %v4252_v6 = vperm.slane %v4246_v0, %v5534_v37  ;;  %v4256_v40 = vperm.slane %v4248_v45, %v5534_v37  ;;  %v7899_v3 = vsel %vm499_vm1, %v4237_v58, %v4200_v63  ;;  %v7902_v25 = vsel %vm499_vm1, %v4241_v4, %v4204_v23 }
 0x400   : > { %v4358_v28 = vsel %vm499_vm1, %v4357_v61, %v4230_v55  ;;  %v7906_v22 = vsel %vm499_vm1, %v4224_v41, %v4239_v8  ;;  %v4376_v2 = vperm.slane %v4370_v48, %v5534_v37  ;;  %v4381_v31 = vrot.slane %v7902_v25, 4 }
 0x401   : > { %v4364_v32 = vperm.slane %v4358_v28, %v5534_v37  ;;  %v4295_v10 = vrot.slane %v4252_v6, 4  ;;  %v4307_v35 = vrot.slane %v4256_v40, 4  ;;  %v4257_v21 = vrot.slane %v4038_v50, 4 }
 0x402   : > { %v4061_v38 = vpop.f32.mrf.mxu2  ;;  %v4393_v52 = vrot.slane %v7893_v33, 4  ;;  %v4382_v62 = vsel %vm499_vm1, %v4381_v31, %v7899_v3  ;;  %v4383_v39 = vrot.slane %v7899_v3, 4  ;;  %v4405_v20 = vrot.slane %v4376_v2, 4 }
 0x403   : > { %v4407_v53 = vrot.slane %v4364_v32, 4  ;;  %v4271_v17 = vrot.slane %v4061_v38, 4  ;;  %v3992_v27 = vpop.f32.mrf.mxu3  ;;  %v4388_v46 = vperm.slane %v4382_v62, %v5534_v37  ;;  %v4395_v63 = vrot.slane %v7906_v22, 4 }
 0x404   : > { %v4394_v11 = vsel %vm499_vm1, %v4393_v52, %v7906_v22  ;;  %v4258_v1 = vsel %vm499_vm1, %v4257_v21, %v3992_v27  ;;  %v4259_v7 = vrot.slane %v3992_v27, 4  ;;  %v4406_v29 = vsel %vm499_vm1, %v4405_v20, %v4364_v32 }
 0x405   : > { %v4400_v14 = vperm.slane %v4394_v11, %v5534_v37  ;;  %v4264_v42 = vperm.slane %v4258_v1, %v5534_v37  ;;  %v7924_v59 = vperm.slane %v4406_v29, %v5556_v60  ;;  %v4408_v23 = vsel %vm499_vm1, %v4376_v2, %v4407_v53 }
 0x406   : > { %v4360_v51 = vsel %vm499_vm1, %v4234_v47, %v4359_v36  ;;  %v4260_v49 = vsel %vm499_vm1, %v4038_v50, %v4259_v7  ;;  %v4107_v16 = vpop.f32.mrf.mxu0  ;;  %v4431_v9 = vrot.slane %v4388_v46, 4  ;;  %v4372_v26 = vsel %vm499_vm1, %v4236_v18, %v4371_v19 }
 0x407   : > { %v4429_v43 = vrot.slane %v4400_v14, 4  ;;  %v4268_v54 = vperm.slane %v4260_v49, %v5534_v37  ;;  %v4293_v57 = vrot.slane %v4264_v42, 4  ;;  %v4296_v8 = vsel %vm499_vm1, %v4264_v42, %v4295_v10 }
 0x408   : > { %v4455_v41 = vrot.slane %v7924_v59, 4  ;;  %v7934_v12 = vperm.slane %v4296_v8, %v5556_v60  ;;  %v4269_v15 = vrot.slane %v4107_v16, 4  ;;  %v4416_v55 = vperm.slane %v4408_v23, %v5556_v60 }
 0x409   : > { %v4430_v34 = vsel %vm499_vm1, %v4429_v43, %v4388_v46  ;;  %v4294_v24 = vsel %vm499_vm1, %v4293_v57, %v4252_v6  ;;  %v4305_v13 = vrot.slane %v4268_v54, 4  ;;  %v4308_v18 = vsel %vm499_vm1, %v4268_v54, %v4307_v35 }
 0x40a   : > { %v7941_v44 = vperm.slane %v4430_v34, %v5556_v60  ;;  %v7944_v58 = vperm.slane %v4294_v24, %v5556_v60  ;;  %v7947_v30 = vperm.slane %v4308_v18, %v5556_v60  ;;  %v4270_v5 = vsel %vm499_vm1, %v4269_v15, %v4061_v38  ;;  %v4130_v50 = vpop.f32.mrf.mxu1 }
 0x40b   : > { %v4272_v47 = vsel %vm499_vm1, %v4107_v16, %v4271_v17  ;;  %v4306_v0 = vsel %vm499_vm1, %v4305_v13, %v4256_v40  ;;  %v4276_v4 = vperm.slane %v4270_v5, %v5534_v37  ;;  %v4084_v61 = vpop.f32.mrf.mxu3  ;;  %v4368_v36 = vperm.slane %v4360_v51, %v5534_v37 }
 0x40c   : > { %v4456_v56 = vsel %vm499_vm1, %v7941_v44, %v4455_v41  ;;  %v7957_v48 = vperm.slane %v4306_v0, %v5556_v60  ;;  %v4343_v19 = vrot.slane %v7944_v58, 4  ;;  %v4347_v45 = vrot.slane %v7934_v12, 4 }
 0x40d   : > { %v4355_v6 = vrot.slane %v7947_v30, 4  ;;  %4583 = vrot.lane.b32.xlu2 %v4456_v56, %s5265_s18  ;;  %v4280_v40 = vperm.slane %v4272_v47, %v5534_v37  ;;  %v4432_v3 = vsel %vm499_vm1, %v4400_v14, %v4431_v9  ;;  %v4459_v28 = vrot.slane %v4416_v55, 4 }
 0x40e   : > { %v4283_v22 = vrot.slane %v4084_v61, 4  ;;  %v4351_v32 = vrot.slane %v7957_v48, 4  ;;  %v4319_v2 = vrot.slane %v4276_v4, 4  ;;  %v4440_v31 = vperm.slane %v4432_v3, %v5556_v60 }
 0x40f   : > { %v4380_v10 = vperm.slane %v4372_v26, %v5534_v37  ;;  %v4384_v35 = vsel %vm499_vm1, %v7902_v25, %v4383_v39  ;;  %v4396_v21 = vsel %vm499_vm1, %v7893_v33, %v4395_v63  ;;  %v4281_v38 = vrot.slane %v4130_v50, 4 }
 0x410   : > { %v4284_v52 = vsel %vm499_vm1, %v4130_v50, %v4283_v22  ;;  %v4460_v62 = vsel %vm499_vm1, %v4440_v31, %v4459_v28  ;;  %v4457_v20 = vrot.slane %v4440_v31, 4  ;;  %v4392_v53 = vperm.slane %v4384_v35, %v5534_v37 }
 0x411   : > { %v4404_v17 = vperm.slane %v4396_v21, %v5534_v37  ;;  %v4331_v27 = vrot.slane %v4280_v40, 4  ;;  %4599 = vrot.lane.b32.xlu1 %v4460_v62, %s5266_s20  ;;  %v4417_v46 = vrot.slane %v4380_v10, 4  ;;  %v4282_v25 = vsel %vm499_vm1, %v4281_v38, %v4084_v61 }
 0x412   : > { %v4292_v39 = vperm.slane %v4284_v52, %v5534_v37  ;;  %v4458_v33 = vsel %vm499_vm1, %v4457_v20, %v4416_v55  ;;  %v4288_v63 = vperm.slane %v4282_v25, %v5534_v37  ;;  %v4419_v1 = vrot.slane %v4368_v36, 4 }
 0x413   : > { %v4441_v11 = vrot.slane %v4404_v17, 4  ;;  %4591 = vrot.lane.b32.xlu0 %v4458_v33, %s5267_s21  ;;  %v4418_v7 = vsel %vm499_vm1, %v4417_v46, %v4368_v36  ;;  %v4443_v42 = vrot.slane %v4392_v53, 4 }
 0x414   : > { %v4329_v14 = vrot.slane %v4292_v39, 4  ;;  %v4332_v29 = vsel %vm499_vm1, %v4292_v39, %v4331_v27  ;;  %v4424_v23 = vperm.slane %v4418_v7, %v5556_v60  ;;  %v4317_v49 = vrot.slane %v4288_v63, 4 }
 0x415   : > { %v4442_v51 = vsel %vm499_vm1, %v4441_v11, %v4392_v53  ;;  %v4320_v43 = vsel %vm499_vm1, %v4288_v63, %v4319_v2  ;;  %v4340_v54 = vperm.slane %v4332_v29, %v5556_v60  ;;  %v4420_v34 = vsel %vm499_vm1, %v4380_v10, %v4419_v1 }
 0x416   : > { %v4448_v16 = vperm.slane %v4442_v51, %v5556_v60  ;;  %v4328_v9 = vperm.slane %v4320_v43, %v5556_v60  ;;  %v4330_v26 = vsel %vm499_vm1, %v4329_v14, %v4280_v40  ;;  %v4463_v57 = vrot.slane %v4424_v23, 4 }
 0x417   : > { %v4318_v8 = vsel %vm499_vm1, %v4317_v49, %v4276_v4  ;;  %v4336_v41 = vperm.slane %v4330_v26, %v5556_v60  ;;  %v4353_v13 = vrot.slane %v4340_v54, 4  ;;  %v4356_v0 = vsel %vm499_vm1, %v4340_v54, %v4355_v6 }
 0x418   : > { %v4324_v15 = vperm.slane %v4318_v8, %v5556_v60  ;;  %v4345_v55 = vrot.slane %v4328_v9, 4  ;;  %v4348_v24 = vsel %vm499_vm1, %v4328_v9, %v4347_v45  ;;  %v4464_v18 = vsel %vm499_vm1, %v4448_v16, %v4463_v57 }
 0x419   : > { %v4349_v5 = vrot.slane %v4336_v41, 4  ;;  %v4352_v47 = vsel %vm499_vm1, %v4336_v41, %v4351_v32  ;;  %4615 = vrot.lane.b32.xlu2 %v4464_v18, %s5268_s22  ;;  %v4354_v61 = vsel %vm499_vm1, %v4353_v13, %v7947_v30  ;;  %v4481_v36 = vrot.slane %v4348_v24, 4 }
 0x41a   : > { %v4341_v56 = vrot.slane %v4324_v15, 4  ;;  %v4346_v4 = vsel %vm499_vm1, %v4345_v55, %v7934_v12  ;;  %v4493_v40 = vrot.slane %v4354_v61, 4  ;;  %v4428_v3 = vperm.slane %v4420_v34, %v5556_v60 }
 0x41b   : > { %v4350_v45 = vsel %vm499_vm1, %v4349_v5, %v7957_v48  ;;  %v4469_v50 = vrot.slane %v4346_v4, 4  ;;  %v4505_v28 = vrot.slane %v4356_v0, 4  ;;  %v4507_v6 = vrot.slane %v4352_v47, 4 }
 0x41c   : > { %v4444_v22 = vsel %vm499_vm1, %v4404_v17, %v4443_v42  ;;  %v4461_v32 = vrot.slane %v4448_v16, 4  ;;  %v4342_v12 = vsel %vm499_vm1, %v4341_v56, %v7944_v58  ;;  %v4344_v30 = vsel %vm499_vm1, %v4324_v15, %v4343_v19 }
 0x41d   : > { %v4452_v2 = vperm.slane %v4444_v22, %v5556_v60  ;;  %v4494_v48 = vsel %vm499_vm1, %v4493_v40, %v4350_v45  ;;  %v4470_v10 = vsel %vm499_vm1, %v4469_v50, %v4342_v12  ;;  %v4471_v35 = vrot.slane %v4342_v12, 4 }
 0x41e   : > { %v4462_v31 = vsel %vm499_vm1, %v4461_v32, %v4424_v23  ;;  %v4482_v21 = vsel %vm499_vm1, %v4481_v36, %v4344_v30  ;;  %v4467_v52 = vrot.slane %v4428_v3, 4  ;;  %v4476_v62 = vperm.slane %v4470_v10, %v5534_v37 }
 0x41f   : > { %v4465_v38 = vrot.slane %v4452_v2, 4  ;;  %4607 = vrot.lane.b32.xlu0 %v4462_v31, %s5269_s23  ;;  %v4483_v20 = vrot.slane %v4344_v30, 4  ;;  %v4488_v58 = vperm.slane %v4482_v21, %v5534_v37  ;;  %v4500_v19 = vperm.slane %v4494_v48, %v5534_v37  ;;  %v4658_v21 = vld [vmem:[#allocation5 + $0x10] sm:$0xff] }
 0x420   : > { %v4506_v53 = vsel %vm499_vm1, %v4505_v28, %v4352_v47  ;;  %v4472_v17 = vsel %vm499_vm1, %v4346_v4, %v4471_v35  ;;  %v4519_v25 = vrot.slane %v4476_v62, 4  ;;  %v4495_v1 = vrot.slane %v4350_v45, 4  ;;  %v4659_v35 = vld [vmem:[#allocation5 + $0x18] sm:$0xff] }
 0x421   : > { %v4466_v27 = vsel %vm499_vm1, %v4465_v38, %v4428_v3  ;;  %v4512_v46 = vperm.slane %v4506_v53, %v5534_v37  ;;  %v4480_v39 = vperm.slane %v4472_v17, %v5534_v37  ;;  %v4543_v33 = vrot.slane %v4500_v19, 4  ;;  %4682 = vmatpush.msrb.mxu2 %v4659_v35  ;;  %v4656_v38 = vld [vmem:[#allocation5] sm:$0xff] }
 0x422   : > { %4623 = vrot.lane.b32.xlu1 %v4466_v27, %s5270_s13  ;;  %v4517_v11 = vrot.slane %v4488_v58, 4  ;;  %v4484_v63 = vsel %vm499_vm1, %v4348_v24, %v4483_v20  ;;  %v4520_v7 = vsel %vm499_vm1, %v4488_v58, %v4519_v25  ;;  %v4508_v42 = vsel %vm499_vm1, %v4356_v0, %v4507_v6 }
 0x423   : > { %v4541_v14 = vrot.slane %v4512_v46, 4  ;;  %v4492_v29 = vperm.slane %v4484_v63, %v5534_v37  ;;  %v4528_v23 = vperm.slane %v4520_v7, %v5556_v60  ;;  %v4544_v51 = vsel %vm499_vm1, %v4512_v46, %v4543_v33  ;;  %4683 = vmatpush.msrb.mxu2 %v4658_v21 }
 0x424   : > { %v4518_v49 = vsel %vm499_vm1, %v4517_v11, %v4476_v62  ;;  %v4496_v43 = vsel %vm499_vm1, %v4354_v61, %v4495_v1  ;;  %v4552_v16 = vperm.slane %v4544_v51, %v5556_v60  ;;  %v4453_v57 = vrot.slane %v7941_v44, 4 }
 0x425   : > { %v4524_v9 = vperm.slane %v4518_v49, %v5556_v60  ;;  %v4542_v26 = vsel %vm499_vm1, %v4541_v14, %v4500_v19  ;;  %v4504_v54 = vperm.slane %v4496_v43, %v5534_v37  ;;  %v4468_v8 = vsel %vm499_vm1, %v4452_v2, %v4467_v52 }
 0x426   : > { %v4516_v41 = vperm.slane %v4508_v42, %v5534_v37  ;;  %v4529_v34 = vrot.slane %v4492_v29, 4  ;;  %v4569_v15 = vrot.slane %v4552_v16, 4  ;;  %v4548_v55 = vperm.slane %v4542_v26, %v5556_v60 }
 0x427   : > { %4631 = vrot.lane.b32.xlu0 %v4468_v8, %s5271_s29  ;;  %v4567_v24 = vrot.slane %v4524_v9, 4  ;;  %v4555_v13 = vrot.slane %v4504_v54, 4  ;;  %v4571_v18 = vrot.slane %v4528_v23, 4  ;;  %v4531_v4 = vrot.slane %v4480_v39, 4  ;;  %v5055_v8 = vld [vmem:[%s8130_s6] ss:$0 sm:$0xff] }
 0x428   : > { %v4530_v5 = vsel %vm499_vm1, %v4529_v34, %v4480_v39  ;;  %v4553_v47 = vrot.slane %v4516_v41, 4  ;;  %v4570_v0 = vsel %vm499_vm1, %v4569_v15, %v4528_v23  ;;  %v4454_v45 = vsel %vm499_vm1, %v4453_v57, %v7924_v59 }
 0x429   : > { %v4568_v44 = vsel %vm499_vm1, %v4548_v55, %v4567_v24  ;;  %v4536_v56 = vperm.slane %v4530_v5, %v5556_v60  ;;  %v4556_v36 = vsel %vm499_vm1, %v4516_v41, %v4555_v13  ;;  %v4572_v50 = vsel %vm499_vm1, %v4552_v16, %v4571_v18 }
 0x42a   : > { %4593 = vrot.lane.b32.xlu1 %v4570_v0, %s5267_s21  ;;  %4585 = vrot.lane.b32.xlu2 %v4568_v44, %s5265_s18  ;;  %v4554_v37 = vsel %vm499_vm1, %v4553_v47, %v4504_v54  ;;  %v4532_v28 = vsel %vm499_vm1, %v4492_v29, %v4531_v4  ;;  %v4564_v6 = vperm.slane %v4556_v36, %v5556_v60  ;;  %v4565_v12 = vrot.slane %v4548_v55, 4 }
 0x42b   : > { %v4560_v61 = vperm.slane %v4554_v37, %v5556_v60  ;;  %v4575_v40 = vrot.slane %v4536_v56, 4  ;;  %v4540_v2 = vperm.slane %v4532_v28, %v5556_v60  ;;  %v4657_v60 = vld [vmem:[#allocation5 + $0x8] sm:$0xff] }
 0x42c   : > { %v4577_v59 = vrot.slane %v4564_v6, 4  ;;  %v4566_v10 = vsel %vm499_vm1, %v4565_v12, %v4524_v9  ;;  %4684 = vmatpush.msrb.mxu2 %v4657_v60 }
 0x42d   : > { %v4573_v3 = vrot.slane %v4560_v61, 4  ;;  %v4576_v22 = vsel %vm499_vm1, %v4560_v61, %v4575_v40  ;;  %v4579_v30 = vrot.slane %v4540_v2, 4 }
 0x42e   : > { %v4578_v48 = vsel %vm499_vm1, %v4577_v59, %v4540_v2  ;;  %4685 = vmatpush.msrb.mxu2 %v4656_v38 }
 0x42f   : > { %4601 = vrot.lane.b32.xlu0 %v4572_v50, %s5266_s20  ;;  %v4574_v32 = vsel %vm499_vm1, %v4573_v3, %v4536_v56  ;;  %v4580_v31 = vsel %vm499_vm1, %v4564_v6, %v4579_v30  ;;  %vm4642_vm1 = vcmask 97280   ;;  %s4707_s20 = scalar_lea.hbm %s8131_s7, %s4901_s14 }
 0x432   : > { %4617 = vrot.lane.b32.xlu1 %v4576_v22, %s5268_s22  ;;  %4609 = vrot.lane.b32.xlu2 %v4574_v32, %s5269_s23  ;;  %s4708_s22 = sshll.u32 %s322_s16, 4  ;;  %s4710_s23 = sshll.u32 %s4707_s20, 4  ;;  %s4709_s22 = int_to_ptr.vmem [resolvable:$true] %s4708_s22  ;;  %s4711_s23 = int_to_ptr.hbm [resolvable:$true] %s4710_s23 }
 0x437   : > { %4625 = vrot.lane.b32.xlu0 %v4578_v48, %s5270_s13  ;;  %s4696_s13 = scalar_lea.sflag [#allocation4], %s320_s19 }
 0x43a   : > { %4633 = vrot.lane.b32.xlu2 %v4580_v31, %s5271_s29  ;;  %s5194_s29 = sshra.s32 %s4711_s23, 4  ;;  %s5195_s29 = int_to_ptr.hbm [resolvable:$true] %s5194_s29 }
 0x43b   : > { %s5196_s8 = scalar_lea.hbm %s5195_s29, 16  ;;  %p5201_p4 = scmp.lt.s32.totalorder %s5195_s29, %s8131_s7 }
 0x43c   : > { %p5197_p1 = scmp.ne.s32.totalorder %s5195_s29, %s5196_s8  ;;  %p5202_p7 = scmp.lt.s32.totalorder %s5200_s15, %s5196_s8 }
 0x43e   : > { %p5198_p2 = pnand %p5197_p1, %p5351_p5  ;;  %p5203_p8 = por %p5202_p7, %p5201_p4 }
 0x440   : > { %p5199_p3 = pneg %p5198_p2 }
 0x442   : > { %p5204_p9 = pnand %p5203_p8, %p5199_p3 }
 0x467   : > { %v4584_v52 = vpop.permute.xlu2 %4583 }
 0x468   : > { %v4637_v58 = vsel %vm2915_vm2, %v4454_v45, %v4584_v52 }
 0x473   : > { %v4616_v19 = vpop.permute.xlu2 %4615 }
 0x483   : > { %v4600_v20 = vpop.permute.xlu1 %4599 }
 0x484   : > { %v4586_v39 = vpop.permute.xlu2 %4585 }
 0x485   : > { %v4592_v62 = vpop.permute.xlu0 %4591  ;;  %v4638_v14 = vsel %vm2915_vm2, %v4566_v10, %v4586_v39 }
 0x486   : > { %v4640_v53 = vsel %vm4639_vm8, %v4637_v58, %v4592_v62 }
 0x487   : > { %v4643_v27 = vsel %vm4642_vm1, %v4640_v53, %v4600_v20 }
 0x48c   : > { %v4610_v29 = vpop.permute.xlu2 %4609 }
 0x491   : > { %v4608_v17 = vpop.permute.xlu0 %4607 }
 0x492   : > { %v4645_v46 = vsel %vm3380_vm3, %v4643_v27, %v4608_v17 }
 0x493   : > { %v4648_v33 = vsel %vm4647_vm9, %v4645_v46, %v4616_v19 }
 0x494   : > { %v4624_v25 = vpop.permute.xlu1 %4623  ;;  %v4634_v26 = vpop.permute.xlu2 %4633 }
 0x495   : > { %v4651_v63 = vsel %vm4650_vm10, %v4648_v33, %v4624_v25 }
 0x499   : > { %v4632_v11 = vpop.permute.xlu0 %4631 }
 0x49a   : > { %v4654_v1 = vsel %vm4653_vm11, %v4651_v63, %v4632_v11 }
 0x49b   : > { %4894 = vmatmul.msk.f32.vlgmr.msrb.gmra.mxu2 %vm346_vm0, %v4654_v1 }
 0x49c   : > { %v4594_v7 = vpop.permute.xlu1 %4593 }
 0x49d   : > { %v4641_v42 = vsel %vm4639_vm8, %v4638_v14, %v4594_v7 }
 0x4a1   : > { %v4602_v23 = vpop.permute.xlu0 %4601 }
 0x4a2   : > { %v4644_v51 = vsel %vm4642_vm1, %v4641_v42, %v4602_v23 }
 0x4a3   : > { %v4646_v43 = vsel %vm3380_vm3, %v4644_v51, %v4610_v29 }
 0x4a4   : > { %v4618_v49 = vpop.permute.xlu1 %4617 }
 0x4a5   : > { %v4649_v16 = vsel %vm4647_vm9, %v4646_v43, %v4618_v49 }
 0x4a9   : > { %v4626_v9 = vpop.permute.xlu0 %4625 }
 0x4aa   : > { %v4652_v54 = vsel %vm4650_vm10, %v4649_v16, %v4626_v9 }
 0x4ab   : > { %v4655_v57 = vsel %vm4653_vm11, %v4652_v54, %v4634_v26 }
 0x4ac   : > { %4895 = vmatmul.msk.f32.gmra.mxu2 %vm346_vm0, %v4655_v57 }
 0x51e   : > { %v4687_v41 = vpop.f32.mrf.mxu2 }
 0x51f   : > { %v4688_v34 = vadd.f32 %v5055_v8, %v4687_v41 }
 0x521   : > { %4693 = vst.msk [vmem:[%s322_s16] sm:$0xff] %vm346_vm0, %v4688_v34 }
 0x52f   : > { %v4690_v15 = vpop.f32.mrf.mxu2 }
 0x530   : > { %v4691_v55 = vadd.f32 %v5055_v8, %v4690_v15 }
 0x532   : > { %4694 = vst.msk [vmem:[%s322_s16 + $0x8] sm:$0xff] %vm346_vm0, %v4691_v55 }
 0x533   : > { %5207 = shalt.err (!%p5204_p9)
}
 0x534   : > { %s5272_s19 = smov 128  }
 0x535   : > { %4914 = dma.vmem_to_hbm [thread:$0]  (%p5351_p5), %s4709_s22, 256, %s4711_s23, %s4696_s13, %s5272_s19, %s5272_s19, %s5267_s21  }
 0x536 PF: > { %p4931_p10 = scmp.ge.s32.totalorder %s5250_s27, 2  ;;  %s4725_s16 = sand.u32 1, %s5238_s24  }
 0x537   : > { %s4726_s18 = scalar_lea.sflag [#allocation4], %s4725_s16 }
 0x538   : > { %p4924_p11 = pnand %p4931_p10, %p5355_p6 }
 0x53a   : > { %p4925_p12 = pneg %p4924_p11 }
 0x53c   : > { %5233 = dma.done.wait (%p4925_p12), %s4726_s18, 256  }
 0x53d   : > { %5235 = vsyncadd (%p4925_p12), %s4726_s18, 4294967040  ;;  %p19_p13 = scmp.ge.s32.totalorder %s5338_s30, 4   ;;  %s8242_s24 = smov %s5242_s25 }
 0x53e   : > { %s8243_s25 = smov %s5246_s26  ;;  %s8244_s26 = smov %s5349_s10 }
 0x53f   : > { %s8245_s27 = smov %s5338_s30  ;;  %21 = sbr.rel (!%p19_p13) target bundleno = 5 (0x5), region = 95 }
 0x544   :  { %4732 = vsyncpa [#allocation3], 1 }
 0x545   :  { %4734 = vsyncpa [#allocation3 + $0x1], 1 }
 0x546   :  { %4735 = vsyncpa [#allocation6], 1 }
 0x547   :  { %4736 = vsyncpa [#allocation4], 1 }
 0x548   :  { %4738 = vsyncpa [#allocation4 + $0x1], 1 }

</bundles_post_ra>
